<compile_context>
chip_gen: v7x
topology: tpu7x:2x2x1
jax: 0.10.0
libtpu: 0.0.40
codegen_flags: <defaults>
</compile_context>

<pallas_src>
import functools

import jax
import jax.numpy as jnp
from jax import lax
from jax.experimental import pallas as pl
from jax.experimental.pallas import tpu as pltpu

N_COLOR_SPACES = 1
C_IN = 3 + N_COLOR_SPACES      # conv1 input channels
C_MID = 32                     # conv1/conv2 output channels
NEG_SLOPE = 0.01               # nn.LeakyReLU default


def _rcs_kernel(x_ref, w1_ref, b1_ref, w2_ref, b2_ref, out_ref, *,
                H, W, TH, n_tiles, compute_dtype):
    """One (batch, row-tile) step of conv3x3 -> LeakyReLU -> conv3x3.

    x_ref  : (1, TH+4, W+4, C_IN)  input tile with a 2-pixel zero/neighbour halo
    w1_ref : (9*C_IN, C_MID)       conv1 weights, im2col row order (di, dj, c_in)
    b1_ref : (1, C_MID)
    w2_ref : (9*C_MID, C_MID)      conv2 weights, im2col row order (di, dj, c_mid)
    b2_ref : (1, C_MID)
    out_ref: (1, TH, W*C_MID)      lane-dense output tile
    """
    tile = pl.program_id(0) % n_tiles          # row-tile index within the image
    row0 = tile * TH - 1                       # global image row of local row 0 of `mid`

    # ---- conv1 over the (TH+2, W+2) halo region: single K = 9*C_IN matmul ----
    taps1 = [x_ref[0, di:di + TH + 2, dj:dj + W + 2, :]
             for di in range(3) for dj in range(3)]
    x1 = jnp.concatenate(taps1, axis=-1).astype(compute_dtype)     # (TH+2, W+2, 9*C_IN)
    a1 = lax.dot_general(
        x1, w1_ref[...].astype(compute_dtype),
        dimension_numbers=(((2,), (0,)), ((), ())),
        preferred_element_type=jnp.float32,
    )                                                              # (TH+2, W+2, C_MID)
    a1 = a1 + b1_ref[0][None, None, :]
    a1 = jnp.where(a1 > 0, a1, NEG_SLOPE * a1)                     # LeakyReLU(0.01)

    # Zero the ring corresponding to conv2's zero padding / tile halo, in GLOBAL coords.
    g_row = row0 + lax.broadcasted_iota(jnp.int32, (TH + 2, W + 2, 1), 0)
    g_col = -1 + lax.broadcasted_iota(jnp.int32, (TH + 2, W + 2, 1), 1)
    inside = (g_row >= 0) & (g_row < H) & (g_col >= 0) & (g_col < W)
    mid = jnp.where(inside, a1, 0.0)                               # (TH+2, W+2, C_MID)

    # ---- conv2: single K = 9*C_MID = 288 matmul ----
    taps2 = [mid[di:di + TH, dj:dj + W, :] for di in range(3) for dj in range(3)]
    x2 = jnp.concatenate(taps2, axis=-1).astype(compute_dtype)      # (TH, W, 288)
    a2 = lax.dot_general(
        x2, w2_ref[...].astype(compute_dtype),
        dimension_numbers=(((2,), (0,)), ((), ())),
        preferred_element_type=jnp.float32,
    )                                                              # (TH, W, C_MID)
    a2 = a2 + b2_ref[0][None, None, :]

    # Lane-dense store: last dim W*C_MID is a multiple of 128 -> unmasked stores.
    out_ref[0] = a2.reshape(TH, W * C_MID).astype(out_ref.dtype)


def _pick_tile_h(H, W):
    """Row-tile height keeping dominant per-step f32 temporaries ~<=10 MiB."""
    budget = 10 * 1024 * 1024
    # rough bytes/row: conv2 im2col (9*32) + mid/acc (4*32) + conv1 im2col (36) + input + out
    per_row = W * 4 * (9 * C_MID + 4 * C_MID + 9 * C_IN + 2 * C_IN + C_MID)
    th = max(8, budget // max(per_row, 1))
    th = min(int(th), H)
    if th >= 8:
        th = (th // 8) * 8
    return max(1, th)


def random_color_space_forward(x_nchw, params, idx=0, compute_dtype=jnp.float32):
    """x_nchw: (N, n_color_spaces*3, H, W) float32.  Returns (N, 32, H, W).

    compute_dtype=jnp.bfloat16 gives ~2x MXU rate / half VMEM traffic on v6e/v7x
    (f32 accumulation kept); leave float32 on v5e or when f32-exactness is needed.
    """
    w1, b1, w2, b2 = params                 # w: (3,3,Cin,Cout), b: (Cout,)
    N, _, H, W = x_nchw.shape

    # --- glue matching the PyTorch forward (slice + one-hot mask concat) ---
    x_sel = x_nchw[:, idx * 3:(idx + 1) * 3]                          # (N,3,H,W)
    mask = jnp.zeros((N_COLOR_SPACES,), x_nchw.dtype).at[idx].set(1.0)
    mask = jnp.broadcast_to(mask[None, :, None, None], (N, N_COLOR_SPACES, H, W))
    x_cat = jnp.concatenate([x_sel, mask], axis=1)                    # (N, C_IN, H, W)
    # TODO(synk): if the surrounding model can emit/consume NHWC directly, the two
    # layout transposes below are pure glue and can be dropped.
    x_nhwc = jnp.transpose(x_cat, (0, 2, 3, 1))                       # (N, H, W, C_IN)

    TH = _pick_tile_h(H, W)
    nT = -(-H // TH)
    Hp = nT * TH

    # 2-pixel halo in H and W (+ bottom rows so the row count is a multiple of TH).
    x_pad = jnp.pad(x_nhwc, ((0, 0), (2, 2 + (Hp - H)), (2, 2), (0, 0)))
    # Overlapping row tiles (halo of 2 rows each side), flattened with the batch axis
    # so every BlockSpec stays plain Blocked indexing.
    x_tiles = jnp.stack(
        [x_pad[:, t * TH: t * TH + TH + 4] for t in range(nT)], axis=1
    ).reshape(N * nT, TH + 4, W + 4, C_IN)

    # im2col weight layout: rows ordered (di, dj, c_in).
    w1r = w1.reshape(9 * C_IN, C_MID)
    w2r = w2.reshape(9 * C_MID, C_MID)
    b1_2d = b1.reshape(1, C_MID)
    b2_2d = b2.reshape(1, C_MID)

    kernel = functools.partial(_rcs_kernel, H=H, W=W, TH=TH, n_tiles=nT,
                               compute_dtype=compute_dtype)

    out = pl.pallas_call(
        kernel,
        out_shape=jax.ShapeDtypeStruct((N * nT, TH, W * C_MID), jnp.float32),
        grid_spec=pltpu.PrefetchScalarGridSpec(
            num_scalar_prefetch=0,
            grid=(N * nT,),
            in_specs=[
                pl.BlockSpec((1, TH + 4, W + 4, C_IN), lambda i: (i, 0, 0, 0)),
                pl.BlockSpec((9 * C_IN, C_MID), lambda i: (0, 0)),
                pl.BlockSpec((1, C_MID), lambda i: (0, 0)),
                pl.BlockSpec((9 * C_MID, C_MID), lambda i: (0, 0)),
                pl.BlockSpec((1, C_MID), lambda i: (0, 0)),
            ],
            out_specs=pl.BlockSpec((1, TH, W * C_MID), lambda i: (i, 0, 0)),
        ),
        compiler_params=pltpu.CompilerParams(dimension_semantics=("parallel",)),
    )(x_tiles, w1r, b1_2d, w2r, b2_2d)

    # (N*nT, TH, W*32) -> (N, Hp, W, 32) -> crop padded rows -> NCHW.
    out = out.reshape(N, Hp, W, C_MID)[:, :H]
    return jnp.transpose(out, (0, 3, 1, 2))


def _init_params(key):
    """Deterministic synthetic init.  PyTorch (O,I,kH,kW) -> kernel (kH,kW,I,O)."""
    k1, k2, k3, k4 = jax.random.split(key, 4)
    scale1 = 1.0 / jnp.sqrt(C_IN * 9)
    scale2 = 1.0 / jnp.sqrt(C_MID * 9)
    w1_oihw = jax.random.uniform(k1, (C_MID, C_IN, 3, 3), jnp.float32, -scale1, scale1)
    b1 = jax.random.uniform(k2, (C_MID,), jnp.float32, -scale1, scale1)
    w2_oihw = jax.random.uniform(k3, (C_MID, C_MID, 3, 3), jnp.float32, -scale2, scale2)
    b2 = jax.random.uniform(k4, (C_MID,), jnp.float32, -scale2, scale2)
    w1 = jnp.transpose(w1_oihw, (2, 3, 1, 0))   # (3,3,C_IN,C_MID)
    w2 = jnp.transpose(w2_oihw, (2, 3, 1, 0))   # (3,3,C_MID,C_MID)
    return w1, b1, w2, b2, w1_oihw, w2_oihw


def _reference_forward(x_nchw, w1_oihw, b1, w2_oihw, b2, idx=0):
    """Pure-JAX NCHW reference (matches the PyTorch module)."""
    N, _, H, W = x_nchw.shape
    x_sel = x_nchw[:, idx * 3:(idx + 1) * 3]
    mask = jnp.zeros((N_COLOR_SPACES,), x_nchw.dtype).at[idx].set(1.0)
    mask = jnp.broadcast_to(mask[None, :, None, None], (N, N_COLOR_SPACES, H, W))
    x = jnp.concatenate([x_sel, mask], axis=1)
    dn = ("NCHW", "OIHW", "NCHW")
    y = lax.conv_general_dilated(x, w1_oihw, (1, 1), ((1, 1), (1, 1)),
                                 dimension_numbers=dn) + b1[None, :, None, None]
    y = jnp.where(y > 0, y, NEG_SLOPE * y)
    y = lax.conv_general_dilated(y, w2_oihw, (1, 1), ((1, 1), (1, 1)),
                                 dimension_numbers=dn) + b2[None, :, None, None]
    return y


if __name__ == "__main__":
    key = jax.random.PRNGKey(0)
    kx, kp = jax.random.split(key)

    N, H, W = 2, 16, 16
    x = jax.random.normal(kx, (N, N_COLOR_SPACES * 3, H, W), jnp.float32)

    w1, b1, w2, b2, w1_oihw, w2_oihw = _init_params(kp)

    out = random_color_space_forward(x, (w1, b1, w2, b2), idx=0)
    out = jax.block_until_ready(out)

    ref = jax.block_until_ready(_reference_forward(x, w1_oihw, b1, w2_oihw, b2, idx=0))
    assert out.shape == (N, 32, H, W)
    err = float(jnp.max(jnp.abs(out - ref)))
    assert jnp.allclose(out, ref, rtol=1e-4, atol=1e-4), err

    print("KERNEL_OK")
</pallas_src>

<mosaic_0001>
module attributes {stable_mosaic.version = 11 : i64} {
  func.func @_rcs_kernel(%arg0: i32, %arg1: memref<1x20x20x4xf32, #tpu.memory_space<vmem>>, %arg2: memref<36x32xf32, #tpu.memory_space<vmem>>, %arg3: memref<1x32xf32, #tpu.memory_space<vmem>>, %arg4: memref<288x32xf32, #tpu.memory_space<vmem>>, %arg5: memref<1x32xf32, #tpu.memory_space<vmem>>, %arg6: memref<1x16x512xf32, #tpu.memory_space<vmem>>) attributes {dimension_semantics = [#tpu.dimension_semantics<parallel>], iteration_bounds = array<i64: 2>, scalar_prefetch = 0 : i64, scratch_operands = 0 : i64, tpu.core_type = #tpu.core_type<tc>, window_params = [{transform_indices = @transform_0, window_bounds = array<i64: 1, 20, 20, 4>}, {pipeline_mode = #tpu.pipeline_mode<synchronous>, transform_indices = @transform_1, window_bounds = array<i64: 36, 32>}, {pipeline_mode = #tpu.pipeline_mode<synchronous>, transform_indices = @transform_2, window_bounds = array<i64: 1, 32>}, {pipeline_mode = #tpu.pipeline_mode<synchronous>, transform_indices = @transform_3, window_bounds = array<i64: 288, 32>}, {pipeline_mode = #tpu.pipeline_mode<synchronous>, transform_indices = @transform_4, window_bounds = array<i64: 1, 32>}, {transform_indices = @transform_5, window_bounds = array<i64: 1, 16, 512>}]} {
    %c1_i32 = arith.constant 1 : i32
    %c0_i32 = arith.constant 0 : i32
    %0 = arith.cmpi eq, %c1_i32, %c0_i32 : i32
    %c1_i32_0 = arith.constant 1 : i32
    %1 = arith.select %0, %c1_i32_0, %c1_i32 : i32
    %2 = arith.remsi %arg0, %1 : i32
    %c0_i32_1 = arith.constant 0 : i32
    %3 = arith.cmpi ne, %2, %c0_i32_1 : i32
    %c0_i32_2 = arith.constant 0 : i32
    %4 = arith.cmpi slt, %2, %c0_i32_2 : i32
    %c0_i32_3 = arith.constant 0 : i32
    %5 = arith.cmpi slt, %1, %c0_i32_3 : i32
    %6 = arith.xori %4, %5 : i1
    %7 = arith.andi %6, %3 : i1
    %8 = arith.addi %2, %1 : i32
    %9 = arith.select %7, %8, %2 : i32
    %c16_i32 = arith.constant 16 : i32
    %10 = arith.muli %9, %c16_i32 : i32
    %c1_i32_4 = arith.constant 1 : i32
    %11 = arith.subi %10, %c1_i32_4 : i32
    %c0 = arith.constant 0 : index
    %c0_5 = arith.constant 0 : index
    %c0_6 = arith.constant 0 : index
    %c0_7 = arith.constant 0 : index
    %12 = vector.load %arg1[%c0, %c0_5, %c0_6, %c0_7] : memref<1x20x20x4xf32, #tpu.memory_space<vmem>>, vector<1x18x18x4xf32>
    %13 = vector.shape_cast %12 : vector<1x18x18x4xf32> to vector<18x18x4xf32>
    %c0_8 = arith.constant 0 : index
    %c0_9 = arith.constant 0 : index
    %c1 = arith.constant 1 : index
    %c0_10 = arith.constant 0 : index
    %14 = vector.load %arg1[%c0_8, %c0_9, %c1, %c0_10] : memref<1x20x20x4xf32, #tpu.memory_space<vmem>>, vector<1x18x18x4xf32>
    %15 = vector.shape_cast %14 : vector<1x18x18x4xf32> to vector<18x18x4xf32>
    %c0_11 = arith.constant 0 : index
    %c0_12 = arith.constant 0 : index
    %c2 = arith.constant 2 : index
    %c0_13 = arith.constant 0 : index
    %16 = vector.load %arg1[%c0_11, %c0_12, %c2, %c0_13] : memref<1x20x20x4xf32, #tpu.memory_space<vmem>>, vector<1x18x18x4xf32>
    %17 = vector.shape_cast %16 : vector<1x18x18x4xf32> to vector<18x18x4xf32>
    %c0_14 = arith.constant 0 : index
    %c1_15 = arith.constant 1 : index
    %c0_16 = arith.constant 0 : index
    %c0_17 = arith.constant 0 : index
    %18 = vector.load %arg1[%c0_14, %c1_15, %c0_16, %c0_17] : memref<1x20x20x4xf32, #tpu.memory_space<vmem>>, vector<1x18x18x4xf32>
    %19 = vector.shape_cast %18 : vector<1x18x18x4xf32> to vector<18x18x4xf32>
    %c0_18 = arith.constant 0 : index
    %c1_19 = arith.constant 1 : index
    %c1_20 = arith.constant 1 : index
    %c0_21 = arith.constant 0 : index
    %20 = vector.load %arg1[%c0_18, %c1_19, %c1_20, %c0_21] : memref<1x20x20x4xf32, #tpu.memory_space<vmem>>, vector<1x18x18x4xf32>
    %21 = vector.shape_cast %20 : vector<1x18x18x4xf32> to vector<18x18x4xf32>
    %c0_22 = arith.constant 0 : index
    %c1_23 = arith.constant 1 : index
    %c2_24 = arith.constant 2 : index
    %c0_25 = arith.constant 0 : index
    %22 = vector.load %arg1[%c0_22, %c1_23, %c2_24, %c0_25] : memref<1x20x20x4xf32, #tpu.memory_space<vmem>>, vector<1x18x18x4xf32>
    %23 = vector.shape_cast %22 : vector<1x18x18x4xf32> to vector<18x18x4xf32>
    %c0_26 = arith.constant 0 : index
    %c2_27 = arith.constant 2 : index
    %c0_28 = arith.constant 0 : index
    %c0_29 = arith.constant 0 : index
    %24 = vector.load %arg1[%c0_26, %c2_27, %c0_28, %c0_29] : memref<1x20x20x4xf32, #tpu.memory_space<vmem>>, vector<1x18x18x4xf32>
    %25 = vector.shape_cast %24 : vector<1x18x18x4xf32> to vector<18x18x4xf32>
    %c0_30 = arith.constant 0 : index
    %c2_31 = arith.constant 2 : index
    %c1_32 = arith.constant 1 : index
    %c0_33 = arith.constant 0 : index
    %26 = vector.load %arg1[%c0_30, %c2_31, %c1_32, %c0_33] : memref<1x20x20x4xf32, #tpu.memory_space<vmem>>, vector<1x18x18x4xf32>
    %27 = vector.shape_cast %26 : vector<1x18x18x4xf32> to vector<18x18x4xf32>
    %c0_34 = arith.constant 0 : index
    %c2_35 = arith.constant 2 : index
    %c2_36 = arith.constant 2 : index
    %c0_37 = arith.constant 0 : index
    %28 = vector.load %arg1[%c0_34, %c2_35, %c2_36, %c0_37] : memref<1x20x20x4xf32, #tpu.memory_space<vmem>>, vector<1x18x18x4xf32>
    %29 = vector.shape_cast %28 : vector<1x18x18x4xf32> to vector<18x18x4xf32>
    %30 = tpu.concatenate %13, %15, %17, %19, %21, %23, %25, %27, %29 in 2 : vector<18x18x4xf32>, vector<18x18x4xf32>, vector<18x18x4xf32>, vector<18x18x4xf32>, vector<18x18x4xf32>, vector<18x18x4xf32>, vector<18x18x4xf32>, vector<18x18x4xf32>, vector<18x18x4xf32> -> vector<18x18x36xf32>
    %c0_38 = arith.constant 0 : index
    %c0_39 = arith.constant 0 : index
    %31 = vector.load %arg2[%c0_38, %c0_39] : memref<36x32xf32, #tpu.memory_space<vmem>>, vector<36x32xf32>
    %cst = arith.constant dense<0.000000e+00> : vector<18x18x32xf32>
    %32 = tpu.matmul %30, %31, %cst {dimension_numbers = #tpu.dot_dimension_numbers<[2], [0], [0, 1], [1], [0, 0, 0, 1, 1, 1], [], []>} : vector<18x18x36xf32>, vector<36x32xf32>, vector<18x18x32xf32> -> vector<18x18x32xf32>
    %c0_40 = arith.constant 0 : index
    %c0_41 = arith.constant 0 : index
    %33 = vector.load %arg3[%c0_40, %c0_41] : memref<1x32xf32, #tpu.memory_space<vmem>>, vector<1x32xf32>
    %34 = vector.shape_cast %33 : vector<1x32xf32> to vector<32xf32>
    %35 = vector.shape_cast %34 : vector<32xf32> to vector<1x1x32xf32>
    %36 = vector.broadcast %35 : vector<1x1x32xf32> to vector<18x18x32xf32>
    %37 = arith.addf %32, %36 : vector<18x18x32xf32>
    %cst_42 = arith.constant 0.000000e+00 : f32
    %38 = vector.broadcast %cst_42 : f32 to vector<18x18x32xf32>
    %39 = arith.cmpf ogt, %37, %38 : vector<18x18x32xf32>
    %cst_43 = arith.constant 0.00999999977 : f32
    %40 = vector.broadcast %cst_43 : f32 to vector<18x18x32xf32>
    %41 = arith.mulf %40, %37 : vector<18x18x32xf32>
    %42 = arith.select %39, %37, %41 : vector<18x18x32xi1>, vector<18x18x32xf32>
    %43 = tpu.iota {dimensions = array<i32: 0>} : vector<18x18x1xi32>
    %44 = vector.broadcast %11 : i32 to vector<18x18x1xi32>
    %45 = arith.addi %44, %43 : vector<18x18x1xi32>
    %46 = tpu.iota {dimensions = array<i32: 1>} : vector<18x18x1xi32>
    %c-1_i32 = arith.constant -1 : i32
    %47 = vector.broadcast %c-1_i32 : i32 to vector<18x18x1xi32>
    %48 = arith.addi %47, %46 : vector<18x18x1xi32>
    %c0_i32_44 = arith.constant 0 : i32
    %49 = vector.broadcast %c0_i32_44 : i32 to vector<18x18x1xi32>
    %50 = arith.cmpi sge, %45, %49 : vector<18x18x1xi32>
    %c16_i32_45 = arith.constant 16 : i32
    %51 = vector.broadcast %c16_i32_45 : i32 to vector<18x18x1xi32>
    %52 = arith.cmpi slt, %45, %51 : vector<18x18x1xi32>
    %53 = arith.andi %50, %52 : vector<18x18x1xi1>
    %c0_i32_46 = arith.constant 0 : i32
    %54 = vector.broadcast %c0_i32_46 : i32 to vector<18x18x1xi32>
    %55 = arith.cmpi sge, %48, %54 : vector<18x18x1xi32>
    %56 = arith.andi %53, %55 : vector<18x18x1xi1>
    %c16_i32_47 = arith.constant 16 : i32
    %57 = vector.broadcast %c16_i32_47 : i32 to vector<18x18x1xi32>
    %58 = arith.cmpi slt, %48, %57 : vector<18x18x1xi32>
    %59 = arith.andi %56, %58 : vector<18x18x1xi1>
    %cst_48 = arith.constant 0.000000e+00 : f32
    %60 = vector.shape_cast %59 : vector<18x18x1xi1> to vector<18x18x1xi1>
    %61 = vector.broadcast %60 : vector<18x18x1xi1> to vector<18x18x32xi1>
    %62 = vector.broadcast %cst_48 : f32 to vector<18x18x32xf32>
    %63 = arith.select %61, %42, %62 : vector<18x18x32xi1>, vector<18x18x32xf32>
    %64 = vector.extract_strided_slice %63 {offsets = [0, 0, 0], sizes = [16, 16, 32], strides = [1, 1, 1]} : vector<18x18x32xf32> to vector<16x16x32xf32>
    %65 = vector.extract_strided_slice %63 {offsets = [0, 1, 0], sizes = [16, 16, 32], strides = [1, 1, 1]} : vector<18x18x32xf32> to vector<16x16x32xf32>
    %66 = vector.extract_strided_slice %63 {offsets = [0, 2, 0], sizes = [16, 16, 32], strides = [1, 1, 1]} : vector<18x18x32xf32> to vector<16x16x32xf32>
    %67 = vector.extract_strided_slice %63 {offsets = [1, 0, 0], sizes = [16, 16, 32], strides = [1, 1, 1]} : vector<18x18x32xf32> to vector<16x16x32xf32>
    %68 = vector.extract_strided_slice %63 {offsets = [1, 1, 0], sizes = [16, 16, 32], strides = [1, 1, 1]} : vector<18x18x32xf32> to vector<16x16x32xf32>
    %69 = vector.extract_strided_slice %63 {offsets = [1, 2, 0], sizes = [16, 16, 32], strides = [1, 1, 1]} : vector<18x18x32xf32> to vector<16x16x32xf32>
    %70 = vector.extract_strided_slice %63 {offsets = [2, 0, 0], sizes = [16, 16, 32], strides = [1, 1, 1]} : vector<18x18x32xf32> to vector<16x16x32xf32>
    %71 = vector.extract_strided_slice %63 {offsets = [2, 1, 0], sizes = [16, 16, 32], strides = [1, 1, 1]} : vector<18x18x32xf32> to vector<16x16x32xf32>
    %72 = vector.extract_strided_slice %63 {offsets = [2, 2, 0], sizes = [16, 16, 32], strides = [1, 1, 1]} : vector<18x18x32xf32> to vector<16x16x32xf32>
    %73 = tpu.concatenate %64, %65, %66, %67, %68, %69, %70, %71, %72 in 2 : vector<16x16x32xf32>, vector<16x16x32xf32>, vector<16x16x32xf32>, vector<16x16x32xf32>, vector<16x16x32xf32>, vector<16x16x32xf32>, vector<16x16x32xf32>, vector<16x16x32xf32>, vector<16x16x32xf32> -> vector<16x16x288xf32>
    %c0_49 = arith.constant 0 : index
    %c0_50 = arith.constant 0 : index
    %74 = vector.load %arg4[%c0_49, %c0_50] : memref<288x32xf32, #tpu.memory_space<vmem>>, vector<288x32xf32>
    %cst_51 = arith.constant dense<0.000000e+00> : vector<16x16x32xf32>
    %75 = tpu.matmul %73, %74, %cst_51 {dimension_numbers = #tpu.dot_dimension_numbers<[2], [0], [0, 1], [1], [0, 0, 0, 1, 1, 1], [], []>} : vector<16x16x288xf32>, vector<288x32xf32>, vector<16x16x32xf32> -> vector<16x16x32xf32>
    %c0_52 = arith.constant 0 : index
    %c0_53 = arith.constant 0 : index
    %76 = vector.load %arg5[%c0_52, %c0_53] : memref<1x32xf32, #tpu.memory_space<vmem>>, vector<1x32xf32>
    %77 = vector.shape_cast %76 : vector<1x32xf32> to vector<32xf32>
    %78 = vector.shape_cast %77 : vector<32xf32> to vector<1x1x32xf32>
    %79 = vector.broadcast %78 : vector<1x1x32xf32> to vector<16x16x32xf32>
    %80 = arith.addf %75, %79 : vector<16x16x32xf32>
    %81 = vector.shape_cast %80 : vector<16x16x32xf32> to vector<16x512xf32>
    %c0_54 = arith.constant 0 : index
    %c0_55 = arith.constant 0 : index
    %c0_56 = arith.constant 0 : index
    %82 = vector.load %arg6[%c0_54, %c0_55, %c0_56] : memref<1x16x512xf32, #tpu.memory_space<vmem>>, vector<1x16x512xf32>
    %83 = vector.shape_cast %82 : vector<1x16x512xf32> to vector<16x512xf32>
    %84 = vector.shape_cast %81 : vector<16x512xf32> to vector<1x16x512xf32>
    tpu.vector_store %arg6[%c0_54, %c0_55, %c0_56], %84 {strides = array<i32>} : memref<1x16x512xf32, #tpu.memory_space<vmem>>, vector<1x16x512xf32>,
    return
  }
  func.func @transform_0(%arg0: i32) -> (i32, i32, i32, i32) {
    %c0_i32 = arith.constant 0 : i32
    %c0_i32_0 = arith.constant 0 : i32
    %c0_i32_1 = arith.constant 0 : i32
    %c0_i32_2 = arith.constant 0 : i32
    return %arg0, %c0_i32, %c0_i32_0, %c0_i32_1 : i32, i32, i32, i32
  }
  func.func @transform_1(%arg0: i32) -> (i32, i32) {
    %c0_i32 = arith.constant 0 : i32
    %c0_i32_0 = arith.constant 0 : i32
    %c0_i32_1 = arith.constant 0 : i32
    return %c0_i32, %c0_i32_0 : i32, i32
  }
  func.func @transform_2(%arg0: i32) -> (i32, i32) {
    %c0_i32 = arith.constant 0 : i32
    %c0_i32_0 = arith.constant 0 : i32
    %c0_i32_1 = arith.constant 0 : i32
    return %c0_i32, %c0_i32_0 : i32, i32
  }
  func.func @transform_3(%arg0: i32) -> (i32, i32) {
    %c0_i32 = arith.constant 0 : i32
    %c0_i32_0 = arith.constant 0 : i32
    %c0_i32_1 = arith.constant 0 : i32
    return %c0_i32, %c0_i32_0 : i32, i32
  }
  func.func @transform_4(%arg0: i32) -> (i32, i32) {
    %c0_i32 = arith.constant 0 : i32
    %c0_i32_0 = arith.constant 0 : i32
    %c0_i32_1 = arith.constant 0 : i32
    return %c0_i32, %c0_i32_0 : i32, i32
  }
  func.func @transform_5(%arg0: i32) -> (i32, i32, i32) {
    %c0_i32 = arith.constant 0 : i32
    %c0_i32_0 = arith.constant 0 : i32
    %c0_i32_1 = arith.constant 0 : i32
    return %arg0, %c0_i32, %c0_i32_0 : i32, i32, i32
  }
}

</mosaic_0001>

<bundles_post_ra>
// kernel: tpu_custom_call.1
= control target key start
LH: loop header
LB: loop body
LE: loop exit
PB: predicated region body
PF: predicated region fallthrough
CT: control target
= control target key end

     0   :  { %10 = vsyncpa [#allocation3], 0  ;;  %s15993_s0 = inlined_call_operand.vmem [shape: f32[2,20,20,4], index: 0, kind: input, shape index: {}]   ;;  %s15994_s1 = inlined_call_operand.vmem [shape: f32[36,32], index: 1, kind: input, shape index: {}]   ;;  %s15995_s2 = inlined_call_operand.vmem [shape: f32[1,32], index: 2, kind: input, shape index: {}]   ;;  %s15996_s3 = inlined_call_operand.vmem [shape: f32[288,32], index: 3, kind: input, shape index: {}]   ;;  %s15997_s4 = inlined_call_operand.vmem [shape: f32[1,32], index: 4, kind: input, shape index: {}]   ;;  %s15998_s5 = inlined_call_operand.hbm [shape: f32[2,16,512], index: 5, kind: output, shape index: {}]  }
   0x1   :  { %12 = vsyncpa [#allocation3 + $0x1], 0  ;;  %s10994_s18 = smov 0   ;;  %s10996_s19 = smov 0  }
   0x2   :  { %s10998_s20 = smov 0   ;;  %s11000_s21 = smov 0  }
   0x3 LB: > { %s11015_s22 = sadd.s32 4294967295, %s10945_s21   ;;  %s9564_s23 = sadd.s32 4294967294, %s10945_s21   ;;  %s10945_s21 = sphi %s11000_s21, %s16555_s21   ;;  %s10941_s20 = sphi %s10998_s20, %s16554_s20   ;;  %s10937_s19 = sphi %s10996_s19, %s16553_s19   ;;  %s10933_s18 = sphi %s10994_s18, %s16552_s18  }
   0x4   : > { %s11019_s24 = sadd.s32 1, %s10945_s21   ;;  %s135_s25 = sadd.s32 1, %s10941_s20 }
   0x5   : > { %s132_s26 = ssub.s32 %s10945_s21, %s11019_s24  ;;  %p145_p0 = scmp.ne.s32.totalorder %s10941_s20, %s10937_s19 }
   0x6   : > { %p133_p1 = scmp.eq.s32.totalorder %s132_s26, 0  ;;  %p146_p2 = scmp.eq.s32.totalorder %s11015_s22, 1 }
   0x7   : > { %p151_p3 = scmp.ne.s32.totalorder %s10937_s19, %s10933_s18  ;;  %p152_p4 = scmp.eq.s32.totalorder %s9564_s23, 1 }
   0x8   : > { %s11030_s27 = scalar_select %p133_p1, %s10941_s20, %s135_s25  }
   0x9   : > { %p11032_p5 = por %p146_p2, %p145_p0  ;;  %p11036_p6 = por %p152_p4, %p151_p3 }
   0xa   : > { %p9567_p7 = scmp.ge.s32.totalorder %s10945_s21, 1  ;;  %p190_p8 = scmp.lt.s32.totalorder %s10945_s21, 3 }
   0xc   : > { %p191_p9 = pnand %p9567_p7, %p190_p8 }
   0xe   : > { %194 = sbr.rel (%p191_p9) target bundleno = 1809 (0x711), region = 40 }
  0x15   : > { %p218_p10 = scmp.lt.s32.totalorder %s11015_s22, 1  ;;  %s10947_s10 = smov 4   ;;  %vm4525_vm0 = vcmask 1043456   ;;  %vm16034_vm1 = vmmov 0   ;;  %vm2439_vm2 = vcmask 31744   ;;  %vm16005_vm3 = vcmask 64512  }
  0x16   : > { %s10948_s11 = smov 8   ;;  %s10949_s12 = smov 12   ;;  %vm16004_vm4 = vcmask 97280   ;;  %vm16003_vm5 = vcmask 130048   ;;  %vm16047_vm6 = vcmask 162816   ;;  %vm16044_vm7 = vcmask 195584  }
  0x17   : > { %s219_s30 = scalar_select %p218_p10, %s11015_s22, 1  ;;  %vm16043_vm8 = vcmask 228352   ;;  %vm2824_vm9 = vcmask 261120   ;;  %vm16038_vm10 = vcmask 293888  }
  0x18   : > { %s10950_s13 = smov 16   ;;  %s10951_s14 = smov 20  }
  0x19   : > { %s10313_s6 = smul.u32 480, %s219_s30  ;;  %s10953_s7 = smov 28  }
  0x1a   : > { %s10954_s8 = smov 24   ;;  %s10959_s16 = smov 64  }
  0x1b   : > { %s11047_s9 = scalar_lea.vmem %s15993_s0, %s10313_s6  ;;  %s10960_s17 = smov 96  }
  0x1c   : > { %v279_v0 = vld [vmem:[%s11047_s9 + $0x11] sm:$0x3]  ;;  %v277_v1 = vld [vmem:[%s11047_s9 + $0x1] sm:$0xff]  ;;  %v280_v2 = vld [vmem:[%s11047_s9 + $0x19] sm:$0xff]  ;;  %s10962_s30 = smov [#allocation2]  }
  0x1d   : > { %769 = vrot.lane.b32.xlu1 %v279_v0, %s10947_s10  ;;  %765 = vrot.lane.b32.xlu0 %v277_v1, %s10947_s10  ;;  %v278_v3 = vld [vmem:[%s11047_s9 + $0x9] sm:$0xff]  ;;  %v281_v5 = vld [vmem:[%s11047_s9 + $0x21] sm:$0xff]  ;;  %s10887_s6 = sshll.u32 %s10962_s30, 4  ;;  %s10888_s6 = int_to_ptr.vmem [resolvable:$false] %s10887_s6 }
  0x1e   : > { %v282_v4 = vld [vmem:[%s11047_s9 + $0x29] sm:$0x3]  ;;  %v284_v6 = vld [vmem:[%s11047_s9 + $0x39] sm:$0xff]  ;;  %v283_v7 = vld [vmem:[%s11047_s9 + $0x31] sm:$0xff] }
  0x1f   : > { %v286_v8 = vld [vmem:[%s11047_s9 + $0x49] sm:$0xff]  ;;  %v285_v9 = vld [vmem:[%s11047_s9 + $0x41] sm:$0x3]  ;;  %v288_v10 = vld [vmem:[%s11047_s9 + $0x59] sm:$0x3] }
  0x20   : > { %v287_v11 = vld [vmem:[%s11047_s9 + $0x51] sm:$0xff]  ;;  %v290_v12 = vld [vmem:[%s11047_s9 + $0x69] sm:$0xff]  ;;  %v289_v13 = vld [vmem:[%s11047_s9 + $0x61] sm:$0xff] }
  0x21   : > { %771 = vrot.lane.b32.xlu1 %v280_v2, %s10947_s10  ;;  %767 = vrot.lane.b32.xlu0 %v278_v3, %s10947_s10  ;;  %v292_v14 = vld [vmem:[%s11047_s9 + $0x79] sm:$0xff]  ;;  %v291_v15 = vld [vmem:[%s11047_s9 + $0x71] sm:$0x3] }
  0x22   : > { %v294_v16 = vld [vmem:[%s11047_s9 + $0x89] sm:$0x3]  ;;  %v293_v17 = vld [vmem:[%s11047_s9 + $0x81] sm:$0xff]  ;;  %v296_v18 = vld [vmem:[%s11047_s9 + $0x99] sm:$0xff] }
  0x23   : > { %v295_v19 = vld [vmem:[%s11047_s9 + $0x91] sm:$0xff]  ;;  %v298_v20 = vld [vmem:[%s11047_s9 + $0xa9] sm:$0xff]  ;;  %v297_v21 = vld [vmem:[%s11047_s9 + $0xa1] sm:$0x3] }
  0x24   : > { %v300_v22 = vld [vmem:[%s11047_s9 + $0xb9] sm:$0x3]  ;;  %v299_v23 = vld [vmem:[%s11047_s9 + $0xb1] sm:$0xff]  ;;  %v302_v24 = vld [vmem:[%s11047_s9 + $0xc9] sm:$0xff] }
  0x25   : > { %775 = vrot.lane.b32.xlu1 %v282_v4, %s10947_s10  ;;  %773 = vrot.lane.b32.xlu0 %v281_v5, %s10947_s10  ;;  %v301_v25 = vld [vmem:[%s11047_s9 + $0xc1] sm:$0xff]  ;;  %v304_v26 = vld [vmem:[%s11047_s9 + $0xd9] sm:$0xff] }
  0x26   : > { %v303_v27 = vld [vmem:[%s11047_s9 + $0xd1] sm:$0x3]  ;;  %v306_v28 = vld [vmem:[%s11047_s9 + $0xe9] sm:$0x3]  ;;  %v305_v29 = vld [vmem:[%s11047_s9 + $0xe1] sm:$0xff] }
  0x27   : > { %v308_v30 = vld [vmem:[%s11047_s9 + $0xf9] sm:$0xff]  ;;  %v307_v31 = vld [vmem:[%s11047_s9 + $0xf1] sm:$0xff]  ;;  %v310_v32 = vld [vmem:[%s11047_s9 + $0x109] sm:$0xff] }
  0x28   : > { %v309_v33 = vld [vmem:[%s11047_s9 + $0x101] sm:$0x3]  ;;  %v312_v34 = vld [vmem:[%s11047_s9 + $0x119] sm:$0x3]  ;;  %v311_v35 = vld [vmem:[%s11047_s9 + $0x111] sm:$0xff] }
  0x29   : > { %779 = vrot.lane.b32.xlu1 %v284_v6, %s10947_s10  ;;  %777 = vrot.lane.b32.xlu0 %v283_v7, %s10947_s10  ;;  %v314_v36 = vld [vmem:[%s11047_s9 + $0x129] sm:$0xff]  ;;  %v313_v37 = vld [vmem:[%s11047_s9 + $0x121] sm:$0xff] }
  0x2a   : > { %v316_v38 = vld [vmem:[%s11047_s9 + $0x139] sm:$0xff]  ;;  %v315_v39 = vld [vmem:[%s11047_s9 + $0x131] sm:$0x3]  ;;  %v318_v40 = vld [vmem:[%s11047_s9 + $0x149] sm:$0x3] }
  0x2b   : > { %v317_v41 = vld [vmem:[%s11047_s9 + $0x141] sm:$0xff]  ;;  %v320_v42 = vld [vmem:[%s11047_s9 + $0x159] sm:$0xff]  ;;  %v319_v43 = vld [vmem:[%s11047_s9 + $0x151] sm:$0xff] }
  0x2c   : > { %v322_v44 = vld [vmem:[%s11047_s9 + $0x169] sm:$0xff]  ;;  %v321_v45 = vld [vmem:[%s11047_s9 + $0x161] sm:$0x3]  ;;  %v324_v46 = vld [vmem:[%s11047_s9 + $0x179] sm:$0x3] }
  0x2d   : > { %783 = vrot.lane.b32.xlu1 %v286_v8, %s10947_s10  ;;  %781 = vrot.lane.b32.xlu0 %v285_v9, %s10947_s10  ;;  %v323_v47 = vld [vmem:[%s11047_s9 + $0x171] sm:$0xff]  ;;  %v326_v48 = vld [vmem:[%s11047_s9 + $0x189] sm:$0xff] }
  0x2e   : > { %v325_v49 = vld [vmem:[%s11047_s9 + $0x181] sm:$0xff]  ;;  %v328_v50 = vld [vmem:[%s11047_s9 + $0x199] sm:$0xff]  ;;  %v327_v51 = vld [vmem:[%s11047_s9 + $0x191] sm:$0x3] }
  0x2f   : > { %v330_v52 = vld [vmem:[%s11047_s9 + $0x1a9] sm:$0x3]  ;;  %v329_v53 = vld [vmem:[%s11047_s9 + $0x1a1] sm:$0xff]  ;;  %v333_v57 = vld [vmem:[%s11047_s9 + $0x12] sm:$0x3] }
  0x30   : > { %v332_v54 = vld [vmem:[%s11047_s9 + $0xa] sm:$0xff]  ;;  %v331_v55 = vld [vmem:[%s11047_s9 + $0x2] sm:$0xff]  ;;  %v334_v56 = vld [vmem:[%s11047_s9 + $0x1a] sm:$0xff] }
  0x31   : > { %787 = vrot.lane.b32.xlu1 %v288_v10, %s10947_s10  ;;  %785 = vrot.lane.b32.xlu0 %v287_v11, %s10947_s10  ;;  %v336_v58 = vld [vmem:[%s11047_s9 + $0x2a] sm:$0x3]  ;;  %v335_v59 = vld [vmem:[%s11047_s9 + $0x22] sm:$0xff] }
  0x32   : > { %v338_v62 = vld [vmem:[%s11047_s9 + $0x3a] sm:$0xff]  ;;  %v337_v63 = vld [vmem:[%s11047_s9 + $0x32] sm:$0xff]  ;;  %v340_v2 = vld [vmem:[%s11047_s9 + $0x4a] sm:$0xff] }
  0x33   : > { %v339_v3 = vld [vmem:[%s11047_s9 + $0x42] sm:$0x3]  ;;  %v342_v6 = vld [vmem:[%s11047_s9 + $0x5a] sm:$0x3]  ;;  %v341_v7 = vld [vmem:[%s11047_s9 + $0x52] sm:$0xff] }
  0x34   : > { %v344_v10 = vld [vmem:[%s11047_s9 + $0x6a] sm:$0xff]  ;;  %v343_v11 = vld [vmem:[%s11047_s9 + $0x62] sm:$0xff] }
  0x35   : > { %791 = vrot.lane.b32.xlu1 %v290_v12, %s10947_s10  ;;  %789 = vrot.lane.b32.xlu0 %v289_v13, %s10947_s10 }
  0x39   : > { %795 = vrot.lane.b32.xlu1 %v292_v14, %s10947_s10  ;;  %793 = vrot.lane.b32.xlu0 %v291_v15, %s10947_s10  ;;  %v346_v14 = vld [vmem:[%s11047_s9 + $0x7a] sm:$0xff]  ;;  %v345_v15 = vld [vmem:[%s11047_s9 + $0x72] sm:$0x3] }
  0x3d   : > { %799 = vrot.lane.b32.xlu1 %v294_v16, %s10947_s10  ;;  %797 = vrot.lane.b32.xlu0 %v293_v17, %s10947_s10 }
  0x41   : > { %803 = vrot.lane.b32.xlu1 %v296_v18, %s10947_s10  ;;  %801 = vrot.lane.b32.xlu0 %v295_v19, %s10947_s10  ;;  %v348_v18 = vld [vmem:[%s11047_s9 + $0x8a] sm:$0x3]  ;;  %v347_v19 = vld [vmem:[%s11047_s9 + $0x82] sm:$0xff] }
  0x45   : > { %807 = vrot.lane.b32.xlu1 %v298_v20, %s10947_s10  ;;  %805 = vrot.lane.b32.xlu0 %v297_v21, %s10947_s10 }
  0x49   : > { %811 = vrot.lane.b32.xlu1 %v300_v22, %s10947_s10  ;;  %809 = vrot.lane.b32.xlu0 %v299_v23, %s10947_s10  ;;  %v350_v22 = vld [vmem:[%s11047_s9 + $0x9a] sm:$0xff]  ;;  %v349_v23 = vld [vmem:[%s11047_s9 + $0x92] sm:$0xff] }
  0x4d   : > { %815 = vrot.lane.b32.xlu1 %v302_v24, %s10947_s10  ;;  %813 = vrot.lane.b32.xlu0 %v301_v25, %s10947_s10 }
  0x51   : > { %819 = vrot.lane.b32.xlu1 %v304_v26, %s10947_s10  ;;  %817 = vrot.lane.b32.xlu0 %v303_v27, %s10947_s10  ;;  %v352_v26 = vld [vmem:[%s11047_s9 + $0xaa] sm:$0xff]  ;;  %v351_v27 = vld [vmem:[%s11047_s9 + $0xa2] sm:$0x3] }
  0x55   : > { %823 = vrot.lane.b32.xlu1 %v306_v28, %s10947_s10  ;;  %821 = vrot.lane.b32.xlu0 %v305_v29, %s10947_s10 }
  0x59   : > { %827 = vrot.lane.b32.xlu1 %v308_v30, %s10947_s10  ;;  %825 = vrot.lane.b32.xlu0 %v307_v31, %s10947_s10  ;;  %v354_v30 = vld [vmem:[%s11047_s9 + $0xba] sm:$0x3]  ;;  %v353_v31 = vld [vmem:[%s11047_s9 + $0xb2] sm:$0xff] }
  0x5d   : > { %831 = vrot.lane.b32.xlu1 %v310_v32, %s10947_s10  ;;  %829 = vrot.lane.b32.xlu0 %v309_v33, %s10947_s10 }
  0x61   : > { %835 = vrot.lane.b32.xlu1 %v312_v34, %s10947_s10  ;;  %833 = vrot.lane.b32.xlu0 %v311_v35, %s10947_s10  ;;  %v356_v34 = vld [vmem:[%s11047_s9 + $0xca] sm:$0xff]  ;;  %v355_v35 = vld [vmem:[%s11047_s9 + $0xc2] sm:$0xff] }
  0x65   : > { %839 = vrot.lane.b32.xlu1 %v314_v36, %s10947_s10  ;;  %837 = vrot.lane.b32.xlu0 %v313_v37, %s10947_s10 }
  0x69   : > { %843 = vrot.lane.b32.xlu1 %v316_v38, %s10947_s10  ;;  %841 = vrot.lane.b32.xlu0 %v315_v39, %s10947_s10  ;;  %v358_v38 = vld [vmem:[%s11047_s9 + $0xda] sm:$0xff]  ;;  %v357_v39 = vld [vmem:[%s11047_s9 + $0xd2] sm:$0x3] }
  0x6d   : > { %847 = vrot.lane.b32.xlu1 %v318_v40, %s10947_s10  ;;  %845 = vrot.lane.b32.xlu0 %v317_v41, %s10947_s10 }
  0x71   : > { %851 = vrot.lane.b32.xlu1 %v320_v42, %s10947_s10  ;;  %849 = vrot.lane.b32.xlu0 %v319_v43, %s10947_s10  ;;  %v360_v42 = vld [vmem:[%s11047_s9 + $0xea] sm:$0x3]  ;;  %v359_v43 = vld [vmem:[%s11047_s9 + $0xe2] sm:$0xff] }
  0x75   : > { %855 = vrot.lane.b32.xlu1 %v322_v44, %s10947_s10  ;;  %853 = vrot.lane.b32.xlu0 %v321_v45, %s10947_s10 }
  0x79   : > { %859 = vrot.lane.b32.xlu1 %v324_v46, %s10947_s10  ;;  %857 = vrot.lane.b32.xlu0 %v323_v47, %s10947_s10  ;;  %v362_v46 = vld [vmem:[%s11047_s9 + $0xfa] sm:$0xff]  ;;  %v361_v47 = vld [vmem:[%s11047_s9 + $0xf2] sm:$0xff] }
  0x7d   : > { %863 = vrot.lane.b32.xlu1 %v326_v48, %s10947_s10  ;;  %861 = vrot.lane.b32.xlu0 %v325_v49, %s10947_s10 }
  0x81   : > { %867 = vrot.lane.b32.xlu1 %v328_v50, %s10947_s10  ;;  %865 = vrot.lane.b32.xlu0 %v327_v51, %s10947_s10  ;;  %v364_v50 = vld [vmem:[%s11047_s9 + $0x10a] sm:$0xff]  ;;  %v363_v51 = vld [vmem:[%s11047_s9 + $0x102] sm:$0x3] }
  0x85   : > { %871 = vrot.lane.b32.xlu1 %v330_v52, %s10947_s10  ;;  %869 = vrot.lane.b32.xlu0 %v329_v53, %s10947_s10  ;;  %s10889_s10 = scalar_lea.vmem %s10888_s6, 2048 }
  0x89   : > { %983 = vrot.lane.b32.xlu1 %v332_v54, %s10948_s11  ;;  %981 = vrot.lane.b32.xlu0 %v331_v55, %s10948_s11  ;;  %v366_v54 = vld [vmem:[%s11047_s9 + $0x11a] sm:$0x3]  ;;  %v365_v55 = vld [vmem:[%s11047_s9 + $0x112] sm:$0xff] }
  0x8d   : > { %987 = vrot.lane.b32.xlu1 %v334_v56, %s10948_s11  ;;  %985 = vrot.lane.b32.xlu0 %v333_v57, %s10948_s11 }
  0x8f   : > { %v11167_v60 = vpop.permute.xlu1 %769  ;;  %v11169_v61 = vpop.permute.xlu0 %765 }
  0x91   : > { %991 = vrot.lane.b32.xlu1 %v336_v58, %s10948_s11  ;;  %989 = vrot.lane.b32.xlu0 %v335_v59, %s10948_s11  ;;  %v368_v58 = vld [vmem:[%s11047_s9 + $0x12a] sm:$0xff]  ;;  %v367_v59 = vld [vmem:[%s11047_s9 + $0x122] sm:$0xff] }
  0x93   : > { %v11175_v0 = vpop.permute.xlu1 %771  ;;  %v11177_v1 = vpop.permute.xlu0 %767 }
  0x95   : > { %995 = vrot.lane.b32.xlu1 %v338_v62, %s10948_s11  ;;  %993 = vrot.lane.b32.xlu0 %v337_v63, %s10948_s11 }
  0x97   : > { %v11183_v4 = vpop.permute.xlu1 %775  ;;  %v11185_v5 = vpop.permute.xlu0 %773 }
  0x99   : > { %999 = vrot.lane.b32.xlu1 %v340_v2, %s10948_s11  ;;  %997 = vrot.lane.b32.xlu0 %v339_v3, %s10948_s11  ;;  %v370_v2 = vld [vmem:[%s11047_s9 + $0x13a] sm:$0xff]  ;;  %v369_v3 = vld [vmem:[%s11047_s9 + $0x132] sm:$0x3] }
  0x9b   : > { %v11191_v8 = vpop.permute.xlu1 %779  ;;  %v11193_v9 = vpop.permute.xlu0 %777 }
  0x9d   : > { %1003 = vrot.lane.b32.xlu1 %v342_v6, %s10948_s11  ;;  %1001 = vrot.lane.b32.xlu0 %v341_v7, %s10948_s11 }
  0x9f   : > { %v11199_v12 = vpop.permute.xlu1 %783  ;;  %v11201_v13 = vpop.permute.xlu0 %781 }
  0xa0   : > { %16062 = vst [vmem:[#allocation5_spill] sm:$0xff] %v11199_v12  ;;  %16063 = vst [vmem:[#allocation6_spill] sm:$0xff] %v11201_v13 }
  0xa1   : > { %1007 = vrot.lane.b32.xlu1 %v344_v10, %s10948_s11  ;;  %1005 = vrot.lane.b32.xlu0 %v343_v11, %s10948_s11  ;;  %v372_v10 = vld [vmem:[%s11047_s9 + $0x14a] sm:$0x3]  ;;  %v371_v11 = vld [vmem:[%s11047_s9 + $0x142] sm:$0xff] }
  0xa3   : > { %v11207_v16 = vpop.permute.xlu1 %787  ;;  %v11209_v17 = vpop.permute.xlu0 %785 }
  0xa4   : > { %16064 = vst [vmem:[#allocation7_spill] sm:$0xff] %v11207_v16  ;;  %16065 = vst [vmem:[#allocation8_spill] sm:$0xff] %v11209_v17  ;;  %v11906_v16 = vld [vmem:[%s11047_s9 + $0x82] sm:$0xff] }
  0xa5   : > { %1011 = vrot.lane.b32.xlu1 %v346_v14, %s10948_s11  ;;  %1009 = vrot.lane.b32.xlu0 %v345_v15, %s10948_s11  ;;  %v2880_v17 = vld [vmem:[%s15994_s1 + $0x8] sm:$0xff] }
  0xa7   : > { %v11215_v20 = vpop.permute.xlu1 %791  ;;  %v11217_v21 = vpop.permute.xlu0 %789 }
  0xa8   : > { %16066 = vst [vmem:[#allocation9_spill] sm:$0xff] %v11215_v20  ;;  %16067 = vst [vmem:[#allocation10_spill] sm:$0xff] %v11217_v21  ;;  %v11896_v21 = vld [vmem:[%s11047_s9 + $0x6a] sm:$0xff] }
  0xa9   : > { %1015 = vrot.lane.b32.xlu1 %v348_v18, %s10948_s11  ;;  %1013 = vrot.lane.b32.xlu0 %v347_v19, %s10948_s11  ;;  %v374_v18 = vld [vmem:[%s11047_s9 + $0x15a] sm:$0xff]  ;;  %v373_v19 = vld [vmem:[%s11047_s9 + $0x152] sm:$0xff] }
  0xab   : > { %v11223_v24 = vpop.permute.xlu1 %795  ;;  %v11225_v25 = vpop.permute.xlu0 %793 }
  0xac   : > { %16068 = vst [vmem:[#allocation11_spill] sm:$0xff] %v11223_v24  ;;  %16069 = vst [vmem:[#allocation12_spill] sm:$0xff] %v11225_v25 }
  0xad   : > { %1019 = vrot.lane.b32.xlu1 %v350_v22, %s10948_s11  ;;  %1017 = vrot.lane.b32.xlu0 %v349_v23, %s10948_s11 }
  0xaf   : > { %v11231_v28 = vpop.permute.xlu1 %799  ;;  %v11233_v29 = vpop.permute.xlu0 %797 }
  0xb0   : > { %16070 = vst [vmem:[#allocation13_spill] sm:$0xff] %v11231_v28  ;;  %16071 = vst [vmem:[#allocation14_spill] sm:$0xff] %v11233_v29  ;;  %v11687_v28 = vld [vmem:[%s11047_s9 + $0xa9] sm:$0xff] }
  0xb1   : > { %1023 = vrot.lane.b32.xlu1 %v352_v26, %s10948_s11  ;;  %1021 = vrot.lane.b32.xlu0 %v351_v27, %s10948_s11  ;;  %v376_v26 = vld [vmem:[%s11047_s9 + $0x16a] sm:$0xff]  ;;  %v375_v27 = vld [vmem:[%s11047_s9 + $0x162] sm:$0x3] }
  0xb3   : > { %v11239_v32 = vpop.permute.xlu1 %803  ;;  %v11241_v33 = vpop.permute.xlu0 %801 }
  0xb4   : > { %16072 = vst [vmem:[#allocation15_spill] sm:$0xff] %v11239_v32  ;;  %16073 = vst [vmem:[#allocation16_spill] sm:$0xff] %v11241_v33  ;;  %v9644_v33 = vld [vmem:[%s11047_s9 + $0xb9] sm:$0x3] }
  0xb5   : > { %1027 = vrot.lane.b32.xlu1 %v354_v30, %s10948_s11  ;;  %1025 = vrot.lane.b32.xlu0 %v353_v31, %s10948_s11 }
  0xb7   : > { %v11247_v36 = vpop.permute.xlu1 %807  ;;  %v11249_v37 = vpop.permute.xlu0 %805 }
  0xb8   : > { %16074 = vst [vmem:[#allocation17_spill] sm:$0xff] %v11247_v36  ;;  %16075 = vst [vmem:[#allocation18_spill] sm:$0xff] %v11249_v37  ;;  %v9641_v37 = vld [vmem:[%s11047_s9 + $0xa1] sm:$0x3]  ;;  %v11674_v36 = vld [vmem:[%s11047_s9 + $0x99] sm:$0xff] }
  0xb9   : > { %1031 = vrot.lane.b32.xlu1 %v356_v34, %s10948_s11  ;;  %1029 = vrot.lane.b32.xlu0 %v355_v35, %s10948_s11  ;;  %v378_v34 = vld [vmem:[%s11047_s9 + $0x17a] sm:$0x3]  ;;  %v377_v35 = vld [vmem:[%s11047_s9 + $0x172] sm:$0xff] }
  0xbb   : > { %v11255_v40 = vpop.permute.xlu1 %811  ;;  %v11257_v41 = vpop.permute.xlu0 %809 }
  0xbc   : > { %16076 = vst [vmem:[#allocation19_spill] sm:$0xff] %v11255_v40  ;;  %16077 = vst [vmem:[#allocation20_spill] sm:$0xff] %v11257_v41  ;;  %v11651_v40 = vld [vmem:[%s11047_s9 + $0x79] sm:$0xff]  ;;  %v9638_v41 = vld [vmem:[%s11047_s9 + $0x89] sm:$0x3] }
  0xbd   : > { %1035 = vrot.lane.b32.xlu1 %v358_v38, %s10948_s11  ;;  %1033 = vrot.lane.b32.xlu0 %v357_v39, %s10948_s11 }
  0xbf   : > { %v11263_v44 = vpop.permute.xlu1 %815  ;;  %v11265_v45 = vpop.permute.xlu0 %813 }
  0xc0   : > { %16078 = vst [vmem:[#allocation21_spill] sm:$0xff] %v11263_v44  ;;  %16079 = vst [vmem:[#allocation22_spill] sm:$0xff] %v11265_v45  ;;  %v11638_v44 = vld [vmem:[%s11047_s9 + $0x69] sm:$0xff]  ;;  %v11648_v45 = vld [vmem:[%s11047_s9 + $0x81] sm:$0xff] }
  0xc1   : > { %1039 = vrot.lane.b32.xlu1 %v360_v42, %s10948_s11  ;;  %1037 = vrot.lane.b32.xlu0 %v359_v43, %s10948_s11  ;;  %v380_v42 = vld [vmem:[%s11047_s9 + $0x18a] sm:$0xff]  ;;  %v379_v43 = vld [vmem:[%s11047_s9 + $0x182] sm:$0xff] }
  0xc3   : > { %v11271_v48 = vpop.permute.xlu1 %819  ;;  %v11273_v49 = vpop.permute.xlu0 %817 }
  0xc4   : > { %16080 = vst [vmem:[#allocation23_spill] sm:$0xff] %v11271_v48  ;;  %16081 = vst [vmem:[#allocation24_spill] sm:$0xff] %v11273_v49 }
  0xc5   : > { %1043 = vrot.lane.b32.xlu1 %v362_v46, %s10948_s11  ;;  %1041 = vrot.lane.b32.xlu0 %v361_v47, %s10948_s11 }
  0xc7   : > { %v11279_v52 = vpop.permute.xlu1 %823  ;;  %v11281_v53 = vpop.permute.xlu0 %821 }
  0xc8   : > { %16082 = vst [vmem:[#allocation25_spill] sm:$0xff] %v11279_v52  ;;  %16083 = vst [vmem:[#allocation26_spill] sm:$0xff] %v11281_v53 }
  0xc9   : > { %1047 = vrot.lane.b32.xlu1 %v364_v50, %s10948_s11  ;;  %1045 = vrot.lane.b32.xlu0 %v363_v51, %s10948_s11  ;;  %v382_v50 = vld [vmem:[%s11047_s9 + $0x19a] sm:$0xff]  ;;  %v381_v51 = vld [vmem:[%s11047_s9 + $0x192] sm:$0x3] }
  0xcb   : > { %v11287_v56 = vpop.permute.xlu1 %827  ;;  %v11289_v57 = vpop.permute.xlu0 %825 }
  0xcc   : > { %16084 = vst [vmem:[#allocation27_spill] sm:$0xff] %v11287_v56  ;;  %16085 = vst [vmem:[#allocation28_spill] sm:$0xff] %v11289_v57  ;;  %v257_v57 = vld [vmem:[%s11047_s9 + $0x110] sm:$0xff] }
  0xcd   : > { %1051 = vrot.lane.b32.xlu1 %v366_v54, %s10948_s11  ;;  %1049 = vrot.lane.b32.xlu0 %v365_v55, %s10948_s11 }
  0xcf   : > { %v11295_v62 = vpop.permute.xlu1 %831  ;;  %v11297_v63 = vpop.permute.xlu0 %829 }
  0xd0   : > { %16086 = vst [vmem:[#allocation29_spill] sm:$0xff] %v11295_v62  ;;  %16087 = vst [vmem:[#allocation30_spill] sm:$0xff] %v11297_v63 }
  0xd1   : > { %1055 = vrot.lane.b32.xlu1 %v368_v58, %s10948_s11  ;;  %1053 = vrot.lane.b32.xlu0 %v367_v59, %s10948_s11  ;;  %v384_v58 = vld [vmem:[%s11047_s9 + $0x1aa] sm:$0x3]  ;;  %v383_v59 = vld [vmem:[%s11047_s9 + $0x1a2] sm:$0xff] }
  0xd3   : > { %v11303_v6 = vpop.permute.xlu1 %835  ;;  %v11305_v7 = vpop.permute.xlu0 %833 }
  0xd4   : > { %16088 = vst [vmem:[#allocation31_spill] sm:$0xff] %v11303_v6  ;;  %16089 = vst [vmem:[#allocation32_spill] sm:$0xff] %v11305_v7 }
  0xd5   : > { %1059 = vrot.lane.b32.xlu1 %v370_v2, %s10948_s11  ;;  %1057 = vrot.lane.b32.xlu0 %v369_v3, %s10948_s11 }
  0xd7   : > { %v11311_v14 = vpop.permute.xlu1 %839  ;;  %v11313_v15 = vpop.permute.xlu0 %837 }
  0xd8   : > { %16090 = vst [vmem:[#allocation33_spill] sm:$0xff] %v11311_v14  ;;  %16091 = vst [vmem:[#allocation34_spill] sm:$0xff] %v11313_v15  ;;  %v251_v15 = vld [vmem:[%s11047_s9 + $0xe0] sm:$0xff] }
  0xd9   : > { %1063 = vrot.lane.b32.xlu1 %v372_v10, %s10948_s11  ;;  %1061 = vrot.lane.b32.xlu0 %v371_v11, %s10948_s11 }
  0xdb   : > { %v11319_v22 = vpop.permute.xlu1 %843  ;;  %v11321_v23 = vpop.permute.xlu0 %841 }
  0xdc   : > { %16092 = vst [vmem:[#allocation35_spill] sm:$0xff] %v11319_v22  ;;  %16093 = vst [vmem:[#allocation36_spill] sm:$0xff] %v11321_v23 }
  0xdd   : > { %1067 = vrot.lane.b32.xlu1 %v374_v18, %s10948_s11  ;;  %1065 = vrot.lane.b32.xlu0 %v373_v19, %s10948_s11  ;;  %v226_v18 = vld [vmem:[%s11047_s9 + $0x18] sm:$0xff]  ;;  %v227_v19 = vld [vmem:[%s11047_s9 + $0x20] sm:$0xff] }
  0xdf   : > { %v11327_v30 = vpop.permute.xlu1 %847  ;;  %v11329_v31 = vpop.permute.xlu0 %845 }
  0xe0   : > { %16094 = vst [vmem:[#allocation37_spill] sm:$0xff] %v11327_v30  ;;  %16095 = vst [vmem:[#allocation38_spill] sm:$0xff] %v11329_v31 }
  0xe1   : > { %1071 = vrot.lane.b32.xlu1 %v376_v26, %s10948_s11  ;;  %1069 = vrot.lane.b32.xlu0 %v375_v27, %s10948_s11  ;;  %v9572_v26 = vld [vmem:[%s11047_s9 + $0x28] sm:$0x3] }
  0xe3   : > { %v11335_v38 = vpop.permute.xlu1 %851  ;;  %v11337_v39 = vpop.permute.xlu0 %849 }
  0xe4   : > { %16096 = vst [vmem:[#allocation39_spill] sm:$0xff] %v11335_v38  ;;  %16097 = vst [vmem:[#allocation40_spill] sm:$0xff] %v11337_v39  ;;  %v245_v39 = vld [vmem:[%s11047_s9 + $0xb0] sm:$0xff] }
  0xe5   : > { %1075 = vrot.lane.b32.xlu1 %v378_v34, %s10948_s11  ;;  %1073 = vrot.lane.b32.xlu0 %v377_v35, %s10948_s11  ;;  %v229_v35 = vld [vmem:[%s11047_s9 + $0x30] sm:$0xff] }
  0xe7   : > { %v11343_v46 = vpop.permute.xlu1 %855  ;;  %v11345_v47 = vpop.permute.xlu0 %853 }
  0xe8   : > { %16098 = vst [vmem:[#allocation41_spill] sm:$0xff] %v11343_v46  ;;  %16099 = vst [vmem:[#allocation42_spill] sm:$0xff] %v11345_v47 }
  0xe9   : > { %1079 = vrot.lane.b32.xlu1 %v380_v42, %s10948_s11  ;;  %1077 = vrot.lane.b32.xlu0 %v379_v43, %s10948_s11  ;;  %v9575_v42 = vld [vmem:[%s11047_s9 + $0x40] sm:$0x3] }
  0xeb   : > { %v11351_v54 = vpop.permute.xlu1 %859  ;;  %v11353_v55 = vpop.permute.xlu0 %857 }
  0xec   : > { %16100 = vst [vmem:[#allocation43_spill] sm:$0xff] %v11351_v54  ;;  %16101 = vst [vmem:[#allocation44_spill] sm:$0xff] %v11353_v55 }
  0xed   : > { %1083 = vrot.lane.b32.xlu1 %v382_v50, %s10948_s11  ;;  %1081 = vrot.lane.b32.xlu0 %v381_v51, %s10948_s11  ;;  %v230_v51 = vld [vmem:[%s11047_s9 + $0x38] sm:$0xff] }
  0xef   : > { %v11359_v2 = vpop.permute.xlu1 %863  ;;  %v11361_v3 = vpop.permute.xlu0 %861 }
  0xf0   : > { %16102 = vst [vmem:[#allocation45_spill] sm:$0xff] %v11359_v2  ;;  %16103 = vst [vmem:[#allocation46_spill] sm:$0xff] %v11361_v3  ;;  %v239_v3 = vld [vmem:[%s11047_s9 + $0x80] sm:$0xff] }
  0xf1   : > { %1087 = vrot.lane.b32.xlu1 %v384_v58, %s10948_s11  ;;  %1085 = vrot.lane.b32.xlu0 %v383_v59, %s10948_s11 }
  0xf3   : > { %v11365_v10 = vpop.permute.xlu1 %867  ;;  %v11367_v11 = vpop.permute.xlu0 %865 }
  0xf4   : > { %16104 = vst [vmem:[#allocation47_spill] sm:$0xff] %v11365_v10  ;;  %16105 = vst [vmem:[#allocation48_spill] sm:$0xff] %v11367_v11 }
  0xf5   : > { %1199 = vrot.lane.b32.xlu1 %v227_v19, %s10949_s12  ;;  %1197 = vrot.lane.b32.xlu0 %v226_v18, %s10949_s12  ;;  %v232_v18 = vld [vmem:[%s11047_s9 + $0x48] sm:$0xff]  ;;  %v233_v19 = vld [vmem:[%s11047_s9 + $0x50] sm:$0xff] }
  0xf7   : > { %v11374_v27 = vpop.permute.xlu1 %871  ;;  %v11376_v34 = vpop.permute.xlu0 %869 }
  0xf8   : > { %16106 = vst [vmem:[#allocation49_spill] sm:$0xff] %v11374_v27  ;;  %16107 = vst [vmem:[#allocation50_spill] sm:$0xff] %v11376_v34 }
  0xf9   : > { %1203 = vrot.lane.b32.xlu1 %v229_v35, %s10949_s12  ;;  %1201 = vrot.lane.b32.xlu0 %v9572_v26, %s10949_s12  ;;  %v9578_v26 = vld [vmem:[%s11047_s9 + $0x58] sm:$0x3] }
  0xfb   : > { %v11382_v43 = vpop.permute.xlu1 %983  ;;  %v11384_v50 = vpop.permute.xlu0 %981 }
  0xfd   : > { %1207 = vrot.lane.b32.xlu1 %v9575_v42, %s10949_s12  ;;  %1205 = vrot.lane.b32.xlu0 %v230_v51, %s10949_s12  ;;  %v235_v42 = vld [vmem:[%s11047_s9 + $0x60] sm:$0xff]  ;;  %v9581_v51 = vld [vmem:[%s11047_s9 + $0x70] sm:$0x3] }
  0xff   : > { %v11389_v58 = vpop.permute.xlu1 %987  ;;  %v11391_v59 = vpop.permute.xlu0 %985 }
 0x101   : > { %1211 = vrot.lane.b32.xlu1 %v233_v19, %s10949_s12  ;;  %1209 = vrot.lane.b32.xlu0 %v232_v18, %s10949_s12  ;;  %v236_v18 = vld [vmem:[%s11047_s9 + $0x68] sm:$0xff] }
 0x103   : > { %v11398_v35 = vpop.permute.xlu1 %991  ;;  %v11400_v27 = vpop.permute.xlu0 %989 }
 0x105   : > { %1215 = vrot.lane.b32.xlu1 %v235_v42, %s10949_s12  ;;  %1213 = vrot.lane.b32.xlu0 %v9578_v26, %s10949_s12  ;;  %v238_v42 = vld [vmem:[%s11047_s9 + $0x78] sm:$0xff]  ;;  %v9584_v26 = vld [vmem:[%s11047_s9 + $0x88] sm:$0x3] }
 0x107   : > { %v11406_v34 = vpop.permute.xlu1 %995  ;;  %v11408_v19 = vpop.permute.xlu0 %993 }
 0x109   : > { %1219 = vrot.lane.b32.xlu1 %v9581_v51, %s10949_s12  ;;  %1217 = vrot.lane.b32.xlu0 %v236_v18, %s10949_s12  ;;  %v241_v51 = vld [vmem:[%s11047_s9 + $0x90] sm:$0xff]  ;;  %v9587_v18 = vld [vmem:[%s11047_s9 + $0xa0] sm:$0x3] }
 0x10b   : > { %v11413_v11 = vpop.permute.xlu1 %999  ;;  %v11415_v10 = vpop.permute.xlu0 %997 }
 0x10c   : > { %16108 = vst [vmem:[#allocation51_spill] sm:$0xff] %v11413_v11  ;;  %16109 = vst [vmem:[#allocation52_spill] sm:$0xff] %v11415_v10  ;;  %v15999_v11 = vmov 0.0|0.0  }
 0x10d   : > { %1223 = vrot.lane.b32.xlu1 %v239_v3, %s10949_s12  ;;  %1221 = vrot.lane.b32.xlu0 %v238_v42, %s10949_s12  ;;  %v242_v42 = vld [vmem:[%s11047_s9 + $0x98] sm:$0xff] }
 0x10e   : > { %10247 = vmatprep.subr.bf16.mxu0 %v15999_v11  ;;  %10253 = vmatprep.subr.bf16.mxu1 %v15999_v11 }
 0x10f   : > { %v11422_v2 = vpop.permute.xlu1 %1003  ;;  %v11424_v55 = vpop.permute.xlu0 %1001 }
 0x110   : > { %16110 = vst [vmem:[#allocation53_spill] sm:$0xff] %v11422_v2  ;;  %16111 = vst [vmem:[#allocation54_spill] sm:$0xff] %v11424_v55 }
 0x111   : > { %1227 = vrot.lane.b32.xlu1 %v241_v51, %s10949_s12  ;;  %1225 = vrot.lane.b32.xlu0 %v9584_v26, %s10949_s12  ;;  %v244_v51 = vld [vmem:[%s11047_s9 + $0xa8] sm:$0xff]  ;;  %v9590_v26 = vld [vmem:[%s11047_s9 + $0xb8] sm:$0x3] }
 0x113   : > { %v11430_v54 = vpop.permute.xlu1 %1007  ;;  %v11432_v3 = vpop.permute.xlu0 %1005 }
 0x114   : > { %16112 = vst [vmem:[#allocation55_spill] sm:$0xff] %v11430_v54  ;;  %16113 = vst [vmem:[#allocation56_spill] sm:$0xff] %v11432_v3  ;;  %v9689_v3 = vld [vmem:[%s11047_s9 + $0x72] sm:$0x3] }
 0x115   : > { %1231 = vrot.lane.b32.xlu1 %v9587_v18, %s10949_s12  ;;  %1229 = vrot.lane.b32.xlu0 %v242_v42, %s10949_s12  ;;  %v247_v18 = vld [vmem:[%s11047_s9 + $0xc0] sm:$0xff]  ;;  %v9593_v42 = vld [vmem:[%s11047_s9 + $0xd0] sm:$0x3] }
 0x117   : > { %v11437_v47 = vpop.permute.xlu1 %1011  ;;  %v11439_v46 = vpop.permute.xlu0 %1009 }
 0x118   : > { %16114 = vst [vmem:[#allocation57_spill] sm:$0xff] %v11437_v47  ;;  %16115 = vst [vmem:[#allocation58_spill] sm:$0xff] %v11439_v46  ;;  %v11710_v46 = vld [vmem:[%s11047_s9 + $0xc9] sm:$0xff] }
 0x119   : > { %1235 = vrot.lane.b32.xlu1 %v245_v39, %s10949_s12  ;;  %1233 = vrot.lane.b32.xlu0 %v244_v51, %s10949_s12  ;;  %v248_v51 = vld [vmem:[%s11047_s9 + $0xc8] sm:$0xff] }
 0x11b   : > { %v11446_v38 = vpop.permute.xlu1 %1015  ;;  %v11448_v31 = vpop.permute.xlu0 %1013 }
 0x11c   : > { %16116 = vst [vmem:[#allocation59_spill] sm:$0xff] %v11446_v38  ;;  %16117 = vst [vmem:[#allocation60_spill] sm:$0xff] %v11448_v31  ;;  %v11684_v38 = vld [vmem:[%s11047_s9 + $0xb1] sm:$0xff] }
 0x11d   : > { %1239 = vrot.lane.b32.xlu1 %v247_v18, %s10949_s12  ;;  %1237 = vrot.lane.b32.xlu0 %v9590_v26, %s10949_s12  ;;  %v250_v18 = vld [vmem:[%s11047_s9 + $0xd8] sm:$0xff]  ;;  %v9596_v26 = vld [vmem:[%s11047_s9 + $0xe8] sm:$0x3] }
 0x11f   : > { %v11454_v30 = vpop.permute.xlu1 %1019  ;;  %v11456_v39 = vpop.permute.xlu0 %1017 }
 0x120   : > { %16118 = vst [vmem:[#allocation61_spill] sm:$0xff] %v11454_v30  ;;  %16119 = vst [vmem:[#allocation62_spill] sm:$0xff] %v11456_v39 }
 0x121   : > { %1243 = vrot.lane.b32.xlu1 %v9593_v42, %s10949_s12  ;;  %1241 = vrot.lane.b32.xlu0 %v248_v51, %s10949_s12  ;;  %v253_v42 = vld [vmem:[%s11047_s9 + $0xf0] sm:$0xff]  ;;  %v9599_v51 = vld [vmem:[%s11047_s9 + $0x100] sm:$0x3] }
 0x123   : > { %v11461_v23 = vpop.permute.xlu1 %1023  ;;  %v11463_v22 = vpop.permute.xlu0 %1021 }
 0x124   : > { %16120 = vst [vmem:[#allocation63_spill] sm:$0xff] %v11461_v23  ;;  %16121 = vst [vmem:[#allocation64_spill] sm:$0xff] %v11463_v22 }
 0x125   : > { %1247 = vrot.lane.b32.xlu1 %v251_v15, %s10949_s12  ;;  %1245 = vrot.lane.b32.xlu0 %v250_v18, %s10949_s12  ;;  %v254_v18 = vld [vmem:[%s11047_s9 + $0xf8] sm:$0xff] }
 0x127   : > { %v11470_v14 = vpop.permute.xlu1 %1027  ;;  %v11472_v7 = vpop.permute.xlu0 %1025 }
 0x128   : > { %16122 = vst [vmem:[#allocation65_spill] sm:$0xff] %v11470_v14  ;;  %16123 = vst [vmem:[#allocation66_spill] sm:$0xff] %v11472_v7 }
 0x129   : > { %1251 = vrot.lane.b32.xlu1 %v253_v42, %s10949_s12  ;;  %1249 = vrot.lane.b32.xlu0 %v9596_v26, %s10949_s12  ;;  %v256_v42 = vld [vmem:[%s11047_s9 + $0x108] sm:$0xff]  ;;  %v9602_v26 = vld [vmem:[%s11047_s9 + $0x118] sm:$0x3] }
 0x12b   : > { %v11478_v6 = vpop.permute.xlu1 %1031  ;;  %v11480_v15 = vpop.permute.xlu0 %1029 }
 0x12c   : > { %16124 = vst [vmem:[#allocation67_spill] sm:$0xff] %v11478_v6  ;;  %16125 = vst [vmem:[#allocation68_spill] sm:$0xff] %v11480_v15  ;;  %v9635_v6 = vld [vmem:[%s11047_s9 + $0x71] sm:$0x3] }
 0x12d   : > { %1255 = vrot.lane.b32.xlu1 %v9599_v51, %s10949_s12  ;;  %1253 = vrot.lane.b32.xlu0 %v254_v18, %s10949_s12  ;;  %v259_v51 = vld [vmem:[%s11047_s9 + $0x120] sm:$0xff]  ;;  %v9605_v18 = vld [vmem:[%s11047_s9 + $0x130] sm:$0x3] }
 0x12f   : > { %v11485_v63 = vpop.permute.xlu1 %1035  ;;  %v11487_v62 = vpop.permute.xlu0 %1033 }
 0x130   : > { %16126 = vst [vmem:[#allocation69_spill] sm:$0xff] %v11485_v63  ;;  %16127 = vst [vmem:[#allocation70_spill] sm:$0xff] %v11487_v62  ;;  %v263_v62 = vld [vmem:[%s11047_s9 + $0x140] sm:$0xff] }
 0x131   : > { %1259 = vrot.lane.b32.xlu1 %v257_v57, %s10949_s12  ;;  %1257 = vrot.lane.b32.xlu0 %v256_v42, %s10949_s12  ;;  %v260_v42 = vld [vmem:[%s11047_s9 + $0x128] sm:$0xff] }
 0x133   : > { %v11494_v56 = vpop.permute.xlu1 %1039  ;;  %v11496_v52 = vpop.permute.xlu0 %1037 }
 0x134   : > { %16128 = vst [vmem:[#allocation71_spill] sm:$0xff] %v11494_v56  ;;  %16129 = vst [vmem:[#allocation72_spill] sm:$0xff] %v11496_v52 }
 0x135   : > { %1263 = vrot.lane.b32.xlu1 %v259_v51, %s10949_s12  ;;  %1261 = vrot.lane.b32.xlu0 %v9602_v26, %s10949_s12  ;;  %v262_v51 = vld [vmem:[%s11047_s9 + $0x138] sm:$0xff]  ;;  %v9608_v26 = vld [vmem:[%s11047_s9 + $0x148] sm:$0x3] }
 0x137   : > { %v11502_v53 = vpop.permute.xlu1 %1043  ;;  %v11504_v57 = vpop.permute.xlu0 %1041 }
 0x138   : > { %16130 = vst [vmem:[#allocation73_spill] sm:$0xff] %v11502_v53  ;;  %16131 = vst [vmem:[#allocation74_spill] sm:$0xff] %v11504_v57 }
 0x139   : > { %1267 = vrot.lane.b32.xlu1 %v9605_v18, %s10949_s12  ;;  %1265 = vrot.lane.b32.xlu0 %v260_v42, %s10949_s12  ;;  %v265_v18 = vld [vmem:[%s11047_s9 + $0x150] sm:$0xff]  ;;  %v9611_v42 = vld [vmem:[%s11047_s9 + $0x160] sm:$0x3] }
 0x13b   : > { %v11509_v56 = vpop.permute.xlu1 %1047  ;;  %v11511_v52 = vpop.permute.xlu0 %1045 }
 0x13c   : > { %16132 = vst [vmem:[#allocation75_spill] sm:$0xff] %v11509_v56  ;;  %16133 = vst [vmem:[#allocation76_spill] sm:$0xff] %v11511_v52  ;;  %v269_v56 = vld [vmem:[%s11047_s9 + $0x170] sm:$0xff] }
 0x13d   : > { %1271 = vrot.lane.b32.xlu1 %v263_v62, %s10949_s12  ;;  %1269 = vrot.lane.b32.xlu0 %v262_v51, %s10949_s12  ;;  %v266_v51 = vld [vmem:[%s11047_s9 + $0x158] sm:$0xff] }
 0x13f   : > { %v11518_v53 = vpop.permute.xlu1 %1051  ;;  %v11520_v57 = vpop.permute.xlu0 %1049 }
 0x140   : > { %16134 = vst [vmem:[#allocation77_spill] sm:$0xff] %v11518_v53  ;;  %16135 = vst [vmem:[#allocation78_spill] sm:$0xff] %v11520_v57 }
 0x141   : > { %1275 = vrot.lane.b32.xlu1 %v265_v18, %s10949_s12  ;;  %1273 = vrot.lane.b32.xlu0 %v9608_v26, %s10949_s12  ;;  %v268_v18 = vld [vmem:[%s11047_s9 + $0x168] sm:$0xff]  ;;  %v9614_v26 = vld [vmem:[%s11047_s9 + $0x178] sm:$0x3] }
 0x143   : > { %v11526_v52 = vpop.permute.xlu1 %1055  ;;  %v11528_v62 = vpop.permute.xlu0 %1053 }
 0x144   : > { %16136 = vst [vmem:[#allocation79_spill] sm:$0xff] %v11526_v52  ;;  %16137 = vst [vmem:[#allocation80_spill] sm:$0xff] %v11528_v62 }
 0x145   : > { %1279 = vrot.lane.b32.xlu1 %v9611_v42, %s10949_s12  ;;  %1277 = vrot.lane.b32.xlu0 %v266_v51, %s10949_s12  ;;  %v271_v42 = vld [vmem:[%s11047_s9 + $0x180] sm:$0xff]  ;;  %v9617_v51 = vld [vmem:[%s11047_s9 + $0x190] sm:$0x3] }
 0x147   : > { %v11533_v57 = vpop.permute.xlu1 %1059  ;;  %v11535_v53 = vpop.permute.xlu0 %1057 }
 0x148   : > { %16138 = vst [vmem:[#allocation81_spill] sm:$0xff] %v11533_v57  ;;  %16139 = vst [vmem:[#allocation82_spill] sm:$0xff] %v11535_v53  ;;  %v274_v57 = vld [vmem:[%s11047_s9 + $0x198] sm:$0xff] }
 0x149   : > { %1283 = vrot.lane.b32.xlu1 %v269_v56, %s10949_s12  ;;  %1281 = vrot.lane.b32.xlu0 %v268_v18, %s10949_s12  ;;  %v272_v18 = vld [vmem:[%s11047_s9 + $0x188] sm:$0xff] }
 0x14b   : > { %v11542_v62 = vpop.permute.xlu1 %1063  ;;  %v11544_v52 = vpop.permute.xlu0 %1061 }
 0x14c   : > { %16140 = vst [vmem:[#allocation83_spill] sm:$0xff] %v11542_v62  ;;  %16141 = vst [vmem:[#allocation84_spill] sm:$0xff] %v11544_v52 }
 0x14d   : > { %1287 = vrot.lane.b32.xlu1 %v271_v42, %s10949_s12  ;;  %1285 = vrot.lane.b32.xlu0 %v9614_v26, %s10949_s12  ;;  %v275_v42 = vld [vmem:[%s11047_s9 + $0x1a0] sm:$0xff]  ;;  %v9621_v26 = vld [vmem:[%s11047_s9 + $0x1b0] sm:$0xff] }
 0x14f   : > { %v11550_v53 = vpop.permute.xlu1 %1067  ;;  %v11552_v56 = vpop.permute.xlu0 %1065 }
 0x150   : > { %16142 = vst [vmem:[#allocation85_spill] sm:$0xff] %v11550_v53  ;;  %16143 = vst [vmem:[#allocation86_spill] sm:$0xff] %v11552_v56  ;;  %v9620_v56 = vld [vmem:[%s11047_s9 + $0x1a8] sm:$0x3] }
 0x151   : > { %1291 = vrot.lane.b32.xlu1 %v9617_v51, %s10949_s12  ;;  %1289 = vrot.lane.b32.xlu0 %v272_v18, %s10949_s12  ;;  %v9623_v51 = vld [vmem:[%s11047_s9 + $0x1c0] sm:$0x3]  ;;  %v9622_v18 = vld [vmem:[%s11047_s9 + $0x1b8] sm:$0xff] }
 0x153   : > { %v11557_v52 = vpop.permute.xlu1 %1071  ;;  %v11559_v62 = vpop.permute.xlu0 %1069 }
 0x154   : > { %16144 = vst [vmem:[#allocation87_spill] sm:$0xff] %v11557_v52  ;;  %16145 = vst [vmem:[#allocation88_spill] sm:$0xff] %v11559_v62 }
 0x155   : > { %1295 = vrot.lane.b32.xlu1 %v275_v42, %s10949_s12  ;;  %1293 = vrot.lane.b32.xlu0 %v274_v57, %s10949_s12  ;;  %v9625_v57 = vld [vmem:[%s11047_s9 + $0x21] sm:$0xff]  ;;  %v9624_v42 = vld [vmem:[%s11047_s9 + $0x19] sm:$0xff] }
 0x157   : > { %v11567_v53 = vpop.permute.xlu1 %1075  ;;  %v11569_v49 = vpop.permute.xlu0 %1073 }
 0x158   : > { %16146 = vst [vmem:[#allocation89_spill] sm:$0xff] %v11567_v53  ;;  %16147 = vst [vmem:[#allocation90_spill] sm:$0xff] %v11569_v49  ;;  %v9632_v53 = vld [vmem:[%s11047_s9 + $0x59] sm:$0x3] }
 0x159   : > { %1299 = vrot.lane.b32.xlu1 %v9621_v26, %s10949_s12  ;;  %1297 = vrot.lane.b32.xlu0 %v9620_v56, %s10949_s12  ;;  %v11590_v56 = vld [vmem:[%s11047_s9 + $0x31] sm:$0xff] }
 0x15b   : > { %v11575_v62 = vpop.permute.xlu1 %1079  ;;  %v11577_v52 = vpop.permute.xlu0 %1077 }
 0x15c   : > { %16148 = vst [vmem:[#allocation91_spill] sm:$0xff] %v11575_v62  ;;  %16149 = vst [vmem:[#allocation92_spill] sm:$0xff] %v11577_v52  ;;  %v9626_v52 = vld [vmem:[%s11047_s9 + $0x29] sm:$0x3] }
 0x15d   : > { %1303 = vrot.lane.b32.xlu1 %v9623_v51, %s10949_s12  ;;  %1301 = vrot.lane.b32.xlu0 %v9622_v18, %s10949_s12  ;;  %s10957_s12 = smov 32  }
 0x15f   : > { %v11583_v49 = vpop.permute.xlu1 %1083  ;;  %v11585_v26 = vpop.permute.xlu0 %1081 }
 0x160   : > { %16150 = vst [vmem:[#allocation93_spill] sm:$0xff] %v11583_v49  ;;  %16151 = vst [vmem:[#allocation94_spill] sm:$0xff] %v11585_v26  ;;  %v9629_v26 = vld [vmem:[%s11047_s9 + $0x41] sm:$0x3]  ;;  %v11602_v49 = vld [vmem:[%s11047_s9 + $0x39] sm:$0xff] }
 0x161   : > { %1415 = vrot.lane.b32.xlu1 %v9625_v57, %s10950_s13  ;;  %1413 = vrot.lane.b32.xlu0 %v9624_v42, %s10950_s13 }
 0x163   : > { %v11593_v51 = vpop.permute.xlu1 %1087  ;;  %v11595_v18 = vpop.permute.xlu0 %1085 }
 0x164   : > { %16152 = vst [vmem:[#allocation95_spill] sm:$0xff] %v11593_v51  ;;  %16153 = vst [vmem:[#allocation96_spill] sm:$0xff] %v11595_v18  ;;  %v11612_v51 = vld [vmem:[%s11047_s9 + $0x51] sm:$0xff]  ;;  %v11615_v18 = vld [vmem:[%s11047_s9 + $0x49] sm:$0xff] }
 0x165   : > { %1419 = vrot.lane.b32.xlu1 %v11590_v56, %s10950_s13  ;;  %1417 = vrot.lane.b32.xlu0 %v9626_v52, %s10950_s13 }
 0x167   : > { %v11604_v57 = vpop.permute.xlu1 %1199  ;;  %v11606_v42 = vpop.permute.xlu0 %1197 }
 0x169   : > { %1423 = vrot.lane.b32.xlu1 %v9629_v26, %s10950_s13  ;;  %1421 = vrot.lane.b32.xlu0 %v11602_v49, %s10950_s13  ;;  %v11626_v26 = vld [vmem:[%s11047_s9 + $0x61] sm:$0xff] }
 0x16b   : > { %v11617_v62 = vpop.permute.xlu1 %1203  ;;  %v11619_v52 = vpop.permute.xlu0 %1201 }
 0x16d   : > { %1427 = vrot.lane.b32.xlu1 %v11612_v51, %s10950_s13  ;;  %1425 = vrot.lane.b32.xlu0 %v11615_v18, %s10950_s13 }
 0x16f   : > { %v11629_v63 = vpop.permute.xlu1 %1207  ;;  %v11631_v48 = vpop.permute.xlu0 %1205 }
 0x171   : > { %1431 = vrot.lane.b32.xlu1 %v11626_v26, %s10950_s13  ;;  %1429 = vrot.lane.b32.xlu0 %v9632_v53, %s10950_s13 }
 0x173   : > { %v11640_v15 = vpop.permute.xlu1 %1211  ;;  %v11642_v14 = vpop.permute.xlu0 %1209 }
 0x175   : > { %1435 = vrot.lane.b32.xlu1 %v9635_v6, %s10950_s13  ;;  %1433 = vrot.lane.b32.xlu0 %v11638_v44, %s10950_s13  ;;  %v11662_v6 = vld [vmem:[%s11047_s9 + $0x91] sm:$0xff] }
 0x177   : > { %v11653_v7 = vpop.permute.xlu1 %1215  ;;  %v11655_v53 = vpop.permute.xlu0 %1213 }
 0x178   : > { %16154 = vst [vmem:[#allocation97_spill] sm:$0xff] %v11653_v7  ;;  %16155 = vst [vmem:[#allocation98_spill] sm:$0xff] %v11655_v53  ;;  %v11926_v53 = vld [vmem:[%s11047_s9 + $0x92] sm:$0xff] }
 0x179   : > { %1439 = vrot.lane.b32.xlu1 %v11648_v45, %s10950_s13  ;;  %1437 = vrot.lane.b32.xlu0 %v11651_v40, %s10950_s13 }
 0x17b   : > { %v11665_v22 = vpop.permute.xlu1 %1219  ;;  %v11667_v23 = vpop.permute.xlu0 %1217 }
 0x17c   : > { %16156 = vst [vmem:[#allocation99_spill] sm:$0xff] %v11665_v22  ;;  %16157 = vst [vmem:[#allocation100_spill] sm:$0xff] %v11667_v23  ;;  %v11909_v23 = vld [vmem:[%s11047_s9 + $0x7a] sm:$0xff] }
 0x17d   : > { %1443 = vrot.lane.b32.xlu1 %v11662_v6, %s10950_s13  ;;  %1441 = vrot.lane.b32.xlu0 %v9638_v41, %s10950_s13 }
 0x17f   : > { %v11676_v30 = vpop.permute.xlu1 %1223  ;;  %v11678_v32 = vpop.permute.xlu0 %1221 }
 0x180   : > { %16158 = vst [vmem:[#allocation101_spill] sm:$0xff] %v11676_v30  ;;  %16159 = vst [vmem:[#allocation102_spill] sm:$0xff] %v11678_v32  ;;  %v9652_v30 = vld [vmem:[%s11047_s9 + $0xf9] sm:$0xff] }
 0x181   : > { %1447 = vrot.lane.b32.xlu1 %v9641_v37, %s10950_s13  ;;  %1445 = vrot.lane.b32.xlu0 %v11674_v36, %s10950_s13  ;;  %v11698_v37 = vld [vmem:[%s11047_s9 + $0xc1] sm:$0xff] }
 0x183   : > { %v11689_v39 = vpop.permute.xlu1 %1227  ;;  %v11691_v41 = vpop.permute.xlu0 %1225 }
 0x184   : > { %16160 = vst [vmem:[#allocation103_spill] sm:$0xff] %v11689_v39  ;;  %16161 = vst [vmem:[#allocation104_spill] sm:$0xff] %v11691_v41  ;;  %v9647_v41 = vld [vmem:[%s11047_s9 + $0xd1] sm:$0x3] }
 0x185   : > { %1451 = vrot.lane.b32.xlu1 %v11684_v38, %s10950_s13  ;;  %1449 = vrot.lane.b32.xlu0 %v11687_v28, %s10950_s13 }
 0x187   : > { %v11701_v31 = vpop.permute.xlu1 %1231  ;;  %v11703_v29 = vpop.permute.xlu0 %1229 }
 0x188   : > { %16162 = vst [vmem:[#allocation105_spill] sm:$0xff] %v11701_v31  ;;  %16163 = vst [vmem:[#allocation106_spill] sm:$0xff] %v11703_v29  ;;  %v9649_v31 = vld [vmem:[%s11047_s9 + $0xe1] sm:$0xff]  ;;  %v9648_v29 = vld [vmem:[%s11047_s9 + $0xd9] sm:$0xff] }
 0x189   : > { %1455 = vrot.lane.b32.xlu1 %v11698_v37, %s10950_s13  ;;  %1453 = vrot.lane.b32.xlu0 %v9644_v33, %s10950_s13 }
 0x18b   : > { %v11712_v25 = vpop.permute.xlu1 %1235  ;;  %v11714_v39 = vpop.permute.xlu0 %1233 }
 0x18c   : > { %16164 = vst [vmem:[#allocation107_spill] sm:$0xff] %v11712_v25  ;;  %16165 = vst [vmem:[#allocation108_spill] sm:$0xff] %v11714_v39  ;;  %v9651_v25 = vld [vmem:[%s11047_s9 + $0xf1] sm:$0xff]  ;;  %v9650_v39 = vld [vmem:[%s11047_s9 + $0xe9] sm:$0x3] }
 0x18d   : > { %1459 = vrot.lane.b32.xlu1 %v9647_v41, %s10950_s13  ;;  %1457 = vrot.lane.b32.xlu0 %v11710_v46, %s10950_s13 }
 0x18f   : > { %v11721_v47 = vpop.permute.xlu1 %1239  ;;  %v11723_v33 = vpop.permute.xlu0 %1237 }
 0x190   : > { %16166 = vst [vmem:[#allocation109_spill] sm:$0xff] %v11721_v47  ;;  %16167 = vst [vmem:[#allocation110_spill] sm:$0xff] %v11723_v33  ;;  %v9653_v47 = vld [vmem:[%s11047_s9 + $0x101] sm:$0x3] }
 0x191   : > { %1463 = vrot.lane.b32.xlu1 %v9649_v31, %s10950_s13  ;;  %1461 = vrot.lane.b32.xlu0 %v9648_v29, %s10950_s13  ;;  %v9655_v29 = vld [vmem:[%s11047_s9 + $0x111] sm:$0xff] }
 0x193   : > { %v11729_v24 = vpop.permute.xlu1 %1243  ;;  %v11731_v41 = vpop.permute.xlu0 %1241 }
 0x194   : > { %16168 = vst [vmem:[#allocation111_spill] sm:$0xff] %v11729_v24  ;;  %16169 = vst [vmem:[#allocation112_spill] sm:$0xff] %v11731_v41  ;;  %v9654_v24 = vld [vmem:[%s11047_s9 + $0x109] sm:$0xff] }
 0x195   : > { %1467 = vrot.lane.b32.xlu1 %v9651_v25, %s10950_s13  ;;  %1465 = vrot.lane.b32.xlu0 %v9650_v39, %s10950_s13  ;;  %v9657_v39 = vld [vmem:[%s11047_s9 + $0x121] sm:$0xff] }
 0x197   : > { %v11737_v33 = vpop.permute.xlu1 %1247  ;;  %v11739_v31 = vpop.permute.xlu0 %1245 }
 0x198   : > { %16170 = vst [vmem:[#allocation113_spill] sm:$0xff] %v11737_v33  ;;  %16171 = vst [vmem:[#allocation114_spill] sm:$0xff] %v11739_v31  ;;  %v9656_v33 = vld [vmem:[%s11047_s9 + $0x119] sm:$0x3] }
 0x199   : > { %1471 = vrot.lane.b32.xlu1 %v9653_v47, %s10950_s13  ;;  %1469 = vrot.lane.b32.xlu0 %v9652_v30, %s10950_s13  ;;  %v9659_v30 = vld [vmem:[%s11047_s9 + $0x131] sm:$0x3] }
 0x19b   : > { %v11745_v41 = vpop.permute.xlu1 %1251  ;;  %v11747_v25 = vpop.permute.xlu0 %1249 }
 0x19c   : > { %16172 = vst [vmem:[#allocation115_spill] sm:$0xff] %v11745_v41  ;;  %16173 = vst [vmem:[#allocation116_spill] sm:$0xff] %v11747_v25  ;;  %v9658_v41 = vld [vmem:[%s11047_s9 + $0x129] sm:$0xff] }
 0x19d   : > { %1475 = vrot.lane.b32.xlu1 %v9655_v29, %s10950_s13  ;;  %1473 = vrot.lane.b32.xlu0 %v9654_v24, %s10950_s13  ;;  %v9661_v24 = vld [vmem:[%s11047_s9 + $0x141] sm:$0xff] }
 0x19f   : > { %v11753_v31 = vpop.permute.xlu1 %1255  ;;  %v11755_v47 = vpop.permute.xlu0 %1253 }
 0x1a0   : > { %16174 = vst [vmem:[#allocation117_spill] sm:$0xff] %v11753_v31  ;;  %16175 = vst [vmem:[#allocation118_spill] sm:$0xff] %v11755_v47  ;;  %v9660_v31 = vld [vmem:[%s11047_s9 + $0x139] sm:$0xff] }
 0x1a1   : > { %1479 = vrot.lane.b32.xlu1 %v9657_v39, %s10950_s13  ;;  %1477 = vrot.lane.b32.xlu0 %v9656_v33, %s10950_s13  ;;  %v9663_v33 = vld [vmem:[%s11047_s9 + $0x151] sm:$0xff] }
 0x1a3   : > { %v11761_v25 = vpop.permute.xlu1 %1259  ;;  %v11763_v29 = vpop.permute.xlu0 %1257 }
 0x1a4   : > { %16176 = vst [vmem:[#allocation119_spill] sm:$0xff] %v11761_v25  ;;  %16177 = vst [vmem:[#allocation120_spill] sm:$0xff] %v11763_v29  ;;  %v9662_v25 = vld [vmem:[%s11047_s9 + $0x149] sm:$0x3] }
 0x1a5   : > { %1483 = vrot.lane.b32.xlu1 %v9659_v30, %s10950_s13  ;;  %1481 = vrot.lane.b32.xlu0 %v9658_v41, %s10950_s13  ;;  %v9665_v41 = vld [vmem:[%s11047_s9 + $0x161] sm:$0x3] }
 0x1a7   : > { %v11769_v47 = vpop.permute.xlu1 %1263  ;;  %v11771_v39 = vpop.permute.xlu0 %1261 }
 0x1a8   : > { %16178 = vst [vmem:[#allocation121_spill] sm:$0xff] %v11769_v47  ;;  %16179 = vst [vmem:[#allocation122_spill] sm:$0xff] %v11771_v39  ;;  %v9664_v47 = vld [vmem:[%s11047_s9 + $0x159] sm:$0xff] }
 0x1a9   : > { %1487 = vrot.lane.b32.xlu1 %v9661_v24, %s10950_s13  ;;  %1485 = vrot.lane.b32.xlu0 %v9660_v31, %s10950_s13  ;;  %v9667_v31 = vld [vmem:[%s11047_s9 + $0x171] sm:$0xff] }
 0x1ab   : > { %v11777_v29 = vpop.permute.xlu1 %1267  ;;  %v11779_v30 = vpop.permute.xlu0 %1265 }
 0x1ac   : > { %16180 = vst [vmem:[#allocation123_spill] sm:$0xff] %v11777_v29  ;;  %16181 = vst [vmem:[#allocation124_spill] sm:$0xff] %v11779_v30  ;;  %v9666_v29 = vld [vmem:[%s11047_s9 + $0x169] sm:$0xff] }
 0x1ad   : > { %1491 = vrot.lane.b32.xlu1 %v9663_v33, %s10950_s13  ;;  %1489 = vrot.lane.b32.xlu0 %v9662_v25, %s10950_s13  ;;  %v9669_v25 = vld [vmem:[%s11047_s9 + $0x181] sm:$0xff] }
 0x1af   : > { %v11785_v39 = vpop.permute.xlu1 %1271  ;;  %v11787_v24 = vpop.permute.xlu0 %1269 }
 0x1b0   : > { %16182 = vst [vmem:[#allocation125_spill] sm:$0xff] %v11785_v39  ;;  %16183 = vst [vmem:[#allocation126_spill] sm:$0xff] %v11787_v24  ;;  %v9668_v39 = vld [vmem:[%s11047_s9 + $0x179] sm:$0x3] }
 0x1b1   : > { %1495 = vrot.lane.b32.xlu1 %v9665_v41, %s10950_s13  ;;  %1493 = vrot.lane.b32.xlu0 %v9664_v47, %s10950_s13  ;;  %v9671_v47 = vld [vmem:[%s11047_s9 + $0x191] sm:$0x3] }
 0x1b3   : > { %v11793_v30 = vpop.permute.xlu1 %1275  ;;  %v11795_v33 = vpop.permute.xlu0 %1273 }
 0x1b4   : > { %16184 = vst [vmem:[#allocation127_spill] sm:$0xff] %v11793_v30  ;;  %16185 = vst [vmem:[#allocation128_spill] sm:$0xff] %v11795_v33  ;;  %v9670_v30 = vld [vmem:[%s11047_s9 + $0x189] sm:$0xff] }
 0x1b5   : > { %1499 = vrot.lane.b32.xlu1 %v9667_v31, %s10950_s13  ;;  %1497 = vrot.lane.b32.xlu0 %v9666_v29, %s10950_s13  ;;  %v9673_v29 = vld [vmem:[%s11047_s9 + $0x1a1] sm:$0xff] }
 0x1b7   : > { %v11801_v24 = vpop.permute.xlu1 %1279  ;;  %v11803_v41 = vpop.permute.xlu0 %1277 }
 0x1b8   : > { %16186 = vst [vmem:[#allocation129_spill] sm:$0xff] %v11801_v24  ;;  %16187 = vst [vmem:[#allocation130_spill] sm:$0xff] %v11803_v41  ;;  %v9672_v24 = vld [vmem:[%s11047_s9 + $0x199] sm:$0xff] }
 0x1b9   : > { %1503 = vrot.lane.b32.xlu1 %v9669_v25, %s10950_s13  ;;  %1501 = vrot.lane.b32.xlu0 %v9668_v39, %s10950_s13  ;;  %v9675_v39 = vld [vmem:[%s11047_s9 + $0x1b1] sm:$0xff] }
 0x1bb   : > { %v11809_v33 = vpop.permute.xlu1 %1283  ;;  %v11811_v31 = vpop.permute.xlu0 %1281 }
 0x1bc   : > { %16188 = vst [vmem:[#allocation131_spill] sm:$0xff] %v11809_v33  ;;  %16189 = vst [vmem:[#allocation132_spill] sm:$0xff] %v11811_v31  ;;  %v9674_v33 = vld [vmem:[%s11047_s9 + $0x1a9] sm:$0x3] }
 0x1bd   : > { %1507 = vrot.lane.b32.xlu1 %v9671_v47, %s10950_s13  ;;  %1505 = vrot.lane.b32.xlu0 %v9670_v30, %s10950_s13  ;;  %v9677_v30 = vld [vmem:[%s11047_s9 + $0x1c1] sm:$0x3]  ;;  %v9676_v47 = vld [vmem:[%s11047_s9 + $0x1b9] sm:$0xff] }
 0x1bf   : > { %v11817_v41 = vpop.permute.xlu1 %1287  ;;  %v11819_v25 = vpop.permute.xlu0 %1285 }
 0x1c0   : > { %16190 = vst [vmem:[#allocation133_spill] sm:$0xff] %v11817_v41  ;;  %16191 = vst [vmem:[#allocation134_spill] sm:$0xff] %v11819_v25 }
 0x1c1   : > { %1511 = vrot.lane.b32.xlu1 %v9673_v29, %s10950_s13  ;;  %1509 = vrot.lane.b32.xlu0 %v9672_v24, %s10950_s13  ;;  %v9679_v24 = vld [vmem:[%s11047_s9 + $0x22] sm:$0xff]  ;;  %v9678_v29 = vld [vmem:[%s11047_s9 + $0x1a] sm:$0xff] }
 0x1c3   : > { %v11825_v31 = vpop.permute.xlu1 %1291  ;;  %v11827_v54 = vpop.permute.xlu0 %1289 }
 0x1c4   : > { %16192 = vst [vmem:[#allocation135_spill] sm:$0xff] %v11825_v31  ;;  %16193 = vst [vmem:[#allocation136_spill] sm:$0xff] %v11827_v54  ;;  %v9686_v31 = vld [vmem:[%s11047_s9 + $0x5a] sm:$0x3] }
 0x1c5   : > { %1515 = vrot.lane.b32.xlu1 %v9675_v39, %s10950_s13  ;;  %1513 = vrot.lane.b32.xlu0 %v9674_v33, %s10950_s13  ;;  %v11848_v33 = vld [vmem:[%s11047_s9 + $0x32] sm:$0xff] }
 0x1c7   : > { %v11833_v25 = vpop.permute.xlu1 %1295  ;;  %v11835_v41 = vpop.permute.xlu0 %1293 }
 0x1c8   : > { %16194 = vst [vmem:[#allocation137_spill] sm:$0xff] %v11833_v25  ;;  %16195 = vst [vmem:[#allocation138_spill] sm:$0xff] %v11835_v41  ;;  %v9680_v41 = vld [vmem:[%s11047_s9 + $0x2a] sm:$0x3] }
 0x1c9   : > { %1519 = vrot.lane.b32.xlu1 %v9677_v30, %s10950_s13  ;;  %1517 = vrot.lane.b32.xlu0 %v9676_v47, %s10950_s13  ;;  %s215_s13 = sand.u32 1, %s10937_s19  }
 0x1ca   : > { %s9568_s15 = sshll.u32 %s215_s13, 6 }
 0x1cb   : > { %v11841_v54 = vpop.permute.xlu1 %1299  ;;  %v11843_v39 = vpop.permute.xlu0 %1297 }
 0x1cc   : > { %16196 = vst [vmem:[#allocation139_spill] sm:$0xff] %v11841_v54  ;;  %16197 = vst [vmem:[#allocation140_spill] sm:$0xff] %v11843_v39  ;;  %v9683_v39 = vld [vmem:[%s11047_s9 + $0x42] sm:$0x3]  ;;  %v11860_v54 = vld [vmem:[%s11047_s9 + $0x3a] sm:$0xff] }
 0x1cd   : > { %1631 = vrot.lane.b32.xlu1 %v9679_v24, %s10951_s14  ;;  %1629 = vrot.lane.b32.xlu0 %v9678_v29, %s10951_s14 }
 0x1cf   : > { %v11851_v30 = vpop.permute.xlu1 %1303  ;;  %v11853_v47 = vpop.permute.xlu0 %1301 }
 0x1d0   : > { %16198 = vst [vmem:[#allocation141_spill] sm:$0xff] %v11851_v30  ;;  %16199 = vst [vmem:[#allocation142_spill] sm:$0xff] %v11853_v47  ;;  %v11870_v30 = vld [vmem:[%s11047_s9 + $0x52] sm:$0xff]  ;;  %v11873_v47 = vld [vmem:[%s11047_s9 + $0x4a] sm:$0xff] }
 0x1d1   : > { %1635 = vrot.lane.b32.xlu1 %v11848_v33, %s10951_s14  ;;  %1633 = vrot.lane.b32.xlu0 %v9680_v41, %s10951_s14 }
 0x1d3   : > { %v11862_v24 = vpop.permute.xlu1 %1415  ;;  %v11864_v29 = vpop.permute.xlu0 %1413 }
 0x1d5   : > { %1639 = vrot.lane.b32.xlu1 %v9683_v39, %s10951_s14  ;;  %1637 = vrot.lane.b32.xlu0 %v11860_v54, %s10951_s14  ;;  %v11884_v39 = vld [vmem:[%s11047_s9 + $0x62] sm:$0xff] }
 0x1d7   : > { %v11875_v25 = vpop.permute.xlu1 %1419  ;;  %v11877_v41 = vpop.permute.xlu0 %1417 }
 0x1d9   : > { %1643 = vrot.lane.b32.xlu1 %v11870_v30, %s10951_s14  ;;  %1641 = vrot.lane.b32.xlu0 %v11873_v47, %s10951_s14 }
 0x1db   : > { %v11887_v20 = vpop.permute.xlu1 %1423  ;;  %v11889_v32 = vpop.permute.xlu0 %1421 }
 0x1dd   : > { %1647 = vrot.lane.b32.xlu1 %v11884_v39, %s10951_s14  ;;  %1645 = vrot.lane.b32.xlu0 %v9686_v31, %s10951_s14 }
 0x1df   : > { %v11898_v22 = vpop.permute.xlu1 %1427  ;;  %v11900_v2 = vpop.permute.xlu0 %1425 }
 0x1e0   : > { %16200 = vst [vmem:[#allocation143_spill] sm:$0xff] %v11898_v22 }
 0x1e1   : > { %1651 = vrot.lane.b32.xlu1 %v9689_v3, %s10951_s14  ;;  %1649 = vrot.lane.b32.xlu0 %v11896_v21, %s10951_s14  ;;  %v2879_v3 = vld [vmem:[%s15994_s1] sm:$0xff] }
 0x1e2   : > { %v10248_v7 = vpack.c.bf16 %v2880_v17, %v2879_v3  ;;  %v2881_v17 = vld [vmem:[%s15994_s1 + $0x10] sm:$0xff]  ;;  %v2882_v3 = vld [vmem:[%s15994_s1 + $0x18] sm:$0xff] }
 0x1e3   : > { %v11911_v55 = vpop.permute.xlu1 %1431  ;;  %v11913_v31 = vpop.permute.xlu0 %1429 }
 0x1e4   : > { %16201 = vst [vmem:[#allocation144_spill] sm:$0xff] %v11911_v55  ;;  %16202 = vst [vmem:[#allocation145_spill] sm:$0xff] %v11913_v31  ;;  %v9692_v55 = vld [vmem:[%s11047_s9 + $0x8a] sm:$0x3]  ;;  %10249 = vmatpush3.bf16.msra.mxu0 %v10248_v7 }
 0x1e5   : > { %1655 = vrot.lane.b32.xlu1 %v11906_v16, %s10951_s14  ;;  %1653 = vrot.lane.b32.xlu0 %v11909_v23, %s10951_s14 }
 0x1e6   : > { %10250 = vmatprep.subr.bf16.mxu0 %v15999_v11  ;;  %v16001_v11 = vmov 0.0  }
 0x1e7   : > { %v11929_v31 = vpop.permute.xlu1 %1435  ;;  %v11931_v10 = vpop.permute.xlu0 %1433  ;;  %10068 = vmatprep.mubr.msk.f32.mxu0 %vm16034_vm1, %v16001_v11 }
 0x1e8   : > { %16203 = vst [vmem:[#allocation146_spill] sm:$0xff] %v11929_v31  ;;  %16204 = vst [vmem:[#allocation147_spill] sm:$0xff] %v11931_v10  ;;  %v9732_v31 = vld [vmem:[%s11047_s9 + $0x30] sm:$0xff]  ;;  %v10251_v10 = vpack.c.bf16 %v2882_v3, %v2881_v17  ;;  %v9735_v17 = vld [vmem:[%s11047_s9 + $0x48] sm:$0xff] }
 0x1e9   : > { %1659 = vrot.lane.b32.xlu1 %v11926_v53, %s10951_s14  ;;  %1657 = vrot.lane.b32.xlu0 %v9692_v55, %s10951_s14  ;;  %v9733_v55 = vld [vmem:[%s11047_s9 + $0x38] sm:$0xff] }
 0x1ea   : > { %10252 = vmatpush3.bf16.msra.mxu0 %v10251_v10  ;;  %v2883_v10 = vld [vmem:[%s15994_s1 + $0x20] sm:$0xf] }
 0x1eb   : > { %v11946_v13 = vpop.permute.xlu1 %1439  ;;  %v11948_v7 = vpop.permute.xlu0 %1437  ;;  %10066 = vmatprep.subr.mxu0 %v16001_v11 }
 0x1ed   : > { %2061 = vrot.lane.b32.xlu1 %v11590_v56, %s10953_s7  ;;  %1845 = vrot.lane.b32.xlu0 %v9732_v31, %s10954_s8 }
 0x1ee   : > { %10067 = vmatpush3.msk.msra.mxu0 %vm4525_vm0, %v2883_v10 }
 0x1ef   : > { %v11954_v12 = vpop.permute.xlu1 %1443  ;;  %v11956_v22 = vpop.permute.xlu0 %1441 }
 0x1f1   : > { %1847 = vrot.lane.b32.xlu1 %v9733_v55, %s10954_s8  ;;  %2277 = vrot.lane.b32.xlu0 %v11848_v33, %s10957_s12  ;;  %v9734_v33 = vld [vmem:[%s11047_s9 + $0x40] sm:$0x3] }
 0x1f3   : > { %v11967_v56 = vpop.permute.xlu1 %1447  ;;  %v11969_v31 = vpop.permute.xlu0 %1445 }
 0x1f4   : > { %16205 = vst [vmem:[#allocation148_spill] sm:$0xff] %v11967_v56  ;;  %16206 = vst [vmem:[#allocation149_spill] sm:$0xff] %v11969_v31 }
 0x1f5   : > { %2279 = vrot.lane.b32.xlu1 %v11860_v54, %s10957_s12  ;;  %2063 = vrot.lane.b32.xlu0 %v11602_v49, %s10953_s7  ;;  %v9736_v49 = vld [vmem:[%s11047_s9 + $0x50] sm:$0xff]  ;;  %v9788_v54 = vld [vmem:[%s11047_s9 + $0x41] sm:$0x3] }
 0x1f7   : > { %v11976_v3 = vpop.permute.xlu1 %1451  ;;  %v11978_v55 = vpop.permute.xlu0 %1449 }
 0x1f8   : > { %16207 = vst [vmem:[#allocation150_spill] sm:$0xff] %v11976_v3  ;;  %16208 = vst [vmem:[#allocation151_spill] sm:$0xff] %v11978_v55  ;;  %v9803_v55 = vld [vmem:[%s11047_s9 + $0xb9] sm:$0x3] }
 0x1f9   : > { %2067 = vrot.lane.b32.xlu1 %v11615_v18, %s10953_s7  ;;  %1851 = vrot.lane.b32.xlu0 %v9735_v17, %s10954_s8  ;;  %v9842_v18 = vld [vmem:[%s11047_s9 + $0x42] sm:$0x3] }
 0x1fb   : > { %v11984_v10 = vpop.permute.xlu1 %1455  ;;  %v11986_v11 = vpop.permute.xlu0 %1453 }
 0x1fc   : > { %16209 = vst [vmem:[#allocation152_spill] sm:$0xff] %v11984_v10  ;;  %16210 = vst [vmem:[#allocation153_spill] sm:$0xff] %v11986_v11 }
 0x1fd   : > { %2283 = vrot.lane.b32.xlu1 %v11873_v47, %s10957_s12  ;;  %1849 = vrot.lane.b32.xlu0 %v9734_v33, %s10954_s8  ;;  %v9738_v47 = vld [vmem:[%s11047_s9 + $0x60] sm:$0xff] }
 0x1ff   : > { %v11993_v3 = vpop.permute.xlu1 %1459  ;;  %v11995_v56 = vpop.permute.xlu0 %1457 }
 0x200   : > { %16211 = vst [vmem:[#allocation154_spill] sm:$0xff] %v11993_v3  ;;  %16212 = vst [vmem:[#allocation155_spill] sm:$0xff] %v11995_v56 }
 0x201   : > { %1853 = vrot.lane.b32.xlu1 %v9736_v49, %s10954_s8  ;;  %2065 = vrot.lane.b32.xlu0 %v9788_v54, %s10953_s7  ;;  %v9737_v49 = vld [vmem:[%s11047_s9 + $0x58] sm:$0x3] }
 0x203   : > { %v12000_v17 = vpop.permute.xlu1 %1463  ;;  %v12002_v11 = vpop.permute.xlu0 %1461 }
 0x204   : > { %16213 = vst [vmem:[#allocation156_spill] sm:$0xff] %v12000_v17  ;;  %16214 = vst [vmem:[#allocation157_spill] sm:$0xff] %v12002_v11 }
 0x205   : > { %2069 = vrot.lane.b32.xlu1 %v11612_v51, %s10953_s7  ;;  %2281 = vrot.lane.b32.xlu0 %v9842_v18, %s10957_s12  ;;  %v9791_v51 = vld [vmem:[%s11047_s9 + $0x59] sm:$0x3] }
 0x207   : > { %v12008_v33 = vpop.permute.xlu1 %1467  ;;  %v12010_v3 = vpop.permute.xlu0 %1465 }
 0x208   : > { %16215 = vst [vmem:[#allocation158_spill] sm:$0xff] %v12008_v33  ;;  %16216 = vst [vmem:[#allocation159_spill] sm:$0xff] %v12010_v3  ;;  %v2948_v33 = vlaneseq }
 0x209   : > { %1857 = vrot.lane.b32.xlu1 %v9738_v47, %s10954_s8  ;;  %2285 = vrot.lane.b32.xlu0 %v11870_v30, %s10957_s12  ;;  %v9845_v30 = vld [vmem:[%s11047_s9 + $0x5a] sm:$0x3]  ;;  %v9739_v47 = vld [vmem:[%s11047_s9 + $0x68] sm:$0xff] }
 0x20b   : > { %v12016_v54 = vpop.permute.xlu1 %1471  ;;  %v12018_v17 = vpop.permute.xlu0 %1469 }
 0x20c   : > { %16217 = vst [vmem:[#allocation160_spill] sm:$0xff] %v12016_v54  ;;  %16218 = vst [vmem:[#allocation161_spill] sm:$0xff] %v12018_v17 }
 0x20d   : > { %1855 = vrot.lane.b32.xlu1 %v9737_v49, %s10954_s8  ;;  %2073 = vrot.lane.b32.xlu0 %v11626_v26, %s10953_s7 }
 0x20f   : > { %v12024_v18 = vpop.permute.xlu1 %1475  ;;  %v12026_v3 = vpop.permute.xlu0 %1473 }
 0x210   : > { %16219 = vst [vmem:[#allocation162_spill] sm:$0xff] %v12024_v18  ;;  %16220 = vst [vmem:[#allocation163_spill] sm:$0xff] %v12026_v3  ;;  %v223_v3 = vld [vmem:[%s11047_s9] sm:$0xff] }
 0x211   : > { %2071 = vrot.lane.b32.xlu1 %v9791_v51, %s10953_s7  ;;  %2289 = vrot.lane.b32.xlu0 %v11884_v39, %s10957_s12  ;;  %v9741_v39 = vld [vmem:[%s11047_s9 + $0x78] sm:$0xff]  ;;  %v9740_v51 = vld [vmem:[%s11047_s9 + $0x70] sm:$0x3]  ;;  %v2440_v11 = vsel %vm2439_vm2, %v223_v3, %v11169_v61  ;;  %v12189_v3 = vshrl.u32 %v2948_v33, 7 }
 0x212   : > { %v9857_v33 = vld [vmem:[%s11047_s9 + $0xba] sm:$0x3] }
 0x213   : > { %v12033_v54 = vpop.permute.xlu1 %1479  ;;  %v12035_v49 = vpop.permute.xlu0 %1477  ;;  %16243 = vst [vmem:[#allocation186_spill] sm:$0xff] %v12189_v3 }
 0x214   : > { %16221 = vst [vmem:[#allocation164_spill] sm:$0xff] %v12033_v54  ;;  %16222 = vst [vmem:[#allocation165_spill] sm:$0xff] %v12035_v49 }
 0x215   : > { %2287 = vrot.lane.b32.xlu1 %v9845_v30, %s10957_s12  ;;  %1859 = vrot.lane.b32.xlu0 %v9739_v47, %s10954_s8  ;;  %v9794_v30 = vld [vmem:[%s11047_s9 + $0x71] sm:$0x3] }
 0x217   : > { %v12039_v26 = vpop.permute.xlu1 %1483  ;;  %v12041_v18 = vpop.permute.xlu0 %1481 }
 0x218   : > { %16223 = vst [vmem:[#allocation166_spill] sm:$0xff] %v12039_v26  ;;  %16224 = vst [vmem:[#allocation167_spill] sm:$0xff] %v12041_v18 }
 0x219   : > { %2291 = vrot.lane.b32.xlu1 %v11896_v21, %s10957_s12  ;;  %2075 = vrot.lane.b32.xlu0 %v11638_v44, %s10953_s7  ;;  %v9848_v21 = vld [vmem:[%s11047_s9 + $0x72] sm:$0x3] }
 0x21b   : > { %v12049_v54 = vpop.permute.xlu1 %1487  ;;  %v12051_v49 = vpop.permute.xlu0 %1485 }
 0x21c   : > { %16225 = vst [vmem:[#allocation168_spill] sm:$0xff] %v12049_v54  ;;  %16226 = vst [vmem:[#allocation169_spill] sm:$0xff] %v12051_v49 }
 0x21d   : > { %1863 = vrot.lane.b32.xlu1 %v9741_v39, %s10954_s8  ;;  %1861 = vrot.lane.b32.xlu0 %v9740_v51, %s10954_s8  ;;  %v9742_v39 = vld [vmem:[%s11047_s9 + $0x80] sm:$0xff] }
 0x21f   : > { %v12056_v47 = vpop.permute.xlu1 %1491  ;;  %v12058_v18 = vpop.permute.xlu0 %1489 }
 0x220   : > { %16227 = vst [vmem:[#allocation170_spill] sm:$0xff] %v12056_v47  ;;  %16228 = vst [vmem:[#allocation171_spill] sm:$0xff] %v12058_v18 }
 0x221   : > { %2079 = vrot.lane.b32.xlu1 %v11651_v40, %s10953_s7  ;;  %2077 = vrot.lane.b32.xlu0 %v9794_v30, %s10953_s7  ;;  %v9743_v40 = vld [vmem:[%s11047_s9 + $0x88] sm:$0x3] }
 0x223   : > { %v12064_v44 = vpop.permute.xlu1 %1495  ;;  %v12066_v49 = vpop.permute.xlu0 %1493 }
 0x224   : > { %16229 = vst [vmem:[#allocation172_spill] sm:$0xff] %v12064_v44  ;;  %16230 = vst [vmem:[#allocation173_spill] sm:$0xff] %v12066_v49 }
 0x225   : > { %2295 = vrot.lane.b32.xlu1 %v11909_v23, %s10957_s12  ;;  %2293 = vrot.lane.b32.xlu0 %v9848_v21, %s10957_s12  ;;  %v9797_v23 = vld [vmem:[%s11047_s9 + $0x89] sm:$0x3]  ;;  %v9744_v21 = vld [vmem:[%s11047_s9 + $0x90] sm:$0xff] }
 0x227   : > { %v12072_v51 = vpop.permute.xlu1 %1499  ;;  %v12074_v18 = vpop.permute.xlu0 %1497 }
 0x228   : > { %16231 = vst [vmem:[#allocation174_spill] sm:$0xff] %v12072_v51  ;;  %16232 = vst [vmem:[#allocation175_spill] sm:$0xff] %v12074_v18 }
 0x229   : > { %2081 = vrot.lane.b32.xlu1 %v11648_v45, %s10953_s7  ;;  %1865 = vrot.lane.b32.xlu0 %v9742_v39, %s10954_s8  ;;  %v9851_v45 = vld [vmem:[%s11047_s9 + $0x8a] sm:$0x3] }
 0x22b   : > { %v12080_v30 = vpop.permute.xlu1 %1503  ;;  %v12082_v49 = vpop.permute.xlu0 %1501 }
 0x22c   : > { %16233 = vst [vmem:[#allocation176_spill] sm:$0xff] %v12080_v30  ;;  %16234 = vst [vmem:[#allocation177_spill] sm:$0xff] %v12082_v49 }
 0x22d   : > { %1867 = vrot.lane.b32.xlu1 %v9743_v40, %s10954_s8  ;;  %2297 = vrot.lane.b32.xlu0 %v11906_v16, %s10957_s12  ;;  %v9745_v16 = vld [vmem:[%s11047_s9 + $0x98] sm:$0xff] }
 0x22f   : > { %v12089_v18 = vpop.permute.xlu1 %1507  ;;  %v12091_v51 = vpop.permute.xlu0 %1505 }
 0x230   : > { %16235 = vst [vmem:[#allocation178_spill] sm:$0xff] %v12089_v18  ;;  %16236 = vst [vmem:[#allocation179_spill] sm:$0xff] %v12091_v51 }
 0x231   : > { %2083 = vrot.lane.b32.xlu1 %v9797_v23, %s10953_s7  ;;  %1869 = vrot.lane.b32.xlu0 %v9744_v21, %s10954_s8  ;;  %v9853_v23 = vld [vmem:[%s11047_s9 + $0x9a] sm:$0xff] }
 0x233   : > { %v12096_v39 = vpop.permute.xlu1 %1511  ;;  %v12098_v49 = vpop.permute.xlu0 %1509 }
 0x234   : > { %16237 = vst [vmem:[#allocation180_spill] sm:$0xff] %v12096_v39  ;;  %16238 = vst [vmem:[#allocation181_spill] sm:$0xff] %v12098_v49 }
 0x235   : > { %2299 = vrot.lane.b32.xlu1 %v9851_v45, %s10957_s12  ;;  %2085 = vrot.lane.b32.xlu0 %v11662_v6, %s10953_s7  ;;  %v9747_v6 = vld [vmem:[%s11047_s9 + $0xa8] sm:$0xff] }
 0x237   : > { %v12104_v40 = vpop.permute.xlu1 %1515  ;;  %v12106_v51 = vpop.permute.xlu0 %1513 }
 0x238   : > { %16239 = vst [vmem:[#allocation182_spill] sm:$0xff] %v12104_v40  ;;  %16240 = vst [vmem:[#allocation183_spill] sm:$0xff] %v12106_v51 }
 0x239   : > { %1871 = vrot.lane.b32.xlu1 %v9745_v16, %s10954_s8  ;;  %2301 = vrot.lane.b32.xlu0 %v11926_v53, %s10957_s12  ;;  %v9855_v53 = vld [vmem:[%s11047_s9 + $0xaa] sm:$0xff] }
 0x23b   : > { %v12112_v21 = vpop.permute.xlu1 %1519  ;;  %v12114_v45 = vpop.permute.xlu0 %1517 }
 0x23c   : > { %16241 = vst [vmem:[#allocation184_spill] sm:$0xff] %v12112_v21  ;;  %16242 = vst [vmem:[#allocation185_spill] sm:$0xff] %v12114_v45  ;;  %v9746_v21 = vld [vmem:[%s11047_s9 + $0xa0] sm:$0x3] }
 0x23d   : > { %2303 = vrot.lane.b32.xlu1 %v9853_v23, %s10957_s12  ;;  %2087 = vrot.lane.b32.xlu0 %v11674_v36, %s10953_s7  ;;  %v9800_v36 = vld [vmem:[%s11047_s9 + $0xa1] sm:$0x3] }
 0x23f   : > { %v12120_v40 = vpop.permute.xlu1 %1631  ;;  %v1630_v16 = vpop.permute.xlu0 %1629 }
 0x241   : > { %2091 = vrot.lane.b32.xlu1 %v11687_v28, %s10953_s7  ;;  %1875 = vrot.lane.b32.xlu0 %v9747_v6, %s10954_s8  ;;  %v9854_v28 = vld [vmem:[%s11047_s9 + $0xa2] sm:$0x3]  ;;  %v9748_v6 = vld [vmem:[%s11047_s9 + $0xb0] sm:$0xff] }
 0x243   : > { %v12127_v45 = vpop.permute.xlu1 %1635  ;;  %v12129_v51 = vpop.permute.xlu0 %1633 }
 0x245   : > { %2307 = vrot.lane.b32.xlu1 %v9855_v53, %s10957_s12  ;;  %1873 = vrot.lane.b32.xlu0 %v9746_v21, %s10954_s8  ;;  %v9856_v21 = vld [vmem:[%s11047_s9 + $0xb2] sm:$0xff] }
 0x247   : > { %v12134_v49 = vpop.permute.xlu1 %1639  ;;  %v12136_v39 = vpop.permute.xlu0 %1637 }
 0x249   : > { %2089 = vrot.lane.b32.xlu1 %v9800_v36, %s10953_s7  ;;  %1661 = vrot.lane.b32.xlu0 %v9853_v23, %s10951_s14  ;;  %v9750_v23 = vld [vmem:[%s11047_s9 + $0xc0] sm:$0xff] }
 0x24b   : > { %v12142_v18 = vpop.permute.xlu1 %1643  ;;  %v12144_v30 = vpop.permute.xlu0 %1641 }
 0x24d   : > { %2305 = vrot.lane.b32.xlu1 %v9854_v28, %s10957_s12  ;;  %1877 = vrot.lane.b32.xlu0 %v9748_v6, %s10954_s8  ;;  %v9695_v28 = vld [vmem:[%s11047_s9 + $0xa2] sm:$0x3] }
 0x24f   : > { %v12149_v44 = vpop.permute.xlu1 %1647  ;;  %v12151_v47 = vpop.permute.xlu0 %1645 }
 0x251   : > { %2309 = vrot.lane.b32.xlu1 %v9856_v21, %s10957_s12  ;;  %2093 = vrot.lane.b32.xlu0 %v11684_v38, %s10953_s7  ;;  %v10958_v38 = vmov 1983009808  }
 0x252   : > { %v2946_v17 = vunpack.c.l.s4 %v10958_v38 }
 0x253   : > { %v12157_v36 = vpop.permute.xlu1 %1651  ;;  %v12159_v54 = vpop.permute.xlu0 %1649 }
 0x254   : > { %v2947_v61 = vunpack.c.0.s8 %v2946_v17 }
 0x255   : > { %1881 = vrot.lane.b32.xlu1 %v9750_v23, %s10954_s8  ;;  %1665 = vrot.lane.b32.xlu0 %v9855_v53, %s10951_s14  ;;  %v12173_v23 = vld [vmem:[%s11047_s9 + $0xc2] sm:$0xff]  ;;  %v9749_v53 = vld [vmem:[%s11047_s9 + $0xb8] sm:$0x3] }
 0x256   : > { %v12200_v17 = vsub.s32 %v2947_v61, %v12189_v3 }
 0x257   : > { %v12164_v6 = vpop.permute.xlu1 %1655  ;;  %v12166_v26 = vpop.permute.xlu0 %1653 }
 0x259   : > { %2097 = vrot.lane.b32.xlu1 %v11698_v37, %s10953_s7  ;;  %1663 = vrot.lane.b32.xlu0 %v9695_v28, %s10951_s14  ;;  %v2495_v37 = vsel %vm16005_vm3, %v2440_v11, %v11384_v50  ;;  %v224_v11 = vld [vmem:[%s11047_s9 + $0x8] sm:$0xff] }
 0x25a   : > { %v2550_v28 = vsel %vm16004_vm4, %v2495_v37, %v11606_v42 }
 0x25b   : > { %v12178_v56 = vpop.permute.xlu1 %1659  ;;  %v12180_v10 = vpop.permute.xlu0 %1657  ;;  %v2605_v38 = vsel %vm16003_vm5, %v2550_v28, %v11864_v29  ;;  %v2441_v29 = vsel %vm2439_vm2, %v224_v11, %v11177_v1 }
 0x25c   : > { %v2660_v50 = vsel %vm16047_vm6, %v2605_v38, %v1630_v16  ;;  %v9751_v16 = vld [vmem:[%s11047_s9 + $0xc8] sm:$0xff] }
 0x25d   : > { %2313 = vrot.lane.b32.xlu1 %v12173_v23, %s10957_s12  ;;  %1879 = vrot.lane.b32.xlu0 %v9749_v53, %s10954_s8  ;;  %v2496_v53 = vsel %vm16005_vm3, %v2441_v29, %v11382_v43  ;;  %v10849_v43 = vld [vmem:[%s11047_s9 + $0x18] sm:$0xff] }
 0x25e   : > { %v2443_v11 = vsel %vm2439_vm2, %v10849_v43, %v11175_v0 }
 0x25f   : > { %v2062_v31 = vpop.permute.xlu1 %2061  ;;  %v1846_v42 = vpop.permute.xlu0 %1845 }
 0x260   : > { %v2715_v37 = vsel %vm16044_vm7, %v2660_v50, %v1846_v42 }
 0x261   : > { %2095 = vrot.lane.b32.xlu1 %v9803_v55, %s10953_s7  ;;  %1667 = vrot.lane.b32.xlu0 %v9856_v21, %s10951_s14  ;;  %v2770_v55 = vsel %vm16043_vm8, %v2715_v37, %v2062_v31  ;;  %v2551_v21 = vsel %vm16004_vm4, %v2496_v53, %v11604_v57  ;;  %v12223_v57 = vld [vmem:[%s11047_s9 + $0xca] sm:$0xff]  ;;  %v2498_v37 = vsel %vm16005_vm3, %v2443_v11, %v11389_v58 }
 0x262   : > { %v2606_v61 = vsel %vm16003_vm5, %v2551_v21, %v11862_v24 }
 0x263   : > { %v1848_v28 = vpop.permute.xlu1 %1847  ;;  %v2278_v38 = vpop.permute.xlu0 %2277  ;;  %v2661_v31 = vsel %vm16047_vm6, %v2606_v61, %v12120_v40 }
 0x264   : > { %v2825_v50 = vsel %vm2824_vm9, %v2770_v55, %v2278_v38  ;;  %v2716_v24 = vsel %vm16044_vm7, %v2661_v31, %v1848_v28  ;;  %v2553_v38 = vsel %vm16004_vm4, %v2498_v37, %v11617_v62  ;;  %v9698_v62 = vld [vmem:[%s11047_s9 + $0xba] sm:$0x3] }
 0x265   : > { %v2944_v42 = vcombine.high %v2825_v50, %v2825_v50  ;;  %v2951_v1 = vrot.slane %v2825_v50, %v12200_v17  ;;  %2311 = vrot.lane.b32.xlu1 %v9857_v33, %s10957_s12  ;;  %1883 = vrot.lane.b32.xlu0 %v9751_v16, %s10954_s8  ;;  %v2608_v58 = vsel %vm16003_vm5, %v2553_v38, %v11875_v25 }
 0x266   : > { %v2663_v61 = vsel %vm16047_vm6, %v2608_v58, %v12127_v45 }
 0x267   : > { %v2958_v29 = vrot.slane %v2944_v42, %v12200_v17  ;;  %v2959_v33 = vcombine.high %v2951_v1, %v2951_v1  ;;  %v2280_v53 = vpop.permute.xlu1 %2279  ;;  %v2064_v16 = vpop.permute.xlu0 %2063 }
 0x268   : > { %v2771_v0 = vsel %vm16043_vm8, %v2716_v24, %v2064_v16  ;;  %v225_v24 = vld [vmem:[%s11047_s9 + $0x10] sm:$0x3] }
 0x269   : > { %v2960_v55 = vcombine.high %v2958_v29, %v2958_v29  ;;  %v3699_v40 = vcombine.low %v2951_v1, %v2959_v33  ;;  %v2826_v21 = vsel %vm2824_vm9, %v2771_v0, %v2280_v53  ;;  %2315 = vrot.lane.b32.xlu1 %v12223_v57, %s10957_s12  ;;  %2099 = vrot.lane.b32.xlu0 %v11710_v46, %s10953_s7  ;;  %v9752_v53 = vld [vmem:[%s11047_s9 + $0xd0] sm:$0x3] }
 0x26a   : > { %v2961_v28 = vcombine.high %v2826_v21, %v2826_v21  ;;  %v2968_v50 = vrot.slane %v2826_v21, %v12200_v17 }
 0x26b   : > { %v3700_v42 = vcombine.low %v2958_v29, %v2960_v55  ;;  %v2068_v1 = vpop.permute.xlu1 %2067  ;;  %v1852_v43 = vpop.permute.xlu0 %1851  ;;  %v3707_v37 = vrot.slane %v3699_v40, %v12200_v17  ;;  %v9753_v29 = vld [vmem:[%s11047_s9 + $0xd8] sm:$0xff] }
 0x26c   : > { %v2975_v11 = vrot.slane %v2961_v28, %v12200_v17  ;;  %v2976_v31 = vcombine.high %v2968_v50, %v2968_v50  ;;  %v2718_v46 = vsel %vm16044_vm7, %v2663_v61, %v1852_v43  ;;  %v9807_v61 = vld [vmem:[%s11047_s9 + $0xd9] sm:$0xff] }
 0x26d   : > { %v3714_v25 = vrot.slane %v3700_v42, %v12200_v17  ;;  %1671 = vrot.lane.b32.xlu1 %v12173_v23, %s10951_s14  ;;  %1669 = vrot.lane.b32.xlu0 %v9698_v62, %s10951_s14  ;;  %v2773_v38 = vsel %vm16043_vm8, %v2718_v46, %v2068_v1  ;;  %v2442_v23 = vsel %vm2439_vm2, %v225_v24, %v11167_v60  ;;  %v9806_v42 = vld [vmem:[%s11047_s9 + $0xd1] sm:$0x3]  ;;  %v10850_v24 = vld [vmem:[%s11047_s9 + $0x20] sm:$0xff] }
 0x26e   : > { %v2977_v33 = vcombine.high %v2975_v11, %v2975_v11  ;;  %v3716_v45 = vcombine.low %v2968_v50, %v2976_v31  ;;  %v2497_v50 = vsel %vm16005_vm3, %v2442_v23, %v11391_v59  ;;  %v16244_v31 = vmov 0.0   ;;  %v9754_v23 = vld [vmem:[%s11047_s9 + $0xe0] sm:$0xff] }
 0x26f   : > { %v2284_v16 = vpop.permute.xlu1 %2283  ;;  %v1850_v0 = vpop.permute.xlu0 %1849  ;;  %v3715_v55 = vcombine.low %v3707_v37, %v3714_v25  ;;  %v2552_v60 = vsel %vm16004_vm4, %v2497_v50, %v11619_v52 }
 0x270   : > { %v3717_v40 = vcombine.low %v2975_v11, %v2977_v33  ;;  %v2828_v21 = vsel %vm2824_vm9, %v2773_v38, %v2284_v16  ;;  %v3724_v62 = vrot.slane %v3716_v45, %v12200_v17  ;;  %v2607_v59 = vsel %vm16003_vm5, %v2552_v60, %v11877_v41 }
 0x271   : > { %v2985_v58 = vcombine.high %v2828_v21, %v2828_v21  ;;  %v2992_v28 = vrot.slane %v2828_v21, %v12200_v17  ;;  %1887 = vrot.lane.b32.xlu1 %v9753_v29, %s10954_s8  ;;  %1885 = vrot.lane.b32.xlu0 %v9752_v53, %s10954_s8  ;;  %v2444_v33 = vsel %vm2439_vm2, %v10850_v24, %v11185_v5  ;;  %v12286_v29 = vld [vmem:[%s11047_s9 + $0xda] sm:$0xff]  ;;  %v9860_v53 = vld [vmem:[%s11047_s9 + $0xd2] sm:$0x3] }
 0x272   : > { %10069 = vmatmul.mubr.msk.f32.vlgmr.msra.gmra.mrb[0].mxu0 %vm16038_vm10, %v3715_v55  ;;  %v3731_v1 = vrot.slane %v3717_v40, %v12200_v17  ;;  %v2662_v52 = vsel %vm16047_vm6, %v2607_v59, %v12129_v51  ;;  %v2499_v45 = vsel %vm16005_vm3, %v2444_v33, %v11400_v27 }
 0x273   : > { %v1854_v43 = vpop.permute.xlu1 %1853  ;;  %v2066_v11 = vpop.permute.xlu0 %2065  ;;  %10071 = vmatprep.mubr.msk.f32.mxu0 %vm16034_vm1, %v16244_v31  ;;  %v2999_v46 = vrot.slane %v2985_v58, %v12200_v17  ;;  %v3000_v37 = vcombine.high %v2992_v28, %v2992_v28  ;;  %v2717_v41 = vsel %vm16044_vm7, %v2662_v52, %v1850_v0  ;;  %v2554_v5 = vsel %vm16004_vm4, %v2499_v45, %v11631_v48  ;;  %v10851_v58 = vld [vmem:[%s11047_s9 + $0x30] sm:$0xff] }
 0x274   : > { %v3732_v25 = vcombine.low %v3724_v62, %v3731_v1  ;;  %v2772_v51 = vsel %vm16043_vm8, %v2717_v41, %v2066_v11  ;;  %v2609_v27 = vsel %vm16003_vm5, %v2554_v5, %v11889_v32  ;;  %v2446_v32 = vsel %vm2439_vm2, %v10851_v58, %v11193_v9  ;;  %v228_v11 = vld [vmem:[%s11047_s9 + $0x28] sm:$0x3] }
 0x275   : > { %2103 = vrot.lane.b32.xlu1 %v9807_v61, %s10953_s7  ;;  %2101 = vrot.lane.b32.xlu0 %v9806_v42, %s10953_s7  ;;  %v3734_v0 = vcombine.low %v3000_v37, %v2999_v46  ;;  %v2664_v40 = vsel %vm16047_vm6, %v2609_v27, %v12136_v39  ;;  %v2501_v42 = vsel %vm16005_vm3, %v2446_v32, %v11408_v19  ;;  %v12322_v19 = vld [vmem:[%s11047_s9 + $0xe2] sm:$0xff] }
 0x276   : > { %10072 = vmatmul.mubr.msk.f32.gmra.mrb[2].mxu0 %vm16038_vm10, %v3732_v25  ;;  %v2719_v48 = vsel %vm16044_vm7, %v2664_v40, %v1854_v43  ;;  %v3001_v43 = vcombine.high %v2999_v46, %v2999_v46  ;;  %v9808_v25 = vld [vmem:[%s11047_s9 + $0xe1] sm:$0xff] }
 0x277   : > { %v2070_v16 = vpop.permute.xlu1 %2069  ;;  %v2282_v38 = vpop.permute.xlu0 %2281  ;;  %10074 = vmatprep.mubr.msk.f32.mxu0 %vm16034_vm1, %v16244_v31  ;;  %v3748_v1 = vrot.slane %v3734_v0, %v12200_v17 }
 0x278   : > { %v2827_v55 = vsel %vm2824_vm9, %v2772_v51, %v2282_v38  ;;  %v2774_v50 = vsel %vm16043_vm8, %v2719_v48, %v2070_v16 }
 0x279   : > { %v2984_v21 = vrot.slane %v2827_v55, %v12200_v17  ;;  %2319 = vrot.lane.b32.xlu1 %v12286_v29, %s10957_s12  ;;  %2317 = vrot.lane.b32.xlu0 %v9860_v53, %s10957_s12  ;;  %v2445_v53 = vsel %vm2439_vm2, %v228_v11, %v11183_v4 }
 0x27b   : > { %v3733_v39 = vcombine.low %v2984_v21, %v2992_v28  ;;  %v1858_v62 = vpop.permute.xlu1 %1857  ;;  %v2286_v61 = vpop.permute.xlu0 %2285  ;;  %v2556_v28 = vsel %vm16004_vm4, %v2501_v42, %v11642_v14  ;;  %v2500_v14 = vsel %vm16005_vm3, %v2445_v53, %v11398_v35 }
 0x27c   : > { %v2829_v60 = vsel %vm2824_vm9, %v2774_v50, %v2286_v61  ;;  %v2555_v16 = vsel %vm16004_vm4, %v2500_v14, %v11629_v63  ;;  %v10852_v63 = vld [vmem:[%s11047_s9 + $0x38] sm:$0xff] }
 0x27d   : > { %v3741_v59 = vrot.slane %v3733_v39, %v12200_v17  ;;  %v3002_v37 = vcombine.high %v2829_v60, %v2829_v60  ;;  %v3009_v9 = vrot.slane %v2829_v60, %v12200_v17  ;;  %1889 = vrot.lane.b32.xlu1 %v9754_v23, %s10954_s8  ;;  %1673 = vrot.lane.b32.xlu0 %v12223_v57, %s10951_s14  ;;  %v9755_v39 = vld [vmem:[%s11047_s9 + $0xe8] sm:$0x3] }
 0x27e   : > { %v2611_v57 = vsel %vm16003_vm5, %v2556_v28, %v11900_v2  ;;  %v9701_v2 = vld [vmem:[%s11047_s9 + $0xd2] sm:$0x3]  ;;  %v2610_v35 = vsel %vm16003_vm5, %v2555_v16, %v11887_v20  ;;  %v2447_v40 = vsel %vm2439_vm2, %v10852_v63, %v11191_v8  ;;  %v9809_v28 = vld [vmem:[%s11047_s9 + $0xe9] sm:$0x3] }
 0x27f   : > { %v3016_v24 = vrot.slane %v3002_v37, %v12200_v17  ;;  %v3017_v46 = vcombine.high %v3009_v9, %v3009_v9  ;;  %v3750_v33 = vcombine.low %v3001_v43, %v3009_v9  ;;  %v1856_v52 = vpop.permute.xlu1 %1855  ;;  %v2074_v45 = vpop.permute.xlu0 %2073  ;;  %v3749_v41 = vcombine.low %v3741_v59, %v3748_v1  ;;  %v9756_v8 = vld [vmem:[%s11047_s9 + $0xf0] sm:$0xff]  ;;  %v9863_v16 = vld [vmem:[%s11047_s9 + $0xea] sm:$0x3] }
 0x280   : > { %v2666_v5 = vsel %vm16047_vm6, %v2611_v57, %v12144_v30  ;;  %v2665_v20 = vsel %vm16047_vm6, %v2610_v35, %v12134_v49  ;;  %v2502_v32 = vsel %vm16005_vm3, %v2447_v40, %v11406_v34  ;;  %v16245_v1 = vld [vmem:[#allocation143_spill] sm:$0xff]  ;;  %v16247_v40 = vld [vmem:[#allocation6_spill] sm:$0xff] }
 0x281   : > { %v3751_v51 = vcombine.low %v3017_v46, %v3016_v24  ;;  %2321 = vrot.lane.b32.xlu1 %v12322_v19, %s10957_s12  ;;  %2105 = vrot.lane.b32.xlu0 %v9808_v25, %s10953_s7  ;;  %v2721_v4 = vsel %vm16044_vm7, %v2666_v5, %v1858_v62  ;;  %v3758_v38 = vrot.slane %v3750_v33, %v12200_v17  ;;  %v9810_v9 = vld [vmem:[%s11047_s9 + $0xf1] sm:$0xff] }
 0x282   : > { %10075 = vmatmul.mubr.msk.f32.gmra.mrb[4].mxu0 %vm16038_vm10, %v3749_v41  ;;  %v2776_v27 = vsel %vm16043_vm8, %v2721_v4, %v2074_v45  ;;  %v2720_v50 = vsel %vm16044_vm7, %v2665_v20, %v1856_v52  ;;  %v2557_v49 = vsel %vm16004_vm4, %v2502_v32, %v11640_v15  ;;  %v3018_v11 = vcombine.high %v3016_v24, %v3016_v24  ;;  %v16250_v32 = vld [vmem:[#allocation97_spill] sm:$0xff] }
 0x283   : > { %v3765_v30 = vrot.slane %v3751_v51, %v12200_v17  ;;  %v2072_v0 = vpop.permute.xlu1 %2071  ;;  %v2290_v55 = vpop.permute.xlu0 %2289  ;;  %10077 = vmatprep.mubr.msk.f32.mxu0 %vm16034_vm1, %v16244_v31  ;;  %v2612_v60 = vsel %vm16003_vm5, %v2557_v49, %v16245_v1  ;;  %v12391_v51 = vld [vmem:[%s11047_s9 + $0xf2] sm:$0xff]  ;;  %v16251_v49 = vld [vmem:[#allocation98_spill] sm:$0xff] }
 0x284   : > { %v2831_v21 = vsel %vm2824_vm9, %v2776_v27, %v2290_v55  ;;  %v2775_v62 = vsel %vm16043_vm8, %v2720_v50, %v2072_v0  ;;  %v2667_v37 = vsel %vm16047_vm6, %v2612_v60, %v12142_v18  ;;  %v231_v18 = vld [vmem:[%s11047_s9 + $0x40] sm:$0x3] }
 0x285   : > { %v3026_v48 = vcombine.high %v2831_v21, %v2831_v21  ;;  %v3033_v23 = vrot.slane %v2831_v21, %v12200_v17  ;;  %1677 = vrot.lane.b32.xlu1 %v12286_v29, %s10951_s14  ;;  %1675 = vrot.lane.b32.xlu0 %v9701_v2, %s10951_s14  ;;  %v3766_v58 = vcombine.low %v3758_v38, %v3765_v30  ;;  %v10853_v38 = vld [vmem:[%s11047_s9 + $0x48] sm:$0xff]  ;;  %v16246_v30 = vld [vmem:[#allocation5_spill] sm:$0xff]  ;;  %v16248_v21 = vld [vmem:[#allocation51_spill] sm:$0xff] }
 0x286   : > { %v2449_v27 = vsel %vm2439_vm2, %v10853_v38, %v16246_v30  ;;  %v2448_v20 = vsel %vm2439_vm2, %v231_v18, %v16247_v40  ;;  %v16253_v60 = vld [vmem:[#allocation145_spill] sm:$0xff]  ;;  %v16256_v18 = vld [vmem:[#allocation100_spill] sm:$0xff]  ;;  %v16257_v30 = vld [vmem:[#allocation147_spill] sm:$0xff] }
 0x287   : > { %v3041_v61 = vcombine.high %v3033_v23, %v3033_v23  ;;  %v2288_v42 = vpop.permute.xlu1 %2287  ;;  %v1860_v29 = vpop.permute.xlu0 %1859  ;;  %10078 = vmatmul.mubr.msk.f32.gmra.mrb[6].mxu0 %vm16038_vm10, %v3766_v58  ;;  %v3040_v34 = vrot.slane %v3026_v48, %v12200_v17  ;;  %v2504_v48 = vsel %vm16005_vm3, %v2449_v27, %v16248_v21 }
 0x288   : > { %v2830_v43 = vsel %vm2824_vm9, %v2775_v62, %v2288_v42  ;;  %10080 = vmatprep.mubr.msk.f32.mxu0 %vm16034_vm1, %v16244_v31  ;;  %v2722_v46 = vsel %vm16044_vm7, %v2667_v37, %v1860_v29  ;;  %v2559_v50 = vsel %vm16004_vm4, %v2504_v48, %v16250_v32 }
 0x289   : > { %v3768_v15 = vcombine.low %v3033_v23, %v3041_v61  ;;  %v3025_v59 = vrot.slane %v2830_v43, %v12200_v17  ;;  %1893 = vrot.lane.b32.xlu1 %v9756_v8, %s10954_s8  ;;  %1891 = vrot.lane.b32.xlu0 %v9755_v39, %s10954_s8  ;;  %v3042_v24 = vcombine.high %v3040_v34, %v3040_v34  ;;  %v16249_v23 = vld [vmem:[#allocation52_spill] sm:$0xff] }
 0x28a   : > { %v2503_v58 = vsel %vm16005_vm3, %v2448_v20, %v16249_v23  ;;  %v9757_v39 = vld [vmem:[%s11047_s9 + $0xf8] sm:$0xff] }
 0x28b   : > { %v3767_v25 = vcombine.low %v3018_v11, %v3025_v59  ;;  %v2292_v33 = vpop.permute.xlu1 %2291  ;;  %v2076_v52 = vpop.permute.xlu0 %2075  ;;  %v3782_v41 = vrot.slane %v3768_v15, %v12200_v17  ;;  %v3784_v0 = vcombine.low %v3040_v34, %v3042_v24  ;;  %v2558_v62 = vsel %vm16004_vm4, %v2503_v58, %v16251_v49  ;;  %v16252_v61 = vld [vmem:[#allocation144_spill] sm:$0xff] }
 0x28c   : > { %v2777_v45 = vsel %vm16043_vm8, %v2722_v46, %v2076_v52  ;;  %v2614_v42 = vsel %vm16003_vm5, %v2559_v50, %v16252_v61  ;;  %v2613_v34 = vsel %vm16003_vm5, %v2558_v62, %v16253_v60  ;;  %v12434_v24 = vld [vmem:[%s11047_s9 + $0xfa] sm:$0xff]  ;;  %v234_v58 = vld [vmem:[%s11047_s9 + $0x58] sm:$0x3] }
 0x28d   : > { %v3775_v53 = vrot.slane %v3767_v25, %v12200_v17  ;;  %v2832_v57 = vsel %vm2824_vm9, %v2777_v45, %v2292_v33  ;;  %2109 = vrot.lane.b32.xlu1 %v9810_v9, %s10953_s7  ;;  %2107 = vrot.lane.b32.xlu0 %v9809_v28, %s10953_s7  ;;  %v3792_v43 = vrot.slane %v3784_v0, %v12200_v17  ;;  %v10854_v9 = vld [vmem:[%s11047_s9 + $0x50] sm:$0xff]  ;;  %v16254_v28 = vld [vmem:[#allocation8_spill] sm:$0xff]  ;;  %v16255_v45 = vld [vmem:[#allocation54_spill] sm:$0xff] }
 0x28e   : > { %v3043_v14 = vcombine.high %v2832_v57, %v2832_v57  ;;  %v3050_v5 = vrot.slane %v2832_v57, %v12200_v17  ;;  %v2669_v59 = vsel %vm16047_vm6, %v2614_v42, %v12149_v44  ;;  %v2668_v37 = vsel %vm16047_vm6, %v2613_v34, %v12151_v47  ;;  %v9811_v44 = vld [vmem:[%s11047_s9 + $0xf9] sm:$0xff]  ;;  %v9759_v0 = vld [vmem:[%s11047_s9 + $0x108] sm:$0xff]  ;;  %v16258_v42 = vld [vmem:[#allocation7_spill] sm:$0xff] }
 0x28f   : > { %v1864_v4 = vpop.permute.xlu1 %1863  ;;  %v1862_v2 = vpop.permute.xlu0 %1861  ;;  %v3783_v35 = vcombine.low %v3775_v53, %v3782_v41  ;;  %v2450_v25 = vsel %vm2439_vm2, %v10854_v9, %v16254_v28  ;;  %v16260_v9 = vld [vmem:[#allocation99_spill] sm:$0xff] }
 0x290   : > { %v3057_v55 = vrot.slane %v3043_v14, %v12200_v17  ;;  %v3058_v63 = vcombine.high %v3050_v5, %v3050_v5  ;;  %v2724_v46 = vsel %vm16044_vm7, %v2669_v59, %v1864_v4  ;;  %v2723_v33 = vsel %vm16044_vm7, %v2668_v37, %v1862_v2  ;;  %v12479_v59 = vld [vmem:[%s11047_s9 + $0x10a] sm:$0xff]  ;;  %v9758_v37 = vld [vmem:[%s11047_s9 + $0x100] sm:$0x3] }
 0x291   : > { %2325 = vrot.lane.b32.xlu1 %v12391_v51, %s10957_s12  ;;  %2323 = vrot.lane.b32.xlu0 %v9863_v16, %s10957_s12  ;;  %v2505_v47 = vsel %vm16005_vm3, %v2450_v25, %v16255_v45 }
 0x292   : > { %v3785_v8 = vcombine.low %v3050_v5, %v3058_v63  ;;  %10081 = vmatmul.mubr.msk.f32.gmra.mrb[8].mxu0 %vm16038_vm10, %v3783_v35  ;;  %v3059_v15 = vcombine.high %v3057_v55, %v3057_v55  ;;  %v2560_v14 = vsel %vm16004_vm4, %v2505_v47, %v16256_v18  ;;  %v16262_v47 = vld [vmem:[#allocation146_spill] sm:$0xff] }
 0x293   : > { %v2080_v29 = vpop.permute.xlu1 %2079  ;;  %v2078_v1 = vpop.permute.xlu0 %2077  ;;  %10083 = vmatprep.mubr.msk.f32.mxu0 %vm16034_vm1, %v16244_v31  ;;  %v2615_v27 = vsel %vm16003_vm5, %v2560_v14, %v16257_v30 }
 0x294   : > { %v3799_v11 = vrot.slane %v3785_v8, %v12200_v17  ;;  %v2779_v41 = vsel %vm16043_vm8, %v2724_v46, %v2080_v29  ;;  %v3801_v5 = vcombine.low %v3057_v55, %v3059_v15  ;;  %v2670_v55 = vsel %vm16047_vm6, %v2615_v27, %v12159_v54  ;;  %v9813_v8 = vld [vmem:[%s11047_s9 + $0x109] sm:$0xff]  ;;  %v16259_v15 = vld [vmem:[#allocation53_spill] sm:$0xff] }
 0x295   : > { %1895 = vrot.lane.b32.xlu1 %v9757_v39, %s10954_s8  ;;  %1679 = vrot.lane.b32.xlu0 %v12322_v19, %s10951_s14  ;;  %v2778_v19 = vsel %vm16043_vm8, %v2723_v33, %v2078_v1  ;;  %v9704_v54 = vld [vmem:[%s11047_s9 + $0xea] sm:$0x3]  ;;  %v2451_v29 = vsel %vm2439_vm2, %v234_v58, %v16258_v42 }
 0x296   : > { %v3800_v52 = vcombine.low %v3792_v43, %v3799_v11  ;;  %v3809_v50 = vrot.slane %v3801_v5, %v12200_v17  ;;  %v2506_v11 = vsel %vm16005_vm3, %v2451_v29, %v16259_v15  ;;  %v16263_v5 = vld [vmem:[#allocation56_spill] sm:$0xff] }
 0x297   : > { %v2296_v53 = vpop.permute.xlu1 %2295  ;;  %v2294_v57 = vpop.permute.xlu0 %2293  ;;  %v2561_v28 = vsel %vm16004_vm4, %v2506_v11, %v16260_v9  ;;  %v16269_v9 = vld [vmem:[#allocation57_spill] sm:$0xff] }
 0x298   : > { %v2834_v16 = vsel %vm2824_vm9, %v2779_v41, %v2296_v53  ;;  %v2833_v4 = vsel %vm2824_vm9, %v2778_v19, %v2294_v57  ;;  %10084 = vmatmul.mubr.msk.f32.gmra.mrb[10].mxu0 %vm16038_vm10, %v3800_v52  ;;  %v10855_v52 = vld [vmem:[%s11047_s9 + $0x60] sm:$0xff]  ;;  %v2616_v41 = vsel %vm16003_vm5, %v2561_v28, %v16262_v47 }
 0x299   : > { %v3067_v2 = vcombine.high %v2834_v16, %v2834_v16  ;;  %v3074_v35 = vrot.slane %v2834_v16, %v12200_v17  ;;  %v3066_v38 = vrot.slane %v2833_v4, %v12200_v17  ;;  %2327 = vrot.lane.b32.xlu1 %v12434_v24, %s10957_s12  ;;  %2111 = vrot.lane.b32.xlu0 %v9811_v44, %s10953_s7  ;;  %v16261_v44 = vld [vmem:[#allocation10_spill] sm:$0xff] }
 0x29a   : > { %10086 = vmatprep.mubr.msk.f32.mxu0 %vm16034_vm1, %v16244_v31  ;;  %v2452_v45 = vsel %vm2439_vm2, %v10855_v52, %v16261_v44  ;;  %v2671_v57 = vsel %vm16047_vm6, %v2616_v41, %v12157_v36 }
 0x29b   : > { %v3802_v63 = vcombine.low %v3066_v38, %v3074_v35  ;;  %v2082_v40 = vpop.permute.xlu1 %2081  ;;  %v1866_v20 = vpop.permute.xlu0 %1865  ;;  %v3081_v21 = vrot.slane %v3067_v2, %v12200_v17  ;;  %v3082_v48 = vcombine.high %v3074_v35, %v3074_v35  ;;  %v2507_v16 = vsel %vm16005_vm3, %v2452_v45, %v16263_v5  ;;  %v9812_v2 = vld [vmem:[%s11047_s9 + $0x101] sm:$0x3]  ;;  %v16264_v35 = vld [vmem:[#allocation102_spill] sm:$0xff] }
 0x29c   : > { %v2725_v23 = vsel %vm16044_vm7, %v2670_v55, %v1866_v20  ;;  %v2562_v38 = vsel %vm16004_vm4, %v2507_v16, %v16264_v35  ;;  %v10856_v55 = vld [vmem:[%s11047_s9 + $0x68] sm:$0xff] }
 0x29d   : > { %v3816_v32 = vrot.slane %v3802_v63, %v12200_v17  ;;  %1899 = vrot.lane.b32.xlu1 %v9759_v0, %s10954_s8  ;;  %1683 = vrot.lane.b32.xlu0 %v12391_v51, %s10951_s14  ;;  %v2780_v62 = vsel %vm16043_vm8, %v2725_v23, %v2082_v40  ;;  %v3818_v1 = vcombine.low %v3082_v48, %v3081_v21  ;;  %v16265_v63 = vld [vmem:[#allocation9_spill] sm:$0xff] }
 0x29e   : > { %v3083_v34 = vcombine.high %v3081_v21, %v3081_v21  ;;  %v2453_v40 = vsel %vm2439_vm2, %v10856_v55, %v16265_v63  ;;  %v2617_v20 = vsel %vm16003_vm5, %v2562_v38, %v11948_v7 }
 0x29f   : > { %v1868_v39 = vpop.permute.xlu1 %1867  ;;  %v2298_v49 = vpop.permute.xlu0 %2297  ;;  %v3817_v61 = vcombine.low %v3809_v50, %v3816_v32  ;;  %v3826_v18 = vrot.slane %v3818_v1, %v12200_v17  ;;  %v2672_v23 = vsel %vm16047_vm6, %v2617_v20, %v12166_v26  ;;  %v16266_v50 = vld [vmem:[#allocation55_spill] sm:$0xff] }
 0x2a0   : > { %v2835_v60 = vsel %vm2824_vm9, %v2780_v62, %v2298_v49  ;;  %v2726_v4 = vsel %vm16044_vm7, %v2671_v57, %v1868_v39  ;;  %v9760_v39 = vld [vmem:[%s11047_s9 + $0x110] sm:$0xff]  ;;  %v16267_v49 = vld [vmem:[#allocation101_spill] sm:$0xff] }
 0x2a1   : > { %v3084_v51 = vcombine.high %v2835_v60, %v2835_v60  ;;  %v3091_v43 = vrot.slane %v2835_v60, %v12200_v17  ;;  %2115 = vrot.lane.b32.xlu1 %v9813_v8, %s10953_s7  ;;  %1681 = vrot.lane.b32.xlu0 %v9704_v54, %s10951_s14  ;;  %v2508_v8 = vsel %vm16005_vm3, %v2453_v40, %v16266_v50  ;;  %v9866_v54 = vld [vmem:[%s11047_s9 + $0x102] sm:$0x3]  ;;  %v16268_v1 = vld [vmem:[#allocation11_spill] sm:$0xff] }
 0x2a2   : > { %10087 = vmatmul.mubr.msk.f32.gmra.mrb[12].mxu0 %vm16038_vm10, %v3817_v61  ;;  %v2563_v26 = vsel %vm16004_vm4, %v2508_v8, %v16267_v49 }
 0x2a3   : > { %v3819_v25 = vcombine.low %v3083_v34, %v3091_v43  ;;  %v2084_v46 = vpop.permute.xlu1 %2083  ;;  %v1870_v33 = vpop.permute.xlu0 %1869  ;;  %10089 = vmatprep.mubr.msk.f32.mxu0 %vm16034_vm1, %v16244_v31  ;;  %v3098_v19 = vrot.slane %v3084_v51, %v12200_v17  ;;  %v3099_v53 = vcombine.high %v3091_v43, %v3091_v43  ;;  %v2618_v34 = vsel %vm16003_vm5, %v2563_v26, %v11946_v13  ;;  %v12545_v13 = vld [vmem:[%s11047_s9 + $0x112] sm:$0xff]  ;;  %v16272_v26 = vld [vmem:[#allocation58_spill] sm:$0xff] }
 0x2a4   : > { %v2781_v36 = vsel %vm16043_vm8, %v2726_v4, %v2084_v46  ;;  %v2727_v7 = vsel %vm16044_vm7, %v2672_v23, %v1870_v33  ;;  %v9814_v46 = vld [vmem:[%s11047_s9 + $0x111] sm:$0xff] }
 0x2a5   : > { %v3833_v14 = vrot.slane %v3819_v25, %v12200_v17  ;;  %2331 = vrot.lane.b32.xlu1 %v12479_v59, %s10957_s12  ;;  %1897 = vrot.lane.b32.xlu0 %v9758_v37, %s10954_s8  ;;  %v3835_v21 = vcombine.low %v3099_v53, %v3098_v19  ;;  %v3100_v58 = vcombine.high %v3098_v19, %v3098_v19  ;;  %v16270_v19 = vld [vmem:[#allocation103_spill] sm:$0xff] }
 0x2a6   : > { %v2673_v25 = vsel %vm16047_vm6, %v2618_v34, %v12164_v6 }
 0x2a7   : > { %v2300_v30 = vpop.permute.xlu1 %2299  ;;  %v2086_v27 = vpop.permute.xlu0 %2085  ;;  %v3834_v0 = vcombine.low %v3826_v18, %v3833_v14  ;;  %v3843_v51 = vrot.slane %v3835_v21, %v12200_v17  ;;  %v9816_v21 = vld [vmem:[%s11047_s9 + $0x121] sm:$0xff] }
 0x2a8   : > { %v2836_v48 = vsel %vm2824_vm9, %v2781_v36, %v2300_v30  ;;  %v2782_v61 = vsel %vm16043_vm8, %v2727_v7, %v2086_v27 }
 0x2a9   : > { %v3107_v32 = vrot.slane %v2836_v48, %v12200_v17  ;;  %2113 = vrot.lane.b32.xlu1 %v9812_v2, %s10953_s7  ;;  %1685 = vrot.lane.b32.xlu0 %v12434_v24, %s10951_s14  ;;  %v10857_v24 = vld [vmem:[%s11047_s9 + $0x78] sm:$0xff]  ;;  %v9762_v2 = vld [vmem:[%s11047_s9 + $0x120] sm:$0xff] }
 0x2aa   : > { %10090 = vmatmul.mubr.msk.f32.gmra.mrb[14].mxu0 %vm16038_vm10, %v3834_v0  ;;  %v2455_v60 = vsel %vm2439_vm2, %v10857_v24, %v16268_v1  ;;  %v9707_v48 = vld [vmem:[%s11047_s9 + $0x102] sm:$0x3]  ;;  %v16273_v1 = vld [vmem:[#allocation104_spill] sm:$0xff] }
 0x2ab   : > { %v3836_v62 = vcombine.low %v3100_v58, %v3107_v32  ;;  %v1872_v42 = vpop.permute.xlu1 %1871  ;;  %v2302_v29 = vpop.permute.xlu0 %2301  ;;  %10092 = vmatprep.mubr.msk.f32.mxu0 %vm16034_vm1, %v16244_v31  ;;  %v2510_v28 = vsel %vm16005_vm3, %v2455_v60, %v16269_v9 }
 0x2ac   : > { %v2837_v43 = vsel %vm2824_vm9, %v2782_v61, %v2302_v29  ;;  %v2728_v33 = vsel %vm16044_vm7, %v2673_v25, %v1872_v42  ;;  %v2565_v53 = vsel %vm16004_vm4, %v2510_v28, %v16270_v19  ;;  %v12588_v42 = vld [vmem:[%s11047_s9 + $0x122] sm:$0xff]  ;;  %v9761_v29 = vld [vmem:[%s11047_s9 + $0x118] sm:$0x3] }
 0x2ad   : > { %v3850_v15 = vrot.slane %v3836_v62, %v12200_v17  ;;  %v3108_v11 = vcombine.high %v2837_v43, %v2837_v43  ;;  %v3115_v37 = vrot.slane %v2837_v43, %v12200_v17  ;;  %2329 = vrot.lane.b32.xlu1 %v9866_v54, %s10957_s12  ;;  %1901 = vrot.lane.b32.xlu0 %v9760_v39, %s10954_s8  ;;  %v16271_v54 = vld [vmem:[#allocation12_spill] sm:$0xff]  ;;  %v10858_v28 = vld [vmem:[%s11047_s9 + $0x80] sm:$0xff]  ;;  %v16274_v25 = vld [vmem:[#allocation14_spill] sm:$0xff] }
 0x2ae   : > { %v2620_v5 = vsel %vm16003_vm5, %v2565_v53, %v11954_v12 }
 0x2af   : > { %v3122_v52 = vrot.slane %v3108_v11, %v12200_v17  ;;  %v3123_v44 = vcombine.high %v3115_v37, %v3115_v37  ;;  %v2304_v45 = vpop.permute.xlu1 %2303  ;;  %v2088_v47 = vpop.permute.xlu0 %2087  ;;  %v3851_v41 = vcombine.low %v3843_v51, %v3850_v15  ;;  %v2675_v35 = vsel %vm16047_vm6, %v2620_v5, %v12178_v56  ;;  %v237_v56 = vld [vmem:[%s11047_s9 + $0x70] sm:$0x3] }
 0x2b0   : > { %v2783_v57 = vsel %vm16043_vm8, %v2728_v33, %v2088_v47  ;;  %v2454_v39 = vsel %vm2439_vm2, %v237_v56, %v16271_v54  ;;  %v12636_v56 = vld [vmem:[%s11047_s9 + $0x12a] sm:$0xff] }
 0x2b1   : > { %v3124_v18 = vcombine.high %v3122_v52, %v3122_v52  ;;  %v3852_v14 = vcombine.low %v3115_v37, %v3123_v44  ;;  %v2838_v6 = vsel %vm2824_vm9, %v2783_v57, %v2304_v45  ;;  %2333 = vrot.lane.b32.xlu1 %v12545_v13, %s10957_s12  ;;  %2117 = vrot.lane.b32.xlu0 %v9814_v46, %s10953_s7  ;;  %v16277_v57 = vld [vmem:[#allocation149_spill] sm:$0xff] }
 0x2b2   : > { %v3125_v16 = vcombine.high %v2838_v6, %v2838_v6  ;;  %v3132_v4 = vrot.slane %v2838_v6, %v12200_v17  ;;  %10093 = vmatmul.mubr.msk.f32.gmra.mrb[16].mxu0 %vm16038_vm10, %v3851_v41  ;;  %v2509_v62 = vsel %vm16005_vm3, %v2454_v39, %v16272_v26  ;;  %v2456_v46 = vsel %vm2439_vm2, %v10858_v28, %v16274_v25  ;;  %v16276_v41 = vld [vmem:[#allocation106_spill] sm:$0xff]  ;;  %v16281_v26 = vld [vmem:[#allocation151_spill] sm:$0xff] }
 0x2b3   : > { %v3853_v38 = vcombine.low %v3122_v52, %v3124_v18  ;;  %v2092_v36 = vpop.permute.xlu1 %2091  ;;  %v1876_v30 = vpop.permute.xlu0 %1875  ;;  %10095 = vmatprep.mubr.msk.f32.mxu0 %vm16034_vm1, %v16244_v31  ;;  %v3860_v55 = vrot.slane %v3852_v14, %v12200_v17  ;;  %v2564_v60 = vsel %vm16004_vm4, %v2509_v62, %v16273_v1 }
 0x2b4   : > { %v3139_v12 = vrot.slane %v3125_v16, %v12200_v17  ;;  %v3140_v27 = vcombine.high %v3132_v4, %v3132_v4  ;;  %v2730_v0 = vsel %vm16044_vm7, %v2675_v35, %v1876_v30  ;;  %v2619_v43 = vsel %vm16003_vm5, %v2564_v60, %v11956_v22  ;;  %v9815_v22 = vld [vmem:[%s11047_s9 + $0x119] sm:$0x3] }
 0x2b5   : > { %v3867_v63 = vrot.slane %v3853_v38, %v12200_v17  ;;  %1905 = vrot.lane.b32.xlu1 %v9762_v2, %s10954_s8  ;;  %1689 = vrot.lane.b32.xlu0 %v12479_v59, %s10951_s14  ;;  %v2785_v58 = vsel %vm16043_vm8, %v2730_v0, %v2092_v36  ;;  %v2674_v11 = vsel %vm16047_vm6, %v2619_v43, %v12180_v10  ;;  %v16275_v10 = vld [vmem:[#allocation60_spill] sm:$0xff]  ;;  %v240_v43 = vld [vmem:[%s11047_s9 + $0x88] sm:$0x3] }
 0x2b6   : > { %v3141_v40 = vcombine.high %v3139_v12, %v3139_v12  ;;  %v3869_v20 = vcombine.low %v3132_v4, %v3140_v27  ;;  %v2511_v52 = vsel %vm16005_vm3, %v2456_v46, %v16275_v10  ;;  %v9869_v16 = vld [vmem:[%s11047_s9 + $0x11a] sm:$0x3]  ;;  %v9763_v4 = vld [vmem:[%s11047_s9 + $0x128] sm:$0xff] }
 0x2b7   : > { %v2308_v23 = vpop.permute.xlu1 %2307  ;;  %v1874_v32 = vpop.permute.xlu0 %1873  ;;  %v3868_v50 = vcombine.low %v3860_v55, %v3867_v63  ;;  %v2566_v19 = vsel %vm16004_vm4, %v2511_v52, %v16276_v41  ;;  %v16283_v52 = vld [vmem:[#allocation59_spill] sm:$0xff]  ;;  %v16284_v41 = vld [vmem:[#allocation105_spill] sm:$0xff] }
 0x2b8   : > { %v3870_v8 = vcombine.low %v3139_v12, %v3141_v40  ;;  %v2840_v7 = vsel %vm2824_vm9, %v2785_v58, %v2308_v23  ;;  %v3877_v61 = vrot.slane %v3869_v20, %v12200_v17  ;;  %v2729_v33 = vsel %vm16044_vm7, %v2674_v11, %v1874_v32  ;;  %v9817_v40 = vld [vmem:[%s11047_s9 + $0x129] sm:$0xff] }
 0x2b9   : > { %v3149_v49 = vcombine.high %v2840_v7, %v2840_v7  ;;  %v3156_v59 = vrot.slane %v2840_v7, %v12200_v17  ;;  %2121 = vrot.lane.b32.xlu1 %v9816_v21, %s10953_s7  ;;  %1687 = vrot.lane.b32.xlu0 %v9707_v48, %s10951_s14  ;;  %v2621_v18 = vsel %vm16003_vm5, %v2566_v19, %v16277_v57  ;;  %v10859_v20 = vld [vmem:[%s11047_s9 + $0x90] sm:$0xff]  ;;  %v16278_v21 = vld [vmem:[#allocation16_spill] sm:$0xff] }
 0x2ba   : > { %10096 = vmatmul.mubr.msk.f32.gmra.mrb[18].mxu0 %vm16038_vm10, %v3868_v50  ;;  %v3884_v24 = vrot.slane %v3870_v8, %v12200_v17  ;;  %v2458_v48 = vsel %vm2439_vm2, %v10859_v20, %v16278_v21  ;;  %v16279_v50 = vld [vmem:[#allocation62_spill] sm:$0xff] }
 0x2bb   : > { %v2090_v34 = vpop.permute.xlu1 %2089  ;;  %v1662_v51 = vpop.permute.xlu0 %1661  ;;  %10098 = vmatprep.mubr.msk.f32.mxu0 %vm16034_vm1, %v16244_v31  ;;  %v3163_v37 = vrot.slane %v3149_v49, %v12200_v17  ;;  %v3164_v9 = vcombine.high %v3156_v59, %v3156_v59  ;;  %v2513_v8 = vsel %vm16005_vm3, %v2458_v48, %v16279_v50  ;;  %v16280_v49 = vld [vmem:[#allocation108_spill] sm:$0xff]  ;;  %v16289_v20 = vld [vmem:[#allocation150_spill] sm:$0xff] }
 0x2bc   : > { %v3885_v15 = vcombine.low %v3877_v61, %v3884_v24  ;;  %v2784_v44 = vsel %vm16043_vm8, %v2729_v33, %v2090_v34  ;;  %v2676_v5 = vsel %vm16047_vm6, %v2621_v18, %v1662_v51  ;;  %v16285_v18 = vld [vmem:[#allocation148_spill] sm:$0xff] }
 0x2bd   : > { %2337 = vrot.lane.b32.xlu1 %v12588_v42, %s10957_s12  ;;  %1903 = vrot.lane.b32.xlu0 %v9761_v29, %s10954_s8  ;;  %v3887_v14 = vcombine.low %v3164_v9, %v3163_v37  ;;  %v3165_v0 = vcombine.high %v3163_v37, %v3163_v37  ;;  %v9710_v29 = vld [vmem:[%s11047_s9 + $0x11a] sm:$0x3]  ;;  %v9764_v9 = vld [vmem:[%s11047_s9 + $0x130] sm:$0x3] }
 0x2be   : > { %10099 = vmatmul.mubr.msk.f32.gmra.mrb[20].mxu0 %vm16038_vm10, %v3885_v15  ;;  %v9765_v37 = vld [vmem:[%s11047_s9 + $0x138] sm:$0xff] }
 0x2bf   : > { %v2306_v45 = vpop.permute.xlu1 %2305  ;;  %v1878_v47 = vpop.permute.xlu0 %1877  ;;  %10101 = vmatprep.mubr.msk.f32.mxu0 %vm16034_vm1, %v16244_v31  ;;  %v3901_v12 = vrot.slane %v3887_v14, %v12200_v17 }
 0x2c0   : > { %v2839_v53 = vsel %vm2824_vm9, %v2784_v44, %v2306_v45  ;;  %v2731_v35 = vsel %vm16044_vm7, %v2676_v5, %v1878_v47  ;;  %v9819_v45 = vld [vmem:[%s11047_s9 + $0x139] sm:$0xff]  ;;  %v9818_v47 = vld [vmem:[%s11047_s9 + $0x131] sm:$0x3] }
 0x2c1   : > { %v3148_v6 = vrot.slane %v2839_v53, %v12200_v17  ;;  %2119 = vrot.lane.b32.xlu1 %v9815_v22, %s10953_s7  ;;  %1691 = vrot.lane.b32.xlu0 %v12545_v13, %s10951_s14  ;;  %v10860_v5 = vld [vmem:[%s11047_s9 + $0x98] sm:$0xff] }
 0x2c3   : > { %v3886_v2 = vcombine.low %v3148_v6, %v3156_v59  ;;  %v2310_v38 = vpop.permute.xlu1 %2309  ;;  %v2094_v36 = vpop.permute.xlu0 %2093  ;;  %v2568_v59 = vsel %vm16004_vm4, %v2513_v8, %v16280_v49 }
 0x2c4   : > { %v2786_v30 = vsel %vm16043_vm8, %v2731_v35, %v2094_v36  ;;  %v2623_v62 = vsel %vm16003_vm5, %v2568_v59, %v16281_v26 }
 0x2c5   : > { %v3894_v27 = vrot.slane %v3886_v2, %v12200_v17  ;;  %v2841_v13 = vsel %vm2824_vm9, %v2786_v30, %v2310_v38  ;;  %2335 = vrot.lane.b32.xlu1 %v9869_v16, %s10957_s12  ;;  %1907 = vrot.lane.b32.xlu0 %v9763_v4, %s10954_s8  ;;  %v16286_v16 = vld [vmem:[#allocation15_spill] sm:$0xff]  ;;  %v16287_v38 = vld [vmem:[#allocation61_spill] sm:$0xff] }
 0x2c6   : > { %v3166_v55 = vcombine.high %v2841_v13, %v2841_v13  ;;  %v3173_v63 = vrot.slane %v2841_v13, %v12200_v17  ;;  %v2459_v4 = vsel %vm2439_vm2, %v10860_v5, %v16286_v16  ;;  %v16288_v13 = vld [vmem:[#allocation107_spill] sm:$0xff]  ;;  %v9767_v5 = vld [vmem:[%s11047_s9 + $0x148] sm:$0x3]  ;;  %v16294_v16 = vld [vmem:[#allocation109_spill] sm:$0xff] }
 0x2c7   : > { %v1882_v23 = vpop.permute.xlu1 %1881  ;;  %v1666_v58 = vpop.permute.xlu0 %1665  ;;  %v3902_v32 = vcombine.low %v3894_v27, %v3901_v12  ;;  %v2514_v36 = vsel %vm16005_vm3, %v2459_v4, %v16287_v38  ;;  %v9873_v12 = vld [vmem:[%s11047_s9 + $0x13a] sm:$0xff]  ;;  %v9872_v27 = vld [vmem:[%s11047_s9 + $0x132] sm:$0x3] }
 0x2c8   : > { %v12645_v7 = vrot.slane %v3166_v55, %v12200_v17  ;;  %v3181_v54 = vcombine.high %v3173_v63, %v3173_v63  ;;  %v3903_v39 = vcombine.low %v3165_v0, %v3173_v63  ;;  %v2678_v24 = vsel %vm16047_vm6, %v2623_v62, %v1666_v58 }
 0x2c9   : > { %2339 = vrot.lane.b32.xlu1 %v12636_v56, %s10957_s12  ;;  %2123 = vrot.lane.b32.xlu0 %v9817_v40, %s10953_s7  ;;  %v2733_v15 = vsel %vm16044_vm7, %v2678_v24, %v1882_v23  ;;  %v2569_v0 = vsel %vm16004_vm4, %v2514_v36, %v16288_v13 }
 0x2ca   : > { %v3904_v61 = vcombine.low %v3181_v54, %v12645_v7  ;;  %10102 = vmatmul.mubr.msk.f32.gmra.mrb[22].mxu0 %vm16038_vm10, %v3902_v32  ;;  %v3911_v34 = vrot.slane %v3903_v39, %v12200_v17  ;;  %v2624_v21 = vsel %vm16003_vm5, %v2569_v0, %v16289_v20  ;;  %v3182_v32 = vcombine.high %v12645_v7, %v12645_v7  ;;  %v9766_v54 = vld [vmem:[%s11047_s9 + $0x140] sm:$0xff] }
 0x2cb   : > { %v2098_v1 = vpop.permute.xlu1 %2097  ;;  %v1664_v60 = vpop.permute.xlu0 %1663  ;;  %10104 = vmatprep.mubr.msk.f32.mxu0 %vm16034_vm1, %v16244_v31 }
 0x2cc   : > { %v3918_v51 = vrot.slane %v3904_v61, %v12200_v17  ;;  %v2788_v28 = vsel %vm16043_vm8, %v2733_v15, %v2098_v1 }
 0x2cd   : > { %1695 = vrot.lane.b32.xlu1 %v12588_v42, %s10951_s14  ;;  %1693 = vrot.lane.b32.xlu0 %v9710_v29, %s10951_s14  ;;  %v16282_v42 = vld [vmem:[#allocation13_spill] sm:$0xff] }
 0x2ce   : > { %v3919_v11 = vcombine.low %v3911_v34, %v3918_v51  ;;  %v2457_v22 = vsel %vm2439_vm2, %v240_v43, %v16282_v42  ;;  %v9820_v34 = vld [vmem:[%s11047_s9 + $0x141] sm:$0xff] }
 0x2cf   : > { %v2314_v25 = vpop.permute.xlu1 %2313  ;;  %v1880_v46 = vpop.permute.xlu0 %1879  ;;  %v2512_v44 = vsel %vm16005_vm3, %v2457_v22, %v16283_v52  ;;  %v16290_v52 = vld [vmem:[#allocation17_spill] sm:$0xff] }
 0x2d0   : > { %v2843_v33 = vsel %vm2824_vm9, %v2788_v28, %v2314_v25  ;;  %10105 = vmatmul.mubr.msk.f32.gmra.mrb[24].mxu0 %vm16038_vm10, %v3919_v11  ;;  %v2567_v19 = vsel %vm16004_vm4, %v2512_v44, %v16284_v41  ;;  %v243_v28 = vld [vmem:[%s11047_s9 + $0xa0] sm:$0x3] }
 0x2d1   : > { %v3197_v10 = vrot.slane %v2843_v33, %v12200_v17  ;;  %1911 = vrot.lane.b32.xlu1 %v9765_v37, %s10954_s8  ;;  %1909 = vrot.lane.b32.xlu0 %v9764_v9, %s10954_s8  ;;  %v2622_v14 = vsel %vm16003_vm5, %v2567_v19, %v16285_v18  ;;  %v3190_v6 = vcombine.high %v2843_v33, %v2843_v33  ;;  %v16292_v19 = vld [vmem:[#allocation63_spill] sm:$0xff] }
 0x2d2   : > { %10107 = vmatprep.mubr.msk.f32.mxu0 %vm16034_vm1, %v16244_v31  ;;  %v2677_v2 = vsel %vm16047_vm6, %v2622_v14, %v1664_v60  ;;  %v12722_v60 = vld [vmem:[%s11047_s9 + $0x142] sm:$0xff] }
 0x2d3   : > { %v2096_v53 = vpop.permute.xlu1 %2095  ;;  %v1668_v57 = vpop.permute.xlu0 %1667  ;;  %v3205_v35 = vcombine.high %v3197_v10, %v3197_v10  ;;  %v2732_v30 = vsel %vm16044_vm7, %v2677_v2, %v1880_v46  ;;  %v3204_v48 = vrot.slane %v3190_v6, %v12200_v17  ;;  %v9768_v6 = vld [vmem:[%s11047_s9 + $0x150] sm:$0xff]  ;;  %v16295_v2 = vld [vmem:[#allocation110_spill] sm:$0xff] }
 0x2d4   : > { %v2787_v55 = vsel %vm16043_vm8, %v2732_v30, %v2096_v53  ;;  %v2679_v8 = vsel %vm16047_vm6, %v2624_v21, %v1668_v57  ;;  %v16293_v57 = vld [vmem:[#allocation64_spill] sm:$0xff] }
 0x2d5   : > { %2127 = vrot.lane.b32.xlu1 %v9819_v45, %s10953_s7  ;;  %2125 = vrot.lane.b32.xlu0 %v9818_v47, %s10953_s7  ;;  %v3921_v58 = vcombine.low %v3197_v10, %v3205_v35  ;;  %v3206_v62 = vcombine.high %v3204_v48, %v3204_v48  ;;  %v10861_v10 = vld [vmem:[%s11047_s9 + $0xa8] sm:$0xff]  ;;  %v16296_v30 = vld [vmem:[#allocation152_spill] sm:$0xff] }
 0x2d6   : > { %v2461_v44 = vsel %vm2439_vm2, %v10861_v10, %v16290_v52  ;;  %v16291_v45 = vld [vmem:[#allocation18_spill] sm:$0xff]  ;;  %v9822_v21 = vld [vmem:[%s11047_s9 + $0x151] sm:$0xff] }
 0x2d7   : > { %v2312_v63 = vpop.permute.xlu1 %2311  ;;  %v1884_v40 = vpop.permute.xlu0 %1883  ;;  %v3935_v7 = vrot.slane %v3921_v58, %v12200_v17  ;;  %v3937_v11 = vcombine.low %v3204_v48, %v3206_v62  ;;  %v2460_v47 = vsel %vm2439_vm2, %v243_v28, %v16291_v45  ;;  %v2516_v53 = vsel %vm16005_vm3, %v2461_v44, %v16292_v19  ;;  %v9821_v48 = vld [vmem:[%s11047_s9 + $0x149] sm:$0x3]  ;;  %v16298_v58 = vld [vmem:[#allocation20_spill] sm:$0xff] }
 0x2d8   : > { %v2842_v23 = vsel %vm2824_vm9, %v2787_v55, %v2312_v63  ;;  %v2734_v49 = vsel %vm16044_vm7, %v2679_v8, %v1884_v40  ;;  %v2515_v18 = vsel %vm16005_vm3, %v2460_v47, %v16293_v57  ;;  %v2571_v4 = vsel %vm16004_vm4, %v2516_v53, %v16294_v16 }
 0x2d9   : > { %v3189_v50 = vrot.slane %v2842_v23, %v12200_v17  ;;  %2343 = vrot.lane.b32.xlu1 %v9873_v12, %s10957_s12  ;;  %2341 = vrot.lane.b32.xlu0 %v9872_v27, %s10957_s12  ;;  %v3945_v42 = vrot.slane %v3937_v11, %v12200_v17  ;;  %v2570_v35 = vsel %vm16004_vm4, %v2515_v18, %v16295_v2  ;;  %v16297_v27 = vld [vmem:[#allocation153_spill] sm:$0xff]  ;;  %v10862_v23 = vld [vmem:[%s11047_s9 + $0xb0] sm:$0xff] }
 0x2da   : > { %v2625_v13 = vsel %vm16003_vm5, %v2570_v35, %v16297_v27  ;;  %v12803_v18 = vld [vmem:[%s11047_s9 + $0x15a] sm:$0xff]  ;;  %v9771_v35 = vld [vmem:[%s11047_s9 + $0x168] sm:$0xff]  ;;  %v16302_v27 = vld [vmem:[#allocation19_spill] sm:$0xff] }
 0x2db   : > { %v3920_v39 = vcombine.low %v3182_v32, %v3189_v50  ;;  %v2316_v59 = vpop.permute.xlu1 %2315  ;;  %v2100_v26 = vpop.permute.xlu0 %2099  ;;  %v2462_v32 = vsel %vm2439_vm2, %v10862_v23, %v16298_v58  ;;  %v9825_v23 = vld [vmem:[%s11047_s9 + $0x169] sm:$0xff] }
 0x2dc   : > { %v2789_v61 = vsel %vm16043_vm8, %v2734_v49, %v2100_v26  ;;  %v16299_v49 = vld [vmem:[#allocation66_spill] sm:$0xff] }
 0x2dd   : > { %v3928_v29 = vrot.slane %v3920_v39, %v12200_v17  ;;  %v2844_v24 = vsel %vm2824_vm9, %v2789_v61, %v2316_v59  ;;  %1913 = vrot.lane.b32.xlu1 %v9766_v54, %s10954_s8  ;;  %1697 = vrot.lane.b32.xlu0 %v12636_v56, %s10951_s14  ;;  %v9713_v56 = vld [vmem:[%s11047_s9 + $0x132] sm:$0x3]  ;;  %v2517_v59 = vsel %vm16005_vm3, %v2462_v32, %v16299_v49  ;;  %v9716_v58 = vld [vmem:[%s11047_s9 + $0x14a] sm:$0x3] }
 0x2de   : > { %v3214_v1 = vrot.slane %v2844_v24, %v12200_v17  ;;  %v3207_v9 = vcombine.high %v2844_v24, %v2844_v24  ;;  %v16300_v24 = vld [vmem:[#allocation112_spill] sm:$0xff]  ;;  %v16306_v32 = vld [vmem:[#allocation111_spill] sm:$0xff] }
 0x2df   : > { %v1672_v51 = vpop.permute.xlu1 %1671  ;;  %v1670_v43 = vpop.permute.xlu0 %1669  ;;  %v3936_v15 = vcombine.low %v3928_v29, %v3935_v7 }
 0x2e0   : > { %v3222_v37 = vcombine.high %v3214_v1, %v3214_v1  ;;  %v3221_v41 = vrot.slane %v3207_v9, %v12200_v17  ;;  %v2680_v63 = vsel %vm16047_vm6, %v2625_v13, %v1670_v43  ;;  %v9875_v43 = vld [vmem:[%s11047_s9 + $0x14a] sm:$0x3] }
 0x2e1   : > { %2345 = vrot.lane.b32.xlu1 %v12722_v60, %s10957_s12  ;;  %2129 = vrot.lane.b32.xlu0 %v9820_v34, %s10953_s7 }
 0x2e2   : > { %v3938_v25 = vcombine.low %v3214_v1, %v3222_v37  ;;  %10108 = vmatmul.mubr.msk.f32.gmra.mrb[26].mxu0 %vm16038_vm10, %v3936_v15  ;;  %v3223_v0 = vcombine.high %v3221_v41, %v3221_v41  ;;  %v2572_v1 = vsel %vm16004_vm4, %v2517_v59, %v16300_v24  ;;  %v16301_v15 = vld [vmem:[#allocation155_spill] sm:$0xff]  ;;  %v16308_v59 = vld [vmem:[#allocation154_spill] sm:$0xff] }
 0x2e3   : > { %v1888_v46 = vpop.permute.xlu1 %1887  ;;  %v1886_v33 = vpop.permute.xlu0 %1885  ;;  %10110 = vmatprep.mubr.msk.f32.mxu0 %vm16034_vm1, %v16244_v31  ;;  %v2627_v11 = vsel %vm16003_vm5, %v2572_v1, %v16301_v15 }
 0x2e4   : > { %v3952_v22 = vrot.slane %v3938_v25, %v12200_v17  ;;  %v2735_v20 = vsel %vm16044_vm7, %v2680_v63, %v1886_v33  ;;  %v3954_v61 = vcombine.low %v3221_v41, %v3223_v0  ;;  %v10863_v0 = vld [vmem:[%s11047_s9 + $0xc0] sm:$0xff] }
 0x2e5   : > { %1701 = vrot.lane.b32.xlu1 %v9873_v12, %s10951_s14  ;;  %1699 = vrot.lane.b32.xlu0 %v9713_v56, %s10951_s14  ;;  %v2626_v12 = vsel %vm16003_vm5, %v2571_v4, %v16296_v30 }
 0x2e6   : > { %v3953_v14 = vcombine.low %v3945_v42, %v3952_v22  ;;  %v2681_v55 = vsel %vm16047_vm6, %v2626_v12, %v1672_v51  ;;  %v9876_v51 = vld [vmem:[%s11047_s9 + $0x152] sm:$0xff] }
 0x2e7   : > { %v2104_v38 = vpop.permute.xlu1 %2103  ;;  %v2102_v36 = vpop.permute.xlu0 %2101  ;;  %v2736_v40 = vsel %vm16044_vm7, %v2681_v55, %v1888_v46  ;;  %v3962_v46 = vrot.slane %v3954_v61, %v12200_v17  ;;  %v9769_v22 = vld [vmem:[%s11047_s9 + $0x158] sm:$0xff]  ;;  %v16303_v55 = vld [vmem:[#allocation22_spill] sm:$0xff] }
 0x2e8   : > { %10111 = vmatmul.mubr.msk.f32.gmra.mrb[28].mxu0 %vm16038_vm10, %v3953_v14  ;;  %v2791_v50 = vsel %vm16043_vm8, %v2736_v40, %v2104_v38  ;;  %v2790_v8 = vsel %vm16043_vm8, %v2735_v20, %v2102_v36  ;;  %v9823_v14 = vld [vmem:[%s11047_s9 + $0x159] sm:$0xff]  ;;  %v2464_v63 = vsel %vm2439_vm2, %v10863_v0, %v16303_v55 }
 0x2e9   : > { %1917 = vrot.lane.b32.xlu1 %v9768_v6, %s10954_s8  ;;  %1915 = vrot.lane.b32.xlu0 %v9767_v5, %s10954_s8  ;;  %v16304_v40 = vld [vmem:[#allocation65_spill] sm:$0xff] }
 0x2ea   : > { %10113 = vmatprep.mubr.msk.f32.mxu0 %vm16034_vm1, %v16244_v31 }
 0x2eb   : > { %v2320_v54 = vpop.permute.xlu1 %2319  ;;  %v2318_v39 = vpop.permute.xlu0 %2317 }
 0x2ec   : > { %v2846_v26 = vsel %vm2824_vm9, %v2791_v50, %v2320_v54  ;;  %v2845_v62 = vsel %vm2824_vm9, %v2790_v8, %v2318_v39  ;;  %v16307_v8 = vld [vmem:[#allocation114_spill] sm:$0xff] }
 0x2ed   : > { %v3238_v7 = vrot.slane %v2846_v26, %v12200_v17  ;;  %v3230_v29 = vrot.slane %v2845_v62, %v12200_v17  ;;  %2133 = vrot.lane.b32.xlu1 %v9822_v21, %s10953_s7  ;;  %2131 = vrot.lane.b32.xlu0 %v9821_v48, %s10953_s7  ;;  %v3231_v34 = vcombine.high %v2846_v26, %v2846_v26  ;;  %v16305_v21 = vld [vmem:[#allocation68_spill] sm:$0xff]  ;;  %v16309_v62 = vld [vmem:[#allocation157_spill] sm:$0xff] }
 0x2ee   : > { %v2519_v48 = vsel %vm16005_vm3, %v2464_v63, %v16305_v21 }
 0x2ef   : > { %v3955_v37 = vcombine.low %v3230_v29, %v3238_v7  ;;  %v1890_v9 = vpop.permute.xlu1 %1889  ;;  %v1674_v28 = vpop.permute.xlu0 %1673  ;;  %v3245_v33 = vrot.slane %v3231_v34, %v12200_v17  ;;  %v3246_v42 = vcombine.high %v3238_v7, %v3238_v7  ;;  %v2574_v54 = vsel %vm16004_vm4, %v2519_v48, %v16307_v8  ;;  %v10864_v34 = vld [vmem:[%s11047_s9 + $0xc8] sm:$0xff]  ;;  %v9826_v8 = vld [vmem:[%s11047_s9 + $0x171] sm:$0xff] }
 0x2f0   : > { %v2682_v25 = vsel %vm16047_vm6, %v2627_v11, %v1674_v28  ;;  %v2629_v61 = vsel %vm16003_vm5, %v2574_v54, %v16309_v62  ;;  %v16311_v28 = vld [vmem:[#allocation67_spill] sm:$0xff]  ;;  %v10865_v54 = vld [vmem:[%s11047_s9 + $0xd8] sm:$0xff] }
 0x2f1   : > { %v3969_v56 = vrot.slane %v3955_v37, %v12200_v17  ;;  %2349 = vrot.lane.b32.xlu1 %v9876_v51, %s10957_s12  ;;  %2347 = vrot.lane.b32.xlu0 %v9875_v43, %s10957_s12  ;;  %v2737_v44 = vsel %vm16044_vm7, %v2682_v25, %v1890_v9  ;;  %v3247_v19 = vcombine.high %v3245_v33, %v3245_v33  ;;  %v12850_v37 = vld [vmem:[%s11047_s9 + $0x16a] sm:$0xff]  ;;  %v9770_v9 = vld [vmem:[%s11047_s9 + $0x160] sm:$0x3] }
 0x2f2   : > { %v3971_v53 = vcombine.low %v3246_v42, %v3245_v33 }
 0x2f3   : > { %v2322_v10 = vpop.permute.xlu1 %2321  ;;  %v2106_v52 = vpop.permute.xlu0 %2105  ;;  %v3970_v45 = vcombine.low %v3962_v46, %v3969_v56 }
 0x2f4   : > { %v2792_v47 = vsel %vm16043_vm8, %v2737_v44, %v2106_v52  ;;  %v3979_v4 = vrot.slane %v3971_v53, %v12200_v17 }
 0x2f5   : > { %v2847_v41 = vsel %vm2824_vm9, %v2792_v47, %v2322_v10  ;;  %1919 = vrot.lane.b32.xlu1 %v9769_v22, %s10954_s8  ;;  %1703 = vrot.lane.b32.xlu0 %v12722_v60, %s10951_s14  ;;  %v246_v60 = vld [vmem:[%s11047_s9 + $0xb8] sm:$0x3] }
 0x2f6   : > { %v3255_v57 = vrot.slane %v2847_v41, %v12200_v17  ;;  %10114 = vmatmul.mubr.msk.f32.gmra.mrb[30].mxu0 %vm16038_vm10, %v3970_v45  ;;  %v3248_v30 = vcombine.high %v2847_v41, %v2847_v41  ;;  %v2463_v13 = vsel %vm2439_vm2, %v246_v60, %v16302_v27  ;;  %v9878_v27 = vld [vmem:[%s11047_s9 + $0x162] sm:$0x3] }
 0x2f7   : > { %v1678_v6 = vpop.permute.xlu1 %1677  ;;  %v1676_v5 = vpop.permute.xlu0 %1675  ;;  %10116 = vmatprep.mubr.msk.f32.mxu0 %vm16034_vm1, %v16244_v31  ;;  %v2518_v20 = vsel %vm16005_vm3, %v2463_v13, %v16304_v40  ;;  %v9772_v13 = vld [vmem:[%s11047_s9 + $0x170] sm:$0xff] }
 0x2f8   : > { %v3972_v16 = vcombine.low %v3247_v19, %v3255_v57  ;;  %v2573_v50 = vsel %vm16004_vm4, %v2518_v20, %v16306_v32  ;;  %v3262_v7 = vrot.slane %v3248_v30, %v12200_v17  ;;  %v3263_v29 = vcombine.high %v3255_v57, %v3255_v57  ;;  %v16312_v19 = vld [vmem:[#allocation113_spill] sm:$0xff] }
 0x2f9   : > { %2351 = vrot.lane.b32.xlu1 %v12803_v18, %s10957_s12  ;;  %2135 = vrot.lane.b32.xlu0 %v9823_v14, %s10953_s7  ;;  %v2628_v26 = vsel %vm16003_vm5, %v2573_v50, %v16308_v59  ;;  %v2684_v24 = vsel %vm16047_vm6, %v2629_v61, %v1678_v6  ;;  %v9824_v57 = vld [vmem:[%s11047_s9 + $0x161] sm:$0x3]  ;;  %v16313_v14 = vld [vmem:[#allocation156_spill] sm:$0xff] }
 0x2fa   : > { %v3986_v2 = vrot.slane %v3972_v16, %v12200_v17  ;;  %v2683_v1 = vsel %vm16047_vm6, %v2628_v26, %v1676_v5  ;;  %v3988_v22 = vcombine.low %v3263_v29, %v3262_v7  ;;  %v3264_v44 = vcombine.high %v3262_v7, %v3262_v7  ;;  %v12888_v50 = vld [vmem:[%s11047_s9 + $0x172] sm:$0xff]  ;;  %v16315_v61 = vld [vmem:[#allocation69_spill] sm:$0xff] }
 0x2fb   : > { %v1894_v38 = vpop.permute.xlu1 %1893  ;;  %v1892_v36 = vpop.permute.xlu0 %1891 }
 0x2fc   : > { %v3987_v12 = vcombine.low %v3979_v4, %v3986_v2  ;;  %v2739_v15 = vsel %vm16044_vm7, %v2684_v24, %v1894_v38  ;;  %v2738_v11 = vsel %vm16044_vm7, %v2683_v1, %v1892_v36  ;;  %v3996_v38 = vrot.slane %v3988_v22, %v12200_v17  ;;  %v16316_v1 = vld [vmem:[#allocation115_spill] sm:$0xff] }
 0x2fd   : > { %1923 = vrot.lane.b32.xlu1 %v9771_v35, %s10954_s8  ;;  %1707 = vrot.lane.b32.xlu0 %v9876_v51, %s10951_s14  ;;  %v16310_v51 = vld [vmem:[#allocation21_spill] sm:$0xff] }
 0x2fe   : > { %10117 = vmatmul.mubr.msk.f32.gmra.mrb[32].mxu0 %vm16038_vm10, %v3987_v12  ;;  %v2465_v43 = vsel %vm2439_vm2, %v10864_v34, %v16310_v51  ;;  %v16317_v51 = vld [vmem:[#allocation158_spill] sm:$0xff] }
 0x2ff   : > { %v2110_v39 = vpop.permute.xlu1 %2109  ;;  %v2108_v49 = vpop.permute.xlu0 %2107  ;;  %10119 = vmatprep.mubr.msk.f32.mxu0 %vm16034_vm1, %v16244_v31  ;;  %v2520_v25 = vsel %vm16005_vm3, %v2465_v43, %v16311_v28 }
 0x300   : > { %v2794_v56 = vsel %vm16043_vm8, %v2739_v15, %v2110_v39  ;;  %v2793_v46 = vsel %vm16043_vm8, %v2738_v11, %v2108_v49  ;;  %v2575_v53 = vsel %vm16004_vm4, %v2520_v25, %v16312_v19  ;;  %v16314_v39 = vld [vmem:[#allocation23_spill] sm:$0xff] }
 0x301   : > { %2139 = vrot.lane.b32.xlu1 %v9825_v23, %s10953_s7  ;;  %1705 = vrot.lane.b32.xlu0 %v9716_v58, %s10951_s14  ;;  %v2630_v6 = vsel %vm16003_vm5, %v2575_v53, %v16313_v14  ;;  %v2467_v49 = vsel %vm2439_vm2, %v10865_v54, %v16314_v39 }
 0x302   : > { %v2522_v7 = vsel %vm16005_vm3, %v2467_v49, %v16315_v61  ;;  %v252_v49 = vld [vmem:[%s11047_s9 + $0xe8] sm:$0x3] }
 0x303   : > { %v2326_v33 = vpop.permute.xlu1 %2325  ;;  %v2324_v42 = vpop.permute.xlu0 %2323  ;;  %v2577_v34 = vsel %vm16004_vm4, %v2522_v7, %v16316_v1 }
 0x304   : > { %v2849_v10 = vsel %vm2824_vm9, %v2794_v56, %v2326_v33  ;;  %v2848_v52 = vsel %vm2824_vm9, %v2793_v46, %v2324_v42  ;;  %v2632_v43 = vsel %vm16003_vm5, %v2577_v34, %v16317_v51  ;;  %v249_v33 = vld [vmem:[%s11047_s9 + $0xd0] sm:$0x3] }
 0x305   : > { %v3272_v45 = vcombine.high %v2849_v10, %v2849_v10  ;;  %v3279_v47 = vrot.slane %v2849_v10, %v12200_v17  ;;  %v3271_v41 = vrot.slane %v2848_v52, %v12200_v17  ;;  %2355 = vrot.lane.b32.xlu1 %v12850_v37, %s10957_s12  ;;  %1921 = vrot.lane.b32.xlu0 %v9770_v9, %s10954_s8  ;;  %v9774_v9 = vld [vmem:[%s11047_s9 + $0x180] sm:$0xff] }
 0x306   : > { %v9828_v10 = vld [vmem:[%s11047_s9 + $0x181] sm:$0xff] }
 0x307   : > { %v3286_v5 = vrot.slane %v3272_v45, %v12200_v17  ;;  %v3287_v16 = vcombine.high %v3279_v47, %v3279_v47  ;;  %v3989_v60 = vcombine.low %v3264_v44, %v3271_v41  ;;  %v1896_v4 = vpop.permute.xlu1 %1895  ;;  %v1680_v2 = vpop.permute.xlu0 %1679  ;;  %v9719_v52 = vld [vmem:[%s11047_s9 + $0x162] sm:$0x3] }
 0x308   : > { %v2685_v35 = vsel %vm16047_vm6, %v2630_v6, %v1680_v2  ;;  %v16320_v2 = vld [vmem:[#allocation116_spill] sm:$0xff] }
 0x309   : > { %v3288_v36 = vcombine.high %v3286_v5, %v3286_v5  ;;  %v4005_v30 = vcombine.low %v3279_v47, %v3287_v16  ;;  %v4003_v12 = vrot.slane %v3989_v60, %v12200_v17  ;;  %2137 = vrot.lane.b32.xlu1 %v9824_v57, %s10953_s7  ;;  %1709 = vrot.lane.b32.xlu0 %v12803_v18, %s10951_s14  ;;  %v16318_v57 = vld [vmem:[#allocation24_spill] sm:$0xff]  ;;  %v12931_v60 = vld [vmem:[%s11047_s9 + $0x182] sm:$0xff] }
 0x30a   : > { %v2740_v40 = vsel %vm16044_vm7, %v2685_v35, %v1896_v4  ;;  %v9773_v4 = vld [vmem:[%s11047_s9 + $0x178] sm:$0x3] }
 0x30b   : > { %v4006_v0 = vcombine.low %v3286_v5, %v3288_v36  ;;  %v2328_v55 = vpop.permute.xlu1 %2327  ;;  %v2112_v63 = vpop.permute.xlu0 %2111  ;;  %v4004_v20 = vcombine.low %v3996_v38, %v4003_v12  ;;  %v4013_v48 = vrot.slane %v4005_v30, %v12200_v17  ;;  %v16319_v5 = vld [vmem:[#allocation70_spill] sm:$0xff]  ;;  %v16321_v30 = vld [vmem:[#allocation159_spill] sm:$0xff] }
 0x30c   : > { %v2795_v21 = vsel %vm16043_vm8, %v2740_v40, %v2112_v63  ;;  %v16322_v63 = vld [vmem:[#allocation26_spill] sm:$0xff] }
 0x30d   : > { %v4020_v23 = vrot.slane %v4006_v0, %v12200_v17  ;;  %v2850_v58 = vsel %vm2824_vm9, %v2795_v21, %v2328_v55  ;;  %2353 = vrot.lane.b32.xlu1 %v9878_v27, %s10957_s12  ;;  %1925 = vrot.lane.b32.xlu0 %v9772_v13, %s10954_s8  ;;  %v10866_v55 = vld [vmem:[%s11047_s9 + $0xe0] sm:$0xff]  ;;  %v9827_v21 = vld [vmem:[%s11047_s9 + $0x179] sm:$0x3] }
 0x30e   : > { %v3289_v18 = vcombine.high %v2850_v58, %v2850_v58  ;;  %v3296_v32 = vrot.slane %v2850_v58, %v12200_v17  ;;  %10120 = vmatmul.mubr.msk.f32.gmra.mrb[34].mxu0 %vm16038_vm10, %v4004_v20  ;;  %v2468_v40 = vsel %vm2439_vm2, %v10866_v55, %v16322_v63  ;;  %v10870_v63 = vld [vmem:[%s11047_s9 + $0x110] sm:$0xff] }
 0x30f   : > { %v1900_v59 = vpop.permute.xlu1 %1899  ;;  %v1684_v26 = vpop.permute.xlu0 %1683  ;;  %10122 = vmatprep.mubr.msk.f32.mxu0 %vm16034_vm1, %v16244_v31  ;;  %v4021_v62 = vcombine.low %v4013_v48, %v4020_v23  ;;  %v16323_v48 = vld [vmem:[#allocation72_spill] sm:$0xff] }
 0x310   : > { %v3303_v29 = vrot.slane %v3289_v18, %v12200_v17  ;;  %v3304_v24 = vcombine.high %v3296_v32, %v3296_v32  ;;  %v2687_v28 = vsel %vm16047_vm6, %v2632_v43, %v1684_v26  ;;  %v2523_v23 = vsel %vm16005_vm3, %v2468_v40, %v16323_v48  ;;  %v16333_v40 = vld [vmem:[#allocation32_spill] sm:$0xff] }
 0x311   : > { %2357 = vrot.lane.b32.xlu1 %v12888_v50, %s10957_s12  ;;  %2141 = vrot.lane.b32.xlu0 %v9826_v8, %s10953_s7  ;;  %v2742_v22 = vsel %vm16044_vm7, %v2687_v28, %v1900_v59  ;;  %v16324_v8 = vld [vmem:[#allocation118_spill] sm:$0xff]  ;;  %v16325_v59 = vld [vmem:[#allocation161_spill] sm:$0xff] }
 0x312   : > { %v3305_v15 = vcombine.high %v3303_v29, %v3303_v29  ;;  %v4022_v11 = vcombine.low %v3296_v32, %v3304_v24  ;;  %10123 = vmatmul.mubr.msk.f32.gmra.mrb[36].mxu0 %vm16038_vm10, %v4021_v62  ;;  %v2578_v54 = vsel %vm16004_vm4, %v2523_v23, %v16324_v8  ;;  %v9775_v24 = vld [vmem:[%s11047_s9 + $0x188] sm:$0xff] }
 0x313   : > { %v2116_v25 = vpop.permute.xlu1 %2115  ;;  %v1682_v56 = vpop.permute.xlu0 %1681  ;;  %10125 = vmatprep.mubr.msk.f32.mxu0 %vm16034_vm1, %v16244_v31  ;;  %v2633_v26 = vsel %vm16003_vm5, %v2578_v54, %v16325_v59  ;;  %v10871_v23 = vld [vmem:[%s11047_s9 + $0x128] sm:$0xff] }
 0x314   : > { %v4023_v46 = vcombine.low %v3303_v29, %v3305_v15  ;;  %v4030_v42 = vrot.slane %v4022_v11, %v12200_v17  ;;  %v2797_v45 = vsel %vm16043_vm8, %v2742_v22, %v2116_v25  ;;  %v9881_v29 = vld [vmem:[%s11047_s9 + $0x17a] sm:$0x3]  ;;  %v16326_v15 = vld [vmem:[#allocation25_spill] sm:$0xff]  ;;  %v258_v22 = vld [vmem:[%s11047_s9 + $0x118] sm:$0x3] }
 0x315   : > { %1929 = vrot.lane.b32.xlu1 %v9774_v9, %s10954_s8  ;;  %1713 = vrot.lane.b32.xlu0 %v12850_v37, %s10951_s14  ;;  %v2466_v37 = vsel %vm2439_vm2, %v249_v33, %v16318_v57  ;;  %v12969_v11 = vsel %vm2439_vm2, %v252_v49, %v16326_v15  ;;  %v255_v9 = vld [vmem:[%s11047_s9 + $0x100] sm:$0x3]  ;;  %v16327_v33 = vld [vmem:[#allocation27_spill] sm:$0xff]  ;;  %v10869_v57 = vld [vmem:[%s11047_s9 + $0x108] sm:$0xff] }
 0x316   : > { %v4037_v44 = vrot.slane %v4023_v46, %v12200_v17  ;;  %v2521_v16 = vsel %vm16005_vm3, %v2466_v37, %v16319_v5  ;;  %v10867_v46 = vld [vmem:[%s11047_s9 + $0xf8] sm:$0xff]  ;;  %v16329_v37 = vld [vmem:[#allocation29_spill] sm:$0xff]  ;;  %v16336_v8 = vld [vmem:[#allocation34_spill] sm:$0xff] }
 0x317   : > { %v2332_v47 = vpop.permute.xlu1 %2331  ;;  %v1898_v41 = vpop.permute.xlu0 %1897  ;;  %v2576_v35 = vsel %vm16004_vm4, %v2521_v16, %v16320_v2  ;;  %v16337_v49 = vld [vmem:[#allocation163_spill] sm:$0xff] }
 0x318   : > { %v2852_v19 = vsel %vm2824_vm9, %v2797_v45, %v2332_v47  ;;  %v4038_v53 = vcombine.low %v4030_v42, %v4037_v44  ;;  %v2631_v12 = vsel %vm16003_vm5, %v2576_v35, %v16321_v30  ;;  %v12981_v42 = vsel %vm2439_vm2, %v10867_v46, %v16327_v33  ;;  %v12986_v45 = vld [vmem:[%s11047_s9 + $0x18a] sm:$0xff]  ;;  %v10875_v46 = vld [vmem:[%s11047_s9 + $0x158] sm:$0xff] }
 0x319   : > { %v3313_v14 = vcombine.high %v2852_v19, %v2852_v19  ;;  %v3320_v6 = vrot.slane %v2852_v19, %v12200_v17  ;;  %2145 = vrot.lane.b32.xlu1 %v9828_v10, %s10953_s7  ;;  %1711 = vrot.lane.b32.xlu0 %v9719_v52, %s10951_s14  ;;  %v2686_v27 = vsel %vm16047_vm6, %v2631_v12, %v1682_v56  ;;  %v9829_v47 = vld [vmem:[%s11047_s9 + $0x189] sm:$0xff]  ;;  %v16328_v19 = vld [vmem:[#allocation28_spill] sm:$0xff] }
 0x31a   : > { %10126 = vmatmul.mubr.msk.f32.gmra.mrb[38].mxu0 %vm16038_vm10, %v4038_v53  ;;  %v2741_v20 = vsel %vm16044_vm7, %v2686_v27, %v1898_v41  ;;  %v10868_v41 = vld [vmem:[%s11047_s9 + $0xf0] sm:$0xff] }
 0x31b   : > { %v2114_v38 = vpop.permute.xlu1 %2113  ;;  %v1686_v36 = vpop.permute.xlu0 %1685  ;;  %10128 = vmatprep.mubr.msk.f32.mxu0 %vm16034_vm1, %v16244_v31  ;;  %v3327_v13 = vrot.slane %v3313_v14, %v12200_v17  ;;  %v3328_v0 = vcombine.high %v3320_v6, %v3320_v6  ;;  %v2470_v53 = vsel %vm2439_vm2, %v10868_v41, %v16328_v19  ;;  %v12995_v14 = vsel %vm2439_vm2, %v10869_v57, %v16329_v37  ;;  %v261_v35 = vld [vmem:[%s11047_s9 + $0x130] sm:$0x3]  ;;  %v10877_v19 = vld [vmem:[%s11047_s9 + $0x168] sm:$0xff] }
 0x31c   : > { %v2796_v58 = vsel %vm16043_vm8, %v2741_v20, %v2114_v38  ;;  %v2688_v7 = vsel %vm16047_vm6, %v2633_v26, %v1686_v36  ;;  %v264_v38 = vld [vmem:[%s11047_s9 + $0x148] sm:$0x3]  ;;  %v13015_v20 = vsel %vm2439_vm2, %v10870_v63, %v16333_v40  ;;  %v16342_v33 = vld [vmem:[#allocation39_spill] sm:$0xff] }
 0x31d   : > { %2361 = vrot.lane.b32.xlu1 %v12931_v60, %s10957_s12  ;;  %1927 = vrot.lane.b32.xlu0 %v9773_v4, %s10954_s8  ;;  %v4040_v62 = vcombine.low %v3328_v0, %v3327_v13  ;;  %v3329_v10 = vcombine.high %v3327_v13, %v3327_v13  ;;  %v16331_v36 = vld [vmem:[#allocation74_spill] sm:$0xff]  ;;  %v16332_v0 = vld [vmem:[#allocation31_spill] sm:$0xff] }
 0x31e   : > { %v2525_v30 = vsel %vm16005_vm3, %v2470_v53, %v16331_v36  ;;  %v13010_v55 = vsel %vm2439_vm2, %v258_v22, %v16332_v0  ;;  %v2483_v22 = vsel %vm2439_vm2, %v10875_v46, %v16342_v33  ;;  %v16344_v53 = vld [vmem:[#allocation41_spill] sm:$0xff]  ;;  %v16345_v37 = vld [vmem:[#allocation42_spill] sm:$0xff]  ;;  %v16347_v36 = vld [vmem:[#allocation44_spill] sm:$0xff] }
 0x31f   : > { %v2330_v18 = vpop.permute.xlu1 %2329  ;;  %v1902_v32 = vpop.permute.xlu0 %1901  ;;  %v4054_v28 = vrot.slane %v4040_v62, %v12200_v17  ;;  %v9722_v62 = vld [vmem:[%s11047_s9 + $0x17a] sm:$0x3]  ;;  %v2485_v57 = vsel %vm2439_vm2, %v10877_v19, %v16344_v53  ;;  %v9776_v63 = vld [vmem:[%s11047_s9 + $0x190] sm:$0x3]  ;;  %v10879_v40 = vld [vmem:[%s11047_s9 + $0x188] sm:$0xff] }
 0x320   : > { %v2851_v39 = vsel %vm2824_vm9, %v2796_v58, %v2330_v18  ;;  %v2743_v34 = vsel %vm16044_vm7, %v2688_v7, %v1902_v32  ;;  %v16335_v58 = vld [vmem:[#allocation33_spill] sm:$0xff]  ;;  %v16338_v7 = vld [vmem:[#allocation35_spill] sm:$0xff]  ;;  %v9777_v0 = vld [vmem:[%s11047_s9 + $0x198] sm:$0xff] }
 0x321   : > { %v3312_v61 = vrot.slane %v2851_v39, %v12200_v17  ;;  %2143 = vrot.lane.b32.xlu1 %v9827_v21, %s10953_s7  ;;  %1715 = vrot.lane.b32.xlu0 %v12888_v50, %s10951_s14  ;;  %v16334_v21 = vld [vmem:[#allocation120_spill] sm:$0xff]  ;;  %v2477_v18 = vsel %vm2439_vm2, %v10871_v23, %v16335_v58  ;;  %v10872_v32 = vld [vmem:[%s11047_s9 + $0x120] sm:$0xff]  ;;  %v16357_v33 = vld [vmem:[#allocation78_spill] sm:$0xff] }
 0x322   : > { %v2580_v48 = vsel %vm16004_vm4, %v2525_v30, %v16334_v21  ;;  %v2476_v54 = vsel %vm2439_vm2, %v10872_v32, %v16336_v8  ;;  %v267_v39 = vld [vmem:[%s11047_s9 + $0x160] sm:$0x3]  ;;  %v10881_v32 = vld [vmem:[%s11047_s9 + $0x198] sm:$0xff]  ;;  %v16350_v8 = vld [vmem:[#allocation47_spill] sm:$0xff] }
 0x323   : > { %v4039_v1 = vcombine.low %v3312_v61, %v3320_v6  ;;  %v2334_v51 = vpop.permute.xlu1 %2333  ;;  %v2118_v43 = vpop.permute.xlu0 %2117  ;;  %v16330_v6 = vld [vmem:[#allocation30_spill] sm:$0xff]  ;;  %v2635_v59 = vsel %vm16003_vm5, %v2580_v48, %v16337_v49  ;;  %v10873_v61 = vld [vmem:[%s11047_s9 + $0x138] sm:$0xff]  ;;  %v16348_v21 = vld [vmem:[#allocation45_spill] sm:$0xff] }
 0x324   : > { %v2798_v50 = vsel %vm16043_vm8, %v2743_v34, %v2118_v43  ;;  %v12999_v5 = vsel %vm2439_vm2, %v255_v9, %v16330_v6  ;;  %v16340_v34 = vld [vmem:[#allocation37_spill] sm:$0xff]  ;;  %v270_v43 = vld [vmem:[%s11047_s9 + $0x178] sm:$0x3]  ;;  %v2484_v6 = vsel %vm2439_vm2, %v267_v39, %v16345_v37  ;;  %v2489_v48 = vsel %vm2439_vm2, %v10879_v40, %v16348_v21  ;;  %v9830_v19 = vld [vmem:[%s11047_s9 + $0x191] sm:$0x3] }
 0x325   : > { %v4047_v25 = vrot.slane %v4039_v1, %v12200_v17  ;;  %v2853_v56 = vsel %vm2824_vm9, %v2798_v50, %v2334_v51  ;;  %2359 = vrot.lane.b32.xlu1 %v9881_v29, %s10957_s12  ;;  %1931 = vrot.lane.b32.xlu0 %v9775_v24, %s10954_s8  ;;  %v2479_v29 = vsel %vm2439_vm2, %v10873_v61, %v16338_v7  ;;  %v16339_v24 = vld [vmem:[#allocation36_spill] sm:$0xff]  ;;  %v10880_v23 = vld [vmem:[%s11047_s9 + $0x180] sm:$0xff]  ;;  %v16352_v61 = vld [vmem:[#allocation71_spill] sm:$0xff] }
 0x326   : > { %v3330_v52 = vcombine.high %v2853_v56, %v2853_v56  ;;  %v3337_v44 = vrot.slane %v2853_v56, %v12200_v17  ;;  %v2478_v1 = vsel %vm2439_vm2, %v261_v35, %v16339_v24  ;;  %v2481_v51 = vsel %vm2439_vm2, %v264_v38, %v16340_v34  ;;  %v10878_v38 = vld [vmem:[%s11047_s9 + $0x170] sm:$0xff]  ;;  %v16353_v24 = vld [vmem:[#allocation73_spill] sm:$0xff]  ;;  %v16367_v21 = vld [vmem:[#allocation86_spill] sm:$0xff] }
 0x327   : > { %v1906_v16 = vpop.permute.xlu1 %1905  ;;  %v1690_v4 = vpop.permute.xlu0 %1689  ;;  %v4055_v2 = vcombine.low %v4047_v25, %v4054_v28  ;;  %v10874_v28 = vld [vmem:[%s11047_s9 + $0x140] sm:$0xff]  ;;  %v16341_v25 = vld [vmem:[#allocation38_spill] sm:$0xff]  ;;  %v2486_v30 = vsel %vm2439_vm2, %v10878_v38, %v16347_v36  ;;  %v2491_v39 = vsel %vm2439_vm2, %v10881_v32, %v16350_v8  ;;  %v2524_v7 = vsel %vm16005_vm3, %v12969_v11, %v16352_v61  ;;  %v16368_v32 = vld [vmem:[#allocation87_spill] sm:$0xff] }
 0x328   : > { %v13006_v12 = vrot.slane %v3330_v52, %v12200_v17  ;;  %v3345_v27 = vcombine.high %v3337_v44, %v3337_v44  ;;  %v4056_v13 = vcombine.low %v3329_v10, %v3337_v44  ;;  %v2690_v15 = vsel %vm16047_vm6, %v2635_v59, %v1690_v4  ;;  %v10876_v44 = vld [vmem:[%s11047_s9 + $0x150] sm:$0xff]  ;;  %v16356_v11 = vld [vmem:[#allocation77_spill] sm:$0xff]  ;;  %v16369_v8 = vld [vmem:[#allocation88_spill] sm:$0xff] }
 0x329   : > { %2363 = vrot.lane.b32.xlu1 %v12986_v45, %s10957_s12  ;;  %2147 = vrot.lane.b32.xlu0 %v9829_v47, %s10953_s7  ;;  %v2480_v56 = vsel %vm2439_vm2, %v10874_v28, %v16341_v25  ;;  %v16343_v47 = vld [vmem:[#allocation40_spill] sm:$0xff]  ;;  %v273_v4 = vld [vmem:[%s11047_s9 + $0x190] sm:$0x3]  ;;  %v2526_v34 = vsel %vm16005_vm3, %v12981_v42, %v16353_v24  ;;  %v2530_v42 = vsel %vm16005_vm3, %v13010_v55, %v16356_v11  ;;  %v16360_v53 = vld [vmem:[#allocation81_spill] sm:$0xff] }
 0x32a   : > { %v4057_v26 = vcombine.low %v3345_v27, %v13006_v12  ;;  %10129 = vmatmul.mubr.msk.f32.gmra.mrb[40].mxu0 %vm16038_vm10, %v4055_v2  ;;  %v4064_v10 = vrot.slane %v4056_v13, %v12200_v17  ;;  %v2482_v41 = vsel %vm2439_vm2, %v10876_v44, %v16343_v47  ;;  %v16346_v2 = vld [vmem:[#allocation43_spill] sm:$0xff]  ;;  %v2745_v27 = vsel %vm16044_vm7, %v2690_v15, %v1906_v16  ;;  %v16355_v28 = vld [vmem:[#allocation76_spill] sm:$0xff]  ;;  %v16363_v38 = vld [vmem:[#allocation117_spill] sm:$0xff] }
 0x32b   : > { %v2122_v9 = vpop.permute.xlu1 %2121  ;;  %v1688_v50 = vpop.permute.xlu0 %1687  ;;  %10131 = vmatprep.mubr.msk.f32.mxu0 %vm16034_vm1, %v16244_v31  ;;  %v2487_v35 = vsel %vm2439_vm2, %v270_v43, %v16346_v2  ;;  %v16354_v15 = vld [vmem:[#allocation75_spill] sm:$0xff]  ;;  %v2527_v25 = vsel %vm16005_vm3, %v12999_v5, %v16355_v28  ;;  %v16359_v44 = vld [vmem:[#allocation80_spill] sm:$0xff]  ;;  %v2534_v37 = vsel %vm16005_vm3, %v2479_v29, %v16360_v53  ;;  %v16377_v53 = vld [vmem:[#allocation94_spill] sm:$0xff] }
 0x32c   : > { %v4071_v52 = vrot.slane %v4057_v26, %v12200_v17  ;;  %v2800_v49 = vsel %vm16043_vm8, %v2745_v27, %v2122_v9  ;;  %v16351_v26 = vld [vmem:[#allocation48_spill] sm:$0xff]  ;;  %v2528_v9 = vsel %vm16005_vm3, %v12995_v14, %v16354_v15  ;;  %v2531_v5 = vsel %vm16005_vm3, %v2476_v54, %v16359_v44  ;;  %v16362_v2 = vld [vmem:[#allocation83_spill] sm:$0xff] }
 0x32d   : > { %1719 = vrot.lane.b32.xlu1 %v12931_v60, %s10951_s14  ;;  %1717 = vrot.lane.b32.xlu0 %v9722_v62, %s10951_s14  ;;  %v16349_v60 = vld [vmem:[#allocation46_spill] sm:$0xff]  ;;  %v2490_v62 = vsel %vm2439_vm2, %v273_v4, %v16351_v26  ;;  %v9831_v47 = vld [vmem:[%s11047_s9 + $0x199] sm:$0xff]  ;;  %v16372_v24 = vld [vmem:[#allocation91_spill] sm:$0xff] }
 0x32e   : > { %v4072_v13 = vcombine.low %v4064_v10, %v4071_v52  ;;  %v2488_v58 = vsel %vm2439_vm2, %v10880_v23, %v16349_v60  ;;  %v2529_v10 = vsel %vm16005_vm3, %v13015_v20, %v16357_v33  ;;  %v16358_v52 = vld [vmem:[#allocation79_spill] sm:$0xff]  ;;  %v16361_v4 = vld [vmem:[#allocation82_spill] sm:$0xff]  ;;  %v2536_v20 = vsel %vm16005_vm3, %v2481_v51, %v16362_v2  ;;  %v16364_v27 = vld [vmem:[#allocation84_spill] sm:$0xff] }
 0x32f   : > { %v2338_v59 = vpop.permute.xlu1 %2337  ;;  %v1904_v16 = vpop.permute.xlu0 %1903  ;;  %v2532_v14 = vsel %vm16005_vm3, %v2477_v18, %v16358_v52  ;;  %v2533_v55 = vsel %vm16005_vm3, %v2478_v1, %v16361_v4  ;;  %v2579_v18 = vsel %vm16004_vm4, %v2524_v7, %v16363_v38  ;;  %v16366_v29 = vld [vmem:[#allocation160_spill] sm:$0xff]  ;;  %v2537_v51 = vsel %vm16005_vm3, %v2482_v41, %v16367_v21  ;;  %v9884_v41 = vld [vmem:[%s11047_s9 + $0x192] sm:$0x3]  ;;  %v16375_v33 = vld [vmem:[#allocation162_spill] sm:$0xff] }
 0x330   : > { %v2855_v43 = vsel %vm2824_vm9, %v2800_v49, %v2338_v59  ;;  %10132 = vmatmul.mubr.msk.f32.gmra.mrb[42].mxu0 %vm16038_vm10, %v4072_v13  ;;  %v2535_v13 = vsel %vm16005_vm3, %v2480_v56, %v16364_v27  ;;  %v2634_v40 = vsel %vm16003_vm5, %v2579_v18, %v16366_v29  ;;  %v2540_v56 = vsel %vm16005_vm3, %v2485_v57, %v16368_v32  ;;  %v16370_v49 = vld [vmem:[#allocation89_spill] sm:$0xff]  ;;  %v16373_v15 = vld [vmem:[#allocation119_spill] sm:$0xff]  ;;  %v16374_v11 = vld [vmem:[#allocation92_spill] sm:$0xff] }
 0x331   : > { %v3361_v46 = vrot.slane %v2855_v43, %v12200_v17  ;;  %1935 = vrot.lane.b32.xlu1 %v9777_v0, %s10954_s8  ;;  %1933 = vrot.lane.b32.xlu0 %v9776_v63, %s10954_s8  ;;  %v16365_v0 = vld [vmem:[#allocation85_spill] sm:$0xff]  ;;  %v3354_v1 = vcombine.high %v2855_v43, %v2855_v43  ;;  %v2689_v23 = vsel %vm16047_vm6, %v2634_v40, %v1688_v50  ;;  %v16371_v50 = vld [vmem:[#allocation90_spill] sm:$0xff]  ;;  %v16380_v27 = vld [vmem:[#allocation123_spill] sm:$0xff] }
 0x332   : > { %10134 = vmatprep.mubr.msk.f32.mxu0 %vm16034_vm1, %v16244_v31  ;;  %v2538_v63 = vsel %vm16005_vm3, %v2483_v22, %v16365_v0  ;;  %v2539_v22 = vsel %vm16005_vm3, %v2484_v6, %v16369_v8  ;;  %v2542_v59 = vsel %vm16005_vm3, %v2487_v35, %v16370_v49  ;;  %v2744_v26 = vsel %vm16044_vm7, %v2689_v23, %v1904_v16  ;;  %v13143_v61 = vld [vmem:[%s11047_s9 + $0x19a] sm:$0xff]  ;;  %v16383_v8 = vld [vmem:[#allocation126_spill] sm:$0xff]  ;;  %v16384_v49 = vld [vmem:[#allocation127_spill] sm:$0xff] }
 0x333   : > { %v2120_v36 = vpop.permute.xlu1 %2119  ;;  %v1692_v54 = vpop.permute.xlu0 %1691  ;;  %v3369_v60 = vcombine.high %v3361_v46, %v3361_v46  ;;  %v2541_v7 = vsel %vm16005_vm3, %v2486_v30, %v16371_v50  ;;  %v13150_v43 = vsel %vm16005_vm3, %v2489_v48, %v16372_v24  ;;  %v2581_v57 = vsel %vm16004_vm4, %v2526_v34, %v16373_v15  ;;  %v16378_v2 = vld [vmem:[#allocation121_spill] sm:$0xff] }
 0x334   : > { %v2799_v6 = vsel %vm16043_vm8, %v2744_v26, %v2120_v36  ;;  %v2543_v16 = vsel %vm16005_vm3, %v2488_v58, %v16374_v11  ;;  %v2636_v52 = vsel %vm16003_vm5, %v2581_v57, %v16375_v33  ;;  %v3368_v30 = vrot.slane %v3354_v1, %v12200_v17  ;;  %v9778_v18 = vld [vmem:[%s11047_s9 + $0x1a0] sm:$0xff]  ;;  %v16385_v26 = vld [vmem:[#allocation128_spill] sm:$0xff] }
 0x335   : > { %2151 = vrot.lane.b32.xlu1 %v9831_v47, %s10953_s7  ;;  %2149 = vrot.lane.b32.xlu0 %v9830_v19, %s10953_s7  ;;  %v4074_v48 = vcombine.low %v3361_v46, %v3369_v60  ;;  %v3346_v47 = vcombine.high %v13006_v12, %v13006_v12  ;;  %v16376_v19 = vld [vmem:[#allocation93_spill] sm:$0xff]  ;;  %v2545_v4 = vsel %vm16005_vm3, %v2490_v62, %v16377_v53  ;;  %v16379_v12 = vld [vmem:[#allocation122_spill] sm:$0xff]  ;;  %v16381_v62 = vld [vmem:[#allocation124_spill] sm:$0xff] }
 0x336   : > { %v2546_v58 = vsel %vm16005_vm3, %v2491_v39, %v16376_v19  ;;  %v2583_v38 = vsel %vm16004_vm4, %v2528_v9, %v16378_v2  ;;  %v2691_v46 = vsel %vm16047_vm6, %v2636_v52, %v1692_v54  ;;  %v2582_v36 = vsel %vm16004_vm4, %v2527_v25, %v16379_v12  ;;  %v16382_v9 = vld [vmem:[#allocation125_spill] sm:$0xff]  ;;  %v16389_v52 = vld [vmem:[#allocation132_spill] sm:$0xff]  ;;  %v16392_v2 = vld [vmem:[#allocation135_spill] sm:$0xff] }
 0x337   : > { %v2336_v28 = vpop.permute.xlu1 %2335  ;;  %v1908_v35 = vpop.permute.xlu0 %1907  ;;  %v2585_v0 = vsel %vm16004_vm4, %v2530_v42, %v16380_v27  ;;  %v2584_v21 = vsel %vm16004_vm4, %v2529_v10, %v16381_v62  ;;  %v2587_v54 = vsel %vm16004_vm4, %v2532_v14, %v16382_v9  ;;  %v3370_v23 = vcombine.high %v3368_v30, %v3368_v30  ;;  %v13199_v24 = vld [vmem:[%s11047_s9 + $0x1a2] sm:$0xff]  ;;  %v9894_v57 = vld [vmem:[%s15995_s2] ss:$0 sm:$0xff] }
 0x338   : > { %v2854_v44 = vsel %vm2824_vm9, %v2799_v6, %v2336_v28  ;;  %v2746_v40 = vsel %vm16044_vm7, %v2691_v46, %v1908_v35  ;;  %v4088_v25 = vrot.slane %v4074_v48, %v12200_v17  ;;  %v2586_v10 = vsel %vm16004_vm4, %v2531_v5, %v16383_v8  ;;  %v9832_v15 = vld [vmem:[%s11047_s9 + $0x1a1] sm:$0xff]  ;;  %v16388_v35 = vld [vmem:[#allocation131_spill] sm:$0xff] }
 0x339   : > { %v3353_v34 = vrot.slane %v2854_v44, %v12200_v17  ;;  %2367 = vrot.lane.b32.xlu1 %v13143_v61, %s10957_s12  ;;  %2365 = vrot.lane.b32.xlu0 %v9884_v41, %s10957_s12  ;;  %v2589_v14 = vsel %vm16004_vm4, %v2534_v37, %v16384_v49  ;;  %v2588_v41 = vsel %vm16004_vm4, %v2533_v55, %v16385_v26  ;;  %v16386_v6 = vld [vmem:[#allocation129_spill] sm:$0xff]  ;;  %v16387_v28 = vld [vmem:[#allocation130_spill] sm:$0xff]  ;;  %v16401_v49 = vld [vmem:[#allocation167_spill] sm:$0xff] }
 0x33a   : > { %v2590_v5 = vsel %vm16004_vm4, %v2535_v13, %v16387_v28  ;;  %v2593_v37 = vsel %vm16004_vm4, %v2538_v63, %v16388_v35  ;;  %v2592_v44 = vsel %vm16004_vm4, %v2537_v51, %v16389_v52  ;;  %v4090_v48 = vcombine.low %v3368_v30, %v3370_v23  ;;  %v16390_v19 = vld [vmem:[#allocation133_spill] sm:$0xff]  ;;  %v16393_v30 = vld [vmem:[#allocation136_spill] sm:$0xff] }
 0x33b   : > { %v4073_v29 = vcombine.low %v3346_v47, %v3353_v34  ;;  %v2340_v39 = vpop.permute.xlu1 %2339  ;;  %v2124_v1 = vpop.permute.xlu0 %2123  ;;  %v13215_v53 = vsel %vm16004_vm4, %v2540_v56, %v16390_v19  ;;  %v3682_v63 = vcombine.high %v9894_v57, %v9894_v57  ;;  %v13226_v51 = vsel %vm16004_vm4, %v2542_v59, %v16392_v2  ;;  %v16394_v12 = vld [vmem:[#allocation137_spill] sm:$0xff]  ;;  %v16406_v19 = vld [vmem:[#allocation172_spill] sm:$0xff] }
 0x33c   : > { %v2801_v60 = vsel %vm16043_vm8, %v2746_v40, %v2124_v1  ;;  %v13230_v46 = vsel %vm16004_vm4, %v2541_v7, %v16393_v30  ;;  %v13240_v27 = vsel %vm16004_vm4, %v13150_v43, %v16394_v12  ;;  %v16396_v40 = vld [vmem:[#allocation139_spill] sm:$0xff]  ;;  %v16398_v43 = vld [vmem:[#allocation164_spill] sm:$0xff]  ;;  %v2639_v26 = vsel %vm16003_vm5, %v2584_v21, %v16401_v49 }
 0x33d   : > { %v4081_v42 = vrot.slane %v4073_v29, %v12200_v17  ;;  %v2856_v32 = vsel %vm2824_vm9, %v2801_v60, %v2340_v39  ;;  %1937 = vrot.lane.b32.xlu1 %v9778_v18, %s10954_s8  ;;  %1721 = vrot.lane.b32.xlu0 %v12986_v45, %s10951_s14  ;;  %v2591_v45 = vsel %vm16004_vm4, %v2536_v20, %v16386_v6  ;;  %v16391_v20 = vld [vmem:[#allocation134_spill] sm:$0xff]  ;;  %v9725_v18 = vld [vmem:[%s11047_s9 + $0x192] sm:$0x3]  ;;  %v16397_v39 = vld [vmem:[#allocation140_spill] sm:$0xff] }
 0x33e   : > { %v3378_v50 = vrot.slane %v2856_v32, %v12200_v17  ;;  %v3371_v47 = vcombine.high %v2856_v32, %v2856_v32  ;;  %v13219_v13 = vsel %vm16004_vm4, %v2539_v22, %v16391_v20  ;;  %v13235_v22 = vrot.slane %v9894_v57, %v12200_v17  ;;  %v16395_v29 = vld [vmem:[#allocation138_spill] sm:$0xff]  ;;  %v16405_v21 = vld [vmem:[#allocation171_spill] sm:$0xff] }
 0x33f   : > { %v1696_v11 = vpop.permute.xlu1 %1695  ;;  %v1694_v55 = vpop.permute.xlu0 %1693  ;;  %v4089_v33 = vcombine.low %v4081_v42, %v4088_v25  ;;  %v13244_v59 = vsel %vm16004_vm4, %v2543_v16, %v16395_v29  ;;  %v13248_v7 = vsel %vm16004_vm4, %v2546_v58, %v16396_v40  ;;  %v13252_v1 = vsel %vm16004_vm4, %v2545_v4, %v16397_v39  ;;  %v16399_v25 = vld [vmem:[#allocation165_spill] sm:$0xff]  ;;  %v16400_v42 = vld [vmem:[#allocation166_spill] sm:$0xff]  ;;  %v16409_v30 = vld [vmem:[#allocation175_spill] sm:$0xff] }
 0x340   : > { %v3386_v34 = vcombine.high %v3378_v50, %v3378_v50  ;;  %v2638_v23 = vsel %vm16003_vm5, %v2583_v38, %v16398_v43  ;;  %v4098_v16 = vrot.slane %v4090_v48, %v12200_v17  ;;  %v3385_v60 = vrot.slane %v3371_v47, %v12200_v17  ;;  %v9779_v6 = vld [vmem:[%s11047_s9 + $0x1a8] sm:$0x3]  ;;  %v9834_v40 = vld [vmem:[%s11047_s9 + $0x1b1] sm:$0xff] }
 0x341   : > { %2369 = vrot.lane.b32.xlu1 %v13199_v24, %s10957_s12  ;;  %2153 = vrot.lane.b32.xlu0 %v9832_v15, %s10953_s7  ;;  %v2637_v4 = vsel %vm16003_vm5, %v2582_v36, %v16399_v25  ;;  %v13265_v32 = vsel %vm16003_vm5, %v2585_v0, %v16400_v42  ;;  %v13271_v38 = vrot.slane %v3682_v63, %v12200_v17  ;;  %v9780_v0 = vld [vmem:[%s11047_s9 + $0x1b0] sm:$0xff]  ;;  %v9833_v39 = vld [vmem:[%s11047_s9 + $0x1a9] sm:$0x3] }
 0x342   : > { %v4091_v56 = vcombine.low %v3378_v50, %v3386_v34  ;;  %10135 = vmatmul.mubr.msk.f32.gmra.mrb[44].mxu0 %vm16038_vm10, %v4089_v33  ;;  %v16402_v50 = vld [vmem:[#allocation168_spill] sm:$0xff]  ;;  %v3697_v28 = vcombine.high %v13235_v22, %v13235_v22  ;;  %v16404_v33 = vld [vmem:[#allocation170_spill] sm:$0xff]  ;;  %v13293_v48 = vsel %vm16003_vm5, %v2588_v41, %v16405_v21  ;;  %v13299_v20 = vsel %vm16003_vm5, %v2591_v45, %v16406_v19  ;;  %v16413_v21 = vld [vmem:[#allocation179_spill] sm:$0xff] }
 0x343   : > { %v1912_v62 = vpop.permute.xlu1 %1911  ;;  %v1910_v9 = vpop.permute.xlu0 %1909  ;;  %10137 = vmatprep.mubr.msk.f32.mxu0 %vm16034_vm1, %v16244_v31  ;;  %v13277_v15 = vsel %vm16003_vm5, %v2587_v54, %v16402_v50  ;;  %v13289_v52 = vsel %vm16003_vm5, %v2589_v14, %v16404_v33  ;;  %v3698_v34 = vcombine.high %v13271_v38, %v13271_v38  ;;  %v16408_v14 = vld [vmem:[#allocation174_spill] sm:$0xff]  ;;  %v3387_v41 = vcombine.high %v3385_v60, %v3385_v60 }
 0x344   : > { %v4105_v58 = vrot.slane %v4091_v56, %v12200_v17  ;;  %v13307_v2 = vsel %vm16003_vm5, %v2593_v37, %v16408_v14  ;;  %v13312_v56 = vsel %vm16003_vm5, %v2592_v44, %v16409_v30  ;;  %v2692_v45 = vsel %vm16047_vm6, %v2637_v4, %v1694_v55 }
 0x345   : > { %v4595_v8 = vpop.f32.mrb[0].mxu0  ;;  %1725 = vrot.lane.b32.xlu1 %v13143_v61, %s10951_s14  ;;  %1723 = vrot.lane.b32.xlu0 %v9725_v18, %s10951_s14  ;;  %v16403_v61 = vld [vmem:[#allocation169_spill] sm:$0xff]  ;;  %v2693_v18 = vsel %vm16047_vm6, %v2638_v23, %v1696_v11  ;;  %v2747_v37 = vsel %vm16044_vm7, %v2692_v45, %v1910_v9  ;;  %v4404_v44 = vcombine.low %v13235_v22, %v13235_v22 }
 0x346   : > { %v10070_v36 = vpop.f32.mrb[1].mxu0  ;;  %v4106_v57 = vcombine.low %v4098_v16, %v4105_v58  ;;  %v13285_v35 = vsel %vm16003_vm5, %v2586_v10, %v16403_v61  ;;  %v16407_v10 = vld [vmem:[#allocation173_spill] sm:$0xff]  ;;  %v2748_v12 = vsel %vm16044_vm7, %v2693_v18, %v1912_v62  ;;  %v4405_v43 = vcombine.low %v3697_v28, %v13271_v38  ;;  %v16412_v61 = vld [vmem:[#allocation178_spill] sm:$0xff]  ;;  %v16414_v18 = vld [vmem:[#allocation180_spill] sm:$0xff] }
 0x347   : > { %v2128_v54 = vpop.permute.xlu1 %2127  ;;  %v2126_v47 = vpop.permute.xlu0 %2125  ;;  %v13303_v63 = vsel %vm16003_vm5, %v2590_v5, %v16407_v10  ;;  %v4421_v9 = vcombine.low %v3698_v34, %v13235_v22  ;;  %v4387_v16 = vcombine.low %v13235_v22, %v3697_v28  ;;  %v4107_v58 = vcombine.low %v3385_v60, %v3387_v41  ;;  %v16410_v36 = vld [vmem:[#allocation176_spill] sm:$0xff]  ;;  %v16411_v60 = vld [vmem:[#allocation177_spill] sm:$0xff] }
 0x348   : > { %10138 = vmatmul.mubr.msk.f32.gmra.mrb[46].mxu0 %vm16038_vm10, %v4106_v57  ;;  %v2803_v11 = vsel %vm16043_vm8, %v2748_v12, %v2128_v54  ;;  %v2802_v55 = vsel %vm16043_vm8, %v2747_v37, %v2126_v47  ;;  %v4388_v42 = vcombine.low %v13271_v38, %v3698_v34  ;;  %v13341_v22 = vsel %vm16003_vm5, %v13215_v53, %v16410_v36  ;;  %v13349_v38 = vld [vmem:[%s11047_s9 + $0x1b2] sm:$0xff]  ;;  %v16415_v45 = vld [vmem:[#allocation181_spill] sm:$0xff]  ;;  %v16416_v12 = vld [vmem:[#allocation182_spill] sm:$0xff] }
 0x349   : > { %1941 = vrot.lane.b32.xlu1 %v9780_v0, %s10954_s8  ;;  %1939 = vrot.lane.b32.xlu0 %v9779_v6, %s10954_s8  ;;  %v4600_v5 = vpop.f32.mrb[2].mxu0  ;;  %v13346_v57 = vsel %vm16003_vm5, %v13219_v13, %v16411_v60  ;;  %v9887_v0 = vld [vmem:[%s11047_s9 + $0x1aa] sm:$0x3]  ;;  %v4412_v6 = vrot.slane %v4404_v44, %v12200_v17  ;;  %v4419_v28 = vrot.slane %v4405_v43, %v12200_v17  ;;  %v9889_v36 = vld [vmem:[%s11047_s9 + $0x1ba] sm:$0xff] }
 0x34a   : > { %v10073_v29 = vpop.f32.mrb[3].mxu0  ;;  %10140 = vmatprep.mubr.msk.f32.mxu0 %vm16034_vm1, %v16244_v31  ;;  %v13357_v33 = vsel %vm16003_vm5, %v13226_v51, %v16412_v61  ;;  %v13362_v53 = vsel %vm16003_vm5, %v13230_v46, %v16413_v21  ;;  %v4428_v34 = vrot.slane %v4421_v9, %v12200_v17  ;;  %v4115_v10 = vrot.slane %v4107_v58, %v12200_v17  ;;  %v9835_v60 = vld [vmem:[%s11047_s9 + $0x1b9] sm:$0xff] }
 0x34b   : > { %v2344_v23 = vpop.permute.xlu1 %2343  ;;  %v2342_v62 = vpop.permute.xlu0 %2341  ;;  %v4395_v14 = vrot.slane %v4387_v16, %v12200_v17  ;;  %v4402_v51 = vrot.slane %v4388_v42, %v12200_v17  ;;  %v13382_v5 = vsel %vm16003_vm5, %v13244_v59, %v16415_v45  ;;  %v13387_v37 = vsel %vm16003_vm5, %v13248_v7, %v16416_v12  ;;  %v9783_v12 = vld [vmem:[%s11047_s9 + $0x1c8] sm:$0xff] }
 0x34c   : > { %v2858_v25 = vsel %vm2824_vm9, %v2803_v11, %v2344_v23  ;;  %v2857_v4 = vsel %vm2824_vm9, %v2802_v55, %v2342_v62  ;;  %v13389_v29 = vcombine.low %v4412_v6, %v4419_v28  ;;  %v6179_v59 = vadd.s32 16, %v12189_v3 }
 0x34d   : > { %v3395_v8 = vcombine.high %v2858_v25, %v2858_v25  ;;  %v3402_v49 = vrot.slane %v2858_v25, %v12200_v17  ;;  %v3394_v50 = vrot.slane %v2857_v4, %v12200_v17  ;;  %2157 = vrot.lane.b32.xlu1 %v9834_v40, %s10953_s7  ;;  %2155 = vrot.lane.b32.xlu0 %v9833_v39, %s10953_s7  ;;  %v9781_v40 = vld [vmem:[%s11047_s9 + $0x1b8] sm:$0xff]  ;;  %v16417_v39 = vld [vmem:[#allocation183_spill] sm:$0xff]  ;;  %v13426_v21 = vadd.s32 4294967295, %v12189_v3 }
 0x34e   : > { %v13395_v44 = vsel %vm16003_vm5, %v13252_v1, %v16417_v39  ;;  %v13400_v7 = vcombine.low %v4428_v34, %v4419_v28  ;;  %v13402_v62 = vcombine.low %v4419_v28, %v4428_v34  ;;  %v13404_v9 = vcombine.low %v4428_v34, %v4395_v14 }
 0x34f   : > { %v4108_v54 = vcombine.low %v3394_v50, %v3402_v49  ;;  %v1914_v13 = vpop.permute.xlu1 %1913  ;;  %v1698_v47 = vpop.permute.xlu0 %1697  ;;  %v3409_v41 = vrot.slane %v3395_v8, %v12200_v17  ;;  %v3410_v30 = vcombine.high %v3402_v49, %v3402_v49  ;;  %16418 = vst [vmem:[#allocation143_spill] sm:$0xff] %v13395_v44  ;;  %v13412_v25 = vcombine.low %v4402_v51, %v4395_v14 }
 0x350   : > { %v2694_v19 = vsel %vm16047_vm6, %v2639_v26, %v1698_v47  ;;  %v13377_v26 = vsel %vm16003_vm5, %v13240_v27, %v16414_v18  ;;  %16419 = vst [vmem:[#allocation5_spill] sm:$0xff] %v13402_v62  ;;  %v13421_v61 = vcombine.low %v4395_v14, %v4402_v51  ;;  %vm6183_vm14 = vcmp.ge.s32.totalorder %v13426_v21, 0 }
 0x351   : > { %v4122_v46 = vrot.slane %v4108_v54, %v12200_v17  ;;  %2373 = vrot.lane.b32.xlu1 %v13349_v38, %s10957_s12  ;;  %2371 = vrot.lane.b32.xlu0 %v9887_v0, %s10957_s12  ;;  %v2749_v11 = vsel %vm16044_vm7, %v2694_v19, %v1914_v13  ;;  %v13406_v16 = vcombine.low %v3410_v30, %v3409_v41  ;;  %v13428_v54 = vadd.s32 4294967295, %v6179_v59 }
 0x352   : > { %v3411_v4 = vcombine.high %v3409_v41, %v3409_v41 }
 0x353   : > { %v2346_v27 = vpop.permute.xlu1 %2345  ;;  %v2130_v43 = vpop.permute.xlu0 %2129  ;;  %v4123_v55 = vcombine.low %v4115_v10, %v4122_v46  ;;  %v4132_v10 = vrot.slane %v13406_v16, %v12200_v17 }
 0x354   : > { %v2804_v23 = vsel %vm16043_vm8, %v2749_v11, %v2130_v43 }
 0x355   : > { %v2859_v1 = vsel %vm2824_vm9, %v2804_v23, %v2346_v27  ;;  %v4605_v58 = vpop.f32.mrb[4].mxu0  ;;  %1943 = vrot.lane.b32.xlu1 %v9781_v40, %s10954_s8  ;;  %1727 = vrot.lane.b32.xlu0 %v13199_v24, %s10951_s14  ;;  %v13423_v24 = vcombine.low %v4402_v51, %v4412_v6  ;;  %v13439_v6 = vrot.slane %v16244_v31, 1  ;;  %v13442_v51 = vrot.slane %v16244_v31, 2 }
 0x356   : > { %v3412_v42 = vcombine.high %v2859_v1, %v2859_v1  ;;  %v3419_v8 = vrot.slane %v2859_v1, %v12200_v17  ;;  %v4606_v49 = vadd.f32 %v4605_v58, %v13389_v29  ;;  %v10076_v50 = vpop.f32.mrb[5].mxu0  ;;  %10141 = vmatmul.mubr.msk.f32.gmra.mrb[48].mxu0 %vm16038_vm10, %v4123_v55 }
 0x357   : > { %v1702_v0 = vpop.permute.xlu1 %1701  ;;  %v1700_v28 = vpop.permute.xlu0 %1699  ;;  %10143 = vmatprep.mubr.msk.f32.mxu0 %vm16034_vm1, %v16244_v31  ;;  %16420 = vst [vmem:[#allocation6_spill] sm:$0xff] %v13439_v6  ;;  %16421 = vst [vmem:[#allocation51_spill] sm:$0xff] %v13442_v51  ;;  %v9728_v50 = vld [vmem:[%s11047_s9 + $0x1aa] sm:$0x3] }
 0x358   : > { %v13431_v13 = vrot.slane %v3412_v42, %v12200_v17  ;;  %v3427_v47 = vcombine.high %v3419_v8, %v3419_v8  ;;  %v4125_v34 = vcombine.low %v3411_v4, %v3419_v8  ;;  %v4874_v19 = vcombine.high %v4606_v49, %v4606_v49 }
 0x359   : > { %v4881_v14 = vrot.slane %v4606_v49, %v12200_v17  ;;  %2375 = vrot.lane.b32.xlu1 %v9889_v36, %s10957_s12  ;;  %2159 = vrot.lane.b32.xlu0 %v9835_v60, %s10953_s7  ;;  %v2696_v46 = vsel %vm16047_vm6, %v13285_v35, %v1702_v0  ;;  %v2695_v18 = vsel %vm16047_vm6, %v13265_v32, %v1700_v28  ;;  %v9837_v49 = vld [vmem:[%s11047_s9 + $0x1c9] sm:$0xff] }
 0x35a   : > { %v4139_v41 = vrot.slane %v4125_v34, %v12200_v17  ;;  %v4888_v30 = vrot.slane %v4874_v19, %v12200_v17  ;;  %v4610_v45 = vpop.f32.mrb[6].mxu0  ;;  %v13452_v40 = vcombine.low %v3427_v47, %v13431_v13  ;;  %v3428_v55 = vcombine.high %v13431_v13, %v13431_v13 }
 0x35b   : > { %v4889_v39 = vcombine.high %v4881_v14, %v4881_v14  ;;  %v4611_v27 = vadd.f32 %v4610_v45, %v13400_v7  ;;  %v1918_v43 = vpop.permute.xlu1 %1917  ;;  %v1916_v11 = vpop.permute.xlu0 %1915 }
 0x35c   : > { %v4890_v59 = vcombine.high %v4888_v30, %v4888_v30  ;;  %vm5700_vm11 = vcmp.gt.f32.partialorder %v4888_v30, 0.0  ;;  %v5862_v35 = vmul.f32 0.01, %v4888_v30  ;;  %v2751_v32 = vsel %vm16044_vm7, %v2696_v46, %v1918_v43  ;;  %v10079_v23 = vpop.f32.mrb[7].mxu0 }
 0x35d   : > { %vm5699_vm12 = vcmp.gt.f32.partialorder %v4889_v39, 0.0  ;;  %v5861_v16 = vmul.f32 0.01, %v4889_v39  ;;  %v4891_v1 = vcombine.high %v4611_v27, %v4611_v27  ;;  %v4898_v58 = vrot.slane %v4611_v27, %v12200_v17  ;;  %1947 = vrot.lane.b32.xlu1 %v9783_v12, %s10954_s8  ;;  %1731 = vrot.lane.b32.xlu0 %v13349_v38, %s10951_s14  ;;  %v9891_v27 = vld [vmem:[%s11047_s9 + $0x1ca] sm:$0xff] }
 0x35e   : > { %v6024_v4 = vsel %vm5700_vm11, %v4888_v30, %v5862_v35  ;;  %vm5701_vm13 = vcmp.gt.f32.partialorder %v4890_v59, 0.0  ;;  %v5863_v42 = vmul.f32 0.01, %v4890_v59  ;;  %v2750_v8 = vsel %vm16044_vm7, %v2695_v18, %v1916_v11  ;;  %v9782_v35 = vld [vmem:[%s11047_s9 + $0x1c0] sm:$0x3] }
 0x35f   : > { %v6023_v36 = vsel %vm5699_vm12, %v4889_v39, %v5861_v16  ;;  %v4905_v60 = vrot.slane %v4891_v1, %v12200_v17  ;;  %v4906_v0 = vcombine.high %v4898_v58, %v4898_v58  ;;  %vm5702_vm15 = vcmp.gt.f32.partialorder %v4898_v58, 0.0  ;;  %v2134_v28 = vpop.permute.xlu1 %2133  ;;  %v2132_v47 = vpop.permute.xlu0 %2131 }
 0x360   : > { %v6416_v34 = vcombine.low %v6023_v36, %v6024_v4  ;;  %v5864_v19 = vmul.f32 0.01, %v4898_v58  ;;  %v6025_v38 = vsel %vm5701_vm13, %v4890_v59, %v5863_v42  ;;  %v4140_v14 = vcombine.low %v4132_v10, %v4139_v41 }
 0x361   : > { %v4907_v30 = vcombine.high %v4905_v60, %v4905_v60  ;;  %vm5703_vm0 = vcmp.gt.f32.partialorder %v4906_v0, 0.0  ;;  %vm5704_vm11 = vcmp.gt.f32.partialorder %v4905_v60, 0.0  ;;  %v5865_v46 = vmul.f32 0.01, %v4906_v0  ;;  %2163 = vrot.lane.b32.xlu1 %v9837_v49, %s10953_s7  ;;  %1729 = vrot.lane.b32.xlu0 %v9728_v50, %s10951_s14 }
 0x362   : > { %v6424_v18 = vrot.slane %v6416_v34, %v12200_v17  ;;  %v5866_v45 = vmul.f32 0.01, %v4905_v60  ;;  %v6026_v12 = vsel %vm5702_vm15, %v4898_v58, %v5864_v19  ;;  %10144 = vmatmul.mubr.msk.f32.gmra.mrb[50].mxu0 %vm16038_vm10, %v4140_v14  ;;  %v2806_v39 = vsel %vm16043_vm8, %v2751_v32, %v2134_v28  ;;  %v9890_v28 = vld [vmem:[%s11047_s9 + $0x1c2] sm:$0x3] }
 0x363   : > { %v6027_v43 = vsel %vm5703_vm0, %v4906_v0, %v5865_v46  ;;  %v6417_v10 = vcombine.low %v6025_v38, %v6026_v12  ;;  %v2805_v41 = vsel %vm16043_vm8, %v2750_v8, %v2132_v47  ;;  %v2350_v11 = vpop.permute.xlu1 %2349  ;;  %v2348_v59 = vpop.permute.xlu0 %2347  ;;  %vm5705_vm12 = vcmp.gt.f32.partialorder %v4907_v30, 0.0  ;;  %10146 = vmatprep.mubr.msk.f32.mxu0 %vm16034_vm1, %v16244_v31  ;;  %v9836_v12 = vld [vmem:[%s11047_s9 + $0x1c1] sm:$0x3] }
 0x364   : > { %v6028_v23 = vsel %vm5704_vm11, %v4905_v60, %v5866_v45  ;;  %v2861_v16 = vsel %vm2824_vm9, %v2806_v39, %v2350_v11  ;;  %v2860_v1 = vsel %vm2824_vm9, %v2805_v41, %v2348_v59  ;;  %v5867_v32 = vmul.f32 0.01, %v4907_v30 }
 0x365   : > { %v6431_v58 = vrot.slane %v6417_v10, %v12200_v17  ;;  %v6433_v4 = vcombine.low %v6027_v43, %v6028_v23  ;;  %v3436_v42 = vcombine.high %v2861_v16, %v2861_v16  ;;  %v3443_v8 = vrot.slane %v2861_v16, %v12200_v17  ;;  %v4615_v49 = vpop.f32.mrb[8].mxu0  ;;  %2379 = vrot.lane.b32.xlu1 %v9891_v27, %s10957_s12 }
 0x366   : > { %v3435_v50 = vrot.slane %v2860_v1, %v12200_v17  ;;  %v4616_v36 = vadd.f32 %v4615_v49, %v13404_v9  ;;  %v6029_v60 = vsel %vm5705_vm12, %v4907_v30, %v5867_v32  ;;  %1945 = vrot.lane.b32.xlu0 %v9782_v35, %s10954_s8  ;;  %v10082_v0 = vpop.f32.mrb[9].mxu0  ;;  %v4149_v47 = vrot.slane %v13452_v40, %v12200_v17 }
 0x367   : > { %v6432_v34 = vcombine.low %v6424_v18, %v6431_v58  ;;  %v6441_v19 = vrot.slane %v6433_v4, %v12200_v17  ;;  %v3450_v38 = vrot.slane %v3436_v42, %v12200_v17  ;;  %v3451_v14 = vcombine.high %v3443_v8, %v3443_v8  ;;  %v1920_v46 = vpop.permute.xlu1 %1919  ;;  %v1704_v45 = vpop.permute.xlu0 %1703 }
 0x368   : > { %v4142_v30 = vcombine.low %v3428_v55, %v3435_v50  ;;  %v4908_v39 = vcombine.high %v4616_v36, %v4616_v36  ;;  %v4915_v27 = vrot.slane %v4616_v36, %v12200_v17  ;;  %v2697_v43 = vsel %vm16047_vm6, %v13277_v15, %v1704_v45 }
 0x369   : > { %v3452_v40 = vcombine.high %v3450_v38, %v3450_v38  ;;  %v4158_v18 = vcombine.low %v3443_v8, %v3451_v14  ;;  %2377 = vrot.lane.b32.xlu1 %v9890_v28, %s10957_s12  ;;  %v2752_v10 = vsel %vm16044_vm7, %v2697_v43, %v1920_v46  ;;  %v13502_v41 = vsel %vm6183_vm14, %v6432_v34, 0.0 }
 0x36a   : > { %16422 = vst [vmem:[#allocation52_spill] sm:$0xff] %v13502_v41  ;;  %v4156_v11 = vrot.slane %v4142_v30, %v12200_v17  ;;  %v4922_v13 = vrot.slane %v4908_v39, %v12200_v17  ;;  %v4923_v55 = vcombine.high %v4915_v27, %v4915_v27  ;;  %vm5706_vm13 = vcmp.gt.f32.partialorder %v4915_v27, 0.0  ;;  %2161 = vrot.lane.b32.xlu0 %v9836_v12, %s10953_s7 }
 0x36b   : > { %v4159_v59 = vcombine.low %v3450_v38, %v3452_v40  ;;  %v4166_v15 = vrot.slane %v4158_v18, %v12200_v17  ;;  %v5868_v35 = vmul.f32 0.01, %v4915_v27  ;;  %v2352_v23 = vpop.permute.xlu1 %2351  ;;  %v2136_v16 = vpop.permute.xlu0 %2135  ;;  %v7452_v1 = vrot.slane %v13502_v41, 2 }
 0x36c   : > { %v4924_v32 = vcombine.high %v4922_v13, %v4922_v13  ;;  %vm5707_vm15 = vcmp.gt.f32.partialorder %v4923_v55, 0.0  ;;  %vm5708_vm0 = vcmp.gt.f32.partialorder %v4922_v13, 0.0  ;;  %v5869_v58 = vmul.f32 0.01, %v4923_v55  ;;  %v4620_v4 = vpop.f32.mrb[10].mxu0 }
 0x36d   : > { %v4173_v42 = vrot.slane %v4159_v59, %v12200_v17  ;;  %v5870_v8 = vmul.f32 0.01, %v4922_v13  ;;  %v6030_v49 = vsel %vm5706_vm13, %v4915_v27, %v5868_v35  ;;  %v2807_v50 = vsel %vm16043_vm8, %v2752_v10, %v2136_v16  ;;  %v10085_v36 = vpop.f32.mrb[11].mxu0 }
 0x36e   : > { %vm5709_vm11 = vcmp.gt.f32.partialorder %v4924_v32, 0.0  ;;  %v5871_v0 = vmul.f32 0.01, %v4924_v32  ;;  %v13511_v28 = vsel %vm5707_vm15, %v4923_v55, %v5869_v58  ;;  %v6434_v34 = vcombine.low %v6029_v60, %v6030_v49 }
 0x36f   : > { %v6032_v38 = vsel %vm5708_vm0, %v4922_v13, %v5870_v8  ;;  %v2862_v14 = vsel %vm2824_vm9, %v2807_v50, %v2352_v23  ;;  %v4621_v46 = vadd.f32 %v4620_v4, %v13412_v25  ;;  %v4157_v45 = vcombine.low %v4149_v47, %v4156_v11  ;;  %v1924_v12 = vpop.permute.xlu1 %1923  ;;  %v1708_v30 = vpop.permute.xlu0 %1707 }
 0x370   : > { %v6033_v39 = vsel %vm5709_vm11, %v4924_v32, %v5871_v0  ;;  %v6448_v43 = vrot.slane %v6434_v34, %v12200_v17  ;;  %v3453_v27 = vcombine.high %v2862_v14, %v2862_v14  ;;  %v3460_v40 = vrot.slane %v2862_v14, %v12200_v17 }
 0x371   : > { %vm7446_vm12 = vcmask 1045504   ;;  %v6457_v18 = vcombine.low %v6032_v38, %v6033_v39  ;;  %v4925_v10 = vcombine.high %v4621_v46, %v4621_v46  ;;  %v4932_v55 = vrot.slane %v4621_v46, %v12200_v17  ;;  %10147 = vmatmul.mubr.msk.f32.gmra.mrb[52].mxu0 %vm16038_vm10, %v4157_v45 }
 0x372   : > { %v2699_v60 = vsel %vm16047_vm6, %v13289_v52, %v1708_v30  ;;  %v13521_v13 = vcombine.low %v6441_v19, %v6448_v43  ;;  %v3467_v47 = vrot.slane %v3453_v27, %v12200_v17  ;;  %v3468_v11 = vcombine.high %v3460_v40, %v3460_v40  ;;  %10149 = vmatprep.mubr.msk.f32.mxu0 %vm16034_vm1, %v16244_v31 }
 0x373   : > { %v4174_v59 = vcombine.low %v4166_v15, %v4173_v42  ;;  %v13527_v35 = vrot.slane %v6457_v18, %v12200_v17  ;;  %v4939_v23 = vrot.slane %v4925_v10, %v12200_v17  ;;  %v4940_v16 = vcombine.high %v4932_v55, %v4932_v55  ;;  %v2140_v32 = vpop.permute.xlu1 %2139  ;;  %v1706_v58 = vpop.permute.xlu0 %1705 }
 0x374   : > { %16423 = vst [vmem:[#allocation97_spill] sm:$0xff] %v13521_v13  ;;  %vm5710_vm13 = vcmp.gt.f32.partialorder %v4932_v55, 0.0  ;;  %v3469_v4 = vcombine.high %v3467_v47, %v3467_v47  ;;  %v13530_v52 = vcombine.low %v3460_v40, %v3468_v11  ;;  %v5872_v19 = vmul.f32 0.01, %v4932_v55 }
 0x375   : > { %v2754_v8 = vsel %vm16044_vm7, %v2699_v60, %v1924_v12  ;;  %v4941_v49 = vcombine.high %v4939_v23, %v4939_v23  ;;  %vm5711_vm15 = vcmp.gt.f32.partialorder %v4940_v16, 0.0  ;;  %vm5712_vm0 = vcmp.gt.f32.partialorder %v4939_v23, 0.0  ;;  %10150 = vmatmul.mubr.msk.f32.gmra.mrb[54].mxu0 %vm16038_vm10, %v4174_v59  ;;  %v4625_v15 = vpop.f32.mrb[12].mxu0 }
 0x376   : > { %v5873_v50 = vmul.f32 0.01, %v4940_v16  ;;  %v4176_v42 = vcombine.low %v3467_v47, %v3469_v4  ;;  %v4183_v36 = vrot.slane %v13530_v52, %v12200_v17  ;;  %v5874_v0 = vmul.f32 0.01, %v4939_v23  ;;  %v10088_v38 = vpop.f32.mrb[13].mxu0  ;;  %10152 = vmatprep.mubr.msk.f32.mxu0 %vm16034_vm1, %v16244_v31 }
 0x377   : > { %v6034_v34 = vsel %vm5710_vm13, %v4932_v55, %v5872_v19  ;;  %vm5713_vm11 = vcmp.gt.f32.partialorder %v4941_v49, 0.0  ;;  %v5875_v14 = vmul.f32 0.01, %v4941_v49  ;;  %v2809_v45 = vsel %vm16043_vm8, %v2754_v8, %v2140_v32  ;;  %v2356_v12 = vpop.permute.xlu1 %2355  ;;  %v1922_v30 = vpop.permute.xlu0 %1921 }
 0x378   : > { %v6035_v46 = vsel %vm5711_vm15, %v4940_v16, %v5873_v50  ;;  %v6036_v39 = vsel %vm5712_vm0, %v4939_v23, %v5874_v0  ;;  %v2698_v27 = vsel %vm16047_vm6, %v13293_v48, %v1706_v58  ;;  %v4626_v40 = vadd.f32 %v4625_v15, %v13423_v24 }
 0x379   : > { %v6458_v43 = vcombine.low %v6034_v34, %v6035_v46  ;;  %v6037_v18 = vsel %vm5713_vm11, %v4941_v49, %v5875_v14  ;;  %v2864_v10 = vsel %vm2824_vm9, %v2809_v45, %v2356_v12  ;;  %v2753_v55 = vsel %vm16044_vm7, %v2698_v27, %v1922_v30 }
 0x37a   : > { %v7453_v60 = vrot.slane %v13521_v13, 2  ;;  %v6474_v11 = vcombine.low %v6036_v39, %v6037_v18  ;;  %v4942_v59 = vcombine.high %v4626_v40, %v4626_v40  ;;  %v4949_v16 = vrot.slane %v4626_v40, %v12200_v17 }
 0x37b   : > { %v6472_v47 = vrot.slane %v6458_v43, %v12200_v17  ;;  %v3477_v23 = vcombine.high %v2864_v10, %v2864_v10  ;;  %v13550_v32 = vrot.slane %v2864_v10, %v12200_v17  ;;  %v4190_v58 = vrot.slane %v4176_v42, %v12200_v17  ;;  %v2138_v4 = vpop.permute.xlu1 %2137  ;;  %v1710_v52 = vpop.permute.xlu0 %1709 }
 0x37c   : > { %v13557_v48 = vsel %vm7446_vm12, %v7452_v1, %v7453_v60  ;;  %v6482_v8 = vrot.slane %v6474_v11, %v12200_v17  ;;  %v4956_v49 = vrot.slane %v4942_v59, %v12200_v17  ;;  %v4957_v50 = vcombine.high %v4949_v16, %v4949_v16 }
 0x37d   : > { %v6473_v19 = vcombine.low %v13527_v35, %v6472_v47  ;;  %vm6194_vm13 = vcmp.lt.s32.totalorder %v13428_v54, 16  ;;  %vm5714_vm15 = vcmp.gt.f32.partialorder %v4949_v16, 0.0  ;;  %v5876_v15 = vmul.f32 0.01, %v4949_v16  ;;  %v4630_v42 = vpop.f32.mrb[14].mxu0 }
 0x37e   : > { %v13565_v0 = vrot.slane %v3477_v23, %v12200_v17  ;;  %v3492_v1 = vcombine.high %v13550_v32, %v13550_v32  ;;  %v4958_v34 = vcombine.high %v4956_v49, %v4956_v49  ;;  %vm5715_vm0 = vcmp.gt.f32.partialorder %v4957_v50, 0.0  ;;  %v10091_v38 = vpop.f32.mrb[15].mxu0 }
 0x37f   : > { %vm5716_vm11 = vcmp.gt.f32.partialorder %v4956_v49, 0.0  ;;  %v5877_v35 = vmul.f32 0.01, %v4957_v50  ;;  %v5878_v14 = vmul.f32 0.01, %v4956_v49  ;;  %v6038_v46 = vsel %vm5714_vm15, %v4949_v16, %v5876_v15  ;;  %v2354_v30 = vpop.permute.xlu1 %2353  ;;  %v1926_v39 = vpop.permute.xlu0 %1925 }
 0x380   : > { %v3493_v45 = vcombine.high %v13565_v0, %v13565_v0  ;;  %v13572_v12 = vcombine.low %v3492_v1, %v13565_v0  ;;  %v10369_v27 = vpack.i.bf16 %v13439_v6, %v13557_v48  ;;  %v4191_v40 = vcombine.low %v4183_v36, %v4190_v58 }
 0x381   : > { %v6039_v43 = vsel %vm5715_vm0, %v4957_v50, %v5877_v35  ;;  %v2808_v18 = vsel %vm16043_vm8, %v2753_v55, %v2138_v4  ;;  %v13577_v10 = vsel %vm5716_vm11, %v4956_v49, %v5878_v14  ;;  %v2700_v59 = vsel %vm16047_vm6, %v13303_v63, %v1710_v52 }
 0x382   : > { %v6475_v47 = vcombine.low %v6038_v46, %v6039_v43  ;;  %v4207_v11 = vrot.slane %v13572_v12, %v12200_v17  ;;  %10370 = vrot.lane.b32.xlu0 %v10369_v27, %s10957_s12  ;;  %10153 = vmatmul.mubr.msk.f32.gmra.mrb[56].mxu0 %vm16038_vm10, %v4191_v40  ;;  %v4631_v36 = vadd.f32 %v4630_v42, %v13402_v62  ;;  %vm5717_vm15 = vcmp.gt.f32.partialorder %v4958_v34, 0.0 }
 0x383   : > { %v5879_v55 = vmul.f32 0.01, %v4958_v34  ;;  %v13591_v58 = vsel %vm6183_vm14, %v6473_v19, 0.0  ;;  %v2863_v4 = vsel %vm2824_vm9, %v2808_v18, %v2354_v30  ;;  %v2755_v63 = vsel %vm16044_vm7, %v2700_v59, %v1926_v39  ;;  %v2358_v52 = vpop.permute.xlu1 %2357  ;;  %v2142_v49 = vpop.permute.xlu0 %2141  ;;  %10155 = vmatprep.mubr.msk.f32.mxu0 %vm16034_vm1, %v16244_v31 }
 0x384   : > { %v6489_v23 = vrot.slane %v6475_v47, %v12200_v17  ;;  %v4959_v50 = vcombine.high %v4631_v36, %v4631_v36  ;;  %v4966_v15 = vrot.slane %v4631_v36, %v12200_v17  ;;  %v10374_v42 = vpack.i.bf16 %v13442_v51, %v13591_v58 }
 0x385   : > { %v6041_v1 = vsel %vm5717_vm15, %v4958_v34, %v5879_v55  ;;  %v3476_v19 = vrot.slane %v2863_v4, %v12200_v17  ;;  %v6456_v38 = vrot.slane %v13511_v28, %v12200_v17  ;;  %v2810_v14 = vsel %vm16043_vm8, %v2755_v63, %v2142_v49  ;;  %v4635_v46 = vpop.f32.mrb[16].mxu0 }
 0x386   : > { %v13600_v35 = vcombine.low %v6482_v8, %v6489_v23  ;;  %v4973_v30 = vrot.slane %v4959_v50, %v12200_v17  ;;  %v4974_v39 = vcombine.high %v4966_v15, %v4966_v15  ;;  %vm5718_vm0 = vcmp.gt.f32.partialorder %v4966_v15, 0.0  ;;  %10375 = vrot.lane.b32.xlu1 %v10374_v42, %s10959_s16  ;;  %v10094_v34 = vpop.f32.mrb[17].mxu0 }
 0x387   : > { %v5880_v43 = vmul.f32 0.01, %v4966_v15  ;;  %v4192_v8 = vcombine.low %v3476_v19, %v13550_v32  ;;  %v13611_v27 = vsel %vm6194_vm13, %v6456_v38, 0.0  ;;  %v2865_v28 = vsel %vm2824_vm9, %v2810_v14, %v2358_v52  ;;  %v13615_v18 = vpop.permute.xlu1 %1929  ;;  %v1714_v47 = vpop.permute.xlu0 %1713 }
 0x388   : > { %16424 = vst [vmem:[#allocation98_spill] sm:$0xff] %v13600_v35  ;;  %v4636_v40 = vadd.f32 %v4635_v46, %v13402_v62  ;;  %v4975_v59 = vcombine.high %v4973_v30, %v4973_v30  ;;  %vm5719_vm11 = vcmp.gt.f32.partialorder %v4974_v39, 0.0  ;;  %vm5720_vm15 = vcmp.gt.f32.partialorder %v4973_v30, 0.0 }
 0x389   : > { %v5881_v36 = vmul.f32 0.01, %v4974_v39  ;;  %v5882_v55 = vmul.f32 0.01, %v4973_v30  ;;  %v6042_v23 = vsel %vm5718_vm0, %v4966_v15, %v5880_v43  ;;  %v4200_v32 = vrot.slane %v4192_v8, %v12200_v17 }
 0x38a   : > { %v7455_v4 = vrot.slane %v13611_v27, 2  ;;  %v6498_v49 = vcombine.low %v6041_v1, %v6042_v23  ;;  %v3494_v50 = vcombine.high %v2865_v28, %v2865_v28  ;;  %v3501_v52 = vrot.slane %v2865_v28, %v12200_v17 }
 0x38b   : > { %v6043_v63 = vsel %vm5719_vm11, %v4974_v39, %v5881_v36  ;;  %v6044_v42 = vsel %vm5720_vm15, %v4973_v30, %v5882_v55  ;;  %v4976_v38 = vcombine.high %v4636_v40, %v4636_v40  ;;  %v4983_v14 = vrot.slane %v4636_v40, %v12200_v17  ;;  %v2146_v46 = vpop.permute.xlu1 %2145  ;;  %v1712_v15 = vpop.permute.xlu0 %1711 }
 0x38c   : > { %v13624_v19 = vsel %vm7446_vm12, %v7453_v60, %v7455_v4  ;;  %v6499_v43 = vcombine.low %v6043_v63, %v6044_v42  ;;  %v13628_v34 = vrot.slane %v6498_v49, %v12200_v17  ;;  %v13633_v39 = vrot.slane %v3494_v50, %v12200_v17 }
 0x38d   : > { %v10384_v1 = vpack.i.bf16 %v13439_v6, %v13624_v19  ;;  %v3509_v30 = vcombine.high %v3501_v52, %v3501_v52  ;;  %v13638_v60 = vcombine.low %v3493_v45, %v3501_v52  ;;  %v4990_v8 = vrot.slane %v4976_v38, %v12200_v17  ;;  %v4640_v40 = vpop.f32.mrb[18].mxu0 }
 0x38e   : > { %v4991_v28 = vcombine.high %v4983_v14, %v4983_v14  ;;  %vm7269_vm0 = vcmask 1046528   ;;  %v6513_v36 = vrot.slane %v6499_v43, %v12200_v17  ;;  %vm5721_vm11 = vcmp.gt.f32.partialorder %v4975_v59, 0.0  ;;  %v10097_v23 = vpop.f32.mrb[19].mxu0 }
 0x38f   : > { %10385 = vrot.lane.b32.xlu1 %v10384_v1, %s10957_s12  ;;  %vm5722_vm15 = vcmp.gt.f32.partialorder %v4983_v14, 0.0  ;;  %v5883_v55 = vmul.f32 0.01, %v4975_v59  ;;  %v13644_v4 = vcombine.low %v3509_v30, %v13633_v39  ;;  %v4992_v45 = vcombine.high %v4990_v8, %v4990_v8  ;;  %v2362_v63 = vpop.permute.xlu1 %2361  ;;  %v1928_v49 = vpop.permute.xlu0 %1927 }
 0x390   : > { %vm5723_vm5 = vcmp.gt.f32.partialorder %v4991_v28, 0.0  ;;  %v6514_v50 = vcombine.low %v13628_v34, %v6513_v36  ;;  %vm5724_vm4 = vcmp.gt.f32.partialorder %v4990_v8, 0.0  ;;  %v5884_v52 = vmul.f32 0.01, %v4983_v14 }
 0x391   : > { %v5885_v42 = vmul.f32 0.01, %v4991_v28  ;;  %vm5725_vm3 = vcmp.gt.f32.partialorder %v4992_v45, 0.0  ;;  %v5886_v38 = vmul.f32 0.01, %v4990_v8  ;;  %v6045_v1 = vsel %vm5721_vm11, %v4975_v59, %v5883_v55  ;;  %v13650_v23 = vpop.f32.mrb[20].mxu0 }
 0x392   : > { %v5887_v43 = vmul.f32 0.01, %v4992_v45  ;;  %v6046_v30 = vsel %vm5722_vm15, %v4983_v14, %v5884_v52  ;;  %v2702_v0 = vsel %vm16047_vm6, %v13312_v56, %v1714_v47  ;;  %v4208_v34 = vcombine.low %v4200_v32, %v4207_v11  ;;  %v10100_v36 = vpop.f32.mrb[21].mxu0 }
 0x393   : > { %v6047_v16 = vsel %vm5723_vm5, %v4991_v28, %v5885_v42  ;;  %v6048_v3 = vsel %vm5724_vm4, %v4990_v8, %v5886_v38  ;;  %v6515_v44 = vcombine.low %v6045_v1, %v6046_v30  ;;  %v7280_v62 = vrot.slane %v13591_v58, 1  ;;  %v13661_v59 = vpop.permute.xlu1 %2143  ;;  %v13663_v55 = vpop.permute.xlu0 %1715 }
 0x394   : > { %v13658_v6 = vsel %vm5725_vm3, %v4992_v45, %v5887_v43  ;;  %v6516_v14 = vcombine.low %v6047_v16, %v6048_v3  ;;  %10156 = vmatmul.mubr.msk.f32.gmra.mrb[58].mxu0 %vm16038_vm10, %v4208_v34  ;;  %v7281_v56 = vrot.slane %v13600_v35, 1  ;;  %v16425_v12 = vrot.slane %v13577_v10, %v12200_v17 }
 0x395   : > { %v2757_v47 = vsel %vm16044_vm7, %v2702_v0, %v13615_v18  ;;  %v6523_v32 = vrot.slane %v6515_v44, %v12200_v17  ;;  %v2701_v16 = vsel %vm16047_vm6, %v13299_v20, %v1712_v15  ;;  %10158 = vmatprep.mubr.msk.f32.mxu0 %vm16034_vm1, %v16244_v31  ;;  %v4641_v45 = vadd.f32 %v4640_v40, %v13421_v61 }
 0x396   : > { %v13672_v11 = vsel %vm6194_vm13, %v16425_v12, 0.0  ;;  %v2812_v3 = vsel %vm16043_vm8, %v2757_v47, %v2146_v46  ;;  %v6530_v10 = vrot.slane %v6516_v14, %v12200_v17  ;;  %v13685_v28 = vsel %vm7269_vm0, %v7280_v62, %v7281_v56 }
 0x397   : > { %v7283_v8 = vrot.slane %v13672_v11, 1  ;;  %v10389_v44 = vpack.i.bf16 %v13442_v51, %v13600_v35  ;;  %v10379_v18 = vpack.i.bf16 %v13502_v41, %v13685_v28  ;;  %v2867_v20 = vsel %vm2824_vm9, %v2812_v3, %v2362_v63  ;;  %v13697_v0 = vpop.permute.xlu1 %2359  ;;  %v13699_v52 = vpop.permute.xlu0 %1931 }
 0x398   : > { %v2756_v15 = vsel %vm16044_vm7, %v2701_v16, %v1928_v49  ;;  %v13701_v62 = vcombine.low %v6523_v32, %v6530_v10  ;;  %v4993_v42 = vcombine.high %v4641_v45, %v4641_v45  ;;  %v5000_v38 = vrot.slane %v4641_v45, %v12200_v17 }
 0x399   : > { %v13693_v46 = vsel %vm7269_vm0, %v7281_v56, %v7283_v8  ;;  %10380 = vrot.lane.b32.xlu0 %v10379_v18, %s10960_s17  ;;  %v3518_v43 = vcombine.high %v2867_v20, %v2867_v20  ;;  %v3525_v63 = vrot.slane %v2867_v20, %v12200_v17  ;;  %v13710_v49 = vsel %vm6183_vm14, %v6514_v50, 0.0 }
 0x39a   : > { %v10394_v40 = vpack.i.bf16 %v13521_v13, %v13693_v46  ;;  %16426 = vst [vmem:[#allocation144_spill] sm:$0xff] %v13710_v49  ;;  %v4224_v1 = vrot.slane %v13644_v4, %v12200_v17  ;;  %v5007_v30 = vrot.slane %v4993_v42, %v12200_v17  ;;  %v5008_v34 = vcombine.high %v5000_v38, %v5000_v38 }
 0x39b   : > { %vm5726_vm3 = vcmp.gt.f32.partialorder %v5000_v38, 0.0  ;;  %v5888_v36 = vmul.f32 0.01, %v5000_v38  ;;  %v3532_v14 = vrot.slane %v3518_v43, %v12200_v17  ;;  %v3533_v56 = vcombine.high %v3525_v63, %v3525_v63  ;;  %v13722_v32 = vpop.permute.xlu1 %2363  ;;  %v13724_v4 = vpop.permute.xlu0 %2147 }
 0x39c   : > { %10395 = vrot.lane.b32.xlu1 %v10394_v40, %s10960_s17  ;;  %v10404_v12 = vpack.i.bf16 %v13557_v48, %v13710_v49  ;;  %v16427_v50 = vrot.slane %v13638_v60, %v12200_v17  ;;  %v5009_v8 = vcombine.high %v5007_v30, %v5007_v30  ;;  %vm5727_vm4 = vcmp.gt.f32.partialorder %v5008_v34, 0.0 }
 0x39d   : > { %vm5728_vm5 = vcmp.gt.f32.partialorder %v5007_v30, 0.0  ;;  %v5889_v3 = vmul.f32 0.01, %v5008_v34  ;;  %v5890_v16 = vmul.f32 0.01, %v5007_v30  ;;  %v6050_v10 = vsel %vm5726_vm3, %v5000_v38, %v5888_v36  ;;  %10390 = vrot.lane.b32.xlu0 %v10389_v44, %s10959_s16  ;;  %v13730_v48 = vpop.f32.mrb[22].mxu0 }
 0x39e   : > { %v4225_v47 = vcombine.low %v16427_v50, %v4224_v1  ;;  %v3534_v45 = vcombine.high %v3532_v14, %v3532_v14  ;;  %v13727_v18 = vcombine.low %v3525_v63, %v3533_v56  ;;  %vm5729_vm11 = vcmp.gt.f32.partialorder %v5009_v8, 0.0  ;;  %v10103_v42 = vpop.f32.mrb[23].mxu0 }
 0x39f   : > { %v5891_v60 = vmul.f32 0.01, %v5009_v8  ;;  %v6051_v20 = vsel %vm5727_vm4, %v5008_v34, %v5889_v3  ;;  %v7275_v40 = vrot.slane %v13502_v41, 1  ;;  %v6052_v44 = vsel %vm5728_vm5, %v5007_v30, %v5890_v16  ;;  %v13741_v1 = vpop.permute.xlu1 %1719  ;;  %v13743_v36 = vpop.permute.xlu0 %1717 }
 0x3a0   : > { %10159 = vmatmul.mubr.msk.f32.gmra.mrb[60].mxu0 %vm16038_vm10, %v4225_v47  ;;  %10405 = vrot.lane.b32.xlu1 %v10404_v12, %s10959_s16  ;;  %v6539_v38 = vcombine.low %v6050_v10, %v6051_v20  ;;  %v13739_v63 = vcombine.low %v3532_v14, %v3534_v45  ;;  %v7276_v56 = vrot.slane %v13521_v13, 1  ;;  %v7457_v12 = vrot.slane %v13591_v58, 2 }
 0x3a1   : > { %10161 = vmatprep.mubr.msk.f32.mxu0 %vm16034_vm1, %v16244_v31  ;;  %v6053_v34 = vsel %vm5729_vm11, %v5009_v8, %v5891_v60  ;;  %v7458_v50 = vrot.slane %v13600_v35, 2  ;;  %v4646_v14 = vadd.f32 %v13650_v23, %v13421_v61  ;;  %v2811_v10 = vsel %vm16043_vm8, %v2756_v15, %v13661_v59 }
 0x3a2   : > { %v6540_v47 = vcombine.low %v6052_v44, %v6053_v34  ;;  %v13749_v30 = vrot.slane %v6539_v38, %v12200_v17  ;;  %v13756_v16 = vsel %vm7269_vm0, %v7275_v40, %v7276_v56  ;;  %v2703_v45 = vsel %vm16047_vm6, %v13307_v2, %v13663_v55 }
 0x3a3   : > { %16428 = vst [vmem:[#allocation145_spill] sm:$0xff] %v13756_v16  ;;  %v13759_v8 = vsel %vm7446_vm12, %v7457_v12, %v7458_v50  ;;  %v5010_v23 = vcombine.high %v4646_v14, %v4646_v14  ;;  %v5017_v40 = vrot.slane %v4646_v14, %v12200_v17  ;;  %v13772_v42 = vpop.permute.xlu1 %1935  ;;  %v13774_v44 = vpop.permute.xlu0 %1933  ;;  %v7278_v38 = vrot.slane %v13611_v27, 1 }
 0x3a4   : > { %16429 = vst [vmem:[#allocation8_spill] sm:$0xff] %v13759_v8  ;;  %v13767_v60 = vrot.slane %v6540_v47, %v12200_v17  ;;  %v10399_v20 = vpack.i.bf16 %v13756_v16, %v13759_v8  ;;  %v7460_v59 = vrot.slane %v13672_v11, 2  ;;  %v2866_v2 = vsel %vm2824_vm9, %v2811_v10, %v13697_v0  ;;  %v13782_v15 = vpop.f32.mrb[24].mxu0 }
 0x3a5   : > { %v3510_v55 = vcombine.high %v13633_v39, %v13633_v39  ;;  %v5024_v12 = vrot.slane %v5010_v23, %v12200_v17  ;;  %v5025_v47 = vcombine.high %v5017_v40, %v5017_v40  ;;  %vm5730_vm15 = vcmp.gt.f32.partialorder %v5017_v40, 0.0  ;;  %v10106_v27 = vpop.f32.mrb[25].mxu0 }
 0x3a6   : > { %10400 = vrot.lane.b32.xlu0 %v10399_v20, %s10957_s12  ;;  %v5892_v14 = vmul.f32 0.01, %v5017_v40  ;;  %v13789_v11 = vsel %vm7269_vm0, %v7276_v56, %v7278_v38  ;;  %v13792_v0 = vsel %vm7446_vm12, %v7458_v50, %v7460_v59  ;;  %v3517_v39 = vrot.slane %v2866_v2, %v12200_v17 }
 0x3a7   : > { %16430 = vst [vmem:[#allocation54_spill] sm:$0xff] %v13792_v0  ;;  %v5026_v10 = vcombine.high %v5024_v12, %v5024_v12  ;;  %vm5731_vm3 = vcmp.gt.f32.partialorder %v5025_v47, 0.0  ;;  %vm5732_vm4 = vcmp.gt.f32.partialorder %v5024_v12, 0.0  ;;  %v5893_v3 = vmul.f32 0.01, %v5025_v47  ;;  %v13795_v34 = vpop.permute.xlu1 %2151  ;;  %v13797_v20 = vpop.permute.xlu0 %2149 }
 0x3a8   : > { %v5894_v23 = vmul.f32 0.01, %v5024_v12  ;;  %v6054_v43 = vsel %vm5730_vm15, %v5017_v40, %v5892_v14  ;;  %v10414_v27 = vpack.i.bf16 %v13789_v11, %v13792_v0  ;;  %v4226_v56 = vcombine.low %v3510_v55, %v3517_v39 }
 0x3a9   : > { %vm5733_vm5 = vcmp.gt.f32.partialorder %v5026_v10, 0.0  ;;  %v5895_v38 = vmul.f32 0.01, %v5026_v10  ;;  %v6055_v50 = vsel %vm5731_vm3, %v5025_v47, %v5893_v3  ;;  %v2758_v59 = vsel %vm16044_vm7, %v2703_v45, %v13699_v52 }
 0x3aa   : > { %v6056_v2 = vsel %vm5732_vm4, %v5024_v12, %v5894_v23  ;;  %v6556_v51 = vcombine.low %v6054_v43, %v6055_v50  ;;  %10415 = vrot.lane.b32.xlu1 %v10414_v27, %s10957_s12  ;;  %v4234_v13 = vrot.slane %v4226_v56, %v12200_v17  ;;  %v7285_v41 = vrot.slane %v13710_v49, 1 }
 0x3ab   : > { %v6057_v16 = vsel %vm5733_vm5, %v5026_v10, %v5895_v38  ;;  %v7286_v40 = vrot.slane %v13701_v62, 1  ;;  %v6538_v55 = vrot.slane %v13658_v6, %v12200_v17  ;;  %v2813_v3 = vsel %vm16043_vm8, %v2758_v59, %v13724_v4  ;;  %v13811_v47 = vpop.permute.xlu1 %2367  ;;  %v13813_v52 = vpop.permute.xlu0 %2365 }
 0x3ac   : > { %v6557_v43 = vcombine.low %v6056_v2, %v6057_v16  ;;  %v6564_v45 = vrot.slane %v6556_v51, %v12200_v17  ;;  %v2868_v12 = vsel %vm2824_vm9, %v2813_v3, %v13722_v32  ;;  %v4651_v14 = vadd.f32 %v13730_v48, %v13389_v29 }
 0x3ad   : > { %v13821_v39 = vsel %vm7269_vm0, %v7285_v41, %v7286_v40  ;;  %v13825_v6 = vsel %vm6194_vm13, %v6538_v55, 0.0  ;;  %v3535_v4 = vcombine.high %v2868_v12, %v2868_v12  ;;  %v3542_v10 = vrot.slane %v2868_v12, %v12200_v17 }
 0x3ae   : > { %v6571_v16 = vrot.slane %v6557_v43, %v12200_v17  ;;  %v10409_v51 = vpack.i.bf16 %v13591_v58, %v13821_v39  ;;  %v7288_v32 = vrot.slane %v13825_v6, 1  ;;  %v5027_v23 = vcombine.high %v4651_v14, %v4651_v14 }
 0x3af   : > { %v3549_v48 = vrot.slane %v3535_v4, %v12200_v17  ;;  %v3550_v27 = vcombine.high %v3542_v10, %v3542_v10  ;;  %v5034_v41 = vrot.slane %v4651_v14, %v12200_v17  ;;  %v10419_v56 = vpack.i.bf16 %v13624_v19, %v13701_v62  ;;  %v13836_v38 = vpop.permute.xlu1 %1937  ;;  %v13838_v50 = vpop.permute.xlu0 %1721 }
 0x3b0   : > { %v13840_v59 = vcombine.low %v6564_v45, %v6571_v16  ;;  %10410 = vrot.lane.b32.xlu0 %v10409_v51, %s10960_s17  ;;  %v13844_v2 = vsel %vm7269_vm0, %v7286_v40, %v7288_v32  ;;  %v5041_v55 = vrot.slane %v5027_v23, %v12200_v17  ;;  %v2705_v3 = vsel %vm16047_vm6, %v13341_v22, %v13741_v1 }
 0x3b1   : > { %v10424_v19 = vpack.i.bf16 %v13600_v35, %v13844_v2  ;;  %v3551_v43 = vcombine.high %v3549_v48, %v3549_v48  ;;  %v4244_v12 = vcombine.low %v3542_v10, %v3550_v27  ;;  %v5042_v14 = vcombine.high %v5034_v41, %v5034_v41 }
 0x3b2   : > { %v5043_v4 = vcombine.high %v5041_v55, %v5041_v55  ;;  %vm5734_vm11 = vcmp.gt.f32.partialorder %v5034_v41, 0.0  ;;  %vm5736_vm15 = vcmp.gt.f32.partialorder %v5041_v55, 0.0  ;;  %v5896_v45 = vmul.f32 0.01, %v5034_v41 }
 0x3b3   : > { %10425 = vrot.lane.b32.xlu1 %v10424_v19, %s10960_s17  ;;  %v4258_v40 = vrot.slane %v4244_v12, %v12200_v17  ;;  %v13854_v16 = vcombine.low %v3549_v48, %v3551_v43  ;;  %vm5735_vm3 = vcmp.gt.f32.partialorder %v5042_v14, 0.0  ;;  %v5897_v51 = vmul.f32 0.01, %v5042_v14  ;;  %v13856_v32 = vpop.permute.xlu0 %2153  ;;  %v13865_v19 = vpop.permute.xlu1 %2369 }
 0x3b4   : > { %v5898_v22 = vmul.f32 0.01, %v5041_v55  ;;  %v6058_v1 = vsel %vm5734_vm11, %v5034_v41, %v5896_v45  ;;  %10420 = vrot.lane.b32.xlu0 %v10419_v56, %s10959_s16  ;;  %v2704_v10 = vsel %vm16047_vm6, %v13346_v57, %v13743_v36  ;;  %v16431_v23 = vrot.slane %v13727_v18, %v12200_v17 }
 0x3b5   : > { %v6059_v48 = vsel %vm5735_vm3, %v5042_v14, %v5897_v51  ;;  %v6579_v43 = vrot.slane %v6058_v1, %v12200_v17  ;;  %v7462_v12 = vrot.slane %v13710_v49, 2  ;;  %v7463_v35 = vrot.slane %v13701_v62, 2  ;;  %v13870_v41 = vpop.f32.mrb[26].mxu0 }
 0x3b6   : > { %v4242_v27 = vcombine.low %v4234_v13, %v16431_v23  ;;  %v6060_v56 = vsel %vm5736_vm15, %v5041_v55, %v5898_v22  ;;  %v16432_v57 = vcombine.low %v13749_v30, %v13767_v60  ;;  %v2760_v18 = vsel %vm16044_vm7, %v2705_v3, %v13772_v42  ;;  %v10109_v14 = vpop.f32.mrb[27].mxu0 }
 0x3b7   : > { %v2759_v36 = vsel %vm16044_vm7, %v2704_v10, %v13774_v44  ;;  %v6580_v45 = vcombine.low %v6059_v48, %v6060_v56  ;;  %v13887_v55 = vsel %vm6194_vm13, %v6579_v43, 0.0  ;;  %v13890_v51 = vsel %vm7446_vm12, %v7462_v12, %v7463_v35  ;;  %v13909_v23 = vpop.permute.xlu0 %1723  ;;  %v13916_v56 = vpop.permute.xlu1 %1725 }
 0x3b8   : > { %10162 = vmatmul.mubr.msk.f32.gmra.mrb[62].mxu0 %vm16038_vm10, %v4242_v27  ;;  %v13879_v13 = vsel %vm6183_vm14, %v16432_v57, 0.0  ;;  %16433 = vst [vmem:[#allocation100_spill] sm:$0xff] %v13890_v51  ;;  %v10429_v60 = vpack.i.bf16 %v13685_v28, %v13890_v51  ;;  %v4656_v42 = vadd.f32 %v13782_v15, %v13400_v7  ;;  %vm5737_vm4 = vcmp.gt.f32.partialorder %v5043_v4, 0.0 }
 0x3b9   : > { %v10434_v30 = vpack.i.bf16 %v13759_v8, %v13879_v13  ;;  %10164 = vmatprep.mubr.msk.f32.mxu0 %vm16034_vm1, %v16244_v31  ;;  %v5899_v44 = vmul.f32 0.01, %v5043_v4  ;;  %v13901_v3 = vrot.slane %v6580_v45, %v12200_v17  ;;  %v7465_v22 = vrot.slane %v13825_v6, 2 }
 0x3ba   : > { %v2815_v1 = vsel %vm16043_vm8, %v2760_v18, %v13795_v34  ;;  %v2814_v10 = vsel %vm16043_vm8, %v2759_v36, %v13797_v20  ;;  %10430 = vrot.lane.b32.xlu0 %v10429_v60, %s10957_s12  ;;  %v5044_v15 = vcombine.high %v4656_v42, %v4656_v42  ;;  %v5051_v27 = vrot.slane %v4656_v42, %v12200_v17 }
 0x3bb   : > { %10435 = vrot.lane.b32.xlu1 %v10434_v30, %s10959_s16  ;;  %v6061_v48 = vsel %vm5737_vm4, %v5043_v4, %v5899_v44  ;;  %v16434_v43 = vrot.slane %v13739_v63, %v12200_v17  ;;  %v13919_v6 = vsel %vm7446_vm12, %v7463_v35, %v7465_v22  ;;  %v7290_v34 = vrot.slane %v13879_v13, 1  ;;  %v13927_v63 = vpop.f32.mrb[28].mxu0 }
 0x3bc   : > { %16435 = vst [vmem:[#allocation147_spill] sm:$0xff] %v13919_v6  ;;  %v7291_v20 = vrot.slane %v13840_v59, 1  ;;  %v2870_v57 = vsel %vm2824_vm9, %v2815_v1, %v13811_v47  ;;  %v5058_v18 = vrot.slane %v5044_v15, %v12200_v17  ;;  %v5059_v36 = vcombine.high %v5051_v27, %v5051_v27  ;;  %v10112_v47 = vpop.f32.mrb[29].mxu0  ;;  %v13941_v15 = vpop.permute.xlu0 %1939 }
 0x3bd   : > { %v4259_v12 = vcombine.low %v16434_v43, %v4258_v40  ;;  %vm5738_vm5 = vcmp.gt.f32.partialorder %v5051_v27, 0.0  ;;  %v5900_v4 = vmul.f32 0.01, %v5051_v27  ;;  %v10444_v35 = vpack.i.bf16 %v13693_v46, %v13919_v6  ;;  %v13945_v47 = vpop.permute.xlu1 %1941 }
 0x3be   : > { %v13932_v40 = vsel %vm7269_vm0, %v7290_v34, %v7291_v20  ;;  %v3559_v14 = vcombine.high %v2870_v57, %v2870_v57  ;;  %v3566_v45 = vrot.slane %v2870_v57, %v12200_v17  ;;  %v5060_v30 = vcombine.high %v5058_v18, %v5058_v18 }
 0x3bf   : > { %10165 = vmatmul.mubr.msk.f32.gmra.mrb[64].mxu0 %vm16038_vm10, %v4259_v12  ;;  %vm5739_vm11 = vcmp.gt.f32.partialorder %v5059_v36, 0.0  ;;  %vm5740_vm15 = vcmp.gt.f32.partialorder %v5058_v18, 0.0  ;;  %v5901_v60 = vmul.f32 0.01, %v5059_v36  ;;  %v5902_v42 = vmul.f32 0.01, %v5058_v18  ;;  %10445 = vrot.lane.b32.xlu1 %v10444_v35, %s10957_s12 }
 0x3c0   : > { %10167 = vmatprep.mubr.msk.f32.mxu0 %vm16034_vm1, %v16244_v31  ;;  %v6062_v44 = vsel %vm5738_vm5, %v5051_v27, %v5900_v4  ;;  %v10439_v22 = vpack.i.bf16 %v13710_v49, %v13932_v40  ;;  %v3573_v1 = vrot.slane %v3559_v14, %v12200_v17  ;;  %v3574_v34 = vcombine.high %v3566_v45, %v3566_v45 }
 0x3c1   : > { %v6063_v43 = vsel %vm5739_vm11, %v5059_v36, %v5901_v60  ;;  %v6581_v12 = vcombine.low %v6061_v48, %v6062_v44  ;;  %v2869_v57 = vsel %vm2824_vm9, %v2814_v10, %v13813_v52  ;;  %v6064_v8 = vsel %vm5740_vm15, %v5058_v18, %v5902_v42 }
 0x3c2   : > { %10440 = vrot.lane.b32.xlu0 %v10439_v22, %s10960_s17  ;;  %v3575_v27 = vcombine.high %v3573_v1, %v3573_v1  ;;  %v3558_v4 = vrot.slane %v2869_v57, %v12200_v17  ;;  %v10449_v35 = vpack.i.bf16 %v13792_v0, %v13840_v59  ;;  %v6597_v49 = vcombine.low %v6063_v43, %v6064_v8 }
 0x3c3   : > { %v6595_v14 = vrot.slane %v6581_v12, %v12200_v17  ;;  %v13952_v36 = vcombine.low %v3574_v34, %v3573_v1  ;;  %v7293_v48 = vrot.slane %v13887_v55, 1  ;;  %v2706_v52 = vsel %vm16047_vm6, %v13362_v53, %v13838_v50  ;;  %v2158_v34 = vpop.permute.xlu1 %2157 }
 0x3c4   : > { %v4261_v60 = vcombine.low %v3558_v4, %v3566_v45  ;;  %v7467_v10 = vrot.slane %v13879_v13, 2  ;;  %v7468_v18 = vrot.slane %v13840_v59, 2  ;;  %v13962_v44 = vrot.slane %v6597_v49, %v12200_v17 }
 0x3c5   : > { %v6596_v42 = vcombine.low %v13901_v3, %v6595_v14  ;;  %v4285_v8 = vrot.slane %v13952_v36, %v12200_v17  ;;  %v13967_v22 = vsel %vm7269_vm0, %v7291_v20, %v7293_v48  ;;  %v2761_v49 = vsel %vm16044_vm7, %v2706_v52, %v13836_v38  ;;  %v13980_v3 = vpop.permute.xlu0 %2155 }
 0x3c6   : > { %v4275_v45 = vrot.slane %v4261_v60, %v12200_v17  ;;  %10450 = vrot.lane.b32.xlu0 %v10449_v35, %s10959_s16  ;;  %v10454_v53 = vpack.i.bf16 %v13701_v62, %v13967_v22  ;;  %v13976_v50 = vsel %vm7446_vm12, %v7467_v10, %v7468_v18  ;;  %v2816_v1 = vsel %vm16043_vm8, %v2761_v49, %v13856_v32 }
 0x3c7   : > { %16436 = vst [vmem:[#allocation7_spill] sm:$0xff] %v13976_v50  ;;  %v10459_v20 = vpack.i.bf16 %v13821_v39, %v13976_v50  ;;  %v13988_v43 = vsel %vm6183_vm14, %v6596_v42, 0.0  ;;  %v4661_v12 = vadd.f32 %v13870_v41, %v13404_v9  ;;  %v2871_v38 = vsel %vm2824_vm9, %v2816_v1, %v13865_v19 }
 0x3c8   : > { %16437 = vst [vmem:[#allocation53_spill] sm:$0xff] %v13988_v43  ;;  %10455 = vrot.lane.b32.xlu1 %v10454_v53, %s10960_s17  ;;  %v10464_v57 = vpack.i.bf16 %v13890_v51, %v13988_v43  ;;  %vm5741_vm3 = vcmp.gt.f32.partialorder %v5060_v30, 0.0  ;;  %v5903_v4 = vmul.f32 0.01, %v5060_v30  ;;  %v3576_v35 = vcombine.high %v2871_v38, %v2871_v38  ;;  %v8271_v51 = vld [vmem:[%s15996_s3 + $0x60] sm:$0xff] }
 0x3c9   : > { %v3583_v32 = vrot.slane %v2871_v38, %v12200_v17  ;;  %v5061_v14 = vcombine.high %v4661_v12, %v4661_v12  ;;  %v5068_v48 = vrot.slane %v4661_v12, %v12200_v17  ;;  %v4268_v60 = vrot.slane %v13854_v16, %v12200_v17  ;;  %v14008_v10 = vpop.f32.mrb[30].mxu0  ;;  %v2374_v38 = vpop.permute.xlu1 %2373 }
 0x3ca   : > { %10460 = vrot.lane.b32.xlu0 %v10459_v20, %s10957_s12  ;;  %v6065_v41 = vsel %vm5741_vm3, %v5060_v30, %v5903_v4  ;;  %v2708_v19 = vsel %vm16047_vm6, %v13382_v5, %v13916_v56  ;;  %v2707_v52 = vsel %vm16047_vm6, %v13357_v33, %v13909_v23  ;;  %v14011_v42 = vrot.slane %v3576_v35, %v12200_v17  ;;  %v10115_v20 = vpop.f32.mrb[31].mxu0  ;;  %v2372_v56 = vpop.permute.xlu0 %2371 }
 0x3cb   : > { %v3591_v53 = vcombine.high %v3583_v32, %v3583_v32  ;;  %v4278_v49 = vcombine.low %v3575_v27, %v3583_v32  ;;  %v5075_v30 = vrot.slane %v5061_v14, %v12200_v17  ;;  %v5076_v16 = vcombine.high %v5068_v48, %v5068_v48 }
 0x3cc   : > { %10465 = vrot.lane.b32.xlu1 %v10464_v57, %s10959_s16  ;;  %vm5742_vm4 = vcmp.gt.f32.partialorder %v5068_v48, 0.0  ;;  %v5904_v1 = vmul.f32 0.01, %v5068_v48  ;;  %v4276_v5 = vcombine.low %v4268_v60, %v4275_v45  ;;  %v7470_v45 = vrot.slane %v13887_v55, 2  ;;  %v8260_v55 = vld [vmem:[%s15996_s3 + $0x8] sm:$0xff] }
 0x3cd   : > { %v4292_v12 = vrot.slane %v4278_v49, %v12200_v17  ;;  %v14017_v33 = vcombine.low %v3591_v53, %v14011_v42  ;;  %v5077_v23 = vcombine.high %v5075_v30, %v5075_v30  ;;  %vm5744_vm5 = vcmp.gt.f32.partialorder %v5075_v30, 0.0 }
 0x3ce   : > { %vm5743_vm11 = vcmp.gt.f32.partialorder %v5076_v16, 0.0  ;;  %v5905_v27 = vmul.f32 0.01, %v5076_v16  ;;  %v5906_v4 = vmul.f32 0.01, %v5075_v30  ;;  %v6066_v35 = vsel %vm5742_vm4, %v5068_v48, %v5904_v1  ;;  %10168 = vmatmul.mubr.msk.f32.gmra.mrb[66].mxu0 %vm16038_vm10, %v4276_v5  ;;  %v8259_v48 = vld [vmem:[%s15996_s3] sm:$0xff]  ;;  %v1728_v5 = vpop.permute.xlu0 %1727 }
 0x3cf   : > { %vm5745_vm15 = vcmp.gt.f32.partialorder %v5077_v23, 0.0  ;;  %v5907_v57 = vmul.f32 0.01, %v5077_v23  ;;  %v6598_v32 = vcombine.low %v6065_v41, %v6066_v35  ;;  %10170 = vmatprep.mubr.msk.f32.mxu0 %vm16034_vm1, %v16244_v31  ;;  %v2763_v53 = vsel %vm16044_vm7, %v2708_v19, %v13945_v47  ;;  %v8261_v1 = vld [vmem:[%s15996_s3 + $0x10] sm:$0xff] }
 0x3d0   : > { %v14023_v14 = vsel %vm5743_vm11, %v5076_v16, %v5905_v27  ;;  %v6068_v60 = vsel %vm5744_vm5, %v5075_v30, %v5906_v4  ;;  %v2762_v49 = vsel %vm16044_vm7, %v2707_v52, %v13941_v15  ;;  %v14041_v47 = vsel %vm7446_vm12, %v7468_v18, %v7470_v45  ;;  %v8262_v18 = vld [vmem:[%s15996_s3 + $0x18] sm:$0xff] }
 0x3d1   : > { %v6069_v41 = vsel %vm5745_vm15, %v5077_v23, %v5907_v57  ;;  %v6612_v20 = vrot.slane %v6598_v32, %v12200_v17  ;;  %v6620_v30 = vrot.slane %v14023_v14, %v12200_v17  ;;  %16438 = vst [vmem:[#allocation99_spill] sm:$0xff] %v14041_v47  ;;  %v10474_v19 = vpack.i.bf16 %v13844_v2, %v14041_v47  ;;  %v14056_v23 = vpop.f32.mrb[32].mxu0 }
 0x3d2   : > { %v6621_v15 = vcombine.low %v6068_v60, %v6069_v41  ;;  %v4666_v52 = vadd.f32 %v13927_v63, %v13412_v25  ;;  %v4293_v16 = vcombine.low %v4285_v8, %v4292_v12  ;;  %v2818_v63 = vsel %vm16043_vm8, %v2763_v53, %v2158_v34  ;;  %v14064_v12 = vpop.permute.xlu1 %1943  ;;  %v10118_v4 = vpop.f32.mrb[33].mxu0 }
 0x3d3   : > { %v14059_v27 = vcombine.low %v13962_v44, %v6612_v20  ;;  %v2817_v36 = vsel %vm16043_vm8, %v2762_v49, %v13980_v3  ;;  %v10254_v8 = vpack.c.bf16 %v8260_v55, %v8259_v48  ;;  %10475 = vrot.lane.b32.xlu1 %v10474_v19, %s10957_s12  ;;  %v2873_v44 = vsel %vm2824_vm9, %v2818_v63, %v2374_v38 }
 0x3d4   : > { %v14067_v35 = vrot.slane %v6621_v15, %v12200_v17  ;;  %v5078_v57 = vcombine.high %v4666_v52, %v4666_v52  ;;  %v5085_v32 = vrot.slane %v4666_v52, %v12200_v17  ;;  %10171 = vmatmul.mubr.msk.f32.gmra.mrb[68].mxu0 %vm16038_vm10, %v4293_v16  ;;  %v2872_v34 = vsel %vm2824_vm9, %v2817_v36, %v2372_v56  ;;  %v2160_v15 = vpop.permute.xlu0 %2159 }
 0x3d5   : > { %16439 = vst [vmem:[#allocation10_spill] sm:$0xff] %v14059_v27  ;;  %10255 = vmatpush1.bf16.msra.mxu1 %v10254_v8  ;;  %v10257_v3 = vpack.c.bf16 %v8262_v18, %v8261_v1  ;;  %v7295_v45 = vrot.slane %v13988_v43, 1  ;;  %v16440_v49 = vmov 0.0|0.0   ;;  %10173 = vmatprep.mubr.msk.f32.mxu0 %vm16034_vm1, %v16244_v31  ;;  %v3600_v48 = vcombine.high %v2873_v44, %v2873_v44 }
 0x3d6   : > { %v5092_v14 = vrot.slane %v5078_v57, %v12200_v17  ;;  %v5093_v60 = vcombine.high %v5085_v32, %v5085_v32  ;;  %vm5746_vm3 = vcmp.gt.f32.partialorder %v5085_v32, 0.0  ;;  %v5908_v53 = vmul.f32 0.01, %v5085_v32  ;;  %10256 = vmatprep.subr.bf16.mxu1 %v16440_v49  ;;  %v2376_v18 = vpop.permute.xlu1 %2375 }
 0x3d7   : > { %v3607_v55 = vrot.slane %v2873_v44, %v12200_v17  ;;  %v3592_v38 = vcombine.high %v14011_v42, %v14011_v42  ;;  %v3599_v56 = vrot.slane %v2872_v34, %v12200_v17  ;;  %v3614_v16 = vrot.slane %v3600_v48, %v12200_v17  ;;  %v8264_v34 = vld [vmem:[%s15996_s3 + $0x28] sm:$0xff] }
 0x3d8   : > { %v5094_v41 = vcombine.high %v5092_v14, %v5092_v14  ;;  %vm5747_vm4 = vcmp.gt.f32.partialorder %v5093_v60, 0.0  ;;  %vm5748_vm5 = vcmp.gt.f32.partialorder %v5092_v14, 0.0  ;;  %v5909_v20 = vmul.f32 0.01, %v5093_v60 }
 0x3d9   : > { %v5910_v19 = vmul.f32 0.01, %v5092_v14  ;;  %v6070_v52 = vsel %vm5746_vm3, %v5085_v32, %v5908_v53  ;;  %v3615_v1 = vcombine.high %v3607_v55, %v3607_v55  ;;  %10258 = vmatpush1.bf16.msra.mxu1 %v10257_v3  ;;  %v14084_v8 = vcombine.low %v3592_v38, %v3599_v56  ;;  %v8263_v32 = vld [vmem:[%s15996_s3 + $0x20] sm:$0xff] }
 0x3da   : > { %vm5749_vm11 = vcmp.gt.f32.partialorder %v5094_v41, 0.0  ;;  %v5911_v63 = vmul.f32 0.01, %v5094_v41  ;;  %v6071_v36 = vsel %vm5747_vm4, %v5093_v60, %v5909_v20  ;;  %10259 = vmatprep.subr.bf16.mxu1 %v16440_v49  ;;  %v3616_v4 = vcombine.high %v3614_v16, %v3614_v16 }
 0x3db   : > { %v6622_v42 = vcombine.low %v6070_v52, %v6071_v36  ;;  %v14087_v57 = vcombine.low %v3607_v55, %v3615_v1  ;;  %v2709_v44 = vsel %vm16047_vm6, %v13377_v26, %v1728_v5  ;;  %v6072_v3 = vsel %vm5748_vm5, %v5092_v14, %v5910_v19  ;;  %v1732_v19 = vpop.permute.xlu0 %1731 }
 0x3dc   : > { %v6073_v60 = vsel %vm5749_vm11, %v5094_v41, %v5911_v63  ;;  %v7296_v53 = vrot.slane %v14059_v27, 1  ;;  %v14101_v48 = vsel %vm6194_vm13, %v6620_v30, 0.0  ;;  %v14104_v5 = vcombine.low %v3614_v16, %v3616_v4 }
 0x3dd   : > { %v6636_v55 = vrot.slane %v6622_v42, %v12200_v17  ;;  %v6638_v26 = vcombine.low %v6072_v3, %v6073_v60  ;;  %v4309_v38 = vrot.slane %v14084_v8, %v12200_v17  ;;  %v7298_v14 = vrot.slane %v14101_v48, 1  ;;  %v8265_v8 = vld [vmem:[%s15996_s3 + $0x30] sm:$0xff]  ;;  %v8266_v42 = vld [vmem:[%s15996_s3 + $0x38] sm:$0xff] }
 0x3de   : > { %v14109_v56 = vsel %vm7269_vm0, %v7295_v45, %v7296_v53  ;;  %v4671_v41 = vadd.f32 %v14008_v10, %v13423_v24  ;;  %v10260_v20 = vpack.c.bf16 %v8264_v34, %v8263_v32  ;;  %v14122_v45 = vpop.permute.xlu1 %1947  ;;  %v4326_v4 = vrot.slane %v14104_v5, %v12200_v17 }
 0x3df   : > { %v6637_v30 = vcombine.low %v14067_v35, %v6636_v55  ;;  %v14116_v52 = vrot.slane %v6638_v26, %v12200_v17  ;;  %v10469_v1 = vpack.i.bf16 %v13879_v13, %v14109_v56  ;;  %v14125_v63 = vsel %vm7269_vm0, %v7296_v53, %v7298_v14 }
 0x3e0   : > { %v5095_v36 = vcombine.high %v4671_v41, %v4671_v41  ;;  %v5102_v10 = vrot.slane %v4671_v41, %v12200_v17  ;;  %10261 = vmatpush1.bf16.msra.mxu1 %v10260_v20  ;;  %v2764_v35 = vsel %vm16044_vm7, %v2709_v44, %v14064_v12  ;;  %v10484_v32 = vpack.i.bf16 %v13840_v59, %v14125_v63 }
 0x3e1   : > { %10470 = vrot.lane.b32.xlu0 %v10469_v1, %s10960_s17  ;;  %v2819_v34 = vsel %vm16043_vm8, %v2764_v35, %v2160_v15  ;;  %10262 = vmatprep.subr.bf16.mxu1 %v16440_v49  ;;  %v14145_v12 = vsel %vm6183_vm14, %v6637_v30, 0.0  ;;  %v10479_v53 = vpack.i.bf16 %v13919_v6, %v14059_v27  ;;  %v14150_v55 = vpop.f32.mrb[34].mxu0  ;;  %v10263_v26 = vpack.c.bf16 %v8266_v42, %v8265_v8  ;;  %v14158_v1 = vpop.permute.xlu0 %1729 }
 0x3e2   : > { %16441 = vst [vmem:[#allocation146_spill] sm:$0xff] %v14145_v12  ;;  %v5109_v44 = vrot.slane %v5095_v36, %v12200_v17  ;;  %v5110_v3 = vcombine.high %v5102_v10, %v5102_v10  ;;  %v5912_v60 = vmul.f32 0.01, %v5102_v10  ;;  %10485 = vrot.lane.b32.xlu1 %v10484_v32, %s10960_s17  ;;  %vm5750_vm15 = vcmp.gt.f32.partialorder %v5102_v10, 0.0  ;;  %v10121_v14 = vpop.f32.mrb[35].mxu0 }
 0x3e3   : > { %v2874_v15 = vsel %vm2824_vm9, %v2819_v34, %v2376_v18  ;;  %v10494_v5 = vpack.i.bf16 %v13976_v50, %v14145_v12  ;;  %v4302_v30 = vrot.slane %v14017_v33, %v12200_v17  ;;  %v14162_v18 = vpop.permute.xlu1 %2163  ;;  %v2711_v14 = vsel %vm16047_vm6, %v13387_v37, %v1732_v19 }
 0x3e4   : > { %v5111_v41 = vcombine.high %v5109_v44, %v5109_v44  ;;  %vm5751_vm3 = vcmp.gt.f32.partialorder %v5110_v3, 0.0  ;;  %v5913_v20 = vmul.f32 0.01, %v5110_v3  ;;  %vm5752_vm4 = vcmp.gt.f32.partialorder %v5109_v44, 0.0  ;;  %10264 = vmatpush1.bf16.msra.mxu1 %v10263_v26 }
 0x3e5   : > { %v5914_v36 = vmul.f32 0.01, %v5109_v44  ;;  %v3617_v35 = vcombine.high %v2874_v15, %v2874_v15  ;;  %v3624_v32 = vrot.slane %v2874_v15, %v12200_v17  ;;  %10480 = vrot.lane.b32.xlu0 %v10479_v53, %s10959_s16  ;;  %v6074_v8 = vsel %vm5750_vm15, %v5102_v10, %v5912_v60  ;;  %10265 = vmatprep.subr.bf16.mxu1 %v16440_v49  ;;  %v14168_v33 = vpop.f32.mrb[36].mxu0 }
 0x3e6   : > { %v6075_v42 = vsel %vm5751_vm3, %v5110_v3, %v5913_v20  ;;  %v4310_v34 = vcombine.low %v4302_v30, %v4309_v38  ;;  %10495 = vrot.lane.b32.xlu1 %v10494_v5, %s10959_s16  ;;  %v7472_v53 = vrot.slane %v13988_v43, 2  ;;  %v10124_v26 = vpop.f32.mrb[37].mxu0  ;;  %v7473_v37 = vrot.slane %v14059_v27, 2  ;;  %v16442_v38 = vld [vmem:[#allocation5_spill] sm:$0xff] }
 0x3e7   : > { %v6639_v16 = vcombine.low %v6074_v8, %v6075_v42  ;;  %v3631_v50 = vrot.slane %v3617_v35, %v12200_v17  ;;  %v3632_v15 = vcombine.high %v3624_v32, %v3624_v32  ;;  %v14174_v10 = vsel %vm5752_vm4, %v5109_v44, %v5914_v36  ;;  %v1946_v8 = vpop.permute.xlu0 %1945 }
 0x3e8   : > { %10174 = vmatmul.mubr.msk.f32.gmra.mrb[70].mxu0 %vm16038_vm10, %v4310_v34  ;;  %v4676_v19 = vadd.f32 %v14056_v23, %v16442_v38  ;;  %vm5753_vm5 = vcmp.gt.f32.partialorder %v5111_v41, 0.0  ;;  %v5915_v5 = vmul.f32 0.01, %v5111_v41  ;;  %v14186_v44 = vsel %vm7446_vm12, %v7472_v53, %v7473_v37 }
 0x3e9   : > { %v6653_v3 = vrot.slane %v6639_v16, %v12200_v17  ;;  %v3633_v60 = vcombine.high %v3631_v50, %v3631_v50  ;;  %v14181_v20 = vcombine.low %v3624_v32, %v3632_v15  ;;  %10176 = vmatprep.mubr.msk.f32.mxu0 %vm16034_vm1, %v16244_v31  ;;  %16443 = vst [vmem:[#allocation56_spill] sm:$0xff] %v14186_v44  ;;  %v8267_v16 = vld [vmem:[%s15996_s3 + $0x40] sm:$0xff]  ;;  %v8268_v32 = vld [vmem:[%s15996_s3 + $0x48] sm:$0xff] }
 0x3ea   : > { %v5112_v30 = vcombine.high %v4676_v19, %v4676_v19  ;;  %v5119_v36 = vrot.slane %v4676_v19, %v12200_v17  ;;  %v16444_v35 = vrot.slane %v14087_v57, %v12200_v17  ;;  %v10489_v57 = vpack.i.bf16 %v13932_v40, %v14186_v44 }
 0x3eb   : > { %v14199_v42 = vcombine.low %v14116_v52, %v6653_v3  ;;  %v4329_v15 = vcombine.low %v3631_v50, %v3633_v60  ;;  %v6077_v52 = vsel %vm5753_vm5, %v5111_v41, %v5915_v5  ;;  %v10266_v3 = vpack.c.bf16 %v8268_v32, %v8267_v16  ;;  %v8269_v60 = vld [vmem:[%s15996_s3 + $0x50] sm:$0xff]  ;;  %v8270_v41 = vld [vmem:[%s15996_s3 + $0x58] sm:$0xff] }
 0x3ec   : > { %v4327_v23 = vcombine.low %v16444_v35, %v4326_v4  ;;  %v2380_v4 = vpop.permute.xlu1 %2379  ;;  %v5126_v53 = vrot.slane %v5112_v30, %v12200_v17  ;;  %v5127_v26 = vcombine.high %v5119_v36, %v5119_v36  ;;  %vm5754_vm11 = vcmp.gt.f32.partialorder %v5119_v36, 0.0  ;;  %10490 = vrot.lane.b32.xlu0 %v10489_v57, %s10957_s12 }
 0x3ed   : > { %16445 = vst [vmem:[#allocation102_spill] sm:$0xff] %v14199_v42  ;;  %v5916_v19 = vmul.f32 0.01, %v5119_v36  ;;  %v4336_v35 = vrot.slane %v14181_v20, %v12200_v17  ;;  %v7475_v50 = vrot.slane %v14101_v48, 2  ;;  %v2766_v20 = vsel %vm16044_vm7, %v2711_v14, %v14122_v45  ;;  %v14222_v5 = vpop.f32.mrb[38].mxu0  ;;  %10267 = vmatpush1.bf16.msra.mxu1 %v10266_v3 }
 0x3ee   : > { %10177 = vmatmul.mubr.msk.f32.gmra.mrb[72].mxu0 %vm16038_vm10, %v4327_v23  ;;  %vm5755_vm15 = vcmp.gt.f32.partialorder %v5127_v26, 0.0  ;;  %vm5756_vm3 = vcmp.gt.f32.partialorder %v5126_v53, 0.0  ;;  %v5917_v30 = vmul.f32 0.01, %v5127_v26  ;;  %v14224_v48 = vcombine.high %v5126_v53, %v5126_v53  ;;  %v10127_v57 = vpop.f32.mrb[39].mxu0  ;;  %10268 = vmatprep.subr.bf16.mxu1 %v16440_v49 }
 0x3ef   : > { %10179 = vmatprep.mubr.msk.f32.mxu0 %vm16034_vm1, %v16244_v31  ;;  %v5918_v23 = vmul.f32 0.01, %v5126_v53  ;;  %v6078_v16 = vsel %vm5754_vm11, %v5119_v36, %v5916_v19  ;;  %v14228_v32 = vsel %vm7446_vm12, %v7473_v37, %v7475_v50  ;;  %v2821_v14 = vsel %vm16043_vm8, %v2766_v20, %v14162_v18  ;;  %v8272_v37 = vld [vmem:[%s15996_s3 + $0x68] sm:$0xff]  ;;  %v2162_v36 = vpop.permute.xlu0 %2161  ;;  %v16447_v19 = vld [vmem:[#allocation143_spill] sm:$0xff] }
 0x3f0   : > { %16446 = vst [vmem:[#allocation9_spill] sm:$0xff] %v14228_v32  ;;  %v6079_v34 = vsel %vm5755_vm15, %v5127_v26, %v5917_v30  ;;  %v6662_v6 = vcombine.low %v6077_v52, %v6078_v16  ;;  %v10504_v45 = vpack.i.bf16 %v13967_v22, %v14228_v32  ;;  %v2710_v52 = vsel %vm16047_vm6, %v16447_v19, %v14158_v1  ;;  %v2378_v50 = vpop.permute.xlu1 %2377 }
 0x3f1   : > { %v6080_v26 = vsel %vm5756_vm3, %v5126_v53, %v5918_v23  ;;  %v10269_v3 = vpack.c.bf16 %v8270_v41, %v8269_v60  ;;  %v2876_v18 = vsel %vm2824_vm9, %v2821_v14, %v2380_v4  ;;  %v2765_v57 = vsel %vm16044_vm7, %v2710_v52, %v1946_v8  ;;  %v8276_v52 = vld [vmem:[%s15996_s3 + $0x88] sm:$0xff] }
 0x3f2   : > { %v6663_v30 = vcombine.low %v6079_v34, %v6080_v26  ;;  %10505 = vrot.lane.b32.xlu1 %v10504_v45, %s10957_s12  ;;  %v3641_v20 = vcombine.high %v2876_v18, %v2876_v18  ;;  %v3648_v16 = vrot.slane %v2876_v18, %v12200_v17  ;;  %v6670_v0 = vrot.slane %v6662_v6, %v12200_v17  ;;  %v8273_v6 = vld [vmem:[%s15996_s3 + $0x70] sm:$0xff] }
 0x3f3   : > { %10270 = vmatpush1.bf16.msra.mxu1 %v10269_v3  ;;  %v10272_v53 = vpack.c.bf16 %v8272_v37, %v8271_v51  ;;  %v4343_v23 = vrot.slane %v4329_v15, %v12200_v17  ;;  %v2820_v1 = vsel %vm16043_vm8, %v2765_v57, %v2162_v36  ;;  %v8274_v51 = vld [vmem:[%s15996_s3 + $0x78] sm:$0xff]  ;;  %v7300_v45 = vrot.slane %v14145_v12, 1 }
 0x3f4   : > { %v6677_v60 = vrot.slane %v6663_v30, %v12200_v17  ;;  %v14254_v4 = vrot.slane %v3641_v20, %v12200_v17  ;;  %v3656_v34 = vcombine.high %v3648_v16, %v3648_v16  ;;  %10271 = vmatprep.subr.bf16.mxu1 %v16440_v49  ;;  %v2875_v41 = vsel %vm2824_vm9, %v2820_v1, %v2378_v50 }
 0x3f5   : > { %v4344_v8 = vcombine.low %v4336_v35, %v4343_v23  ;;  %v3640_v15 = vrot.slane %v2875_v41, %v12200_v17  ;;  %v7301_v14 = vrot.slane %v14199_v42, 1  ;;  %v16449_v36 = vrot.slane %v14174_v10, %v12200_v17  ;;  %v8275_v35 = vld [vmem:[%s15996_s3 + $0x80] sm:$0xff] }
 0x3f6   : > { %16448 = vst [vmem:[#allocation55_spill] sm:$0xff] %v14254_v4  ;;  %v6678_v37 = vcombine.low %v6670_v0, %v6677_v60  ;;  %v4681_v19 = vadd.f32 %v14150_v55, %v16442_v38  ;;  %v14283_v0 = vcombine.low %v3656_v34, %v14254_v4  ;;  %v10275_v10 = vpack.c.bf16 %v8274_v51, %v8273_v6 }
 0x3f7   : > { %v14272_v26 = vsel %vm6194_vm13, %v16449_v36, 0.0  ;;  %10273 = vmatpush1.bf16.msra.mxu1 %v10272_v53  ;;  %10180 = vmatmul.mubr.msk.f32.gmra.mrb[74].mxu0 %vm16038_vm10, %v4344_v8  ;;  %v14287_v3 = vsel %vm7269_vm0, %v7300_v45, %v7301_v14  ;;  %vm5757_vm4 = vcmp.gt.f32.partialorder %v14224_v48, 0.0  ;;  %v4345_v20 = vcombine.low %v3640_v15, %v3648_v16  ;;  %v8278_v45 = vld [vmem:[%s15996_s3 + $0x98] sm:$0xff] }
 0x3f8   : > { %16450 = vst [vmem:[#allocation101_spill] sm:$0xff] %v14287_v3  ;;  %v7303_v55 = vrot.slane %v14272_v26, 1  ;;  %10274 = vmatprep.subr.bf16.mxu1 %v16440_v49  ;;  %v10499_v18 = vpack.i.bf16 %v13988_v43, %v14287_v3  ;;  %v5129_v50 = vcombine.high %v4681_v19, %v4681_v19  ;;  %v5136_v30 = vrot.slane %v4681_v19, %v12200_v17 }
 0x3f9   : > { %v5919_v53 = vmul.f32 0.01, %v14224_v48  ;;  %v10278_v23 = vpack.c.bf16 %v8276_v52, %v8275_v35  ;;  %10182 = vmatprep.mubr.msk.f32.mxu0 %vm16034_vm1, %v16244_v31  ;;  %v10509_v6 = vpack.i.bf16 %v14041_v47, %v14199_v42  ;;  %v14310_v51 = vsel %vm6183_vm14, %v6678_v37, 0.0 }
 0x3fa   : > { %v14296_v57 = vsel %vm7269_vm0, %v7301_v14, %v7303_v55  ;;  %10500 = vrot.lane.b32.xlu0 %v10499_v18, %s10960_s17  ;;  %v5143_v60 = vrot.slane %v5129_v50, %v12200_v17  ;;  %v5144_v34 = vcombine.high %v5136_v30, %v5136_v30  ;;  %vm5758_vm5 = vcmp.gt.f32.partialorder %v5136_v30, 0.0  ;;  %16452 = vst [vmem:[#allocation57_spill] sm:$0xff] %v14310_v51 }
 0x3fb   : > { %16451 = vst [vmem:[#allocation11_spill] sm:$0xff] %v14296_v57  ;;  %v10514_v1 = vpack.i.bf16 %v14059_v27, %v14296_v57  ;;  %10276 = vmatpush1.bf16.msra.mxu1 %v10275_v10  ;;  %v5920_v16 = vmul.f32 0.01, %v5136_v30  ;;  %v6081_v41 = vsel %vm5757_vm4, %v14224_v48, %v5919_v53  ;;  %v8277_v48 = vld [vmem:[%s15996_s3 + $0x90] sm:$0xff]  ;;  %v10524_v36 = vpack.i.bf16 %v14186_v44, %v14310_v51 }
 0x3fc   : > { %v14313_v8 = vcombine.high %v5143_v60, %v5143_v60  ;;  %vm5759_vm11 = vcmp.gt.f32.partialorder %v5144_v34, 0.0  ;;  %vm5760_vm15 = vcmp.gt.f32.partialorder %v5143_v60, 0.0  ;;  %v5921_v15 = vmul.f32 0.01, %v5144_v34  ;;  %10277 = vmatprep.subr.bf16.mxu1 %v16440_v49 }
 0x3fd   : > { %10515 = vrot.lane.b32.xlu1 %v10514_v1, %s10960_s17  ;;  %v5922_v14 = vmul.f32 0.01, %v5143_v60  ;;  %v6082_v37 = vsel %vm5758_vm5, %v5136_v30, %v5920_v16  ;;  %v4686_v19 = vadd.f32 %v14168_v33, %v13421_v61  ;;  %v4360_v35 = vrot.slane %v14283_v0, %v12200_v17  ;;  %v14330_v18 = vpop.f32.mrb[40].mxu0 }
 0x3fe   : > { %v4353_v52 = vrot.slane %v4345_v20, %v12200_v17  ;;  %v6083_v10 = vsel %vm5759_vm11, %v5144_v34, %v5921_v15  ;;  %v6679_v55 = vcombine.low %v6081_v41, %v6082_v37  ;;  %10510 = vrot.lane.b32.xlu0 %v10509_v6, %s10959_s16  ;;  %v10281_v1 = vpack.c.bf16 %v8278_v45, %v8277_v48  ;;  %v10130_v16 = vpop.f32.mrb[41].mxu0  ;;  %v14342_v45 = vpop.permute.xlu1 %10375 }
 0x3ff   : > { %v6084_v50 = vsel %vm5760_vm15, %v5143_v60, %v5922_v14  ;;  %10279 = vmatpush1.bf16.msra.mxu1 %v10278_v23  ;;  %v5146_v30 = vcombine.high %v4686_v19, %v4686_v19  ;;  %v5153_v53 = vrot.slane %v4686_v19, %v12200_v17  ;;  %v5923_v33 = vmul.f32 0.01, %v14313_v8  ;;  %v8282_v16 = vld [vmem:[%s15996_s3 + $0xb8] sm:$0xff] }
 0x400   : > { %v6680_v44 = vcombine.low %v6083_v10, %v6084_v50  ;;  %v6687_v0 = vrot.slane %v6679_v55, %v12200_v17  ;;  %10280 = vmatprep.subr.bf16.mxu1 %v16440_v49  ;;  %v7477_v20 = vrot.slane %v14145_v12, 2  ;;  %v7478_v6 = vrot.slane %v14199_v42, 2  ;;  %v14358_v10 = vpop.permute.xlu0 %10370 }
 0x401   : > { %10525 = vrot.lane.b32.xlu1 %v10524_v36, %s10959_s16  ;;  %v5160_v34 = vrot.slane %v5146_v30, %v12200_v17  ;;  %v5161_v60 = vcombine.high %v5153_v53, %v5153_v53  ;;  %vm5762_vm3 = vcmp.gt.f32.partialorder %v5153_v53, 0.0  ;;  %v5924_v23 = vmul.f32 0.01, %v5153_v53  ;;  %v8279_v36 = vld [vmem:[%s15996_s3 + $0xa0] sm:$0xff] }
 0x402   : > { %v6694_v41 = vrot.slane %v6680_v44, %v12200_v17  ;;  %v4361_v15 = vcombine.low %v4353_v52, %v4360_v35  ;;  %v7480_v48 = vrot.slane %v14272_v26, 2  ;;  %v8280_v44 = vld [vmem:[%s15996_s3 + $0xa8] sm:$0xff]  ;;  %v14354_v52 = vsel %vm7446_vm12, %v7477_v20, %v7478_v6 }
 0x403   : > { %v5162_v14 = vcombine.high %v5160_v34, %v5160_v34  ;;  %vm5763_vm4 = vcmp.gt.f32.partialorder %v5161_v60, 0.0  ;;  %vm5764_vm5 = vcmp.gt.f32.partialorder %v5160_v34, 0.0  ;;  %v5925_v37 = vmul.f32 0.01, %v5161_v60  ;;  %10282 = vmatpush1.bf16.msra.mxu1 %v10281_v1  ;;  %16453 = vst [vmem:[#allocation103_spill] sm:$0xff] %v14354_v52  ;;  %v14360_v55 = vpop.f32.mrb[42].mxu0 }
 0x404   : > { %v14350_v19 = vcombine.low %v6687_v0, %v6694_v41  ;;  %v5926_v35 = vmul.f32 0.01, %v5160_v34  ;;  %v6086_v26 = vsel %vm5762_vm3, %v5153_v53, %v5924_v23  ;;  %10183 = vmatmul.mubr.msk.f32.gmra.mrb[76].mxu0 %vm16038_vm10, %v4361_v15  ;;  %10283 = vmatprep.subr.bf16.mxu1 %v16440_v49  ;;  %v10519_v1 = vpack.i.bf16 %v14109_v56, %v14354_v52  ;;  %v8281_v53 = vld [vmem:[%s15996_s3 + $0xb0] sm:$0xff]  ;;  %v10133_v0 = vpop.f32.mrb[43].mxu0 }
 0x405   : > { %vm5765_vm11 = vcmp.gt.f32.partialorder %v5162_v14, 0.0  ;;  %v5927_v50 = vmul.f32 0.01, %v5162_v14  ;;  %v6087_v30 = vsel %vm5763_vm4, %v5161_v60, %v5925_v37  ;;  %10185 = vmatprep.mubr.msk.f32.mxu0 %vm16034_vm1, %v16244_v31  ;;  %vm5761_vm15 = vcmp.gt.f32.partialorder %v14313_v8, 0.0 }
 0x406   : > { %v6703_v20 = vcombine.low %v6086_v26, %v6087_v30  ;;  %v14375_v60 = vsel %vm7446_vm12, %v7478_v6, %v7480_v48  ;;  %v10284_v23 = vpack.c.bf16 %v8280_v44, %v8279_v36  ;;  %v6088_v41 = vsel %vm5764_vm5, %v5160_v34, %v5926_v35  ;;  %10520 = vrot.lane.b32.xlu0 %v10519_v1, %s10957_s12  ;;  %v8283_v6 = vld [vmem:[%s15996_s3 + $0xc0] sm:$0xff]  ;;  %v8284_v34 = vld [vmem:[%s15996_s3 + $0xc8] sm:$0xff]  ;;  %v14390_v48 = vpop.permute.xlu1 %10385  ;;  %v8285_v35 = vld [vmem:[%s15996_s3 + $0xd0] sm:$0xff] }
 0x407   : > { %16454 = vst [vmem:[#allocation12_spill] sm:$0xff] %v14375_v60  ;;  %v6089_v15 = vsel %vm5765_vm11, %v5162_v14, %v5927_v50  ;;  %v10534_v37 = vpack.i.bf16 %v14125_v63, %v14375_v60  ;;  %v10373_v0 = vunpack.i.h.bf16 %v14358_v10  ;;  %v4691_v4 = vadd.f32 %v14222_v5, %v13421_v61  ;;  %v8286_v50 = vld [vmem:[%s15996_s3 + $0xd8] sm:$0xff] }
 0x408   : > { %v6704_v47 = vcombine.low %v6088_v41, %v6089_v15  ;;  %10285 = vmatpush1.bf16.msra.mxu1 %v10284_v23  ;;  %v10287_v26 = vpack.c.bf16 %v8282_v16, %v8281_v53  ;;  %v6085_v14 = vsel %vm5761_vm15, %v14313_v8, %v5923_v33  ;;  %v6711_v36 = vrot.slane %v6703_v20, %v12200_v17 }
 0x409   : > { %10535 = vrot.lane.b32.xlu1 %v10534_v37, %s10957_s12  ;;  %v14398_v5 = vsel %vm2824_vm9, 0.0, %v10373_v0  ;;  %10286 = vmatprep.subr.bf16.mxu1 %v16440_v49  ;;  %v5163_v33 = vcombine.high %v4691_v4, %v4691_v4  ;;  %v5170_v30 = vrot.slane %v4691_v4, %v12200_v17  ;;  %v10290_v53 = vpack.c.bf16 %v8284_v34, %v8283_v6 }
 0x40a   : > { %v6718_v8 = vrot.slane %v6704_v47, %v12200_v17  ;;  %v10388_v16 = vunpack.i.h.bf16 %v14390_v48  ;;  %v7305_v20 = vrot.slane %v14310_v51, 1  ;;  %v7306_v23 = vrot.slane %v14350_v19, 1 }
 0x40b   : > { %v5177_v41 = vrot.slane %v5163_v33, %v12200_v17  ;;  %v5178_v15 = vcombine.high %v5170_v30, %v5170_v30  ;;  %vm5766_vm3 = vcmp.gt.f32.partialorder %v5170_v30, 0.0  ;;  %v10293_v37 = vpack.c.bf16 %v8286_v50, %v8285_v35  ;;  %v14420_v44 = vpop.permute.xlu0 %10380 }
 0x40c   : > { %10288 = vmatpush1.bf16.msra.mxu1 %v10287_v26  ;;  %v6719_v0 = vcombine.low %v6711_v36, %v6718_v8  ;;  %v5928_v47 = vmul.f32 0.01, %v5170_v30  ;;  %v14417_v4 = vsel %vm7269_vm0, %v7305_v20, %v7306_v23  ;;  %v6702_v6 = vrot.slane %v6085_v14, %v12200_v17  ;;  %v8287_v14 = vld [vmem:[%s15996_s3 + $0xe0] sm:$0xff]  ;;  %v8288_v20 = vld [vmem:[%s15996_s3 + $0xe8] sm:$0xff] }
 0x40d   : > { %10289 = vmatprep.subr.bf16.mxu1 %v16440_v49  ;;  %v5179_v34 = vcombine.high %v5177_v41, %v5177_v41  ;;  %vm5767_vm4 = vcmp.gt.f32.partialorder %v5178_v15, 0.0  ;;  %vm5768_vm5 = vcmp.gt.f32.partialorder %v5177_v41, 0.0  ;;  %v5929_v1 = vmul.f32 0.01, %v5178_v15 }
 0x40e   : > { %v5930_v33 = vmul.f32 0.01, %v5177_v41  ;;  %v6090_v31 = vsel %vm5766_vm3, %v5170_v30, %v5928_v47  ;;  %v10529_v26 = vpack.i.bf16 %v14145_v12, %v14417_v4  ;;  %v7190_v36 = vsel %vm6194_vm13, %v6702_v6, 0.0 }
 0x40f   : > { %vm5769_vm11 = vcmp.gt.f32.partialorder %v5179_v34, 0.0  ;;  %v5931_v35 = vmul.f32 0.01, %v5179_v34  ;;  %v6091_v50 = vsel %vm5767_vm4, %v5178_v15, %v5929_v1  ;;  %v7308_v8 = vrot.slane %v7190_v36, 1 }
 0x410   : > { %10291 = vmatpush1.bf16.msra.mxu1 %v10290_v53  ;;  %v6720_v30 = vcombine.low %v6090_v31, %v6091_v50  ;;  %v10377_v47 = vunpack.i.l.bf16 %v14342_v45  ;;  %10530 = vrot.lane.b32.xlu0 %v10529_v26, %s10960_s17  ;;  %v14438_v1 = vsel %vm6183_vm14, %v6719_v0, 0.0  ;;  %v6092_v53 = vsel %vm5768_vm5, %v5177_v41, %v5930_v33  ;;  %v8289_v0 = vld [vmem:[%s15996_s3 + $0xf0] sm:$0xff] }
 0x411   : > { %10292 = vmatprep.subr.bf16.mxu1 %v16440_v49  ;;  %v6093_v15 = vsel %vm5769_vm11, %v5179_v34, %v5931_v35  ;;  %v14442_v12 = vsel %vm2824_vm9, 0.0, %v10388_v16  ;;  %v14445_v31 = vsel %vm7269_vm0, %v7306_v23, %v7308_v8  ;;  %v10296_v6 = vpack.c.bf16 %v8288_v20, %v8287_v14  ;;  %v8290_v16 = vld [vmem:[%s15996_s3 + $0xf8] sm:$0xff]  ;;  %v14463_v35 = vpop.permute.xlu0 %10390 }
 0x412   : > { %v6721_v50 = vcombine.low %v6092_v53, %v6093_v15  ;;  %v10544_v27 = vpack.i.bf16 %v14199_v42, %v14445_v31  ;;  %v10539_v26 = vpack.i.bf16 %v14228_v32, %v14350_v19  ;;  %v6728_v41 = vrot.slane %v6720_v30, %v12200_v17 }
 0x413   : > { %v10554_v23 = vpack.i.bf16 %v14354_v52, %v14438_v1  ;;  %v10383_v34 = vunpack.i.h.bf16 %v14420_v44  ;;  %v4696_v33 = vadd.f32 %v14330_v18, %v13389_v29  ;;  %v10382_v14 = vunpack.i.l.bf16 %v14420_v44 }
 0x414   : > { %10294 = vmatpush1.bf16.msra.mxu1 %v10293_v37  ;;  %v6735_v8 = vrot.slane %v6721_v50, %v12200_v17  ;;  %10545 = vrot.lane.b32.xlu1 %v10544_v27, %s10960_s17  ;;  %v7482_v37 = vrot.slane %v14310_v51, 2  ;;  %v7483_v20 = vrot.slane %v14350_v19, 2  ;;  %v10299_v18 = vpack.c.bf16 %v8290_v16, %v8289_v0  ;;  %v14477_v27 = vpop.permute.xlu1 %10395 }
 0x415   : > { %10295 = vmatprep.subr.bf16.mxu1 %v16440_v49  ;;  %10540 = vrot.lane.b32.xlu0 %v10539_v26, %s10959_s16  ;;  %v5180_v30 = vcombine.high %v4696_v33, %v4696_v33  ;;  %v5187_v53 = vrot.slane %v4696_v33, %v12200_v17  ;;  %v7485_v15 = vrot.slane %v7190_v36, 2  ;;  %v14473_v52 = vpop.f32.mrb[44].mxu0  ;;  %v10392_v44 = vunpack.i.l.bf16 %v14463_v35 }
 0x416   : > { %v14475_v50 = vcombine.low %v6728_v41, %v6735_v8  ;;  %v14480_v32 = vsel %vm7446_vm12, %v7482_v37, %v7483_v20  ;;  %vm8097_vm15 = vcmask 523264   ;;  %v10136_v42 = vpop.f32.mrb[45].mxu0  ;;  %vm8130_vm4 = vcmask 785408  }
 0x417   : > { %16456 = vst [vmem:[#allocation104_spill] sm:$0xff] %v14480_v32  ;;  %v5194_v26 = vrot.slane %v5180_v30, %v12200_v17  ;;  %v5195_v43 = vcombine.high %v5187_v53, %v5187_v53  ;;  %vm5770_vm3 = vcmp.gt.f32.partialorder %v5187_v53, 0.0  ;;  %v5932_v0 = vmul.f32 0.01, %v5187_v53  ;;  %v16459_v42 = vld [vmem:[#allocation145_spill] sm:$0xff] }
 0x418   : > { %16455 = vst [vmem:[#allocation58_spill] sm:$0xff] %v14475_v50  ;;  %10297 = vmatpush1.bf16.msra.mxu1 %v10296_v6  ;;  %10555 = vrot.lane.b32.xlu1 %v10554_v23, %s10959_s16  ;;  %v10549_v36 = vpack.i.bf16 %v14287_v3, %v14480_v32  ;;  %v14489_v16 = vsel %vm7446_vm12, %v7483_v20, %v7485_v15  ;;  %v16458_v41 = vunpack.i.l.bf16 %v14358_v10  ;;  %v14499_v30 = vpop.permute.xlu1 %10405 }
 0x419   : > { %10298 = vmatprep.subr.bf16.mxu1 %v16440_v49  ;;  %16457 = vst [vmem:[#allocation14_spill] sm:$0xff] %v14489_v16  ;;  %v5196_v33 = vcombine.high %v5194_v26, %v5194_v26  ;;  %vm5771_vm5 = vcmp.gt.f32.partialorder %v5195_v43, 0.0  ;;  %vm5772_vm11 = vcmp.gt.f32.partialorder %v5194_v26, 0.0  ;;  %v5933_v8 = vmul.f32 0.01, %v5195_v43 }
 0x41a   : > { %v8163_v6 = vsel %vm2824_vm9, %v16459_v42, %v16458_v41  ;;  %v5934_v37 = vmul.f32 0.01, %v5194_v26  ;;  %v6094_v23 = vsel %vm5770_vm3, %v5187_v53, %v5932_v0  ;;  %10550 = vrot.lane.b32.xlu0 %v10549_v36, %s10957_s12  ;;  %v10564_v49 = vpack.i.bf16 %v14296_v57, %v14489_v16  ;;  %v14507_v0 = vpop.permute.xlu0 %10400 }
 0x41b   : > { %v8195_v20 = vsel %vm8097_vm15, %v8163_v6, %v10377_v47  ;;  %v6095_v15 = vsel %vm5771_vm5, %v5195_v43, %v5933_v8  ;;  %v6743_v10 = vrot.slane %v6094_v23, %v12200_v17  ;;  %v16460_v42 = vunpack.i.h.bf16 %v14342_v45  ;;  %v14509_v36 = vpop.f32.mrb[46].mxu0 }
 0x41c   : > { %10300 = vmatpush1.bf16.msra.mxu1 %v10299_v18  ;;  %v8227_v41 = vsel %vm8130_vm4, %v8195_v20, %v10382_v14  ;;  %v10398_v57 = vunpack.i.h.bf16 %v14477_v27  ;;  %v10397_v47 = vunpack.i.l.bf16 %v14477_v27  ;;  %v6096_v43 = vsel %vm5772_vm11, %v5194_v26, %v5934_v37  ;;  %10565 = vrot.lane.b32.xlu1 %v10564_v49, %s10957_s12  ;;  %v10139_v18 = vpop.f32.mrb[47].mxu0 }
 0x41d   : > { %v8098_v53 = vsel %vm8097_vm15, %v14398_v5, %v16460_v42  ;;  %8430 = vmatprep.mubr.f32.mxu1 %v8227_v41  ;;  %v6744_v45 = vcombine.low %v6095_v15, %v6096_v43  ;;  %v10393_v6 = vunpack.i.h.bf16 %v14463_v35  ;;  %v14521_v23 = vsel %vm6194_vm13, %v6743_v10, 0.0 }
 0x41e   : > { %v8131_v14 = vsel %vm8130_vm4, %v8098_v53, %v10383_v34  ;;  %v10403_v27 = vunpack.i.h.bf16 %v14507_v0  ;;  %v4701_v26 = vadd.f32 %v14360_v55, %v13400_v7  ;;  %v16461_v34 = vunpack.i.l.bf16 %v14390_v48  ;;  %v14535_v53 = vpop.permute.xlu1 %10415 }
 0x41f   : > { %8431 = vmatmul.mubr.f32.vlgmr.msra.gmra.mrb[0].mxu1 %v8131_v14  ;;  %v5935_v35 = vmul.f32 0.01, %v5196_v33  ;;  %v7310_v20 = vrot.slane %v14438_v1, 1  ;;  %v7311_v15 = vrot.slane %v14475_v50, 1  ;;  %vm5773_vm3 = vcmp.gt.f32.partialorder %v5196_v33, 0.0 }
 0x420   : > { %v8164_v37 = vsel %vm2824_vm9, %v13789_v11, %v16461_v34  ;;  %v5197_v10 = vcombine.high %v4701_v26, %v4701_v26  ;;  %v5204_v41 = vrot.slane %v4701_v26, %v12200_v17  ;;  %v14538_v55 = vrot.slane %v6744_v45, %v12200_v17 }
 0x421   : > { %v8196_v49 = vsel %vm8097_vm15, %v8164_v37, %v10392_v44  ;;  %v10402_v11 = vunpack.i.l.bf16 %v14507_v0  ;;  %v14542_v48 = vsel %vm7269_vm0, %v7310_v20, %v7311_v15  ;;  %v8099_v44 = vsel %vm8097_vm15, %v14442_v12, %v10393_v6 }
 0x422   : > { %v8228_v42 = vsel %vm8130_vm4, %v8196_v49, %v10397_v47  ;;  %v5211_v43 = vrot.slane %v5197_v10, %v12200_v17  ;;  %v5212_v14 = vcombine.high %v5204_v41, %v5204_v41  ;;  %vm5774_vm5 = vcmp.gt.f32.partialorder %v5204_v41, 0.0  ;;  %v10411_v47 = vpop.permute.xlu0 %10410 }
 0x423   : > { %8435 = vmatprep.mubr.f32.mxu1 %v8228_v42  ;;  %v5936_v18 = vmul.f32 0.01, %v5204_v41  ;;  %v6097_v26 = vsel %vm5773_vm3, %v5196_v33, %v5935_v35  ;;  %v10559_v45 = vpack.i.bf16 %v14310_v51, %v14542_v48  ;;  %v8132_v34 = vsel %vm8130_vm4, %v8099_v44, %v10398_v57 }
 0x424   : > { %v10418_v0 = vunpack.i.h.bf16 %v14535_v53  ;;  %vm5775_vm11 = vcmp.gt.f32.partialorder %v5212_v14, 0.0  ;;  %vm5776_vm1 = vcmp.gt.f32.partialorder %v5211_v43, 0.0  ;;  %v5937_v37 = vmul.f32 0.01, %v5212_v14  ;;  %8436 = vmatmul.mubr.f32.gmra.mrb[2].mxu1 %v8132_v34 }
 0x425   : > { %v10417_v12 = vunpack.i.l.bf16 %v14535_v53  ;;  %v5938_v6 = vmul.f32 0.01, %v5211_v43  ;;  %v6098_v49 = vsel %vm5774_vm5, %v5204_v41, %v5936_v18  ;;  %10560 = vrot.lane.b32.xlu0 %v10559_v45, %s10960_s17  ;;  %v10569_v33 = vpack.i.bf16 %v14375_v60, %v14475_v50  ;;  %v14555_v20 = vpop.permute.xlu1 %10425 }
 0x426   : > { %v10413_v35 = vunpack.i.h.bf16 %v10411_v47  ;;  %v5213_v10 = vcombine.high %v5211_v43, %v5211_v43  ;;  %v6099_v57 = vsel %vm5775_vm11, %v5212_v14, %v5937_v37  ;;  %v6745_v42 = vcombine.low %v6097_v26, %v6098_v49  ;;  %v10421_v5 = vpop.permute.xlu0 %10420 }
 0x427   : > { %v10412_v44 = vunpack.i.l.bf16 %v10411_v47  ;;  %v6100_v8 = vsel %vm5776_vm1, %v5211_v43, %v5938_v6  ;;  %v7487_v34 = vrot.slane %v14438_v1, 2  ;;  %v7488_v53 = vrot.slane %v14475_v50, 2  ;;  %v16463_v47 = vld [vmem:[#allocation52_spill] sm:$0xff] }
 0x428   : > { %v7313_v41 = vrot.slane %v14521_v23, 1  ;;  %v6759_v18 = vrot.slane %v6745_v42, %v12200_v17  ;;  %v10427_v45 = vunpack.i.l.bf16 %v14555_v20  ;;  %v10422_v60 = vunpack.i.l.bf16 %v10421_v5 }
 0x429   : > { %v8165_v51 = vsel %vm2824_vm9, %v13685_v28, %v10402_v11  ;;  %v6761_v3 = vcombine.low %v6099_v57, %v6100_v8  ;;  %10570 = vrot.lane.b32.xlu0 %v10569_v33, %s10959_s16  ;;  %v14566_v14 = vsel %vm7446_vm12, %v7487_v34, %v7488_v53  ;;  %v8067_v26 = vsel %vm2824_vm9, %v16463_v47, %v10403_v27  ;;  %v14573_v37 = vpop.f32.mrb[48].mxu0  ;;  %v16467_v47 = vld [vmem:[#allocation97_spill] sm:$0xff] }
 0x42a   : > { %16462 = vst [vmem:[#allocation60_spill] sm:$0xff] %v14566_v14  ;;  %v14569_v43 = vsel %vm7269_vm0, %v7311_v15, %v7313_v41  ;;  %v6760_v6 = vcombine.low %v14538_v55, %v6759_v18  ;;  %v10579_v49 = vpack.i.bf16 %v14417_v4, %v14566_v14  ;;  %v16464_v8 = vunpack.i.l.bf16 %v14499_v30  ;;  %v10142_v33 = vpop.f32.mrb[49].mxu0 }
 0x42b   : > { %v10574_v28 = vpack.i.bf16 %v14350_v19, %v14569_v43  ;;  %v16465_v57 = vunpack.i.h.bf16 %v14499_v30  ;;  %v8166_v55 = vsel %vm2824_vm9, %v13693_v46, %v10417_v12  ;;  %v4706_v42 = vadd.f32 %v14473_v52, %v13404_v9 }
 0x42c   : > { %v8197_v11 = vsel %vm8097_vm15, %v8165_v51, %v16464_v8  ;;  %v10428_v34 = vunpack.i.h.bf16 %v14555_v20  ;;  %v6769_v30 = vrot.slane %v6761_v3, %v12200_v17  ;;  %v10423_v18 = vunpack.i.h.bf16 %v10421_v5  ;;  %v14604_v12 = vpop.permute.xlu0 %10430 }
 0x42d   : > { %v8229_v15 = vsel %vm8130_vm4, %v8197_v11, %v10412_v44  ;;  %v8100_v27 = vsel %vm8097_vm15, %v8067_v26, %v16465_v57  ;;  %10575 = vrot.lane.b32.xlu1 %v10574_v28, %s10960_s17  ;;  %v14594_v41 = vpop.permute.xlu1 %10435  ;;  %v8198_v44 = vsel %vm8097_vm15, %v8166_v55, %v10422_v60  ;;  %10580 = vrot.lane.b32.xlu0 %v10579_v49, %s10957_s12  ;;  %v14602_v52 = vsel %vm6183_vm14, %v6760_v6, 0.0 }
 0x42e   : > { %8440 = vmatprep.mubr.f32.mxu1 %v8229_v15  ;;  %v8133_v51 = vsel %vm8130_vm4, %v8100_v27, %v10413_v35  ;;  %v8230_v46 = vsel %vm8130_vm4, %v8198_v44, %v10427_v45  ;;  %16466 = vst [vmem:[#allocation106_spill] sm:$0xff] %v14602_v52  ;;  %v10584_v35 = vpack.i.bf16 %v14480_v32, %v14602_v52  ;;  %vm5777_vm1 = vcmp.gt.f32.partialorder %v5213_v10, 0.0 }
 0x42f   : > { %8441 = vmatmul.mubr.f32.gmra.mrb[4].mxu1 %v8133_v51  ;;  %v5214_v20 = vcombine.high %v4706_v42, %v4706_v42  ;;  %v5221_v60 = vrot.slane %v4706_v42, %v12200_v17  ;;  %v5939_v3 = vmul.f32 0.01, %v5213_v10  ;;  %v8068_v5 = vsel %vm2824_vm9, %v16467_v47, %v10418_v0 }
 0x430   : > { %8445 = vmatprep.mubr.f32.mxu1 %v8230_v46  ;;  %v7490_v45 = vrot.slane %v14521_v23, 2  ;;  %v4711_v26 = vadd.f32 %v14509_v36, %v13412_v25  ;;  %v10432_v8 = vunpack.i.l.bf16 %v14604_v12  ;;  %v8101_v15 = vsel %vm8097_vm15, %v8068_v5, %v10423_v18 }
 0x431   : > { %10585 = vrot.lane.b32.xlu1 %v10584_v35, %s10959_s16  ;;  %v5228_v6 = vrot.slane %v5214_v20, %v12200_v17  ;;  %v5229_v49 = vcombine.high %v5221_v60, %v5221_v60  ;;  %vm5778_vm3 = vcmp.gt.f32.partialorder %v5221_v60, 0.0  ;;  %v5940_v28 = vmul.f32 0.01, %v5221_v60  ;;  %v14619_v23 = vpop.permute.xlu1 %10445 }
 0x432   : > { %v6101_v33 = vsel %vm5777_vm1, %v5213_v10, %v5939_v3  ;;  %v14622_v36 = vsel %vm7446_vm12, %v7488_v53, %v7490_v45  ;;  %v5231_v27 = vcombine.high %v4711_v26, %v4711_v26  ;;  %v8134_v51 = vsel %vm8130_vm4, %v8101_v15, %v10428_v34 }
 0x433   : > { %v5230_v0 = vcombine.high %v5228_v6, %v5228_v6  ;;  %v5941_v57 = vmul.f32 0.01, %v5229_v49  ;;  %16468 = vst [vmem:[#allocation149_spill] sm:$0xff] %v14622_v36  ;;  %vm5779_vm5 = vcmp.gt.f32.partialorder %v5229_v49, 0.0  ;;  %v5942_v55 = vmul.f32 0.01, %v5228_v6  ;;  %8446 = vmatmul.mubr.f32.gmra.mrb[6].mxu1 %v8134_v51 }
 0x434   : > { %v6102_v42 = vsel %vm5778_vm3, %v5221_v60, %v5940_v28  ;;  %v10441_v44 = vpop.permute.xlu0 %10440  ;;  %vm5780_vm11 = vcmp.gt.f32.partialorder %v5228_v6, 0.0  ;;  %v10433_v18 = vunpack.i.h.bf16 %v14604_v12  ;;  %v10437_v35 = vunpack.i.l.bf16 %v14594_v41 }
 0x435   : > { %vm5781_vm10 = vcmp.gt.f32.partialorder %v5230_v0, 0.0  ;;  %v5943_v46 = vmul.f32 0.01, %v5230_v0  ;;  %v6762_v10 = vcombine.low %v6101_v33, %v6102_v42  ;;  %v10448_v20 = vunpack.i.h.bf16 %v14619_v23  ;;  %v14630_v3 = vpop.f32.mrb[50].mxu0 }
 0x436   : > { %v10594_v53 = vpack.i.bf16 %v14445_v31, %v14622_v36  ;;  %v6103_v60 = vsel %vm5779_vm5, %v5229_v49, %v5941_v57  ;;  %v10442_v5 = vunpack.i.l.bf16 %v10441_v44  ;;  %v10145_v45 = vpop.f32.mrb[51].mxu0  ;;  %v6104_v28 = vsel %vm5780_vm11, %v5228_v6, %v5942_v55 }
 0x437   : > { %v6105_v47 = vsel %vm5781_vm10, %v5230_v0, %v5943_v46  ;;  %v6776_v34 = vrot.slane %v6762_v10, %v12200_v17  ;;  %v5238_v12 = vrot.slane %v4711_v26, %v12200_v17  ;;  %v5245_v33 = vrot.slane %v5231_v27, %v12200_v17 }
 0x438   : > { %10595 = vrot.lane.b32.xlu1 %v10594_v53, %s10957_s12  ;;  %v8167_v15 = vsel %vm2824_vm9, %v13821_v39, %v10432_v8  ;;  %v6785_v51 = vcombine.low %v6104_v28, %v6105_v47  ;;  %v10447_v49 = vunpack.i.l.bf16 %v14619_v23  ;;  %v10443_v0 = vunpack.i.h.bf16 %v10441_v44  ;;  %v10451_v57 = vpop.permute.xlu0 %10450 }
 0x439   : > { %v14638_v42 = vcombine.low %v6769_v30, %v6776_v34  ;;  %v5246_v46 = vcombine.high %v5238_v12, %v5238_v12  ;;  %v5247_v10 = vcombine.high %v5245_v33, %v5245_v33  ;;  %vm5782_vm10 = vcmp.gt.f32.partialorder %v5238_v12, 0.0 }
 0x43a   : > { %v8199_v6 = vsel %vm8097_vm15, %v8167_v15, %v10437_v35  ;;  %v10456_v55 = vpop.permute.xlu1 %10455  ;;  %vm5784_vm1 = vcmp.gt.f32.partialorder %v5245_v33, 0.0  ;;  %v5944_v26 = vmul.f32 0.01, %v5238_v12  ;;  %v5946_v53 = vmul.f32 0.01, %v5245_v33 }
 0x43b   : > { %16469 = vst [vmem:[#allocation16_spill] sm:$0xff] %v14638_v42  ;;  %v8231_v27 = vsel %vm8130_vm4, %v8199_v6, %v10442_v5  ;;  %vm5783_vm3 = vcmp.gt.f32.partialorder %v5246_v46, 0.0  ;;  %vm5785_vm5 = vcmp.gt.f32.partialorder %v5247_v10, 0.0  ;;  %v5945_v39 = vmul.f32 0.01, %v5246_v46 }
 0x43c   : > { %v5947_v30 = vmul.f32 0.01, %v5247_v10  ;;  %8450 = vmatprep.mubr.f32.mxu1 %v8231_v27  ;;  %v6106_v8 = vsel %vm5782_vm10, %v5238_v12, %v5944_v26  ;;  %v10453_v23 = vunpack.i.h.bf16 %v10451_v57  ;;  %v10452_v44 = vunpack.i.l.bf16 %v10451_v57  ;;  %v14650_v27 = vpop.permute.xlu0 %10460 }
 0x43d   : > { %v10458_v47 = vunpack.i.h.bf16 %v10456_v55  ;;  %v6107_v34 = vsel %vm5783_vm3, %v5246_v46, %v5945_v39  ;;  %v10457_v28 = vunpack.i.l.bf16 %v10456_v55  ;;  %v8069_v35 = vsel %vm2824_vm9, %v13591_v58, %v10433_v18 }
 0x43e   : > { %v6109_v45 = vsel %vm5785_vm5, %v5247_v10, %v5947_v30  ;;  %v6784_v15 = vrot.slane %v6103_v60, %v12200_v17  ;;  %v6108_v11 = vsel %vm5784_vm1, %v5245_v33, %v5946_v53  ;;  %v6786_v5 = vcombine.low %v6106_v8, %v6107_v34  ;;  %v16471_v10 = vld [vmem:[#allocation98_spill] sm:$0xff]  ;;  %v14661_v55 = vpop.permute.xlu1 %10465 }
 0x43f   : > { %v16470_v6 = vunpack.i.h.bf16 %v14594_v41  ;;  %v6802_v12 = vcombine.low %v6108_v11, %v6109_v45  ;;  %v8168_v46 = vsel %vm2824_vm9, %v13844_v2, %v10447_v49  ;;  %v8070_v58 = vsel %vm2824_vm9, %v16471_v10, %v10448_v20 }
 0x440   : > { %v6793_v18 = vrot.slane %v6785_v51, %v12200_v17  ;;  %v6800_v60 = vrot.slane %v6786_v5, %v12200_v17  ;;  %v8200_v41 = vsel %vm8097_vm15, %v8168_v46, %v10452_v44  ;;  %v8103_v33 = vsel %vm8097_vm15, %v8070_v58, %v10453_v23 }
 0x441   : > { %v8102_v32 = vsel %vm8097_vm15, %v8069_v35, %v16470_v6  ;;  %v8136_v2 = vsel %vm8130_vm4, %v8103_v33, %v10458_v47  ;;  %v7315_v49 = vrot.slane %v14602_v52, 1  ;;  %v7316_v51 = vrot.slane %v14638_v42, 1 }
 0x442   : > { %v8135_v57 = vsel %vm8130_vm4, %v8102_v32, %v10443_v0  ;;  %v8232_v32 = vsel %vm8130_vm4, %v8200_v41, %v10457_v28  ;;  %v6801_v20 = vcombine.low %v6793_v18, %v6800_v60  ;;  %v7196_v0 = vsel %vm6194_vm13, %v6784_v15, 0.0 }
 0x443   : > { %8451 = vmatmul.mubr.f32.gmra.mrb[8].mxu1 %v8135_v57  ;;  %v4716_v26 = vadd.f32 %v14573_v37, %v13423_v24  ;;  %v6810_v53 = vrot.slane %v6802_v12, %v12200_v17  ;;  %v10462_v39 = vunpack.i.l.bf16 %v14650_v27  ;;  %v7318_v8 = vrot.slane %v7196_v0, 1 }
 0x444   : > { %8455 = vmatprep.mubr.f32.mxu1 %v8232_v32  ;;  %v14676_v23 = vsel %vm7269_vm0, %v7315_v49, %v7316_v51  ;;  %v14681_v34 = vsel %vm6183_vm14, %v6801_v20, 0.0  ;;  %v4725_v45 = vpop.f32.mrb[52].mxu0  ;;  %v10467_v37 = vunpack.i.l.bf16 %v14661_v55  ;;  %v7493_v15 = vrot.slane %v14638_v42, 2 }
 0x445   : > { %v5248_v44 = vcombine.high %v4716_v26, %v4716_v26  ;;  %v5255_v47 = vrot.slane %v4716_v26, %v12200_v17  ;;  %v10589_v28 = vpack.i.bf16 %v14438_v1, %v14676_v23  ;;  %v14687_v35 = vsel %vm7269_vm0, %v7316_v51, %v7318_v8  ;;  %v10148_v5 = vpop.f32.mrb[53].mxu0 }
 0x446   : > { %v10604_v6 = vpack.i.bf16 %v14475_v50, %v14687_v35  ;;  %v10599_v46 = vpack.i.bf16 %v14489_v16, %v14638_v42  ;;  %v10614_v58 = vpack.i.bf16 %v14566_v14, %v14681_v34  ;;  %v7492_v18 = vrot.slane %v14602_v52, 2 }
 0x447   : > { %8456 = vmatmul.mubr.f32.gmra.mrb[10].mxu1 %v8136_v2  ;;  %v5262_v12 = vrot.slane %v5248_v44, %v12200_v17  ;;  %v5263_v57 = vcombine.high %v5255_v47, %v5255_v47  ;;  %10590 = vrot.lane.b32.xlu0 %v10589_v28, %s10960_s17  ;;  %vm5786_vm11 = vcmp.gt.f32.partialorder %v5255_v47, 0.0  ;;  %v5948_v10 = vmul.f32 0.01, %v5255_v47  ;;  %v14702_v2 = vpop.permute.xlu1 %10475 }
 0x448   : > { %10605 = vrot.lane.b32.xlu1 %v10604_v6, %s10960_s17  ;;  %v14700_v33 = vpop.f32.mrb[54].mxu0  ;;  %v14705_v49 = vsel %vm7446_vm12, %v7492_v18, %v7493_v15  ;;  %v4721_v20 = vadd.f32 %v14630_v3, %v16442_v38  ;;  %v7495_v51 = vrot.slane %v7196_v0, 2 }
 0x449   : > { %v5264_v60 = vcombine.high %v5262_v12, %v5262_v12  ;;  %vm5787_vm10 = vcmp.gt.f32.partialorder %v5263_v57, 0.0  ;;  %vm5788_vm1 = vcmp.gt.f32.partialorder %v5262_v12, 0.0  ;;  %v5949_v41 = vmul.f32 0.01, %v5263_v57  ;;  %16472 = vst [vmem:[#allocation62_spill] sm:$0xff] %v14705_v49  ;;  %v10151_v26 = vpop.f32.mrb[55].mxu0 }
 0x44a   : > { %v5950_v32 = vmul.f32 0.01, %v5262_v12  ;;  %v6110_v8 = vsel %vm5786_vm11, %v5255_v47, %v5948_v10  ;;  %v5265_v30 = vcombine.high %v4721_v20, %v4721_v20  ;;  %v5272_v11 = vrot.slane %v4721_v20, %v12200_v17 }
 0x44b   : > { %v6111_v44 = vsel %vm5787_vm10, %v5263_v57, %v5949_v41  ;;  %vm5789_vm3 = vcmp.gt.f32.partialorder %v5264_v60, 0.0  ;;  %v5951_v28 = vmul.f32 0.01, %v5264_v60  ;;  %10600 = vrot.lane.b32.xlu0 %v10599_v46, %s10959_s16  ;;  %v10609_v3 = vpack.i.bf16 %v14542_v48, %v14705_v49 }
 0x44c   : > { %v6112_v5 = vsel %vm5788_vm1, %v5262_v12, %v5950_v32  ;;  %v6803_v6 = vcombine.low %v6110_v8, %v6111_v44  ;;  %10615 = vrot.lane.b32.xlu1 %v10614_v58, %s10959_s16  ;;  %v14718_v0 = vsel %vm7446_vm12, %v7493_v15, %v7495_v51  ;;  %v5279_v12 = vrot.slane %v5265_v30, %v12200_v17 }
 0x44d   : > { %v6825_v18 = vrot.slane %v6112_v5, %v12200_v17  ;;  %16473 = vst [vmem:[#allocation108_spill] sm:$0xff] %v14718_v0  ;;  %v5280_v57 = vcombine.high %v5272_v11, %v5272_v11  ;;  %vm5790_vm5 = vcmp.gt.f32.partialorder %v5272_v11, 0.0  ;;  %v5952_v46 = vmul.f32 0.01, %v5272_v11 }
 0x44e   : > { %v6817_v47 = vrot.slane %v6803_v6, %v12200_v17  ;;  %v6113_v10 = vsel %vm5789_vm3, %v5264_v60, %v5951_v28  ;;  %v10624_v41 = vpack.i.bf16 %v14569_v43, %v14718_v0  ;;  %v8169_v58 = vsel %vm2824_vm9, %v13932_v40, %v10462_v39 }
 0x44f   : > { %10610 = vrot.lane.b32.xlu0 %v10609_v3, %s10957_s12  ;;  %vm5791_vm11 = vcmp.gt.f32.partialorder %v5280_v57, 0.0  ;;  %vm5792_vm10 = vcmp.gt.f32.partialorder %v5279_v12, 0.0  ;;  %v14732_v30 = vsel %vm6194_vm13, %v6825_v18, 0.0  ;;  %v5953_v15 = vmul.f32 0.01, %v5280_v57 }
 0x450   : > { %v14727_v32 = vcombine.low %v6810_v53, %v6817_v47  ;;  %v5954_v20 = vmul.f32 0.01, %v5279_v12  ;;  %v6114_v51 = vsel %vm5790_vm5, %v5272_v11, %v5952_v46  ;;  %10625 = vrot.lane.b32.xlu1 %v10624_v41, %s10957_s12  ;;  %v8201_v60 = vsel %vm8097_vm15, %v8169_v58, %v10467_v37  ;;  %v16475_v46 = vld [vmem:[#allocation144_spill] sm:$0xff] }
 0x451   : > { %v6826_v26 = vcombine.low %v6113_v10, %v6114_v51  ;;  %v7320_v40 = vrot.slane %v14681_v34, 1  ;;  %v4726_v39 = vadd.f32 %v4725_v45, %v16442_v38  ;;  %v5281_v8 = vcombine.high %v5279_v12, %v5279_v12 }
 0x452   : > { %v7321_v53 = vrot.slane %v14727_v32, 1  ;;  %v6115_v44 = vsel %vm5791_vm11, %v5280_v57, %v5953_v15  ;;  %v6116_v28 = vsel %vm5792_vm10, %v5279_v12, %v5954_v20  ;;  %v7323_v6 = vrot.slane %v14732_v30, 1 }
 0x453   : > { %v10471_v5 = vpop.permute.xlu0 %10470  ;;  %v6827_v18 = vcombine.low %v6115_v44, %v6116_v28  ;;  %v16474_v47 = vunpack.i.h.bf16 %v14650_v27  ;;  %v5282_v45 = vcombine.high %v4726_v39, %v4726_v39  ;;  %v5289_v12 = vrot.slane %v4726_v39, %v12200_v17 }
 0x454   : > { %v10473_v3 = vunpack.i.h.bf16 %v10471_v5  ;;  %v10472_v11 = vunpack.i.l.bf16 %v10471_v5  ;;  %v14745_v10 = vsel %vm7269_vm0, %v7320_v40, %v7321_v53  ;;  %v14748_v41 = vsel %vm7269_vm0, %v7321_v53, %v7323_v6  ;;  %v10486_v15 = vpop.permute.xlu1 %10485 }
 0x455   : > { %v8071_v37 = vsel %vm2824_vm9, %v16475_v46, %v16474_v47  ;;  %v6834_v57 = vrot.slane %v6826_v26, %v12200_v17  ;;  %v6841_v58 = vrot.slane %v6827_v18, %v12200_v17  ;;  %v16476_v27 = vunpack.i.h.bf16 %v14661_v55  ;;  %v4735_v44 = vpop.f32.mrb[56].mxu0 }
 0x456   : > { %v8233_v20 = vsel %vm8130_vm4, %v8201_v60, %v10472_v11  ;;  %v10619_v53 = vpack.i.bf16 %v14602_v52, %v14745_v10  ;;  %v10634_v39 = vpack.i.bf16 %v14638_v42, %v14748_v41  ;;  %v5296_v28 = vrot.slane %v5282_v45, %v12200_v17  ;;  %v10154_v5 = vpop.f32.mrb[57].mxu0 }
 0x457   : > { %v8104_v51 = vsel %vm8097_vm15, %v8071_v37, %v16476_v27  ;;  %v10481_v40 = vpop.permute.xlu0 %10480  ;;  %8460 = vmatprep.mubr.f32.mxu1 %v8233_v20  ;;  %v10477_v60 = vunpack.i.l.bf16 %v14702_v2  ;;  %v6842_v6 = vcombine.low %v6834_v57, %v6841_v58  ;;  %v5297_v55 = vcombine.high %v5289_v12, %v5289_v12 }
 0x458   : > { %v8137_v26 = vsel %vm8130_vm4, %v8104_v51, %v10473_v3  ;;  %vm5793_vm1 = vcmp.gt.f32.partialorder %v5281_v8, 0.0  ;;  %v10488_v18 = vunpack.i.h.bf16 %v10486_v15  ;;  %v10482_v11 = vunpack.i.l.bf16 %v10481_v40  ;;  %10620 = vrot.lane.b32.xlu0 %v10619_v53, %s10960_s17  ;;  %10635 = vrot.lane.b32.xlu1 %v10634_v39, %s10960_s17  ;;  %v14766_v45 = vpop.permute.xlu1 %10495 }
 0x459   : > { %8461 = vmatmul.mubr.f32.gmra.mrb[12].mxu1 %v8137_v26  ;;  %vm5794_vm3 = vcmp.gt.f32.partialorder %v5289_v12, 0.0  ;;  %v5955_v47 = vmul.f32 0.01, %v5281_v8  ;;  %v10487_v46 = vunpack.i.l.bf16 %v10486_v15  ;;  %vm5795_vm5 = vcmp.gt.f32.partialorder %v5297_v55, 0.0 }
 0x45a   : > { %vm5796_vm11 = vcmp.gt.f32.partialorder %v5296_v28, 0.0  ;;  %v5956_v3 = vmul.f32 0.01, %v5289_v12  ;;  %v10483_v37 = vunpack.i.h.bf16 %v10481_v40  ;;  %v5298_v20 = vcombine.high %v5296_v28, %v5296_v28 }
 0x45b   : > { %v5957_v57 = vmul.f32 0.01, %v5297_v55  ;;  %v5958_v58 = vmul.f32 0.01, %v5296_v28  ;;  %v6117_v27 = vsel %vm5793_vm1, %v5281_v8, %v5955_v47  ;;  %v10629_v53 = vpack.i.bf16 %v14622_v36, %v14727_v32 }
 0x45c   : > { %v6118_v51 = vsel %vm5794_vm3, %v5289_v12, %v5956_v3  ;;  %v8170_v39 = vsel %vm2824_vm9, %v13967_v22, %v10477_v60  ;;  %v16477_v8 = vunpack.i.h.bf16 %v14702_v2  ;;  %v5959_v47 = vmul.f32 0.01, %v5298_v20 }
 0x45d   : > { %v6119_v26 = vsel %vm5795_vm5, %v5297_v55, %v5957_v57  ;;  %v6120_v15 = vsel %vm5796_vm11, %v5296_v28, %v5958_v58  ;;  %v6843_v5 = vcombine.low %v6117_v27, %v6118_v51  ;;  %v8202_v14 = vsel %vm8097_vm15, %v8170_v39, %v10482_v11  ;;  %10630 = vrot.lane.b32.xlu0 %v10629_v53, %s10959_s16 }
 0x45e   : > { %v6844_v16 = vcombine.low %v6119_v26, %v6120_v15  ;;  %v8234_v42 = vsel %vm8130_vm4, %v8202_v14, %v10487_v46  ;;  %v8072_v12 = vsel %vm2824_vm9, %v13701_v62, %v16477_v8  ;;  %v14784_v28 = vsel %vm6183_vm14, %v6842_v6, 0.0  ;;  %v14797_v3 = vpop.permute.xlu0 %10490 }
 0x45f   : > { %8465 = vmatprep.mubr.f32.mxu1 %v8234_v42  ;;  %v8105_v22 = vsel %vm8097_vm15, %v8072_v12, %v10483_v37  ;;  %v4731_v60 = vadd.f32 %v14700_v33, %v13421_v61  ;;  %vm5797_vm10 = vcmp.gt.f32.partialorder %v5298_v20, 0.0  ;;  %v6851_v55 = vrot.slane %v6843_v5, %v12200_v17 }
 0x460   : > { %v6858_v14 = vrot.slane %v6844_v16, %v12200_v17  ;;  %v8138_v2 = vsel %vm8130_vm4, %v8105_v22, %v10488_v18  ;;  %v10644_v62 = vpack.i.bf16 %v14705_v49, %v14784_v28  ;;  %v7497_v6 = vrot.slane %v14681_v34, 2 }
 0x461   : > { %8466 = vmatmul.mubr.f32.gmra.mrb[14].mxu1 %v8138_v2  ;;  %v5299_v42 = vcombine.high %v4731_v60, %v4731_v60  ;;  %v5306_v11 = vrot.slane %v4731_v60, %v12200_v17  ;;  %v7498_v33 = vrot.slane %v14727_v32, 2  ;;  %v7500_v37 = vrot.slane %v14732_v30, 2 }
 0x462   : > { %v14795_v46 = vcombine.low %v6851_v55, %v6858_v14  ;;  %v4736_v16 = vadd.f32 %v4735_v44, %v13421_v61  ;;  %v10497_v18 = vunpack.i.l.bf16 %v14766_v45  ;;  %v14803_v57 = vsel %vm5797_vm10, %v5298_v20, %v5959_v47  ;;  %10645 = vrot.lane.b32.xlu1 %v10644_v62, %s10959_s16 }
 0x463   : > { %v5313_v58 = vrot.slane %v5299_v42, %v12200_v17  ;;  %v5314_v27 = vcombine.high %v5306_v11, %v5306_v11  ;;  %v14808_v51 = vsel %vm7446_vm12, %v7497_v6, %v7498_v33  ;;  %v14811_v53 = vsel %vm7446_vm12, %v7498_v33, %v7500_v37 }
 0x464   : > { %16478 = vst [vmem:[#allocation151_spill] sm:$0xff] %v14808_v51  ;;  %16479 = vst [vmem:[#allocation13_spill] sm:$0xff] %v14811_v53  ;;  %v5316_v39 = vcombine.high %v4736_v16, %v4736_v16  ;;  %v5323_v30 = vrot.slane %v4736_v16, %v12200_v17  ;;  %v10493_v44 = vunpack.i.h.bf16 %v14797_v3  ;;  %v10492_v26 = vunpack.i.l.bf16 %v14797_v3  ;;  %v14816_v20 = vpop.permute.xlu1 %10505 }
 0x465   : > { %v5315_v15 = vcombine.high %v5313_v58, %v5313_v58  ;;  %v5960_v5 = vmul.f32 0.01, %v5306_v11  ;;  %vm5799_vm1 = vcmp.gt.f32.partialorder %v5314_v27, 0.0  ;;  %vm5800_vm3 = vcmp.gt.f32.partialorder %v5313_v58, 0.0 }
 0x466   : > { %v5961_v8 = vmul.f32 0.01, %v5314_v27  ;;  %v5962_v12 = vmul.f32 0.01, %v5313_v58  ;;  %v10639_v22 = vpack.i.bf16 %v14676_v23, %v14808_v51  ;;  %v10654_v60 = vpack.i.bf16 %v14687_v35, %v14811_v53 }
 0x467   : > { %vm5801_vm5 = vcmp.gt.f32.partialorder %v5315_v15, 0.0  ;;  %v5963_v47 = vmul.f32 0.01, %v5315_v15  ;;  %vm5798_vm11 = vcmp.gt.f32.partialorder %v5306_v11, 0.0  ;;  %v5330_v14 = vrot.slane %v5316_v39, %v12200_v17  ;;  %v14824_v62 = vpop.f32.mrb[58].mxu0 }
 0x468   : > { %v5331_v2 = vcombine.high %v5323_v30, %v5323_v30  ;;  %v6123_v42 = vsel %vm5799_vm1, %v5314_v27, %v5961_v8  ;;  %v6124_v6 = vsel %vm5800_vm3, %v5313_v58, %v5962_v12  ;;  %10640 = vrot.lane.b32.xlu0 %v10639_v22, %s10957_s12  ;;  %10655 = vrot.lane.b32.xlu1 %v10654_v60, %s10957_s12  ;;  %v5964_v33 = vmul.f32 0.01, %v5323_v30  ;;  %v10157_v37 = vpop.f32.mrb[59].mxu0 }
 0x469   : > { %v6125_v3 = vsel %vm5801_vm5, %v5315_v15, %v5963_v47  ;;  %v5332_v40 = vcombine.high %v5330_v14, %v5330_v14  ;;  %vm5802_vm10 = vcmp.gt.f32.partialorder %v5323_v30, 0.0  ;;  %v6122_v55 = vsel %vm5798_vm11, %v5306_v11, %v5960_v5 }
 0x46a   : > { %v6868_v16 = vcombine.low %v6124_v6, %v6125_v3  ;;  %vm5803_vm8 = vcmp.gt.f32.partialorder %v5331_v2, 0.0  ;;  %vm5804_vm7 = vcmp.gt.f32.partialorder %v5330_v14, 0.0  ;;  %v5965_v49 = vmul.f32 0.01, %v5331_v2 }
 0x46b   : > { %v5966_v39 = vmul.f32 0.01, %v5330_v14  ;;  %v6867_v36 = vcombine.low %v6122_v55, %v6123_v42  ;;  %vm5805_vm6 = vcmp.gt.f32.partialorder %v5332_v40, 0.0  ;;  %v5967_v52 = vmul.f32 0.01, %v5332_v40 }
 0x46c   : > { %v10501_v27 = vpop.permute.xlu0 %10500  ;;  %v8171_v58 = vsel %vm2824_vm9, %v14109_v56, %v10492_v26  ;;  %v6882_v15 = vrot.slane %v6868_v16, %v12200_v17  ;;  %v6126_v8 = vsel %vm5802_vm10, %v5323_v30, %v5964_v33  ;;  %v6127_v12 = vsel %vm5803_vm8, %v5331_v2, %v5965_v49 }
 0x46d   : > { %v10502_v47 = vunpack.i.l.bf16 %v10501_v27  ;;  %v6128_v22 = vsel %vm5804_vm7, %v5330_v14, %v5966_v39  ;;  %v6129_v60 = vsel %vm5805_vm6, %v5332_v40, %v5967_v52  ;;  %v10503_v6 = vunpack.i.h.bf16 %v10501_v27 }
 0x46e   : > { %v8203_v11 = vsel %vm8097_vm15, %v8171_v58, %v10497_v18  ;;  %v10507_v5 = vunpack.i.l.bf16 %v14816_v20  ;;  %v6884_v3 = vcombine.low %v6126_v8, %v6127_v12  ;;  %v6885_v55 = vcombine.low %v6128_v22, %v6129_v60 }
 0x46f   : > { %v8235_v42 = vsel %vm8130_vm4, %v8203_v11, %v10502_v47  ;;  %v6875_v37 = vrot.slane %v6867_v36, %v12200_v17  ;;  %v10516_v50 = vpop.permute.xlu1 %10515  ;;  %v8073_v49 = vsel %vm2824_vm9, %v13879_v13, %v10493_v44  ;;  %v7325_v30 = vrot.slane %v14784_v28, 1 }
 0x470   : > { %v10511_v56 = vpop.permute.xlu0 %10510  ;;  %8470 = vmatprep.mubr.f32.mxu1 %v8235_v42  ;;  %v7326_v52 = vrot.slane %v14795_v46, 1  ;;  %v6899_v40 = vrot.slane %v6885_v55, %v12200_v17  ;;  %v16480_v14 = vunpack.i.h.bf16 %v14766_v45  ;;  %v6866_v13 = vrot.slane %v14803_v57, %v12200_v17 }
 0x471   : > { %v10513_v18 = vunpack.i.h.bf16 %v10511_v56  ;;  %v10512_v26 = vunpack.i.l.bf16 %v10511_v56  ;;  %v6883_v36 = vcombine.low %v6875_v37, %v6882_v15  ;;  %v6892_v27 = vrot.slane %v6884_v3, %v12200_v17 }
 0x472   : > { %v8106_v2 = vsel %vm8097_vm15, %v8073_v49, %v16480_v14  ;;  %v14845_v39 = vsel %vm7269_vm0, %v7325_v30, %v7326_v52  ;;  %v10517_v58 = vunpack.i.l.bf16 %v10516_v50  ;;  %v8172_v8 = vsel %vm2824_vm9, %v14125_v63, %v10507_v5 }
 0x473   : > { %v4745_v33 = vpop.f32.mrb[60].mxu0  ;;  %v8139_v16 = vsel %vm8130_vm4, %v8106_v2, %v10503_v6  ;;  %v10649_v45 = vpack.i.bf16 %v14681_v34, %v14845_v39  ;;  %v10518_v15 = vunpack.i.h.bf16 %v10516_v50  ;;  %v7202_v12 = vsel %vm6194_vm13, %v6866_v13, 0.0  ;;  %v14866_v50 = vpop.permute.xlu1 %10525 }
 0x474   : > { %v10160_v44 = vpop.f32.mrb[61].mxu0  ;;  %8471 = vmatmul.mubr.f32.gmra.mrb[16].mxu1 %v8139_v16  ;;  %v8204_v47 = vsel %vm8097_vm15, %v8172_v8, %v10512_v26  ;;  %v16481_v22 = vunpack.i.h.bf16 %v14816_v20  ;;  %v14861_v60 = vcombine.low %v6892_v27, %v6899_v40  ;;  %v7328_v6 = vrot.slane %v7202_v12, 1  ;;  %v9784_v26 = vld [vmem:[%s11047_s9 + $0x1d0] sm:$0xff] }
 0x475   : > { %10650 = vrot.lane.b32.xlu0 %v10649_v45, %s10960_s17  ;;  %v8236_v11 = vsel %vm8130_vm4, %v8204_v47, %v10517_v58  ;;  %v10659_v20 = vpack.i.bf16 %v14718_v0, %v14795_v46  ;;  %v4741_v3 = vadd.f32 %v14824_v62, %v13389_v29  ;;  %v7502_v42 = vrot.slane %v14784_v28, 2 }
 0x476   : > { %v8074_v57 = vsel %vm2824_vm9, %v13840_v59, %v16481_v22  ;;  %8475 = vmatprep.mubr.f32.mxu1 %v8236_v11  ;;  %v14873_v59 = vsel %vm6183_vm14, %v6883_v36, 0.0  ;;  %v14878_v55 = vsel %vm7269_vm0, %v7326_v52, %v7328_v6  ;;  %v7503_v37 = vrot.slane %v14795_v46, 2 }
 0x477   : > { %v8107_v63 = vsel %vm8097_vm15, %v8074_v57, %v10513_v18  ;;  %v4746_v56 = vadd.f32 %v4745_v33, %v13400_v7  ;;  %v10664_v49 = vpack.i.bf16 %v14727_v32, %v14878_v55  ;;  %v5333_v30 = vcombine.high %v4741_v3, %v4741_v3 }
 0x478   : > { %v8140_v5 = vsel %vm8130_vm4, %v8107_v63, %v10518_v15  ;;  %v5340_v40 = vrot.slane %v4741_v3, %v12200_v17  ;;  %v7505_v18 = vrot.slane %v7202_v12, 2  ;;  %v10527_v62 = vunpack.i.l.bf16 %v14866_v50  ;;  %v14888_v52 = vpop.permute.xlu0 %10520 }
 0x479   : > { %8476 = vmatmul.mubr.f32.gmra.mrb[18].mxu1 %v8140_v5  ;;  %10660 = vrot.lane.b32.xlu0 %v10659_v20, %s10959_s16  ;;  %v10674_v14 = vpack.i.bf16 %v14808_v51, %v14873_v59  ;;  %v14894_v7 = vsel %vm7446_vm12, %v7502_v42, %v7503_v37  ;;  %v5347_v2 = vrot.slane %v5333_v30, %v12200_v17  ;;  %v7330_v27 = vrot.slane %v14873_v59, 1 }
 0x47a   : > { %16482 = vst [vmem:[#allocation59_spill] sm:$0xff] %v14894_v7  ;;  %10665 = vrot.lane.b32.xlu1 %v10664_v49, %s10960_s17  ;;  %v5348_v33 = vcombine.high %v5340_v40, %v5340_v40  ;;  %v5350_v36 = vcombine.high %v4746_v56, %v4746_v56  ;;  %v5357_v16 = vrot.slane %v4746_v56, %v12200_v17  ;;  %vm5806_vm6 = vcmp.gt.f32.partialorder %v5340_v40, 0.0 }
 0x47b   : > { %v5968_v13 = vmul.f32 0.01, %v5340_v40  ;;  %v10669_v44 = vpack.i.bf16 %v14745_v10, %v14894_v7  ;;  %v10523_v58 = vunpack.i.h.bf16 %v14888_v52  ;;  %v5349_v45 = vcombine.high %v5347_v2, %v5347_v2  ;;  %v14906_v15 = vpop.permute.xlu1 %10535 }
 0x47c   : > { %vm5807_vm7 = vcmp.gt.f32.partialorder %v5348_v33, 0.0  ;;  %v14904_v8 = vsel %vm7446_vm12, %v7503_v37, %v7505_v18  ;;  %vm5808_vm8 = vcmp.gt.f32.partialorder %v5347_v2, 0.0  ;;  %v5969_v12 = vmul.f32 0.01, %v5348_v33 }
 0x47d   : > { %16483 = vst [vmem:[#allocation105_spill] sm:$0xff] %v14904_v8  ;;  %v5970_v47 = vmul.f32 0.01, %v5347_v2  ;;  %v6130_v22 = vsel %vm5806_vm6, %v5340_v40, %v5968_v13  ;;  %10670 = vrot.lane.b32.xlu0 %v10669_v44, %s10957_s12  ;;  %v10522_v57 = vunpack.i.l.bf16 %v14888_v52  ;;  %v5364_v11 = vrot.slane %v5350_v36, %v12200_v17 }
 0x47e   : > { %10675 = vrot.lane.b32.xlu1 %v10674_v14, %s10959_s16  ;;  %v6907_v6 = vrot.slane %v6130_v22, %v12200_v17  ;;  %v5365_v63 = vcombine.high %v5357_v16, %v5357_v16  ;;  %v6131_v5 = vsel %vm5807_vm7, %v5348_v33, %v5969_v12  ;;  %v10684_v3 = vpack.i.bf16 %v14748_v41, %v14904_v8 }
 0x47f   : > { %v6132_v20 = vsel %vm5808_vm8, %v5347_v2, %v5970_v47  ;;  %v5971_v42 = vmul.f32 0.01, %v5349_v45  ;;  %v10538_v37 = vunpack.i.h.bf16 %v14906_v15  ;;  %vm5809_vm1 = vcmp.gt.f32.partialorder %v5349_v45, 0.0  ;;  %v9730_v2 = vld [vmem:[%s11047_s9 + $0x1ba] sm:$0xff] }
 0x480   : > { %v6908_v56 = vcombine.low %v6131_v5, %v6132_v20  ;;  %vm5810_vm3 = vcmp.gt.f32.partialorder %v5357_v16, 0.0  ;;  %v10537_v49 = vunpack.i.l.bf16 %v14906_v15  ;;  %v14919_v30 = vsel %vm6194_vm13, %v6907_v6, 0.0 }
 0x481   : > { %v14921_v40 = vcombine.high %v5364_v11, %v5364_v11  ;;  %v5972_v18 = vmul.f32 0.01, %v5357_v16  ;;  %vm5811_vm5 = vcmp.gt.f32.partialorder %v5365_v63, 0.0  ;;  %vm5812_vm11 = vcmp.gt.f32.partialorder %v5364_v11, 0.0 }
 0x482   : > { %10685 = vrot.lane.b32.xlu1 %v10684_v3, %s10957_s12  ;;  %v5973_v52 = vmul.f32 0.01, %v5365_v63  ;;  %v7331_v14 = vrot.slane %v14861_v60, 1  ;;  %v5974_v33 = vmul.f32 0.01, %v5364_v11  ;;  %v6133_v36 = vsel %vm5809_vm1, %v5349_v45, %v5971_v42  ;;  %v10531_v44 = vpop.permute.xlu0 %10530 }
 0x483   : > { %v6134_v13 = vsel %vm5810_vm3, %v5357_v16, %v5972_v18  ;;  %v16050_v15 = vrot.slane %v14861_v60, 2  ;;  %v6916_v12 = vrot.slane %v6908_v56, %v12200_v17  ;;  %v10689_v6 = vpack.i.bf16 %v14811_v53, %v14861_v60  ;;  %v16484_v56 = vld [vmem:[#allocation101_spill] sm:$0xff] }
 0x484   : > { %v6909_v47 = vcombine.low %v6133_v36, %v6134_v13  ;;  %v14929_v22 = vsel %vm7269_vm0, %v7330_v27, %v7331_v14  ;;  %v10533_v20 = vunpack.i.h.bf16 %v10531_v44  ;;  %v10532_v3 = vunpack.i.l.bf16 %v10531_v44  ;;  %v16485_v18 = vld [vmem:[#allocation53_spill] sm:$0xff] }
 0x485   : > { %v10679_v5 = vpack.i.bf16 %v14784_v28, %v14929_v22  ;;  %v7507_v16 = vrot.slane %v14873_v59, 2  ;;  %v6135_v45 = vsel %vm5811_vm5, %v5365_v63, %v5973_v52  ;;  %v8173_v27 = vsel %vm2824_vm9, %v16484_v56, %v10522_v57 }
 0x486   : > { %1733 = vrot.lane.b32.xlu1 %v9730_v2, %s10951_s14  ;;  %v6923_v42 = vrot.slane %v6909_v47, %v12200_v17  ;;  %v8075_v36 = vsel %vm2824_vm9, %v16485_v18, %v10523_v58  ;;  %v6136_v13 = vsel %vm5812_vm11, %v5364_v11, %v5974_v33  ;;  %v10546_v44 = vpop.permute.xlu1 %10545  ;;  %v8205_v63 = vsel %vm8097_vm15, %v8173_v27, %v10527_v62 }
 0x487   : > { %10680 = vrot.lane.b32.xlu0 %v10679_v5, %s10960_s17  ;;  %v14949_v2 = vsel %vm7446_vm12, %v7507_v16, %v16050_v15  ;;  %v7333_v57 = vrot.slane %v14919_v30, 1  ;;  %v10548_v47 = vunpack.i.h.bf16 %v10546_v44  ;;  %v10541_v58 = vpop.permute.xlu0 %10540  ;;  %v8237_v11 = vsel %vm8130_vm4, %v8205_v63, %v10532_v3  ;;  %v16488_v3 = vld [vmem:[#allocation11_spill] sm:$0xff] }
 0x488   : > { %16486 = vst [vmem:[#allocation148_spill] sm:$0xff] %v14949_v2  ;;  %v6924_v52 = vcombine.low %v6916_v12, %v6923_v42  ;;  %v16487_v33 = vunpack.i.h.bf16 %v14866_v50  ;;  %v10543_v56 = vunpack.i.h.bf16 %v10541_v58  ;;  %v10542_v18 = vunpack.i.l.bf16 %v10541_v58  ;;  %8480 = vmatprep.mubr.f32.mxu1 %v8237_v11  ;;  %v16489_v42 = vld [vmem:[#allocation10_spill] sm:$0xff] }
 0x489   : > { %v14961_v15 = vsel %vm7269_vm0, %v7331_v14, %v7333_v57  ;;  %v10547_v62 = vunpack.i.l.bf16 %v10546_v44  ;;  %v8174_v50 = vsel %vm2824_vm9, %v16488_v3, %v10537_v49  ;;  %v8076_v27 = vsel %vm2824_vm9, %v16489_v42, %v10538_v37 }
 0x48a   : > { %v8108_v5 = vsel %vm8097_vm15, %v8075_v36, %v16487_v33  ;;  %1949 = vrot.lane.b32.xlu1 %v9784_v26, %s10954_s8  ;;  %v10694_v12 = vpack.i.bf16 %v14795_v46, %v14961_v15  ;;  %v8109_v14 = vsel %vm8097_vm15, %v8076_v27, %v10543_v56  ;;  %v14975_v26 = vsel %vm6183_vm14, %v6924_v52, 0.0  ;;  %v14980_v58 = vpop.permute.xlu1 %10555 }
 0x48b   : > { %v8141_v16 = vsel %vm8130_vm4, %v8108_v5, %v10533_v20  ;;  %v4750_v36 = vpop.f32.mrb[62].mxu0  ;;  %10690 = vrot.lane.b32.xlu0 %v10689_v6, %s10959_s16  ;;  %v8206_v20 = vsel %vm8097_vm15, %v8174_v50, %v10542_v18  ;;  %v6925_v57 = vcombine.low %v6135_v45, %v6136_v13  ;;  %v10699_v49 = vpack.i.bf16 %v14845_v39, %v14949_v2 }
 0x48c   : > { %8481 = vmatmul.mubr.f32.gmra.mrb[20].mxu1 %v8141_v16  ;;  %v4751_v44 = vadd.f32 %v4750_v36, %v13404_v9  ;;  %v10163_v63 = vpop.f32.mrb[63].mxu0  ;;  %v8238_v37 = vsel %vm8130_vm4, %v8206_v20, %v10547_v62  ;;  %v8142_v6 = vsel %vm8130_vm4, %v8109_v14, %v10548_v47  ;;  %v10704_v9 = vpack.i.bf16 %v14894_v7, %v14975_v26  ;;  %v10551_v52 = vpop.permute.xlu0 %10550  ;;  %v9838_v16 = vld [vmem:[%s11047_s9 + $0x1d1] sm:$0xff] }
 0x48d   : > { %8485 = vmatprep.mubr.f32.mxu1 %v8238_v37  ;;  %vm5813_vm10 = vcmp.gt.f32.partialorder %v14921_v40, 0.0  ;;  %v5975_v45 = vmul.f32 0.01, %v14921_v40  ;;  %v7510_v13 = vrot.slane %v14919_v30, 2  ;;  %v6933_v18 = vrot.slane %v6925_v57, %v12200_v17  ;;  %v9892_v37 = vld [vmem:[%s11047_s9 + $0x1d2] sm:$0xff] }
 0x48e   : > { %v5367_v11 = vcombine.high %v4751_v44, %v4751_v44  ;;  %v5374_v33 = vrot.slane %v4751_v44, %v12200_v17  ;;  %10700 = vrot.lane.b32.xlu1 %v10699_v49, %s10957_s12  ;;  %v10558_v3 = vunpack.i.h.bf16 %v14980_v58  ;;  %v10557_v50 = vunpack.i.l.bf16 %v14980_v58  ;;  %v10566_v14 = vpop.permute.xlu1 %10565 }
 0x48f   : > { %10695 = vrot.lane.b32.xlu0 %v10694_v12, %s10960_s17  ;;  %v16490_v30 = vrot.slane %v14861_v60, 2  ;;  %v10553_v36 = vunpack.i.h.bf16 %v10551_v52  ;;  %v10552_v20 = vunpack.i.l.bf16 %v10551_v52  ;;  %v6137_v44 = vsel %vm5813_vm10, %v14921_v40, %v5975_v45 }
 0x490   : > { %8486 = vmatmul.mubr.f32.gmra.mrb[22].mxu1 %v8142_v6  ;;  %v5381_v47 = vrot.slane %v5367_v11, %v12200_v17  ;;  %v5382_v5 = vcombine.high %v5374_v33, %v5374_v33  ;;  %vm5814_vm6 = vcmp.gt.f32.partialorder %v5374_v33, 0.0  ;;  %v5976_v56 = vmul.f32 0.01, %v5374_v33 }
 0x491   : > { %v15000_v12 = vsel %vm7446_vm12, %v16490_v30, %v7510_v13  ;;  %v10568_v13 = vunpack.i.h.bf16 %v10566_v14  ;;  %v10567_v45 = vunpack.i.l.bf16 %v10566_v14  ;;  %v8175_v52 = vsel %vm2824_vm9, %v14417_v4, %v10552_v20 }
 0x492   : > { %v4755_v62 = vpop.f32.mrb[64].mxu0  ;;  %v5383_v42 = vcombine.high %v5381_v47, %v5381_v47  ;;  %16491 = vst [vmem:[#allocation15_spill] sm:$0xff] %v15000_v12  ;;  %10705 = vrot.lane.b32.xlu1 %v10704_v9, %s10959_s16  ;;  %v6138_v63 = vsel %vm5814_vm6, %v5374_v33, %v5976_v56  ;;  %vm5815_vm7 = vcmp.gt.f32.partialorder %v5382_v5, 0.0  ;;  %v5977_v57 = vmul.f32 0.01, %v5382_v5 }
 0x493   : > { %v10166_v27 = vpop.f32.mrb[65].mxu0  ;;  %2165 = vrot.lane.b32.xlu0 %v9838_v16, %s10953_s7  ;;  %v5978_v49 = vmul.f32 0.01, %v5381_v47  ;;  %v6926_v58 = vcombine.low %v6137_v44, %v6138_v63  ;;  %vm5816_vm8 = vcmp.gt.f32.partialorder %v5381_v47, 0.0  ;;  %v10714_v11 = vpack.i.bf16 %v14878_v55, %v15000_v12  ;;  %v9731_v63 = vld [vmem:[%s11047_s9 + $0x1c2] sm:$0x3] }
 0x494   : > { %v5979_v6 = vmul.f32 0.01, %v5383_v42  ;;  %v4756_v9 = vadd.f32 %v4755_v62, %v13412_v25  ;;  %vm5817_vm1 = vcmp.gt.f32.partialorder %v5383_v42, 0.0  ;;  %v7512_v33 = vrot.slane %v14975_v26, 2  ;;  %v16493_v27 = vld [vmem:[#allocation146_spill] sm:$0xff] }
 0x495   : > { %v6940_v40 = vrot.slane %v6926_v58, %v12200_v17  ;;  %v6139_v30 = vsel %vm5815_vm7, %v5382_v5, %v5977_v57  ;;  %v6140_v25 = vsel %vm5816_vm8, %v5381_v47, %v5978_v49  ;;  %v8077_v44 = vsel %vm2824_vm9, %v16493_v27, %v10553_v36 }
 0x496   : > { %10715 = vrot.lane.b32.xlu1 %v10714_v11, %s10957_s12  ;;  %v5384_v56 = vcombine.high %v4756_v9, %v4756_v9  ;;  %v5391_v16 = vrot.slane %v4756_v9, %v12200_v17  ;;  %v6141_v14 = vsel %vm5817_vm1, %v5383_v42, %v5979_v6  ;;  %v8207_v47 = vsel %vm8097_vm15, %v8175_v52, %v10557_v50 }
 0x497   : > { %2381 = vrot.lane.b32.xlu0 %v9892_v37, %s10957_s12  ;;  %v15019_v62 = vcombine.low %v6933_v18, %v6940_v40  ;;  %v10561_v58 = vpop.permute.xlu0 %10560  ;;  %v8110_v36 = vsel %vm8097_vm15, %v8077_v44, %v10558_v3  ;;  %v6948_v42 = vrot.slane %v6139_v30, %v12200_v17  ;;  %v6949_v57 = vcombine.low %v6140_v25, %v6141_v14  ;;  %v9785_v40 = vld [vmem:[%s11047_s9 + $0x1d8] sm:$0x3]  ;;  %v16495_v14 = vld [vmem:[#allocation102_spill] sm:$0xff] }
 0x498   : > { %v15025_v11 = vrot.slane %v5384_v56, %v12200_v17  ;;  %v5399_v4 = vcombine.high %v5391_v16, %v5391_v16  ;;  %vm5818_vm3 = vcmp.gt.f32.partialorder %v5391_v16, 0.0  ;;  %v10563_v20 = vunpack.i.h.bf16 %v10561_v58 }
 0x499   : > { %16492 = vst [vmem:[#allocation61_spill] sm:$0xff] %v15019_v62  ;;  %v10562_v9 = vunpack.i.l.bf16 %v10561_v58  ;;  %v5980_v37 = vmul.f32 0.01, %v5391_v16  ;;  %v7513_v5 = vrot.slane %v15019_v62, 2  ;;  %v8078_v58 = vsel %vm2824_vm9, %v16495_v14, %v10568_v13 }
 0x49a   : > { %vm5819_vm5 = vcmp.gt.f32.partialorder %v5399_v4, 0.0  ;;  %v5981_v18 = vmul.f32 0.01, %v5399_v4  ;;  %1735 = vrot.lane.b32.xlu1 %v9731_v63, %s10951_s14  ;;  %v8143_v6 = vsel %vm8130_vm4, %v8110_v36, %v10563_v20  ;;  %v5400_v27 = vcombine.high %v15025_v11, %v15025_v11  ;;  %v8291_v36 = vld [vmem:[%s15996_s3 + $0x100] sm:$0xff] }
 0x49b   : > { %v8239_v49 = vsel %vm8130_vm4, %v8207_v47, %v10562_v9  ;;  %v10571_v56 = vpop.permute.xlu0 %10570  ;;  %v6142_v50 = vsel %vm5818_vm3, %v5391_v16, %v5980_v37  ;;  %v15041_v3 = vsel %vm7446_vm12, %v7512_v33, %v7513_v5  ;;  %v8176_v63 = vsel %vm2824_vm9, %v14445_v31, %v10567_v45 }
 0x49c   : > { %8490 = vmatprep.mubr.f32.mxu1 %v8239_v49  ;;  %v6143_v52 = vsel %vm5819_vm5, %v5399_v4, %v5981_v18  ;;  %16494 = vst [vmem:[#allocation107_spill] sm:$0xff] %v15041_v3  ;;  %v10573_v30 = vunpack.i.h.bf16 %v10571_v56  ;;  %v10572_v25 = vunpack.i.l.bf16 %v10571_v56  ;;  %v10729_v16 = vpack.i.bf16 %v14929_v22, %v15041_v3 }
 0x49d   : > { %v6950_v44 = vcombine.low %v6142_v50, %v6143_v52  ;;  %8491 = vmatmul.mubr.f32.gmra.mrb[24].mxu1 %v8143_v6  ;;  %v7335_v4 = vrot.slane %v14975_v26, 1  ;;  %v7336_v33 = vrot.slane %v15019_v62, 1  ;;  %v6957_v20 = vrot.slane %v6949_v57, %v12200_v17  ;;  %v8292_v57 = vld [vmem:[%s15996_s3 + $0x108] sm:$0xff] }
 0x49e   : > { %1951 = vrot.lane.b32.xlu1 %v9785_v40, %s10954_s8  ;;  %v5982_v9 = vmul.f32 0.01, %v15025_v11  ;;  %v7208_v31 = vsel %vm6194_vm13, %v6948_v42, 0.0  ;;  %vm5821_vm11 = vcmp.gt.f32.partialorder %v5400_v27, 0.0  ;;  %v5983_v49 = vmul.f32 0.01, %v5400_v27 }
 0x49f   : > { %v6964_v37 = vrot.slane %v6950_v44, %v12200_v17  ;;  %v10576_v47 = vpop.permute.xlu1 %10575  ;;  %v15058_v18 = vsel %vm7269_vm0, %v7335_v4, %v7336_v33  ;;  %v8208_v40 = vsel %vm8097_vm15, %v8176_v63, %v10572_v25  ;;  %v8111_v42 = vsel %vm8097_vm15, %v8078_v58, %v10573_v30 }
 0x4a0   : > { %v10578_v45 = vunpack.i.h.bf16 %v10576_v47  ;;  %v10577_v13 = vunpack.i.l.bf16 %v10576_v47  ;;  %v10709_v44 = vpack.i.bf16 %v14873_v59, %v15058_v18  ;;  %v7338_v25 = vrot.slane %v7208_v31, 1 }
 0x4a1   : > { %v6965_v6 = vcombine.low %v6957_v20, %v6964_v37  ;;  %v4760_v56 = vpop.f32.mrb[66].mxu0  ;;  %v7515_v30 = vrot.slane %v7208_v31, 2  ;;  %v10301_v63 = vpack.c.bf16 %v8292_v57, %v8291_v36  ;;  %vm5820_vm10 = vcmp.gt.f32.partialorder %v15025_v11, 0.0 }
 0x4a2   : > { %v8240_v50 = vsel %vm8130_vm4, %v8208_v40, %v10577_v13  ;;  %v8144_v52 = vsel %vm8130_vm4, %v8111_v42, %v10578_v45  ;;  %10730 = vrot.lane.b32.xlu1 %v10729_v16, %s10957_s12  ;;  %v4761_v14 = vadd.f32 %v4760_v56, %v13423_v24  ;;  %v10169_v4 = vpop.f32.mrb[67].mxu0  ;;  %10710 = vrot.lane.b32.xlu0 %v10709_v44, %s10960_s17  ;;  %v8293_v44 = vld [vmem:[%s15996_s3 + $0x110] sm:$0xff] }
 0x4a3   : > { %8495 = vmatprep.mubr.f32.mxu1 %v8240_v50  ;;  %v15076_v20 = vsel %vm6183_vm14, %v6965_v6, 0.0  ;;  %v6145_v37 = vsel %vm5821_vm11, %v5400_v27, %v5983_v49  ;;  %v10719_v24 = vpack.i.bf16 %v14904_v8, %v15019_v62  ;;  %10302 = vmatprep.subr.bf16.mxu0 %v10301_v63  ;;  %v15090_v36 = vsel %vm7446_vm12, %v7513_v5, %v7515_v30 }
 0x4a4   : > { %8496 = vmatmul.mubr.f32.gmra.mrb[26].mxu1 %v8144_v52  ;;  %v5401_v58 = vcombine.high %v4761_v14, %v4761_v14  ;;  %v5408_v16 = vrot.slane %v4761_v14, %v12200_v17  ;;  %v10734_v47 = vpack.i.bf16 %v14949_v2, %v15076_v20  ;;  %10304 = vmatpush3.bf16.msra.mxu0 %v10301_v63  ;;  %v8294_v14 = vld [vmem:[%s15996_s3 + $0x118] sm:$0xff] }
 0x4a5   : > { %10309 = vmatprep.subr.bf16.mxu1 %v10301_v63  ;;  %v6144_v27 = vsel %vm5820_vm10, %v15025_v11, %v5982_v9  ;;  %v15095_v57 = vsel %vm7269_vm0, %v7336_v33, %v7338_v25  ;;  %v10744_v11 = vpack.i.bf16 %v14961_v15, %v15090_v36 }
 0x4a6   : > { %v5415_v31 = vrot.slane %v5401_v58, %v12200_v17  ;;  %v5416_v45 = vcombine.high %v5408_v16, %v5408_v16  ;;  %v5984_v13 = vmul.f32 0.01, %v5408_v16  ;;  %vm5822_vm6 = vcmp.gt.f32.partialorder %v5408_v16, 0.0  ;;  %10735 = vrot.lane.b32.xlu1 %v10734_v47, %s10959_s16  ;;  %10311 = vmatpush3.bf16.msra.mxu1 %v10301_v63  ;;  %v9839_v47 = vld [vmem:[%s11047_s9 + $0x1d9] sm:$0x3] }
 0x4a7   : > { %v4765_v49 = vpop.f32.mrb[68].mxu0  ;;  %10720 = vrot.lane.b32.xlu0 %v10719_v24, %s10959_s16  ;;  %v6966_v42 = vcombine.low %v6144_v27, %v6145_v37  ;;  %v10724_v52 = vpack.i.bf16 %v14861_v60, %v15095_v57 }
 0x4a8   : > { %v5417_v6 = vcombine.high %v5415_v31, %v5415_v31  ;;  %vm5823_vm7 = vcmp.gt.f32.partialorder %v5416_v45, 0.0  ;;  %vm5824_vm8 = vcmp.gt.f32.partialorder %v5415_v31, 0.0  ;;  %v5985_v40 = vmul.f32 0.01, %v5416_v45  ;;  %v10172_v5 = vpop.f32.mrb[69].mxu0 }
 0x4a9   : > { %v5986_v56 = vmul.f32 0.01, %v5415_v31  ;;  %v4766_v50 = vadd.f32 %v4765_v49, %v16442_v38  ;;  %v6146_v9 = vsel %vm5822_vm6, %v5408_v16, %v5984_v13  ;;  %v6974_v37 = vrot.slane %v6966_v42, %v12200_v17  ;;  %v10581_v42 = vpop.permute.xlu0 %10580 }
 0x4aa   : > { %v6147_v33 = vsel %vm5823_vm7, %v5416_v45, %v5985_v40  ;;  %10745 = vrot.lane.b32.xlu1 %v10744_v11, %s10957_s12  ;;  %v5987_v16 = vmul.f32 0.01, %v5417_v6  ;;  %vm5825_vm1 = vcmp.gt.f32.partialorder %v5417_v6, 0.0  ;;  %v10305_v45 = vpack.c.bf16 %v8294_v14, %v8293_v44 }
 0x4ab   : > { %v6148_v4 = vsel %vm5824_vm8, %v5415_v31, %v5986_v56  ;;  %v6967_v25 = vcombine.low %v6146_v9, %v6147_v33  ;;  %10725 = vrot.lane.b32.xlu0 %v10724_v52, %s10960_s17  ;;  %v5418_v63 = vcombine.high %v4766_v50, %v4766_v50  ;;  %v5425_v58 = vrot.slane %v4766_v50, %v12200_v17  ;;  %v10586_v56 = vpop.permute.xlu1 %10585  ;;  %v9893_v52 = vld [vmem:[%s11047_s9 + $0x1da] sm:$0x3] }
 0x4ac   : > { %v6989_v30 = vrot.slane %v6148_v4, %v12200_v17  ;;  %v7340_v40 = vrot.slane %v15076_v20, 1  ;;  %10306 = vmatprep.subr.bf16.mxu0 %v10305_v45  ;;  %10310 = vmatprep.subr.bf16.mxu1 %v10305_v45  ;;  %v6149_v11 = vsel %vm5825_vm1, %v5417_v6, %v5987_v16  ;;  %v10587_v16 = vunpack.i.l.bf16 %v10586_v56 }
 0x4ad   : > { %v6981_v24 = vrot.slane %v6967_v25, %v12200_v17  ;;  %v5432_v31 = vrot.slane %v5418_v63, %v12200_v17  ;;  %v5433_v13 = vcombine.high %v5425_v58, %v5425_v58  ;;  %vm5826_vm3 = vcmp.gt.f32.partialorder %v5425_v58, 0.0  ;;  %10308 = vmatpush3.bf16.msra.mxu0 %v10305_v45  ;;  %10312 = vmatpush3.bf16.msra.mxu1 %v10305_v45 }
 0x4ae   : > { %v5988_v27 = vmul.f32 0.01, %v5425_v58  ;;  %v7211_v5 = vsel %vm6194_vm13, %v6989_v30, 0.0  ;;  %v10582_v30 = vunpack.i.l.bf16 %v10581_v42  ;;  %v10583_v45 = vunpack.i.h.bf16 %v10581_v42 }
 0x4af   : > { %v15117_v49 = vcombine.low %v6974_v37, %v6981_v24  ;;  %vm5827_vm5 = vcmp.gt.f32.partialorder %v5433_v13, 0.0  ;;  %vm5828_vm11 = vcmp.gt.f32.partialorder %v5432_v31, 0.0  ;;  %v5989_v50 = vmul.f32 0.01, %v5433_v13  ;;  %2167 = vrot.lane.b32.xlu0 %v9839_v47, %s10953_s7 }
 0x4b0   : > { %v5990_v9 = vmul.f32 0.01, %v5432_v31  ;;  %v6150_v33 = vsel %vm5826_vm3, %v5425_v58, %v5988_v27  ;;  %v7343_v14 = vrot.slane %v7211_v5, 1  ;;  %v5434_v27 = vcombine.high %v5432_v31, %v5432_v31 }
 0x4b1   : > { %v7341_v44 = vrot.slane %v15117_v49, 1  ;;  %v6151_v4 = vsel %vm5827_vm5, %v5433_v13, %v5989_v50  ;;  %v6990_v25 = vcombine.low %v6149_v11, %v6150_v33  ;;  %v10596_v13 = vpop.permute.xlu1 %10595  ;;  %v8177_v11 = vsel %vm2824_vm9, %v14542_v48, %v10582_v30 }
 0x4b2   : > { %v6152_v63 = vsel %vm5828_vm11, %v5432_v31, %v5990_v9  ;;  %v7518_v9 = vrot.slane %v15117_v49, 2  ;;  %v10588_v33 = vunpack.i.h.bf16 %v10586_v56  ;;  %v10598_v42 = vunpack.i.h.bf16 %v10596_v13  ;;  %v16496_v31 = vld [vmem:[#allocation57_spill] sm:$0xff] }
 0x4b3   : > { %v15128_v37 = vsel %vm7269_vm0, %v7340_v40, %v7341_v44  ;;  %v15131_v6 = vsel %vm7269_vm0, %v7341_v44, %v7343_v14  ;;  %v6991_v24 = vcombine.low %v6151_v4, %v6152_v63  ;;  %2383 = vrot.lane.b32.xlu0 %v9893_v52, %s10957_s12  ;;  %v6998_v50 = vrot.slane %v6990_v25, %v12200_v17 }
 0x4b4   : > { %v10739_v58 = vpack.i.bf16 %v14975_v26, %v15128_v37  ;;  %v10754_v47 = vpack.i.bf16 %v15019_v62, %v15131_v6  ;;  %v8209_v44 = vsel %vm8097_vm15, %v8177_v11, %v10587_v16  ;;  %v10597_v14 = vunpack.i.l.bf16 %v10596_v13 }
 0x4b5   : > { %v7005_v40 = vrot.slane %v6991_v24, %v12200_v17  ;;  %v8079_v4 = vsel %vm2824_vm9, %v16496_v31, %v10583_v45  ;;  %v7517_v25 = vrot.slane %v15076_v20, 2  ;;  %v5991_v24 = vmul.f32 0.01, %v5434_v27 }
 0x4b6   : > { %10755 = vrot.lane.b32.xlu1 %v10754_v47, %s10960_s17  ;;  %v10749_v48 = vpack.i.bf16 %v15000_v12, %v15117_v49  ;;  %v7520_v30 = vrot.slane %v7211_v5, 2  ;;  %vm5829_vm10 = vcmp.gt.f32.partialorder %v5434_v27, 0.0 }
 0x4b7   : > { %v7006_v52 = vcombine.low %v6998_v50, %v7005_v40  ;;  %10740 = vrot.lane.b32.xlu0 %v10739_v58, %s10960_s17  ;;  %v15158_v45 = vsel %vm7446_vm12, %v7517_v25, %v7518_v9  ;;  %v8112_v40 = vsel %vm8097_vm15, %v8079_v4, %v10588_v33  ;;  %v8080_v4 = vsel %vm2824_vm9, %v14350_v19, %v10598_v42 }
 0x4b8   : > { %v15164_v5 = vsel %vm7446_vm12, %v7518_v9, %v7520_v30  ;;  %v10759_v9 = vpack.i.bf16 %v15058_v18, %v15158_v45 }
 0x4b9   : > { %v10591_v63 = vpop.permute.xlu0 %10590  ;;  %v15153_v56 = vsel %vm6183_vm14, %v7006_v52, 0.0 }
 0x4ba   : > { %v10593_v16 = vunpack.i.h.bf16 %v10591_v63  ;;  %v10592_v47 = vunpack.i.l.bf16 %v10591_v63  ;;  %v10606_v58 = vpop.permute.xlu1 %10605  ;;  %v10764_v13 = vpack.i.bf16 %v15041_v3, %v15153_v56  ;;  %v8178_v3 = vsel %vm2824_vm9, %v14569_v43, %v10597_v14 }
 0x4bb   : > { %v4770_v50 = vpop.f32.mrb[70].mxu0  ;;  %10750 = vrot.lane.b32.xlu0 %v10749_v48, %s10959_s16  ;;  %v10774_v14 = vpack.i.bf16 %v15095_v57, %v15164_v5 }
 0x4bc   : > { %v4771_v11 = vadd.f32 %v4770_v50, %v16442_v38  ;;  %v10175_v52 = vpop.f32.mrb[71].mxu0  ;;  %v8241_v31 = vsel %vm8130_vm4, %v8209_v44, %v10592_v47  ;;  %v8145_v63 = vsel %vm8130_vm4, %v8112_v40, %v10593_v16  ;;  %10765 = vrot.lane.b32.xlu1 %v10764_v13, %s10959_s16  ;;  %v6153_v16 = vsel %vm5829_vm10, %v5434_v27, %v5991_v24 }
 0x4bd   : > { %v10601_v25 = vpop.permute.xlu0 %10600  ;;  %8500 = vmatprep.mubr.f32.mxu1 %v8241_v31  ;;  %v10608_v47 = vunpack.i.h.bf16 %v10606_v58  ;;  %v10607_v50 = vunpack.i.l.bf16 %v10606_v58 }
 0x4be   : > { %v5435_v33 = vcombine.high %v4771_v11, %v4771_v11  ;;  %v5442_v38 = vrot.slane %v4771_v11, %v12200_v17  ;;  %v10603_v48 = vunpack.i.h.bf16 %v10601_v25  ;;  %v10602_v44 = vunpack.i.l.bf16 %v10601_v25  ;;  %8501 = vmatmul.mubr.f32.gmra.mrb[28].mxu1 %v8145_v63  ;;  %v10616_v30 = vpop.permute.xlu1 %10615 }
 0x4bf   : > { %10760 = vrot.lane.b32.xlu0 %v10759_v9, %s10957_s12 }
 0x4c0   : > { %v5449_v13 = vrot.slane %v5435_v33, %v12200_v17  ;;  %v5450_v40 = vcombine.high %v5442_v38, %v5442_v38  ;;  %vm5830_vm6 = vcmp.gt.f32.partialorder %v5442_v38, 0.0  ;;  %v5992_v42 = vmul.f32 0.01, %v5442_v38  ;;  %10775 = vrot.lane.b32.xlu1 %v10774_v14, %s10957_s12 }
 0x4c1   : > { %v4775_v43 = vpop.f32.mrb[72].mxu0  ;;  %v8210_v11 = vsel %vm8097_vm15, %v8178_v3, %v10602_v44  ;;  %v8113_v52 = vsel %vm8097_vm15, %v8080_v4, %v10603_v48  ;;  %v10611_v31 = vpop.permute.xlu0 %10610 }
 0x4c2   : > { %v10178_v19 = vpop.f32.mrb[73].mxu0  ;;  %v5451_v27 = vcombine.high %v5449_v13, %v5449_v13  ;;  %vm5831_vm7 = vcmp.gt.f32.partialorder %v5450_v40, 0.0  ;;  %vm5832_vm8 = vcmp.gt.f32.partialorder %v5449_v13, 0.0  ;;  %v5993_v24 = vmul.f32 0.01, %v5450_v40  ;;  %v10626_v12 = vpop.permute.xlu1 %10625 }
 0x4c3   : > { %v5994_v58 = vmul.f32 0.01, %v5449_v13  ;;  %v6154_v63 = vsel %vm5830_vm6, %v5442_v38, %v5992_v42  ;;  %v10613_v25 = vunpack.i.h.bf16 %v10611_v31  ;;  %v10612_v33 = vunpack.i.l.bf16 %v10611_v31 }
 0x4c4   : > { %vm5833_vm1 = vcmp.gt.f32.partialorder %v5451_v27, 0.0  ;;  %v5995_v9 = vmul.f32 0.01, %v5451_v27  ;;  %v6155_v19 = vsel %vm5831_vm7, %v5450_v40, %v5993_v24  ;;  %v7007_v2 = vcombine.low %v6153_v16, %v6154_v63 }
 0x4c5   : > { %v6156_v8 = vsel %vm5832_vm8, %v5449_v13, %v5994_v58  ;;  %v8242_v3 = vsel %vm8130_vm4, %v8210_v11, %v10607_v50  ;;  %v8146_v4 = vsel %vm8130_vm4, %v8113_v52, %v10608_v47  ;;  %v10628_v14 = vunpack.i.h.bf16 %v10626_v12 }
 0x4c6   : > { %v6157_v48 = vsel %vm5833_vm1, %v5451_v27, %v5995_v9  ;;  %v7008_v44 = vcombine.low %v6155_v19, %v6156_v8  ;;  %8505 = vmatprep.mubr.f32.mxu1 %v8242_v3  ;;  %v10627_v7 = vunpack.i.l.bf16 %v10626_v12  ;;  %v4776_v38 = vadd.f32 %v4775_v43, %v13421_v61 }
 0x4c7   : > { %8506 = vmatmul.mubr.f32.gmra.mrb[30].mxu1 %v8146_v4  ;;  %v8179_v42 = vsel %vm2824_vm9, %v14676_v23, %v10612_v33  ;;  %v8081_v40 = vsel %vm2824_vm9, %v14438_v1, %v10613_v25  ;;  %v7030_v16 = vrot.slane %v6157_v48, %v12200_v17  ;;  %v10618_v13 = vunpack.i.h.bf16 %v10616_v30  ;;  %v16497_v33 = vld [vmem:[#allocation58_spill] sm:$0xff] }
 0x4c8   : > { %v10617_v50 = vunpack.i.l.bf16 %v10616_v30  ;;  %v7015_v47 = vrot.slane %v7007_v2, %v12200_v17  ;;  %v7022_v8 = vrot.slane %v7008_v44, %v12200_v17  ;;  %v5452_v11 = vcombine.high %v4776_v38, %v4776_v38 }
 0x4c9   : > { %v5459_v12 = vrot.slane %v4776_v38, %v12200_v17  ;;  %v7345_v52 = vrot.slane %v15153_v56, 1  ;;  %v15198_v43 = vsel %vm6194_vm13, %v7030_v16, 0.0  ;;  %v8114_v30 = vsel %vm8097_vm15, %v8081_v40, %v10618_v13 }
 0x4ca   : > { %v15200_v23 = vcombine.low %v7015_v47, %v7022_v8  ;;  %v4780_v1 = vpop.f32.mrb[74].mxu0  ;;  %v8211_v27 = vsel %vm8097_vm15, %v8179_v42, %v10617_v50  ;;  %v8180_v2 = vsel %vm2824_vm9, %v14687_v35, %v10627_v7  ;;  %v5466_v24 = vrot.slane %v5452_v11, %v12200_v17  ;;  %v10621_v63 = vpop.permute.xlu0 %10620 }
 0x4cb   : > { %v5467_v31 = vcombine.high %v5459_v12, %v5459_v12  ;;  %v10181_v58 = vpop.f32.mrb[75].mxu0  ;;  %v7348_v25 = vrot.slane %v15198_v43, 1  ;;  %v8082_v9 = vsel %vm2824_vm9, %v16497_v33, %v10628_v14  ;;  %vm5834_vm3 = vcmp.gt.f32.partialorder %v5459_v12, 0.0  ;;  %v10636_v35 = vpop.permute.xlu1 %10635 }
 0x4cc   : > { %v5996_v19 = vmul.f32 0.01, %v5459_v12  ;;  %v4781_v3 = vadd.f32 %v4780_v1, %v13421_v61  ;;  %v10623_v4 = vunpack.i.h.bf16 %v10621_v63  ;;  %v5468_v48 = vcombine.high %v5466_v24, %v5466_v24 }
 0x4cd   : > { %vm5835_vm5 = vcmp.gt.f32.partialorder %v5467_v31, 0.0  ;;  %v5997_v44 = vmul.f32 0.01, %v5467_v31  ;;  %v10622_v38 = vunpack.i.l.bf16 %v10621_v63  ;;  %vm5836_vm11 = vcmp.gt.f32.partialorder %v5466_v24, 0.0 }
 0x4ce   : > { %v5998_v7 = vmul.f32 0.01, %v5466_v24  ;;  %v5469_v42 = vcombine.high %v4781_v3, %v4781_v3  ;;  %v5476_v40 = vrot.slane %v4781_v3, %v12200_v17  ;;  %vm5837_vm10 = vcmp.gt.f32.partialorder %v5468_v48, 0.0 }
 0x4cf   : > { %v5999_v16 = vmul.f32 0.01, %v5468_v48  ;;  %v6159_v13 = vsel %vm5835_vm5, %v5467_v31, %v5997_v44  ;;  %v7346_v14 = vrot.slane %v15200_v23, 1  ;;  %v6158_v50 = vsel %vm5834_vm3, %v5459_v12, %v5996_v19  ;;  %v10631_v63 = vpop.permute.xlu0 %10630 }
 0x4d0   : > { %v5483_v61 = vrot.slane %v5469_v42, %v12200_v17  ;;  %v5484_v47 = vcombine.high %v5476_v40, %v5476_v40  ;;  %v10638_v8 = vunpack.i.h.bf16 %v10636_v35  ;;  %v6160_v11 = vsel %vm5836_vm11, %v5466_v24, %v5998_v7 }
 0x4d1   : > { %v6161_v1 = vsel %vm5837_vm10, %v5468_v48, %v5999_v16  ;;  %vm5838_vm6 = vcmp.gt.f32.partialorder %v5476_v40, 0.0  ;;  %v6000_v58 = vmul.f32 0.01, %v5476_v40  ;;  %v7031_v33 = vcombine.low %v6158_v50, %v6159_v13 }
 0x4d2   : > { %v7032_v53 = vcombine.low %v6160_v11, %v6161_v1  ;;  %v5485_v62 = vcombine.high %v5483_v61, %v5483_v61  ;;  %vm5839_vm7 = vcmp.gt.f32.partialorder %v5484_v47, 0.0  ;;  %vm5840_vm8 = vcmp.gt.f32.partialorder %v5483_v61, 0.0 }
 0x4d3   : > { %v6001_v3 = vmul.f32 0.01, %v5484_v47  ;;  %v6002_v31 = vmul.f32 0.01, %v5483_v61  ;;  %v6162_v44 = vsel %vm5838_vm6, %v5476_v40, %v6000_v58  ;;  %v10633_v12 = vunpack.i.h.bf16 %v10631_v63 }
 0x4d4   : > { %vm5841_vm1 = vcmp.gt.f32.partialorder %v5485_v62, 0.0  ;;  %v6003_v51 = vmul.f32 0.01, %v5485_v62  ;;  %v10632_v19 = vunpack.i.l.bf16 %v10631_v63  ;;  %v8243_v24 = vsel %vm8130_vm4, %v8211_v27, %v10622_v38 }
 0x4d5   : > { %v6163_v42 = vsel %vm5839_vm7, %v5484_v47, %v6001_v3  ;;  %v6164_v0 = vsel %vm5840_vm8, %v5483_v61, %v6002_v31  ;;  %v8147_v48 = vsel %vm8130_vm4, %v8114_v30, %v10623_v4  ;;  %8510 = vmatprep.mubr.f32.mxu1 %v8243_v24  ;;  %v15218_v13 = vsel %vm7269_vm0, %v7345_v52, %v7346_v14 }
 0x4d6   : > { %v6165_v7 = vsel %vm5841_vm1, %v5485_v62, %v6003_v51  ;;  %v7048_v16 = vcombine.low %v6162_v44, %v6163_v42  ;;  %v15221_v50 = vsel %vm7269_vm0, %v7346_v14, %v7348_v25  ;;  %v10637_v11 = vunpack.i.l.bf16 %v10636_v35  ;;  %8511 = vmatmul.mubr.f32.gmra.mrb[32].mxu1 %v8147_v48 }
 0x4d7   : > { %v7049_v40 = vcombine.low %v6164_v0, %v6165_v7  ;;  %v10769_v47 = vpack.i.bf16 %v15076_v20, %v15218_v13  ;;  %v10784_v27 = vpack.i.bf16 %v15117_v49, %v15221_v50  ;;  %v4785_v38 = vpop.f32.mrb[76].mxu0  ;;  %v8212_v62 = vsel %vm8097_vm15, %v8180_v2, %v10632_v19 }
 0x4d8   : > { %v7056_v51 = vrot.slane %v7048_v16, %v12200_v17  ;;  %v8115_v52 = vsel %vm8097_vm15, %v8082_v9, %v10633_v12  ;;  %v10184_v30 = vpop.f32.mrb[77].mxu0  ;;  %v8244_v0 = vsel %vm8130_vm4, %v8212_v62, %v10637_v11  ;;  %v7523_v35 = vrot.slane %v15200_v23, 2 }
 0x4d9   : > { %v7063_v25 = vrot.slane %v7049_v40, %v12200_v17  ;;  %10770 = vrot.lane.b32.xlu0 %v10769_v47, %s10960_s17  ;;  %10785 = vrot.lane.b32.xlu1 %v10784_v27, %s10960_s17  ;;  %v8148_v4 = vsel %vm8130_vm4, %v8115_v52, %v10638_v8  ;;  %v7039_v14 = vrot.slane %v7031_v33, %v12200_v17  ;;  %v7522_v61 = vrot.slane %v15153_v56, 2 }
 0x4da   : > { %8515 = vmatprep.mubr.f32.mxu1 %v8244_v0  ;;  %v7046_v2 = vrot.slane %v7032_v53, %v12200_v17  ;;  %v4786_v9 = vadd.f32 %v4785_v38, %v13389_v29  ;;  %v10779_v58 = vpack.i.bf16 %v15090_v36, %v15200_v23  ;;  %v7525_v33 = vrot.slane %v15198_v43, 2  ;;  %v10641_v44 = vpop.permute.xlu0 %10640  ;;  %v10646_v43 = vpop.permute.xlu1 %10645 }
 0x4db   : > { %v15240_v1 = vcombine.low %v7056_v51, %v7063_v25  ;;  %8516 = vmatmul.mubr.f32.gmra.mrb[34].mxu1 %v8148_v4  ;;  %v15246_v3 = vsel %vm7446_vm12, %v7522_v61, %v7523_v35  ;;  %v10643_v11 = vunpack.i.h.bf16 %v10641_v44  ;;  %v10642_v47 = vunpack.i.l.bf16 %v10641_v44  ;;  %v16498_v4 = vld [vmem:[#allocation106_spill] sm:$0xff] }
 0x4dc   : > { %v7047_v63 = vcombine.low %v7039_v14, %v7046_v2  ;;  %v5493_v8 = vrot.slane %v4786_v9, %v12200_v17  ;;  %v10789_v19 = vpack.i.bf16 %v15128_v37, %v15246_v3  ;;  %v15261_v48 = vsel %vm7446_vm12, %v7523_v35, %v7525_v33 }
 0x4dd   : > { %10780 = vrot.lane.b32.xlu0 %v10779_v58, %s10959_s16  ;;  %v7723_v31 = vrot.slane %v15240_v1, 1  ;;  %v7760_v40 = vrot.slane %v15240_v1, 2  ;;  %v10804_v51 = vpack.i.bf16 %v15131_v6, %v15261_v48  ;;  %v8181_v54 = vsel %vm2824_vm9, %v14745_v10, %v10642_v47 }
 0x4de   : > { %v15252_v29 = vsel %vm6183_vm14, %v7047_v63, 0.0  ;;  %vm5842_vm3 = vcmp.gt.f32.partialorder %v5493_v8, 0.0  ;;  %v6004_v53 = vmul.f32 0.01, %v5493_v8  ;;  %v10656_v25 = vpop.permute.xlu1 %10655  ;;  %v8083_v35 = vsel %vm2824_vm9, %v16498_v4, %v10643_v11  ;;  %v16501_v4 = vld [vmem:[#allocation6_spill] sm:$0xff] }
 0x4df   : > { %v10794_v12 = vpack.i.bf16 %v15158_v45, %v15252_v29  ;;  %v7722_v42 = vrot.slane %v15252_v29, 1  ;;  %v7759_v16 = vrot.slane %v15252_v29, 2  ;;  %v10648_v2 = vunpack.i.h.bf16 %v10646_v43 }
 0x4e0   : > { %v6166_v24 = vsel %vm5842_vm3, %v5493_v8, %v6004_v53  ;;  %v10647_v9 = vunpack.i.l.bf16 %v10646_v43  ;;  %v10809_v58 = vpack.i.bf16 %v15164_v5, %v15240_v1  ;;  %v10658_v53 = vunpack.i.h.bf16 %v10656_v25 }
 0x4e1   : > { %10795 = vrot.lane.b32.xlu1 %v10794_v12, %s10959_s16  ;;  %v7071_v21 = vrot.slane %v6166_v24, %v12200_v17  ;;  %10790 = vrot.lane.b32.xlu0 %v10789_v19, %s10957_s12  ;;  %v15267_v7 = vsel %vm7269_vm0, %v7722_v42, %v7723_v31  ;;  %v15278_v62 = vsel %vm7446_vm12, %v7759_v16, %v7760_v40  ;;  %v16499_v24 = vmov 0.0  }
 0x4e2   : > { %v10799_v27 = vpack.i.bf16 %v15153_v56, %v15267_v7  ;;  %v8213_v10 = vsel %vm8097_vm15, %v8181_v54, %v10647_v9  ;;  %v8116_v44 = vsel %vm8097_vm15, %v8083_v35, %v10648_v2  ;;  %v10819_v43 = vpack.i.bf16 %v15218_v13, %v15278_v62 }
 0x4e3   : > { %v7217_v38 = vsel %vm6194_vm13, %v7071_v21, 0.0  ;;  %v10824_v21 = vpack.i.bf16 %v15246_v3, %v16499_v24  ;;  %v10829_v35 = vpack.i.bf16 %v15252_v29, %v16501_v4  ;;  %vm16504_vm14 = vcmask 64512  }
 0x4e4   : > { %v7725_v52 = vrot.slane %v7217_v38, 1  ;;  %v7762_v30 = vrot.slane %v7217_v38, 2  ;;  %vm16508_vm13 = vcmask 130048   ;;  %vm16510_vm5 = vcmask 195584   ;;  %vm16517_vm7 = vmmov %vm16504_vm14 }
 0x4e5   : > { %10805 = vrot.lane.b32.xlu1 %v10804_v51, %s10957_s12  ;;  %10800 = vrot.lane.b32.xlu0 %v10799_v27, %s10960_s17  ;;  %v16500_v51 = vld [vmem:[#allocation16_spill] sm:$0xff]  ;;  %vm16511_vm11 = vcmask 228352   ;;  %vm16513_vm10 = vcmask 293888   ;;  %vm16514_vm6 = vmmov 0   ;;  %vm16521_vm1 = vmmov %vm16508_vm13 }
 0x4e6   : > { %v15283_v0 = vsel %vm7269_vm0, %v7723_v31, %v7725_v52  ;;  %v15290_v14 = vsel %vm7446_vm12, %v7760_v40, %v7762_v30  ;;  %v10657_v31 = vunpack.i.l.bf16 %v10656_v25  ;;  %v8084_v52 = vsel %vm2824_vm9, %v16500_v51, %v10658_v53  ;;  %vm16523_vm3 = vmmov %vm16510_vm5 }
 0x4e7   : > { %v10651_v61 = vpop.permute.xlu0 %10650  ;;  %v10814_v63 = vpack.i.bf16 %v15200_v23, %v15283_v0  ;;  %vm16506_vm12 = vcmask 97280   ;;  %vm16509_vm0 = vcmask 162816  }
 0x4e8   : > { %v10653_v8 = vunpack.i.h.bf16 %v10651_v61  ;;  %v10652_v33 = vunpack.i.l.bf16 %v10651_v61  ;;  %v8182_v38 = vsel %vm2824_vm9, %v14748_v41, %v10657_v31  ;;  %v10834_v61 = vpack.i.bf16 %v15221_v50, %v15290_v14  ;;  %vm16519_vm8 = vmmov %vm16506_vm12 }
 0x4e9   : > { %10810 = vrot.lane.b32.xlu0 %v10809_v58, %s10959_s16  ;;  %10815 = vrot.lane.b32.xlu1 %v10814_v63, %s10960_s17  ;;  %v10844_v31 = vpack.i.bf16 %v15240_v1, %v16501_v4 }
 0x4ea   : > { %v8245_v12 = vsel %vm8130_vm4, %v8213_v10, %v10652_v33  ;;  %v8149_v19 = vsel %vm8130_vm4, %v8116_v44, %v10653_v8  ;;  %v10839_v8 = vpack.i.bf16 %v15261_v48, %v16499_v24 }
 0x4eb   : > { %v10661_v42 = vpop.permute.xlu0 %10660  ;;  %8520 = vmatprep.mubr.f32.mxu1 %v8245_v12 }
 0x4ec   : > { %v10666_v16 = vpop.permute.xlu1 %10665  ;;  %v10663_v40 = vunpack.i.h.bf16 %v10661_v42  ;;  %v10662_v11 = vunpack.i.l.bf16 %v10661_v42  ;;  %8521 = vmatmul.mubr.f32.gmra.mrb[36].mxu1 %v8149_v19 }
 0x4ed   : > { %v10668_v47 = vunpack.i.h.bf16 %v10666_v16  ;;  %v10667_v27 = vunpack.i.l.bf16 %v10666_v16  ;;  %10820 = vrot.lane.b32.xlu0 %v10819_v43, %s10957_s12  ;;  %10825 = vrot.lane.b32.xlu1 %v10824_v21, %s10959_s16 }
 0x4ee   : > { %v8214_v30 = vsel %vm8097_vm15, %v8182_v38, %v10662_v11  ;;  %v8117_v25 = vsel %vm8097_vm15, %v8084_v52, %v10663_v40 }
 0x4ef   : > { %v8246_v54 = vsel %vm8130_vm4, %v8214_v30, %v10667_v27  ;;  %v8150_v2 = vsel %vm8130_vm4, %v8117_v25, %v10668_v47  ;;  %v10671_v41 = vpop.permute.xlu0 %10670 }
 0x4f0   : > { %v10676_v9 = vpop.permute.xlu1 %10675  ;;  %8525 = vmatprep.mubr.f32.mxu1 %v8246_v54  ;;  %v10673_v29 = vunpack.i.h.bf16 %v10671_v41  ;;  %v10672_v33 = vunpack.i.l.bf16 %v10671_v41 }
 0x4f1   : > { %10830 = vrot.lane.b32.xlu0 %v10829_v35, %s10960_s17  ;;  %8526 = vmatmul.mubr.f32.gmra.mrb[38].mxu1 %v8150_v2  ;;  %v10678_v42 = vunpack.i.h.bf16 %v10676_v9  ;;  %v10677_v43 = vunpack.i.l.bf16 %v10676_v9 }
 0x4f2   : > { %10835 = vrot.lane.b32.xlu1 %v10834_v61, %s10957_s12  ;;  %v15322_v58 = vpop.f32.mrb[0].mxu1  ;;  %v8183_v12 = vsel %vm2824_vm9, %v14845_v39, %v10672_v33  ;;  %v8085_v19 = vsel %vm2824_vm9, %v14681_v34, %v10673_v29 }
 0x4f3   : > { %v8434_v63 = vpop.f32.mrb[1].mxu1  ;;  %v8215_v1 = vsel %vm8097_vm15, %v8183_v12, %v10677_v43  ;;  %v8118_v47 = vsel %vm8097_vm15, %v8085_v19, %v10678_v42  ;;  %v16505_v43 = vld [vmem:[#allocation142_spill] sm:$0xff] }
 0x4f4   : > { %v10686_v53 = vpop.permute.xlu1 %10685  ;;  %v10882_v63 = vld [vmem:[%s11047_s9 + $0x1a0] sm:$0xff] }
 0x4f5   : > { %10840 = vrot.lane.b32.xlu0 %v10839_v8, %s10959_s16  ;;  %v10688_v39 = vunpack.i.h.bf16 %v10686_v53  ;;  %v10687_v52 = vunpack.i.l.bf16 %v10686_v53  ;;  %v16502_v8 = vld [vmem:[#allocation50_spill] sm:$0xff] }
 0x4f6   : > { %10845 = vrot.lane.b32.xlu1 %v10844_v31, %s10960_s17  ;;  %v2492_v29 = vsel %vm2439_vm2, %v10882_v63, %v16502_v8  ;;  %v16503_v31 = vld [vmem:[#allocation96_spill] sm:$0xff] }
 0x4f7   : > { %v15330_v44 = vpop.f32.mrb[2].mxu1  ;;  %v8184_v9 = vsel %vm2824_vm9, %v14878_v55, %v10687_v52  ;;  %v8086_v61 = vsel %vm2824_vm9, %v14727_v32, %v10688_v39  ;;  %v2547_v12 = vsel %vm16504_vm14, %v2492_v29, %v16503_v31  ;;  %vm16524_vm14 = vmmov %vm16511_vm11 }
 0x4f8   : > { %v1734_v10 = vpop.permute.xlu1 %1733  ;;  %v8439_v16 = vpop.f32.mrb[3].mxu1  ;;  %v2602_v32 = vsel %vm16506_vm12, %v2547_v12, %v16505_v43  ;;  %vm16525_vm12 = vmmov %vm16513_vm10 }
 0x4f9   : > { %v10681_v21 = vpop.permute.xlu0 %10680  ;;  %v16507_v16 = vld [vmem:[#allocation185_spill] sm:$0xff] }
 0x4fa   : > { %v10683_v40 = vunpack.i.h.bf16 %v10681_v21  ;;  %v10682_v11 = vunpack.i.l.bf16 %v10681_v21 }
 0x4fc   : > { %v8247_v27 = vsel %vm8130_vm4, %v8215_v1, %v10682_v11  ;;  %v8151_v38 = vsel %vm8130_vm4, %v8118_v47, %v10683_v40  ;;  %v1950_v34 = vpop.permute.xlu1 %1949  ;;  %v2657_v40 = vsel %vm16508_vm13, %v2602_v32, %v16507_v16 }
 0x4fd   : > { %v10691_v51 = vpop.permute.xlu0 %10690  ;;  %8530 = vmatprep.mubr.f32.mxu1 %v8247_v27  ;;  %v2712_v11 = vsel %vm16509_vm0, %v2657_v40, %v1734_v10 }
 0x4fe   : > { %8531 = vmatmul.mubr.f32.gmra.mrb[40].mxu1 %v8151_v38  ;;  %v10693_v30 = vunpack.i.h.bf16 %v10691_v51  ;;  %v10692_v25 = vunpack.i.l.bf16 %v10691_v51  ;;  %v2767_v1 = vsel %vm16510_vm5, %v2712_v11, %v1950_v34 }
 0x500   : > { %v8216_v33 = vsel %vm8097_vm15, %v8184_v9, %v10692_v25  ;;  %v8119_v53 = vsel %vm8097_vm15, %v8086_v61, %v10693_v30  ;;  %v10701_v19 = vpop.permute.xlu1 %10700  ;;  %v16512_v30 = vld [vmem:[#allocation55_spill] sm:$0xff] }
 0x501   : > { %v10696_v54 = vpop.permute.xlu0 %10695  ;;  %v3657_v25 = vcombine.high %v16512_v30, %v16512_v30  ;;  %v10703_v8 = vunpack.i.h.bf16 %v10701_v19  ;;  %v10702_v29 = vunpack.i.l.bf16 %v10701_v19 }
 0x502   : > { %v15340_v4 = vpop.f32.mrb[4].mxu1  ;;  %v10698_v35 = vunpack.i.h.bf16 %v10696_v54  ;;  %v10697_v2 = vunpack.i.l.bf16 %v10696_v54 }
 0x503   : > { %v8444_v41 = vpop.f32.mrb[5].mxu1  ;;  %v8185_v16 = vsel %vm2824_vm9, %v14929_v22, %v10702_v29  ;;  %v8087_v19 = vsel %vm2824_vm9, %v14784_v28, %v10703_v8  ;;  %v276_v28 = vld [vmem:[%s11047_s9 + $0x1a8] sm:$0x3] }
 0x504   : > { %v8248_v42 = vsel %vm8130_vm4, %v8216_v33, %v10697_v2  ;;  %v8152_v55 = vsel %vm8130_vm4, %v8119_v53, %v10698_v35  ;;  %v10706_v47 = vpop.permute.xlu1 %10705 }
 0x505   : > { %v2166_v21 = vpop.permute.xlu0 %2165  ;;  %8535 = vmatprep.mubr.f32.mxu1 %v8248_v42  ;;  %v10708_v53 = vunpack.i.h.bf16 %v10706_v47  ;;  %v10707_v31 = vunpack.i.l.bf16 %v10706_v47 }
 0x506   : > { %8536 = vmatmul.mubr.f32.gmra.mrb[42].mxu1 %v8152_v55  ;;  %v15361_v27 = vpop.f32.mrb[6].mxu1  ;;  %v2822_v38 = vsel %vm16511_vm11, %v2767_v1, %v2166_v21 }
 0x507   : > { %v8449_v39 = vpop.f32.mrb[7].mxu1  ;;  %v8217_v11 = vsel %vm8097_vm15, %v8185_v16, %v10707_v31  ;;  %v8120_v1 = vsel %vm8097_vm15, %v8087_v19, %v10708_v53 }
 0x508   : > { %v10716_v61 = vpop.permute.xlu1 %10715 }
 0x509   : > { %v2382_v51 = vpop.permute.xlu0 %2381  ;;  %v10718_v39 = vunpack.i.h.bf16 %v10716_v61 }
 0x50a   : > { %v2877_v52 = vsel %vm2824_vm9, %v2822_v38, %v2382_v51 }
 0x50b   : > { %v3658_v54 = vcombine.high %v2877_v52, %v2877_v52  ;;  %v3665_v35 = vrot.slane %v2877_v52, %v12200_v17  ;;  %v10717_v52 = vunpack.i.l.bf16 %v10716_v61 }
 0x50c   : > { %v1736_v42 = vpop.permute.xlu1 %1735 }
 0x50d   : > { %v15369_v2 = vrot.slane %v3658_v54, %v12200_v17  ;;  %v3673_v10 = vcombine.high %v3665_v35, %v3665_v35  ;;  %v4362_v34 = vcombine.low %v3657_v25, %v3665_v35 }
 0x50f   : > { %v4363_v9 = vcombine.low %v3673_v10, %v15369_v2  ;;  %v4370_v41 = vrot.slane %v4362_v34, %v12200_v17 }
 0x510   : > { %v1952_v22 = vpop.permute.xlu1 %1951 }
 0x511   : > { %v4377_v63 = vrot.slane %v4363_v9, %v12200_v17  ;;  %v8186_v9 = vsel %vm2824_vm9, %v14961_v15, %v10717_v52 }
 0x513   : > { %v4378_v33 = vcombine.low %v4370_v41, %v4377_v63  ;;  %v8088_v41 = vsel %vm2824_vm9, %v14795_v46, %v10718_v39  ;;  %v16515_v63 = vld [vmem:[#allocation49_spill] sm:$0xff]  ;;  %v16520_v46 = vld [vmem:[#allocation184_spill] sm:$0xff] }
 0x514   : > { %v10711_v43 = vpop.permute.xlu0 %10710  ;;  %v10731_v35 = vpop.permute.xlu1 %10730  ;;  %v2493_v8 = vsel %vm2439_vm2, %v276_v28, %v16515_v63  ;;  %vm16522_vm2 = vmmov %vm16509_vm0 }
 0x515   : > { %10186 = vmatmul.mubr.msk.f32.gmra.mrb[78].mxu0 %vm16513_vm10, %v4378_v33  ;;  %v10713_v32 = vunpack.i.h.bf16 %v10711_v43  ;;  %v10712_v21 = vunpack.i.l.bf16 %v10711_v43  ;;  %v16516_v33 = vld [vmem:[#allocation95_spill] sm:$0xff]  ;;  %v16518_v43 = vld [vmem:[#allocation141_spill] sm:$0xff] }
 0x516   : > { %v15374_v12 = vpop.f32.mrb[8].mxu1  ;;  %10188 = vmatprep.mubr.msk.f32.mxu0 %vm16514_vm6, %v16499_v24  ;;  %v2548_v53 = vsel %vm16517_vm7, %v2493_v8, %v16516_v33 }
 0x517   : > { %v8454_v55 = vpop.f32.mrb[9].mxu1  ;;  %v8249_v38 = vsel %vm8130_vm4, %v8217_v11, %v10712_v21  ;;  %v8153_v24 = vsel %vm8130_vm4, %v8120_v1, %v10713_v32  ;;  %v2603_v15 = vsel %vm16519_vm8, %v2548_v53, %v16518_v43  ;;  %v10732_v1 = vunpack.i.l.bf16 %v10731_v35 }
 0x518   : > { %8540 = vmatprep.mubr.f32.mxu1 %v8249_v38  ;;  %v2658_v21 = vsel %vm16521_vm1, %v2603_v15, %v16520_v46  ;;  %v10736_v16 = vpop.permute.xlu1 %10735 }
 0x519   : > { %v10721_v51 = vpop.permute.xlu0 %10720  ;;  %8541 = vmatmul.mubr.f32.gmra.mrb[44].mxu1 %v8153_v24  ;;  %v2713_v19 = vsel %vm16522_vm2, %v2658_v21, %v1736_v42  ;;  %v10733_v24 = vunpack.i.h.bf16 %v10731_v35  ;;  %v10738_v52 = vunpack.i.h.bf16 %v10736_v16  ;;  %v8187_v42 = vsel %vm2824_vm9, %v15058_v18, %v10732_v1 }
 0x51a   : > { %v15383_v40 = vpop.f32.mrb[10].mxu1  ;;  %v10723_v30 = vunpack.i.h.bf16 %v10721_v51  ;;  %v10722_v25 = vunpack.i.l.bf16 %v10721_v51  ;;  %v2768_v11 = vsel %vm16523_vm3, %v2713_v19, %v1952_v22  ;;  %v10737_v51 = vunpack.i.l.bf16 %v10736_v16 }
 0x51b   : > { %v8459_v47 = vpop.f32.mrb[11].mxu1 }
 0x51c   : > { %v8218_v61 = vsel %vm8097_vm15, %v8186_v9, %v10722_v25  ;;  %v8121_v29 = vsel %vm8097_vm15, %v8088_v41, %v10723_v30  ;;  %v3674_v30 = vcombine.high %v15369_v2, %v15369_v2  ;;  %v10746_v28 = vpop.permute.xlu1 %10745  ;;  %v8219_v35 = vsel %vm8097_vm15, %v8187_v42, %v10737_v51  ;;  %v16530_v51 = vld [vmem:[#allocation7_spill] sm:$0xff]  ;;  %v16536_v42 = vld [vmem:[#allocation104_spill] sm:$0xff] }
 0x51d   : > { %v10726_v54 = vpop.permute.xlu0 %10725  ;;  %v8089_v41 = vsel %vm2824_vm9, %v14873_v59, %v10733_v24  ;;  %v10748_v63 = vunpack.i.h.bf16 %v10746_v28  ;;  %v10747_v8 = vunpack.i.l.bf16 %v10746_v28  ;;  %v16535_v28 = vld [vmem:[#allocation12_spill] sm:$0xff] }
 0x51e   : > { %v10728_v10 = vunpack.i.h.bf16 %v10726_v54  ;;  %v10727_v34 = vunpack.i.l.bf16 %v10726_v54 }
 0x51f   : > { %v8188_v46 = vsel %vm2824_vm9, %v15095_v57, %v10747_v8  ;;  %v8090_v21 = vsel %vm2824_vm9, %v14861_v60, %v10748_v63  ;;  %v16529_v60 = vld [vmem:[#allocation147_spill] sm:$0xff]  ;;  %v16538_v8 = vld [vmem:[#allocation60_spill] sm:$0xff] }
 0x520   : > { %v8250_v31 = vsel %vm8130_vm4, %v8218_v61, %v10727_v34  ;;  %v8154_v55 = vsel %vm8130_vm4, %v8121_v29, %v10728_v10  ;;  %v8122_v29 = vsel %vm8097_vm15, %v8089_v41, %v10738_v52  ;;  %v16532_v52 = vld [vmem:[#allocation56_spill] sm:$0xff]  ;;  %v16537_v41 = vld [vmem:[#allocation14_spill] sm:$0xff] }
 0x521   : > { %v2168_v32 = vpop.permute.xlu0 %2167  ;;  %8545 = vmatprep.mubr.f32.mxu1 %v8250_v31 }
 0x522   : > { %8546 = vmatmul.mubr.f32.gmra.mrb[46].mxu1 %v8154_v55  ;;  %v2823_v47 = vsel %vm16524_vm14, %v2768_v11, %v2168_v32  ;;  %v16526_v55 = vld [vmem:[#allocation8_spill] sm:$0xff]  ;;  %v16527_v11 = vld [vmem:[#allocation54_spill] sm:$0xff] }
 0x525   : > { %v2384_v38 = vpop.permute.xlu0 %2383 }
 0x526   : > { %v2878_v39 = vsel %vm2824_vm9, %v2823_v47, %v2384_v38  ;;  %v16528_v38 = vld [vmem:[#allocation100_spill] sm:$0xff] }
 0x527   : > { %v3681_v25 = vrot.slane %v2878_v39, %v12200_v17  ;;  %v16531_v39 = vld [vmem:[#allocation99_spill] sm:$0xff] }
 0x528   : > { %v10756_v33 = vpop.permute.xlu1 %10755 }
 0x529   : > { %v4379_v54 = vcombine.low %v3674_v30, %v3681_v25  ;;  %v10741_v10 = vpop.permute.xlu0 %10740  ;;  %v10758_v15 = vunpack.i.h.bf16 %v10756_v33  ;;  %v10757_v32 = vunpack.i.l.bf16 %v10756_v33  ;;  %v16533_v30 = vld [vmem:[#allocation9_spill] sm:$0xff]  ;;  %v16534_v25 = vld [vmem:[#allocation103_spill] sm:$0xff] }
 0x52a   : > { %v10743_v22 = vunpack.i.h.bf16 %v10741_v10  ;;  %v10742_v34 = vunpack.i.l.bf16 %v10741_v10 }
 0x52b   : > { %v4386_v2 = vrot.slane %v4379_v54, %v12200_v17 }
 0x52c   : > { %v15415_v9 = vpop.f32.mrb[12].mxu1  ;;  %v8251_v53 = vsel %vm8130_vm4, %v8219_v35, %v10742_v34  ;;  %v8155_v18 = vsel %vm8130_vm4, %v8122_v29, %v10743_v22 }
 0x52d   : > { %v8464_v61 = vpop.f32.mrb[13].mxu1  ;;  %10189 = vmatmul.mubr.msk.f32.gmra.mrb[80].mxu0 %vm16525_vm12, %v4386_v2  ;;  %v10751_v31 = vpop.permute.xlu0 %10750  ;;  %8550 = vmatprep.mubr.f32.mxu1 %v8251_v53  ;;  %v16539_v53 = vld [vmem:[#allocation149_spill] sm:$0xff] }
 0x52e   : > { %10199 = vmatprep.mubr.msk.f32.mxu0 %vm2824_vm9, %v16526_v55  ;;  %v10753_v59 = vunpack.i.h.bf16 %v10751_v31  ;;  %v10752_v43 = vunpack.i.l.bf16 %v10751_v31  ;;  %8551 = vmatmul.mubr.f32.gmra.mrb[48].mxu1 %v8155_v18  ;;  %v10766_v54 = vpop.permute.xlu1 %10765 }
 0x52f   : > { %v10768_v18 = vunpack.i.h.bf16 %v10766_v54  ;;  %v10767_v31 = vunpack.i.l.bf16 %v10766_v54 }
 0x530   : > { %v8220_v16 = vsel %vm8097_vm15, %v8188_v46, %v10752_v43  ;;  %v8123_v19 = vsel %vm8097_vm15, %v8090_v21, %v10753_v59  ;;  %v16540_v59 = vld [vmem:[#allocation62_spill] sm:$0xff] }
 0x531   : > { %10200 = vmatmul.mubr.msk.f32.vlgmr.msra.gmra.mrb[82].mxu0 %vm2824_vm9, %v16527_v11  ;;  %v8252_v1 = vsel %vm8130_vm4, %v8220_v16, %v10757_v32  ;;  %v8156_v47 = vsel %vm8130_vm4, %v8123_v19, %v10758_v15  ;;  %v10761_v10 = vpop.permute.xlu0 %10760 }
 0x532   : > { %10202 = vmatprep.mubr.msk.f32.mxu0 %vm2824_vm9, %v16528_v38  ;;  %8555 = vmatprep.mubr.f32.mxu1 %v8252_v1  ;;  %v10763_v22 = vunpack.i.h.bf16 %v10761_v10  ;;  %v10762_v34 = vunpack.i.l.bf16 %v10761_v10  ;;  %v10776_v2 = vpop.permute.xlu1 %10775  ;;  %v16541_v1 = vld [vmem:[#allocation108_spill] sm:$0xff]  ;;  %v16542_v38 = vld [vmem:[#allocation151_spill] sm:$0xff]  ;;  %v16544_v10 = vld [vmem:[#allocation13_spill] sm:$0xff] }
 0x533   : > { %8556 = vmatmul.mubr.f32.gmra.mrb[50].mxu1 %v8156_v47  ;;  %v10778_v46 = vunpack.i.h.bf16 %v10776_v2  ;;  %v10777_v21 = vunpack.i.l.bf16 %v10776_v2  ;;  %v16546_v2 = vld [vmem:[#allocation105_spill] sm:$0xff] }
 0x534   : > { %v15439_v24 = vpop.f32.mrb[14].mxu1  ;;  %v8189_v61 = vsel %vm2824_vm9, %v15128_v37, %v10762_v34  ;;  %v8091_v33 = vsel %vm2824_vm9, %v14975_v26, %v10763_v22 }
 0x535   : > { %v8469_v57 = vpop.f32.mrb[15].mxu1  ;;  %10203 = vmatmul.mubr.msk.f32.gmra.mrb[84].mxu0 %vm2824_vm9, %v16529_v60  ;;  %v8221_v16 = vsel %vm8097_vm15, %v8189_v61, %v10767_v31  ;;  %v8124_v19 = vsel %vm8097_vm15, %v8091_v33, %v10768_v18 }
 0x536   : > { %10205 = vmatprep.mubr.msk.f32.mxu0 %vm2824_vm9, %v16530_v51 }
 0x539   : > { %10206 = vmatmul.mubr.msk.f32.gmra.mrb[86].mxu0 %vm2824_vm9, %v16531_v39 }
 0x53a   : > { %10208 = vmatprep.mubr.msk.f32.mxu0 %vm2824_vm9, %v16532_v52  ;;  %v8190_v52 = vsel %vm2824_vm9, %v15131_v6, %v10777_v21 }
 0x53d   : > { %10209 = vmatmul.mubr.msk.f32.gmra.mrb[88].mxu0 %vm2824_vm9, %v16533_v30  ;;  %v16543_v30 = vld [vmem:[#allocation61_spill] sm:$0xff] }
 0x53e   : > { %10211 = vmatprep.mubr.msk.f32.mxu0 %vm2824_vm9, %v16534_v25  ;;  %v8092_v25 = vsel %vm2824_vm9, %v16543_v30, %v10778_v46 }
 0x541   : > { %10212 = vmatmul.mubr.msk.f32.gmra.mrb[90].mxu0 %vm2824_vm9, %v16535_v28 }
 0x542   : > { %10214 = vmatprep.mubr.msk.f32.mxu0 %vm2824_vm9, %v16536_v42 }
 0x545   : > { %10215 = vmatmul.mubr.msk.f32.gmra.mrb[92].mxu0 %vm2824_vm9, %v16537_v41 }
 0x546   : > { %10217 = vmatprep.mubr.msk.f32.mxu0 %vm2824_vm9, %v16538_v8 }
 0x547   : > { %v15457_v35 = vpop.f32.mrb[16].mxu1 }
 0x548   : > { %v8474_v63 = vpop.f32.mrb[17].mxu1 }
 0x549   : > { %10218 = vmatmul.mubr.msk.f32.gmra.mrb[94].mxu0 %vm2824_vm9, %v16539_v53  ;;  %v16545_v63 = vld [vmem:[#allocation59_spill] sm:$0xff] }
 0x54a   : > { %10220 = vmatprep.mubr.msk.f32.mxu0 %vm2824_vm9, %v16540_v59  ;;  %v16547_v59 = vld [vmem:[#allocation148_spill] sm:$0xff] }
 0x54b   : > { %v10771_v55 = vpop.permute.xlu0 %10770  ;;  %v10786_v37 = vpop.permute.xlu1 %10785 }
 0x54c   : > { %v15465_v29 = vpop.f32.mrb[18].mxu1  ;;  %v10773_v43 = vunpack.i.h.bf16 %v10771_v55  ;;  %v10772_v15 = vunpack.i.l.bf16 %v10771_v55  ;;  %v10788_v51 = vunpack.i.h.bf16 %v10786_v37  ;;  %v10787_v39 = vunpack.i.l.bf16 %v10786_v37 }
 0x54d   : > { %v8479_v32 = vpop.f32.mrb[19].mxu1  ;;  %10221 = vmatmul.mubr.msk.f32.gmra.mrb[96].mxu0 %vm2824_vm9, %v16541_v1 }
 0x54e   : > { %v8253_v26 = vsel %vm8130_vm4, %v8221_v16, %v10772_v15  ;;  %v8157_v11 = vsel %vm8130_vm4, %v8124_v19, %v10773_v43  ;;  %10223 = vmatprep.mubr.msk.f32.mxu0 %vm2824_vm9, %v16542_v38 }
 0x54f   : > { %v10781_v47 = vpop.permute.xlu0 %10780  ;;  %8560 = vmatprep.mubr.f32.mxu1 %v8253_v26 }
 0x550   : > { %v10783_v57 = vunpack.i.h.bf16 %v10781_v47  ;;  %v10782_v60 = vunpack.i.l.bf16 %v10781_v47  ;;  %8561 = vmatmul.mubr.f32.gmra.mrb[52].mxu1 %v8157_v11 }
 0x551   : > { %10224 = vmatmul.mubr.msk.f32.gmra.mrb[98].mxu0 %vm2824_vm9, %v16544_v10 }
 0x552   : > { %v8222_v28 = vsel %vm8097_vm15, %v8190_v52, %v10782_v60  ;;  %v8125_v54 = vsel %vm8097_vm15, %v8092_v25, %v10783_v57  ;;  %10226 = vmatprep.mubr.msk.f32.mxu0 %vm2824_vm9, %v16545_v63 }
 0x553   : > { %v10796_v42 = vpop.permute.xlu1 %10795  ;;  %v10791_v22 = vpop.permute.xlu0 %10790  ;;  %v8254_v34 = vsel %vm8130_vm4, %v8222_v28, %v10787_v39  ;;  %v8158_v41 = vsel %vm8130_vm4, %v8125_v54, %v10788_v51 }
 0x554   : > { %v10793_v6 = vunpack.i.h.bf16 %v10791_v22  ;;  %v10792_v8 = vunpack.i.l.bf16 %v10791_v22  ;;  %8565 = vmatprep.mubr.f32.mxu1 %v8254_v34  ;;  %v10798_v53 = vunpack.i.h.bf16 %v10796_v42  ;;  %v10797_v18 = vunpack.i.l.bf16 %v10796_v42 }
 0x555   : > { %8566 = vmatmul.mubr.f32.gmra.mrb[54].mxu1 %v8158_v41  ;;  %10227 = vmatmul.mubr.msk.f32.gmra.mrb[100].mxu0 %vm2824_vm9, %v16546_v2 }
 0x556   : > { %v8191_v61 = vsel %vm2824_vm9, %v15218_v13, %v10792_v8  ;;  %v8093_v33 = vsel %vm2824_vm9, %v15076_v20, %v10793_v6  ;;  %10229 = vmatprep.mubr.msk.f32.mxu0 %vm2824_vm9, %v16547_v59  ;;  %v16548_v20 = vld [vmem:[#allocation15_spill] sm:$0xff] }
 0x557   : > { %v10806_v31 = vpop.permute.xlu1 %10805  ;;  %v10801_v55 = vpop.permute.xlu0 %10800  ;;  %v8223_v21 = vsel %vm8097_vm15, %v8191_v61, %v10797_v18  ;;  %v8126_v37 = vsel %vm8097_vm15, %v8093_v33, %v10798_v53 }
 0x558   : > { %v10803_v43 = vunpack.i.h.bf16 %v10801_v55  ;;  %v10802_v15 = vunpack.i.l.bf16 %v10801_v55  ;;  %v10808_v32 = vunpack.i.h.bf16 %v10806_v31  ;;  %v10807_v46 = vunpack.i.l.bf16 %v10806_v31 }
 0x559   : > { %10230 = vmatmul.mubr.msk.f32.gmra.mrb[102].mxu0 %vm2824_vm9, %v16548_v20 }
 0x55a   : > { %v8255_v13 = vsel %vm8130_vm4, %v8223_v21, %v10802_v15  ;;  %v8159_v16 = vsel %vm8130_vm4, %v8126_v37, %v10803_v43  ;;  %v8192_v60 = vsel %vm2824_vm9, %v15221_v50, %v10807_v46  ;;  %v8094_v51 = vsel %vm2824_vm9, %v15117_v49, %v10808_v32 }
 0x55b   : > { %v10811_v19 = vpop.permute.xlu0 %10810  ;;  %8570 = vmatprep.mubr.f32.mxu1 %v8255_v13  ;;  %v10816_v26 = vpop.permute.xlu1 %10815 }
 0x55c   : > { %v10813_v11 = vunpack.i.h.bf16 %v10811_v19  ;;  %v10812_v1 = vunpack.i.l.bf16 %v10811_v19  ;;  %8571 = vmatmul.mubr.f32.gmra.mrb[56].mxu1 %v8159_v16  ;;  %v10818_v47 = vunpack.i.h.bf16 %v10816_v26  ;;  %v10817_v38 = vunpack.i.l.bf16 %v10816_v26 }
 0x55e   : > { %v8224_v39 = vsel %vm8097_vm15, %v8192_v60, %v10812_v1  ;;  %v8127_v30 = vsel %vm8097_vm15, %v8094_v51, %v10813_v11  ;;  %v16549_v11 = vld [vmem:[#allocation107_spill] sm:$0xff] }
 0x55f   : > { %v15507_v57 = vpop.f32.mrb[20].mxu1  ;;  %v10821_v25 = vpop.permute.xlu0 %10820  ;;  %v8256_v54 = vsel %vm8130_vm4, %v8224_v39, %v10817_v38  ;;  %v8160_v10 = vsel %vm8130_vm4, %v8127_v30, %v10818_v47 }
 0x560   : > { %v8484_v52 = vpop.f32.mrb[21].mxu1  ;;  %v10826_v28 = vpop.permute.xlu1 %10825  ;;  %v10823_v42 = vunpack.i.h.bf16 %v10821_v25  ;;  %v10822_v22 = vunpack.i.l.bf16 %v10821_v25  ;;  %8575 = vmatprep.mubr.f32.mxu1 %v8256_v54 }
 0x561   : > { %v10828_v34 = vunpack.i.h.bf16 %v10826_v28  ;;  %v10827_v41 = vunpack.i.l.bf16 %v10826_v28  ;;  %8576 = vmatmul.mubr.f32.gmra.mrb[58].mxu1 %v8160_v10 }
 0x562   : > { %v8193_v63 = vsel %vm2824_vm9, %v15267_v7, %v10822_v22  ;;  %v8095_v6 = vsel %vm2824_vm9, %v15153_v56, %v10823_v42 }
 0x563   : > { %v15517_v50 = vpop.f32.mrb[22].mxu1  ;;  %v10831_v8 = vpop.permute.xlu0 %10830  ;;  %v8225_v31 = vsel %vm8097_vm15, %v8193_v63, %v10827_v41  ;;  %v8128_v55 = vsel %vm8097_vm15, %v8095_v6, %v10828_v34 }
 0x564   : > { %v8489_v49 = vpop.f32.mrb[23].mxu1  ;;  %v10833_v2 = vunpack.i.h.bf16 %v10831_v8  ;;  %v10832_v61 = vunpack.i.l.bf16 %v10831_v8  ;;  %v10836_v33 = vpop.permute.xlu1 %10835  ;;  %v15582_v8 = vld [vmem:[%s15997_s4] ss:$0 sm:$0xff] }
 0x565   : > { %v10838_v53 = vunpack.i.h.bf16 %v10836_v33  ;;  %v10837_v18 = vunpack.i.l.bf16 %v10836_v33 }
 0x566   : > { %v8257_v59 = vsel %vm8130_vm4, %v8225_v31, %v10832_v61  ;;  %v8161_v43 = vsel %vm8130_vm4, %v8128_v55, %v10833_v2 }
 0x567   : > { %v10841_v15 = vpop.permute.xlu0 %10840  ;;  %8580 = vmatprep.mubr.f32.mxu1 %v8257_v59  ;;  %v8194_v37 = vsel %vm2824_vm9, %v15283_v0, %v10837_v18  ;;  %v8096_v13 = vsel %vm2824_vm9, %v15200_v23, %v10838_v53  ;;  %v8438_v53 = vadd.f32 %v15582_v8, %v15330_v44  ;;  %v8433_v18 = vadd.f32 %v15582_v8, %v15322_v58 }
 0x568   : > { %v10843_v7 = vunpack.i.h.bf16 %v10841_v15  ;;  %v10842_v32 = vunpack.i.l.bf16 %v10841_v15  ;;  %v10846_v46 = vpop.permute.xlu1 %10845  ;;  %8581 = vmatmul.mubr.f32.gmra.mrb[60].mxu1 %v8161_v43  ;;  %v8458_v58 = vadd.f32 %v15582_v8, %v15383_v40 }
 0x569   : > { %v10848_v56 = vunpack.i.h.bf16 %v10846_v46  ;;  %v10847_v21 = vunpack.i.l.bf16 %v10846_v46  ;;  %v8443_v46 = vadd.f32 %v15582_v8, %v15340_v4  ;;  %v8463_v4 = vadd.f32 %v15582_v8, %v15415_v9 }
 0x56a   : > { %v8226_v16 = vsel %vm8097_vm15, %v8194_v37, %v10842_v32  ;;  %v8129_v20 = vsel %vm8097_vm15, %v8096_v13, %v10843_v7  ;;  %v8448_v7 = vadd.f32 %v15582_v8, %v15361_v27  ;;  %v8453_v13 = vadd.f32 %v15582_v8, %v15374_v12 }
 0x56b   : > { %v8258_v19 = vsel %vm8130_vm4, %v8226_v16, %v10847_v21  ;;  %v8162_v26 = vsel %vm8130_vm4, %v8129_v20, %v10848_v56  ;;  %v8468_v27 = vadd.f32 %v15582_v8, %v15439_v24  ;;  %v8473_v12 = vadd.f32 %v15582_v8, %v15457_v35 }
 0x56c   : > { %8585 = vmatprep.mubr.f32.mxu1 %v8258_v19 }
 0x56d   : > { %8586 = vmatmul.mubr.f32.gmra.mrb[62].mxu1 %v8162_v26 }
 0x56e   : > { %10232 = vmatprep.mubr.msk.f32.mxu1 %vm2824_vm9, %v16549_v11 }
 0x570   : > { %v15537_v1 = vpop.f32.mrb[24].mxu1 }
 0x571   : > { %v8494_v47 = vpop.f32.mrb[25].mxu1  ;;  %10233 = vmatmul.mubr.msk.f32.vlgmr.msra.gmra.mrb[64].mxu1 %vm2824_vm9, %v15090_v36  ;;  %v16550_v36 = vld [vmem:[#allocation51_spill] sm:$0xff] }
 0x572   : > { %10235 = vmatprep.mubr.msk.f32.mxu1 %vm2824_vm9, %v15158_v45 }
 0x575   : > { %10236 = vmatmul.mubr.msk.f32.gmra.mrb[66].mxu1 %vm2824_vm9, %v15164_v5 }
 0x576   : > { %10238 = vmatprep.mubr.msk.f32.mxu1 %vm2824_vm9, %v15246_v3 }
 0x577   : > { %v15547_v23 = vpop.f32.mrb[26].mxu1 }
 0x578   : > { %v8499_v0 = vpop.f32.mrb[27].mxu1 }
 0x579   : > { %10239 = vmatmul.mubr.msk.f32.gmra.mrb[68].mxu1 %vm2824_vm9, %v15261_v48 }
 0x57a   : > { %10241 = vmatprep.mubr.msk.f32.mxu1 %vm2824_vm9, %v15278_v62 }
 0x57d   : > { %10242 = vmatmul.mubr.msk.f32.gmra.mrb[70].mxu1 %vm2824_vm9, %v15290_v14 }
 0x57e   : > { %10244 = vmatprep.mubr.msk.f32.mxu1 %vm2824_vm9, %v16550_v36 }
 0x581   : > { %10245 = vmatmul.mubr.msk.f32.gmra.mrb[72].mxu1 %vm2824_vm9, %v16550_v36 }
 0x591   : > { %v15559_v45 = vpop.f32.mrb[28].mxu1 }
 0x592   : > { %v8504_v5 = vpop.f32.mrb[29].mxu1 }
 0x59a   : > { %v15561_v3 = vpop.f32.mrb[30].mxu1 }
 0x59b   : > { %v8509_v38 = vpop.f32.mrb[31].mxu1 }
 0x5a9   : > { %v15563_v60 = vpop.f32.mrb[32].mxu1 }
 0x5aa   : > { %v8514_v48 = vpop.f32.mrb[33].mxu1 }
 0x5ae   : > { %v15565_v51 = vpop.f32.mrb[34].mxu1 }
 0x5af   : > { %v8519_v62 = vpop.f32.mrb[35].mxu1 }
 0x5b0   : > { %v8478_v62 = vadd.f32 %v15582_v8, %v15465_v29 }
 0x5bf   : > { %v15567_v39 = vpop.f32.mrb[36].mxu1 }
 0x5c0   : > { %v8524_v14 = vpop.f32.mrb[37].mxu1 }
 0x5c1   : > { %v10961_v14 = vmov 1934713408  }
 0x5c4   : > { %v15569_v52 = vpop.f32.mrb[38].mxu1 }
 0x5c5   : > { %v8529_v30 = vpop.f32.mrb[39].mxu1 }
 0x5c6   : > { %v8883_v30 = vunpack.c.l.s4 %v10961_v14 }
 0x5d1   : > { %v15571_v25 = vpop.f32.mrb[40].mxu1 }
 0x5d2   : > { %v8534_v28 = vpop.f32.mrb[41].mxu1 }
 0x5d9   : > { %v15573_v54 = vpop.f32.mrb[42].mxu1 }
 0x5da   : > { %v8539_v10 = vpop.f32.mrb[43].mxu1 }
 0x5e8   : > { %v4790_v42 = vpop.f32.mrb[78].mxu0 }
 0x5e9   : > { %v10187_v22 = vpop.f32.mrb[79].mxu0 }
 0x5ec   : > { %v15575_v34 = vpop.f32.mrb[44].mxu1 }
 0x5ed   : > { %v8544_v41 = vpop.f32.mrb[45].mxu1 }
 0x5f5   : > { %v15577_v49 = vpop.f32.mrb[46].mxu1 }
 0x5f6   : > { %v8549_v63 = vpop.f32.mrb[47].mxu1 }
 0x600   : > { %v4795_v6 = vpop.f32.mrb[80].mxu0 }
 0x601   : > { %v10190_v2 = vpop.f32.mrb[81].mxu0  ;;  %v15584_v61 = vpop.f32.mrb[48].mxu1 }
 0x602   : > { %v8554_v33 = vpop.f32.mrb[49].mxu1 }
 0x604   : > { %v10201_v31 = vpop.f32.mrb[82].mxu0 }
 0x605   : > { %v8663_v55 = vadd.f32 %v10201_v31, %v8438_v53  ;;  %v8657_v59 = vpop.f32.mrb[83].mxu0 }
 0x606   : > { %v8658_v43 = vadd.f32 %v8657_v59, %v8433_v18  ;;  %v15590_v15 = vpop.f32.mrb[50].mxu1 }
 0x607   : > { %v8559_v32 = vpop.f32.mrb[51].mxu1 }
 0x608   : > { %v10204_v56 = vpop.f32.mrb[84].mxu0 }
 0x609   : > { %v8673_v21 = vadd.f32 %v10204_v56, %v8448_v7  ;;  %v8667_v37 = vpop.f32.mrb[85].mxu0 }
 0x60a   : > { %v8668_v44 = vadd.f32 %v8667_v37, %v8443_v46 }
 0x60c   : > { %v10207_v16 = vpop.f32.mrb[86].mxu0 }
 0x60d   : > { %v8683_v20 = vadd.f32 %v10207_v16, %v8458_v58  ;;  %v8677_v19 = vpop.f32.mrb[87].mxu0  ;;  %v8488_v58 = vadd.f32 %v15582_v8, %v15517_v50  ;;  %v8508_v50 = vadd.f32 %v15582_v8, %v15561_v3 }
 0x60e   : > { %v8678_v26 = vadd.f32 %v8677_v19, %v8453_v13  ;;  %v8884_v13 = vunpack.c.0.s8 %v8883_v30 }
 0x60f   : > { %v9088_v11 = vcombine.low %v8663_v55, %v8683_v20  ;;  %v9089_v47 = vcombine.high %v8663_v55, %v8683_v20  ;;  %v8498_v20 = vadd.f32 %v15582_v8, %v15547_v23  ;;  %v8513_v23 = vadd.f32 %v15582_v8, %v15563_v60 }
 0x610   : > { %v8816_v0 = vcombine.low %v8658_v43, %v8678_v26  ;;  %v8817_v36 = vcombine.high %v8658_v43, %v8678_v26  ;;  %v10210_v5 = vpop.f32.mrb[88].mxu0  ;;  %v8538_v60 = vadd.f32 %v15582_v8, %v15573_v54 }
 0x611   : > { %v8693_v38 = vadd.f32 %v10210_v5, %v8468_v27  ;;  %v8687_v40 = vpop.f32.mrb[89].mxu0  ;;  %v9096_v10 = vrot.slane %v9088_v11, %v12200_v17  ;;  %v9103_v9 = vrot.slane %v9089_v47, %v12200_v17  ;;  %v8493_v27 = vadd.f32 %v15582_v8, %v15537_v1  ;;  %v16551_v47 = vld [vmem:[#allocation186_spill] sm:$0xff] }
 0x612   : > { %v8688_v48 = vadd.f32 %v8687_v40, %v8463_v4  ;;  %v8824_v63 = vrot.slane %v8816_v0, %v12200_v17  ;;  %v15614_v29 = vrot.slane %v8817_v36, %v12200_v17  ;;  %v15633_v4 = vsub.s32 %v8884_v13, %v16551_v47 }
 0x613   : > { %v9104_v24 = vcombine.low %v8673_v21, %v8693_v38  ;;  %v9105_v28 = vcombine.high %v8673_v21, %v8693_v38  ;;  %v8518_v38 = vadd.f32 %v15582_v8, %v15565_v51  ;;  %v8523_v1 = vadd.f32 %v15582_v8, %v15567_v39 }
 0x614   : > { %v8832_v42 = vcombine.low %v8668_v44, %v8688_v48  ;;  %v8833_v22 = vcombine.high %v8668_v44, %v8688_v48  ;;  %v10213_v41 = vpop.f32.mrb[90].mxu0  ;;  %v8483_v44 = vadd.f32 %v15582_v8, %v15507_v57  ;;  %v8503_v57 = vadd.f32 %v15582_v8, %v15559_v45 }
 0x615   : > { %v9112_v6 = vrot.slane %v9104_v24, %v12200_v17  ;;  %v9119_v35 = vrot.slane %v9105_v28, %v12200_v17  ;;  %v8703_v2 = vadd.f32 %v10213_v41, %v8478_v62  ;;  %v8697_v33 = vpop.f32.mrb[91].mxu0  ;;  %v8528_v48 = vadd.f32 %v15582_v8, %v15569_v52 }
 0x616   : > { %v8840_v53 = vrot.slane %v8832_v42, %v12200_v17  ;;  %v15618_v18 = vrot.slane %v8833_v22, %v12200_v17  ;;  %v8698_v31 = vadd.f32 %v8697_v33, %v8473_v12  ;;  %v15649_v45 = vadd.f32 %v15582_v8, %v15571_v25 }
 0x617   : > { %v9152_v55 = vcombine.low %v9096_v10, %v9112_v6  ;;  %v9153_v59 = vcombine.high %v9096_v10, %v9112_v6  ;;  %v9168_v43 = vcombine.low %v9103_v9, %v9119_v35  ;;  %v9169_v7 = vcombine.high %v9103_v9, %v9119_v35 }
 0x618   : > { %v8880_v32 = vcombine.low %v8824_v63, %v8840_v53  ;;  %v8881_v46 = vcombine.high %v8824_v63, %v8840_v53  ;;  %v8896_v56 = vcombine.low %v15614_v29, %v15618_v18  ;;  %v8897_v21 = vcombine.high %v15614_v29, %v15618_v18  ;;  %v10216_v37 = vpop.f32.mrb[92].mxu0 }
 0x619   : > { %v8707_v16 = vpop.f32.mrb[93].mxu0  ;;  %v8713_v19 = vadd.f32 %v10216_v37, %v8488_v58  ;;  %v15654_v51 = vrot.slane %v9152_v55, %v15633_v4  ;;  %v15657_v39 = vrot.slane %v9153_v59, %v15633_v4  ;;  %v15660_v52 = vrot.slane %v9168_v43, %v15633_v4 }
 0x61a   : > { %v8708_v26 = vadd.f32 %v8707_v16, %v8483_v44  ;;  %v15663_v25 = vrot.slane %v9169_v7, %v15633_v4  ;;  %v15666_v28 = vrot.slane %v8880_v32, %v15633_v4  ;;  %v15671_v9 = vrot.slane %v8881_v46, %v15633_v4 }
 0x61b   : > { %v15674_v42 = vrot.slane %v8896_v56, %v15633_v4  ;;  %v15691_v16 = vrot.slane %v8897_v21, %v15633_v4 }
 0x61c   : > { %v10219_v11 = vpop.f32.mrb[94].mxu0 }
 0x61d   : > { %v8723_v0 = vadd.f32 %v10219_v11, %v8498_v20  ;;  %v8717_v36 = vpop.f32.mrb[95].mxu0 }
 0x61e   : > { %v8718_v5 = vadd.f32 %v8717_v36, %v8493_v27 }
 0x61f   : > { %v9120_v40 = vcombine.low %v8703_v2, %v8723_v0  ;;  %v9121_v12 = vcombine.high %v8703_v2, %v8723_v0 }
 0x620   : > { %v8848_v3 = vcombine.low %v8698_v31, %v8718_v5  ;;  %v8849_v62 = vcombine.high %v8698_v31, %v8718_v5  ;;  %v10222_v14 = vpop.f32.mrb[96].mxu0 }
 0x621   : > { %v8733_v30 = vadd.f32 %v10222_v14, %v8508_v50  ;;  %v8727_v24 = vpop.f32.mrb[97].mxu0  ;;  %v9128_v6 = vrot.slane %v9120_v40, %v12200_v17  ;;  %v9135_v35 = vrot.slane %v9121_v12, %v12200_v17 }
 0x622   : > { %v8728_v54 = vadd.f32 %v8727_v24, %v8503_v57  ;;  %v8856_v53 = vrot.slane %v8848_v3, %v12200_v17  ;;  %v8863_v43 = vrot.slane %v8849_v62, %v12200_v17 }
 0x623   : > { %v15668_v10 = vpop.f32.mrb[52].mxu1  ;;  %v9136_v41 = vcombine.low %v8713_v19, %v8733_v30  ;;  %v9137_v63 = vcombine.high %v8713_v19, %v8733_v30 }
 0x624   : > { %v8564_v22 = vpop.f32.mrb[53].mxu1  ;;  %v8864_v2 = vcombine.low %v8708_v26, %v8728_v54  ;;  %v8865_v33 = vcombine.high %v8708_v26, %v8728_v54  ;;  %v10225_v29 = vpop.f32.mrb[98].mxu0 }
 0x625   : > { %v9144_v18 = vrot.slane %v9136_v41, %v12200_v17  ;;  %v9151_v31 = vrot.slane %v9137_v63, %v12200_v17  ;;  %v15681_v55 = vadd.f32 %v10225_v29, %v8518_v38  ;;  %v8737_v59 = vpop.f32.mrb[99].mxu0 }
 0x626   : > { %v8872_v7 = vrot.slane %v8864_v2, %v12200_v17  ;;  %v8879_v32 = vrot.slane %v8865_v33, %v12200_v17  ;;  %v15686_v46 = vadd.f32 %v8737_v59, %v8513_v23 }
 0x627   : > { %v9184_v37 = vcombine.low %v9128_v6, %v9144_v18  ;;  %v9185_v44 = vcombine.high %v9128_v6, %v9144_v18  ;;  %v9200_v58 = vcombine.low %v9135_v35, %v9151_v31  ;;  %v9201_v13 = vcombine.high %v9135_v35, %v9151_v31 }
 0x628   : > { %v15688_v56 = vpop.f32.mrb[54].mxu1  ;;  %v8912_v19 = vcombine.low %v8856_v53, %v8872_v7  ;;  %v8913_v26 = vcombine.high %v8856_v53, %v8872_v7  ;;  %v8928_v27 = vcombine.low %v8863_v43, %v8879_v32  ;;  %v10228_v11 = vpop.f32.mrb[100].mxu0  ;;  %v8929_v5 = vcombine.high %v8863_v43, %v8879_v32 }
 0x629   : > { %v8569_v20 = vpop.f32.mrb[55].mxu1  ;;  %v15694_v47 = vrot.slane %v9184_v37, %v15633_v4  ;;  %v15697_v0 = vrot.slane %v9185_v44, %v15633_v4  ;;  %v15700_v36 = vrot.slane %v9200_v58, %v15633_v4  ;;  %v15703_v57 = vrot.slane %v9201_v13, %v15633_v4  ;;  %v8747_v50 = vpop.f32.mrb[101].mxu0 }
 0x62a   : > { %v15706_v21 = vrot.slane %v8912_v19, %v15633_v4  ;;  %v15709_v23 = vrot.slane %v8913_v26, %v15633_v4  ;;  %v15712_v38 = vrot.slane %v8928_v27, %v15633_v4  ;;  %v8753_v40 = vadd.f32 %v10228_v11, %v8528_v48 }
 0x62b   : > { %v15714_v12 = vadd.f32 %v8747_v50, %v8523_v1  ;;  %v9217_v3 = vcombine.high %v15654_v51, %v15694_v47  ;;  %v9221_v62 = vcombine.high %v15660_v52, %v15700_v36  ;;  %v15721_v14 = vrot.slane %v8929_v5, %v15633_v4 }
 0x62c   : > { %v10231_v30 = vpop.f32.mrb[102].mxu0  ;;  %v8945_v24 = vcombine.high %v15666_v28, %v15706_v21  ;;  %v8949_v54 = vcombine.high %v15674_v42, %v15712_v38  ;;  %v8946_v1 = vcombine.low %v15671_v9, %v15709_v23  ;;  %v9218_v41 = vcombine.low %v15657_v39, %v15697_v0 }
 0x62d   : > { %v8763_v48 = vadd.f32 %v10231_v30, %v8538_v60  ;;  %v8757_v22 = vpop.f32.mrb[103].mxu0  ;;  %v9222_v63 = vcombine.low %v15663_v25, %v15703_v57  ;;  %v8947_v6 = vcombine.high %v15671_v9, %v15709_v23  ;;  %v8950_v33 = vcombine.low %v15691_v16, %v15721_v14 }
 0x62e   : > { %v8758_v2 = vadd.f32 %v8757_v22, %v15649_v45  ;;  %9362 = vrot.lane.b32.xlu0 %v8945_v24, %s10957_s12  ;;  %v8951_v60 = vcombine.high %v15691_v16, %v15721_v14  ;;  %v9219_v29 = vcombine.high %v15657_v39, %v15697_v0  ;;  %v9223_v59 = vcombine.high %v15663_v25, %v15703_v57 }
 0x62f   : > { %v15735_v35 = vpop.f32.mrb[56].mxu1  ;;  %v9224_v18 = vcombine.low %v15681_v55, %v8763_v48  ;;  %v9225_v31 = vcombine.high %v15681_v55, %v8763_v48  ;;  %v8944_v7 = vcombine.low %v15666_v28, %v15706_v21  ;;  %v8948_v32 = vcombine.low %v15674_v42, %v15712_v38 }
 0x630   : > { %v8574_v53 = vpop.f32.mrb[57].mxu1  ;;  %v8952_v45 = vcombine.low %v15686_v46, %v8758_v2  ;;  %v8953_v43 = vcombine.high %v15686_v46, %v8758_v2  ;;  %v9216_v37 = vcombine.low %v15654_v51, %v15694_v47  ;;  %v9220_v44 = vcombine.low %v15660_v52, %v15700_v36 }
 0x631   : > { %v8548_v26 = vadd.f32 %v15582_v8, %v15577_v49  ;;  %v8543_v27 = vadd.f32 %v15582_v8, %v15575_v34  ;;  %v8558_v30 = vadd.f32 %v15582_v8, %v15590_v15  ;;  %v9232_v49 = vrot.slane %v9224_v18, %v12200_v17 }
 0x632   : > { %9386 = vrot.lane.b32.xlu0 %v8949_v54, %s10957_s12  ;;  %v8960_v2 = vrot.slane %v8952_v45, %v12200_v17 }
 0x634   : > { %v8577_v55 = vpop.f32.mrb[58].mxu1 }
 0x635   : > { %v8579_v58 = vpop.f32.mrb[59].mxu1 }
 0x636   : > { %9410 = vrot.lane.b32.xlu0 %v9217_v3, %s10957_s12 }
 0x63a   : > { %9434 = vrot.lane.b32.xlu0 %v9221_v62, %s10957_s12  ;;  %v8553_v62 = vadd.f32 %v15582_v8, %v15584_v61 }
 0x63b   : > { %v8582_v13 = vpop.f32.mrb[60].mxu1 }
 0x63c   : > { %v8584_v46 = vpop.f32.mrb[61].mxu1 }
 0x63e   : > { %9370 = vrot.lane.b32.xlu0 %v8946_v1, %s10959_s16  ;;  %v9239_v1 = vrot.slane %v9225_v31, %v12200_v17 }
 0x640   : > { %v8587_v20 = vpop.f32.mrb[62].mxu1 }
 0x641   : > { %v8589_v19 = vpop.f32.mrb[63].mxu1 }
 0x642   : > { %9394 = vrot.lane.b32.xlu0 %v8950_v33, %s10959_s16 }
 0x644   : > { %v10234_v11 = vpop.f32.mrb[64].mxu1 }
 0x645   : > { %v8773_v50 = vadd.f32 %v10234_v11, %v8548_v26  ;;  %v8767_v5 = vpop.f32.mrb[65].mxu1 }
 0x646   : > { %v8768_v3 = vadd.f32 %v8767_v5, %v8543_v27  ;;  %9418 = vrot.lane.b32.xlu0 %v9218_v41, %s10959_s16  ;;  %v8563_v5 = vadd.f32 %v15582_v8, %v15668_v10 }
 0x647   : > { %v9240_v24 = vcombine.low %v8753_v40, %v8773_v50  ;;  %v9241_v54 = vcombine.high %v8753_v40, %v8773_v50  ;;  %v8967_v40 = vrot.slane %v8953_v43, %v12200_v17  ;;  %v8568_v43 = vadd.f32 %v15582_v8, %v15688_v56 }
 0x648   : > { %v8968_v34 = vcombine.low %v15714_v12, %v8768_v3  ;;  %v8969_v48 = vcombine.high %v15714_v12, %v8768_v3  ;;  %v10237_v22 = vpop.f32.mrb[66].mxu1 }
 0x649   : > { %v9248_v61 = vrot.slane %v9240_v24, %v12200_v17  ;;  %v9255_v33 = vrot.slane %v9241_v54, %v12200_v17  ;;  %v8783_v15 = vadd.f32 %v10237_v22, %v8558_v30  ;;  %v8777_v53 = vpop.f32.mrb[67].mxu1 }
 0x64a   : > { %v8976_v41 = vrot.slane %v8968_v34, %v12200_v17  ;;  %v8983_v18 = vrot.slane %v8969_v48, %v12200_v17  ;;  %v8778_v31 = vadd.f32 %v8777_v53, %v8553_v62  ;;  %9442 = vrot.lane.b32.xlu0 %v9222_v63, %s10959_s16  ;;  %v8578_v62 = vadd.f32 %v15582_v8, %v8577_v55 }
 0x64b   : > { %v9288_v58 = vcombine.low %v9232_v49, %v9248_v61  ;;  %v9289_v46 = vcombine.high %v9232_v49, %v9248_v61  ;;  %v9304_v19 = vcombine.low %v9239_v1, %v9255_v33  ;;  %v9305_v12 = vcombine.high %v9239_v1, %v9255_v33 }
 0x64c   : > { %v9016_v45 = vcombine.low %v8960_v2, %v8976_v41  ;;  %v9017_v26 = vcombine.high %v8960_v2, %v8976_v41  ;;  %v9032_v27 = vcombine.low %v8967_v40, %v8983_v18  ;;  %v9033_v11 = vcombine.high %v8967_v40, %v8983_v18  ;;  %v10240_v50 = vpop.f32.mrb[68].mxu1 }
 0x64d   : > { %v8787_v3 = vpop.f32.mrb[69].mxu1  ;;  %v8793_v30 = vadd.f32 %v10240_v50, %v8568_v43  ;;  %v8573_v63 = vadd.f32 %v15582_v8, %v15735_v35  ;;  %v8588_v34 = vadd.f32 %v15582_v8, %v8587_v20  ;;  %v8583_v55 = vadd.f32 %v15582_v8, %v8582_v13 }
 0x64e   : > { %v8788_v24 = vadd.f32 %v8787_v3, %v8563_v5  ;;  %9378 = vrot.lane.b32.xlu0 %v8947_v6, %s10960_s17  ;;  %v15802_v35 = vrot.slane %v9288_v58, %v15633_v4  ;;  %v15805_v61 = vrot.slane %v9289_v46, %v15633_v4  ;;  %v15808_v20 = vrot.slane %v9304_v19, %v15633_v4 }
 0x64f   : > { %v15811_v33 = vrot.slane %v9305_v12, %v15633_v4  ;;  %v15814_v8 = vrot.slane %v9016_v45, %v15633_v4  ;;  %v9031_v14 = vrot.slane %v9017_v26, %v15633_v4  ;;  %v9047_v53 = vrot.slane %v9033_v11, %v15633_v4 }
 0x650   : > { %v10243_v54 = vpop.f32.mrb[70].mxu1 }
 0x651   : > { %v8803_v49 = vadd.f32 %v10243_v54, %v8578_v62  ;;  %v8797_v1 = vpop.f32.mrb[71].mxu1 }
 0x652   : > { %v8798_v10 = vadd.f32 %v8797_v1, %v8573_v63  ;;  %9402 = vrot.lane.b32.xlu0 %v8951_v60, %s10960_s17 }
 0x653   : > { %v9256_v56 = vcombine.low %v8783_v15, %v8803_v49  ;;  %v9257_v48 = vcombine.high %v8783_v15, %v8803_v49  ;;  %v15822_v15 = vrot.slane %v9032_v27, %v15633_v4 }
 0x654   : > { %v8984_v9 = vcombine.low %v8778_v31, %v8798_v10  ;;  %v8985_v23 = vcombine.high %v8778_v31, %v8798_v10  ;;  %v10246_v6 = vpop.f32.mrb[72].mxu1 }
 0x655   : > { %v8813_v22 = vadd.f32 %v10246_v6, %v8588_v34  ;;  %v8807_v2 = vpop.f32.mrb[73].mxu1  ;;  %v9264_v18 = vrot.slane %v9256_v56, %v12200_v17  ;;  %v9271_v31 = vrot.slane %v9257_v48, %v12200_v17 }
 0x656   : > { %v8808_v16 = vadd.f32 %v8807_v2, %v8583_v55  ;;  %9426 = vrot.lane.b32.xlu0 %v9219_v29, %s10960_s17  ;;  %v8992_v19 = vrot.slane %v8984_v9, %v12200_v17  ;;  %v8999_v39 = vrot.slane %v8985_v23, %v12200_v17 }
 0x657   : > { %v9272_v60 = vcombine.low %v8793_v30, %v8813_v22  ;;  %v9273_v13 = vcombine.high %v8793_v30, %v8813_v22 }
 0x658   : > { %v9000_v40 = vcombine.low %v8788_v24, %v8808_v16  ;;  %v9001_v41 = vcombine.high %v8788_v24, %v8808_v16 }
 0x659   : > { %v9280_v58 = vrot.slane %v9272_v60, %v12200_v17  ;;  %v9287_v46 = vrot.slane %v9273_v13, %v12200_v17 }
 0x65a   : > { %v9008_v0 = vrot.slane %v9000_v40, %v12200_v17  ;;  %v9015_v29 = vrot.slane %v9001_v41, %v12200_v17  ;;  %9450 = vrot.lane.b32.xlu0 %v9223_v59, %s10960_s17 }
 0x65b   : > { %v9320_v12 = vcombine.low %v9264_v18, %v9280_v58  ;;  %v9321_v45 = vcombine.high %v9264_v18, %v9280_v58  ;;  %v9336_v26 = vcombine.low %v9271_v31, %v9287_v46  ;;  %v9337_v27 = vcombine.high %v9271_v31, %v9287_v46 }
 0x65c   : > { %v9048_v11 = vcombine.low %v8992_v19, %v9008_v0  ;;  %v9049_v50 = vcombine.high %v8992_v19, %v9008_v0  ;;  %v9064_v5 = vcombine.low %v8999_v39, %v9015_v29  ;;  %v9065_v43 = vcombine.high %v8999_v39, %v9015_v29 }
 0x65d   : > { %v15838_v3 = vrot.slane %v9320_v12, %v15633_v4  ;;  %v9335_v62 = vrot.slane %v9321_v45, %v15633_v4  ;;  %v15842_v17 = vrot.slane %v9336_v26, %v15633_v4  ;;  %v9351_v30 = vrot.slane %v9337_v27, %v15633_v4 }
 0x65e   : > { %v15846_v24 = vrot.slane %v9048_v11, %v15633_v4  ;;  %v9063_v25 = vrot.slane %v9049_v50, %v15633_v4  ;;  %v15850_v57 = vrot.slane %v9064_v5, %v15633_v4  ;;  %v9079_v59 = vrot.slane %v9065_v43, %v15633_v4 }
 0x65f   : > { %v9353_v63 = vcombine.high %v15802_v35, %v15838_v3  ;;  %v9357_v54 = vcombine.high %v15808_v20, %v15842_v17  ;;  %v9354_v49 = vcombine.low %v15805_v61, %v9335_v62  ;;  %v9358_v1 = vcombine.low %v15811_v33, %v9351_v30 }
 0x660   : > { %v9081_v10 = vcombine.high %v15814_v8, %v15846_v24  ;;  %v9085_v34 = vcombine.high %v15822_v15, %v15850_v57  ;;  %v9082_v56 = vcombine.low %v9031_v14, %v9063_v25  ;;  %v9086_v48 = vcombine.low %v9047_v53, %v9079_v59 }
 0x661   : > { %v9083_v55 = vcombine.high %v9031_v14, %v9063_v25  ;;  %v9087_v4 = vcombine.high %v9047_v53, %v9079_v59  ;;  %v9355_v9 = vcombine.high %v15805_v61, %v9335_v62  ;;  %v9359_v23 = vcombine.high %v15811_v33, %v9351_v30 }
 0x662   : > { %9364 = vrot.lane.b32.xlu1 %v9081_v10, %s10957_s12  ;;  %v9080_v6 = vcombine.low %v15814_v8, %v15846_v24  ;;  %v9084_v22 = vcombine.low %v15822_v15, %v15850_v57  ;;  %v9352_v2 = vcombine.low %v15802_v35, %v15838_v3  ;;  %v9356_v16 = vcombine.low %v15808_v20, %v15842_v17 }
 0x666   : > { %9388 = vrot.lane.b32.xlu1 %v9085_v34, %s10957_s12 }
 0x66a   : > { %9412 = vrot.lane.b32.xlu1 %v9353_v63, %s10957_s12 }
 0x66e   : > { %9436 = vrot.lane.b32.xlu1 %v9357_v54, %s10957_s12 }
 0x672   : > { %9372 = vrot.lane.b32.xlu1 %v9082_v56, %s10959_s16 }
 0x676   : > { %9396 = vrot.lane.b32.xlu1 %v9086_v48, %s10959_s16 }
 0x67a   : > { %9420 = vrot.lane.b32.xlu1 %v9354_v49, %s10959_s16 }
 0x67e   : > { %9444 = vrot.lane.b32.xlu1 %v9358_v1, %s10959_s16  ;;  %s15894_s16 = scalar_lea.vmem [#allocation2], %s9568_s15 }
 0x67f   : > { %s9502_s23 = sshll.u32 %s15894_s16, 4  ;;  %s15945_s23 = int_to_ptr.vmem [resolvable:$true] %s9502_s23 }
 0x680   : > { %s10883_s26 = scalar_lea.vmem %s15945_s23, 1024  ;;  %p10890_p0 = scmp.lt.s32.totalorder %s15945_s23, %s10888_s6 }
 0x681   : > { %p10884_p11 = scmp.ne.s32.totalorder %s15945_s23, %s10883_s26  ;;  %p10891_p1 = scmp.lt.s32.totalorder %s10889_s10, %s10883_s26 }
 0x682   : > { %9380 = vrot.lane.b32.xlu1 %v9083_v55, %s10960_s17 }
 0x683   : > { %p10885_p12 = pnand %p10884_p11, %p11032_p5  ;;  %p10892_p2 = por %p10891_p1, %p10890_p0 }
 0x685   : > { %p10886_p13 = pneg %p10885_p12 }
 0x686   : > { %9404 = vrot.lane.b32.xlu1 %v9087_v4, %s10960_s17 }
 0x687   : > { %p10893_p3 = pnand %p10892_p2, %p10886_p13 }
 0x68a   : > { %9428 = vrot.lane.b32.xlu1 %v9355_v9, %s10960_s17 }
 0x68e   : > { %9452 = vrot.lane.b32.xlu1 %v9359_v23, %s10960_s17  ;;  %s9975_s17 = sshll.u32 %s11015_s22, 10  ;;  %s15951_s22 = scalar_lea.sflag [#allocation3], %s215_s13 }
 0x68f   : > { %s15942_s25 = scalar_lea.hbm %s15998_s5, %s9975_s17 }
 0x6a0   : > { %v9363_v61 = vpop.permute.xlu0 %9362 }
 0x6a1   : > { %v9456_v40 = vsel %vm2824_vm9, %v8944_v7, %v9363_v61 }
 0x6a4   : > { %v9387_v33 = vpop.permute.xlu0 %9386 }
 0x6a5   : > { %v9462_v58 = vsel %vm2824_vm9, %v8948_v32, %v9387_v33 }
 0x6a8   : > { %v9411_v8 = vpop.permute.xlu0 %9410 }
 0x6a9   : > { %v9468_v46 = vsel %vm2824_vm9, %v9216_v37, %v9411_v8 }
 0x6ac   : > { %v9435_v14 = vpop.permute.xlu0 %9434 }
 0x6ad   : > { %v9474_v42 = vsel %vm2824_vm9, %v9220_v44, %v9435_v14 }
 0x6b0   : > { %v9371_v60 = vpop.permute.xlu0 %9370 }
 0x6b1   : > { %v9458_v41 = vsel %vm8097_vm15, %v9456_v40, %v9371_v60 }
 0x6b4   : > { %v9395_v13 = vpop.permute.xlu0 %9394 }
 0x6b5   : > { %v9464_v28 = vsel %vm8097_vm15, %v9462_v58, %v9395_v13 }
 0x6b8   : > { %v9419_v15 = vpop.permute.xlu0 %9418 }
 0x6b9   : > { %v9470_v19 = vsel %vm8097_vm15, %v9468_v46, %v9419_v15 }
 0x6bc   : > { %v9443_v53 = vpop.permute.xlu0 %9442 }
 0x6bd   : > { %v9476_v38 = vsel %vm8097_vm15, %v9474_v42, %v9443_v53 }
 0x6c0   : > { %v9379_v18 = vpop.permute.xlu0 %9378 }
 0x6c1   : > { %v9460_v31 = vsel %vm8130_vm4, %v9458_v41, %v9379_v18 }
 0x6c2   : > { %9480 = vst [vmem:[%s15894_s16] sm:$0xff] %v9460_v31 }
 0x6c4   : > { %v9403_v21 = vpop.permute.xlu0 %9402 }
 0x6c5   : > { %v9466_v7 = vsel %vm8130_vm4, %v9464_v28, %v9403_v21 }
 0x6c6   : > { %9481 = vst [vmem:[%s15894_s16 + $0x8] sm:$0xff] %v9466_v7 }
 0x6c8   : > { %v9427_v39 = vpop.permute.xlu0 %9426 }
 0x6c9   : > { %v9472_v0 = vsel %vm8130_vm4, %v9470_v19, %v9427_v39 }
 0x6ca   : > { %9482 = vst [vmem:[%s15894_s16 + $0x10] sm:$0xff] %v9472_v0 }
 0x6cc   : > { %v9451_v32 = vpop.permute.xlu0 %9450 }
 0x6cd   : > { %v9478_v29 = vsel %vm8130_vm4, %v9476_v38, %v9451_v32 }
 0x6ce   : > { %9483 = vst [vmem:[%s15894_s16 + $0x18] sm:$0xff] %v9478_v29 }
 0x6d4   : > { %v9365_v51 = vpop.permute.xlu1 %9364 }
 0x6d5   : > { %v9457_v52 = vsel %vm2824_vm9, %v9080_v6, %v9365_v51 }
 0x6d8   : > { %v9389_v47 = vpop.permute.xlu1 %9388 }
 0x6d9   : > { %v9463_v5 = vsel %vm2824_vm9, %v9084_v22, %v9389_v47 }
 0x6dc   : > { %v9413_v37 = vpop.permute.xlu1 %9412 }
 0x6dd   : > { %v9469_v24 = vsel %vm2824_vm9, %v9352_v2, %v9413_v37 }
 0x6e0   : > { %v9437_v12 = vpop.permute.xlu1 %9436 }
 0x6e1   : > { %v9475_v63 = vsel %vm2824_vm9, %v9356_v16, %v9437_v12 }
 0x6e4   : > { %v9373_v45 = vpop.permute.xlu1 %9372 }
 0x6e5   : > { %v9459_v36 = vsel %vm8097_vm15, %v9457_v52, %v9373_v45 }
 0x6e8   : > { %v9397_v26 = vpop.permute.xlu1 %9396 }
 0x6e9   : > { %v9465_v43 = vsel %vm8097_vm15, %v9463_v5, %v9397_v26 }
 0x6ec   : > { %v9421_v27 = vpop.permute.xlu1 %9420 }
 0x6ed   : > { %v9471_v25 = vsel %vm8097_vm15, %v9469_v24, %v9421_v27 }
 0x6f0   : > { %v9445_v11 = vpop.permute.xlu1 %9444 }
 0x6f1   : > { %v9477_v35 = vsel %vm8097_vm15, %v9475_v63, %v9445_v11 }
 0x6f4   : > { %v9381_v44 = vpop.permute.xlu1 %9380 }
 0x6f5   : > { %v9461_v50 = vsel %vm8130_vm4, %v9459_v36, %v9381_v44 }
 0x6f6   : > { %9484 = vst [vmem:[%s15894_s16 + $0x20] sm:$0xff] %v9461_v50 }
 0x6f8   : > { %v9405_v62 = vpop.permute.xlu1 %9404 }
 0x6f9   : > { %v9467_v30 = vsel %vm8130_vm4, %v9465_v43, %v9405_v62 }
 0x6fa   : > { %9485 = vst [vmem:[%s15894_s16 + $0x28] sm:$0xff] %v9467_v30 }
 0x6fc   : > { %v9429_v57 = vpop.permute.xlu1 %9428 }
 0x6fd   : > { %v9473_v59 = vsel %vm8130_vm4, %v9471_v25, %v9429_v57 }
 0x6fe   : > { %9486 = vst [vmem:[%s15894_s16 + $0x30] sm:$0xff] %v9473_v59 }
 0x700   : > { %v9453_v3 = vpop.permute.xlu1 %9452 }
 0x701   : > { %v9479_v54 = vsel %vm8130_vm4, %v9477_v35, %v9453_v3 }
 0x702   : > { %9487 = vst [vmem:[%s15894_s16 + $0x38] sm:$0xff] %v9479_v54 }
 0x703   : > { %10896 = shalt.err (!%p10893_p3)
}
 0x704   : > { %s10897_s11 = scalar_lea.hbm %s15942_s25, 1024  ;;  %s10901_s13 = scalar_lea.hbm %s15998_s5, 2048 }
 0x705   : > { %p10898_p4 = scmp.ne.s32.totalorder %s15942_s25, %s10897_s11  ;;  %p10902_p9 = scmp.lt.u32.totalorder %s15942_s25, %s15998_s5 }
 0x706   : > { %p10903_p10 = scmp.lt.u32.totalorder %s10901_s13, %s10897_s11  ;;  %p10905_p12 = scmp.lt.u32.totalorder %s10897_s11, %s15942_s25 }
 0x707   : > { %p10899_p7 = pnand %p10898_p4, %p11032_p5 }
 0x708   : > { %p10904_p11 = por %p10903_p10, %p10902_p9 }
 0x709   : > { %p10900_p8 = pneg %p10899_p7 }
 0x70a   : > { %p10906_p13 = por %p10905_p12, %p10904_p11 }
 0x70c   : > { %p10907_p0 = pnand %p10906_p13, %p10900_p8 }
 0x70e   : > { %10910 = shalt.err (!%p10907_p0)
}
 0x70f   : > { %s10963_s17 = smov 512  }
 0x710   : > { %10314 = dma.vmem_to_hbm [thread:$0]  (%p11032_p5), %s15945_s23, 1024, %s15942_s25, %s15951_s22, %s10963_s17, %s10963_s17, %s10957_s12  }
 0x711 PF: > { %p10320_p1 = scmp.ge.s32.totalorder %s10945_s21, 2  ;;  %s9517_s14 = sand.u32 1, %s10933_s18  }
 0x712   : > { %s9518_s8 = scalar_lea.sflag [#allocation3], %s9517_s14 }
 0x713   : > { %p10317_p2 = pnand %p10320_p1, %p11036_p6 }
 0x715   : > { %10928 = dma.done.wait (!%p10317_p2), %s9518_s8, 1024  }
 0x716   : > { %10930 = vsyncadd (!%p10317_p2), %s9518_s8, 4294966272  ;;  %p15_p3 = scmp.ge.s32.totalorder %s11019_s24, 4   ;;  %s16552_s18 = smov %s10937_s19 }
 0x717   : > { %s16553_s19 = smov %s10941_s20  ;;  %s16554_s20 = smov %s11030_s27 }
 0x718   : > { %s16555_s21 = smov %s11019_s24  ;;  %17 = sbr.rel (!%p15_p3) target bundleno = 3 (0x3), region = 77 }
 0x71f   :  { %9523 = vsyncpa [#allocation3], 1 }
 0x720   :  { %9525 = vsyncpa [#allocation3 + $0x1], 1 }

</bundles_post_ra>
